<compile_context>
chip_gen: v5e
topology: v5e:2x2
jax: 0.10.0
libtpu: 0.0.40
codegen_flags: <defaults>
</compile_context>

<pallas_src>
import functools

import jax
import jax.numpy as jnp
from jax import lax
from jax.experimental import pallas as pl
from jax.experimental.pallas import tpu as pltpu

_BN_EPS = 1e-5


def _relu6(x):
    return jnp.minimum(jnp.maximum(x, 0.0), 6.0)


# --------------------------------------------------------------------------------------
# Device queries (host side, cached; used only for tiling / dtype decisions)
# --------------------------------------------------------------------------------------
@functools.lru_cache(maxsize=1)
def _device_kind():
    try:                                   # device discovery only -- never wraps the kernel
        return jax.devices()[0].device_kind.lower()
    except Exception:
        return ""


def _has_bf16_vpu():
    # v6e / v7x VPUs have native bf16 VALU lanes; v5e (and older) do not.
    return any(tag in _device_kind() for tag in ("v6", "v7", "tpu7"))


def _num_tensorcores():
    return 2 if any(tag in _device_kind() for tag in ("v7", "tpu7")) else 1


@functools.lru_cache(maxsize=1)
def _vmem_capacity_bytes():
    try:                                   # hardware query only; conservative default below
        return int(pltpu.get_tpu_info().vmem_capacity_bytes)
    except Exception:
        return 64 * 1024 * 1024            # v7x-sized (smallest) default


# --------------------------------------------------------------------------------------
# Kernel body
# --------------------------------------------------------------------------------------
def _make_kernel(*, has_expand, stride, dilation, th, th_in, wout,
                 cin, chid, cout, pad_beg, use_res, compute_dtype):
    """Builds the fused inverted-residual kernel body (static config baked in)."""

    def kernel(*refs):
        if has_expand:
            x_ref, w1_ref, b1_ref, dw_ref, b2_ref, w3_ref, b3_ref, o_ref = refs
        else:
            x_ref, dw_ref, b2_ref, w3_ref, b3_ref, o_ref = refs

        # First padded-input row touched by this row tile.
        row0 = pl.multiple_of(pl.program_id(1) * (th * stride), th * stride)

        # ---- 1x1 expansion conv (MXU, bf16) + folded-BN bias + ReLU6, kept in registers ----
        xin = x_ref[pl.ds(row0, th_in), :, :]                    # (th_in, wp, cin), bf16
        wp = xin.shape[1]
        if has_expand:
            h = jnp.dot(xin.reshape(th_in * wp, cin), w1_ref[...],
                        preferred_element_type=jnp.float32)
            h = _relu6(h + b1_ref[...]).reshape(th_in, wp, chid).astype(compute_dtype)
        else:
            h = xin.astype(compute_dtype)                        # (th_in, wp, chid)

        # ---- 3x3 depthwise conv accumulated in vector registers ----
        if stride == 1:
            # One shifted copy per dx, reused for all three dy taps; dy offsets are
            # leading-dim slices (essentially free).
            cols = [h[:, dx * dilation: dx * dilation + wout, :] for dx in range(3)]

            def tap(dy, dx):
                ys = dy * dilation
                return cols[dx][ys: ys + th]
        else:
            # stride == 2: split the columns once into even/odd halves (two strided
            # slices); every tap is then a contiguous column window of one half.
            halves = (h[:, 0::2, :], h[:, 1::2, :])

            def tap(dy, dx):
                xs = dx * dilation
                src = halves[xs % 2]
                ys = dy * dilation
                # TODO(synk): rows still use a strided leading-dim slice; an even/odd row
                # split would remove it if the stride-2 path ever shows up hot.
                return src[ys: ys + stride * (th - 1) + 1: stride,
                           xs // 2: xs // 2 + wout, :]

        dw = dw_ref[...]                                         # (9, chid), compute_dtype
        acc = tap(0, 0) * dw[0]
        for k in range(1, 9):
            acc = acc + tap(k // 3, k % 3) * dw[k]
        acc = _relu6(acc.astype(jnp.float32) + b2_ref[...])      # (th, wout, chid), f32

        # ---- 1x1 projection conv (MXU, bf16) + folded-BN bias.  The matmul result is
        #      already (th*wout, cout), i.e. exactly the contiguous output block layout ----
        out = jnp.dot(acc.reshape(th * wout, chid).astype(jnp.bfloat16), w3_ref[...],
                      preferred_element_type=jnp.float32)
        out = out + b3_ref[...]

        # ---- residual add: original pixels sliced back out of the resident padded input ----
        if use_res:
            rows = x_ref[pl.ds(row0 + pad_beg, th), :, :]
            res = rows[:, pad_beg:pad_beg + wout, :]
            out = out + res.reshape(th * wout, cout).astype(jnp.float32)

        o_ref[...] = out.astype(o_ref.dtype)

    return kernel


# --------------------------------------------------------------------------------------
# Host-side helpers
# --------------------------------------------------------------------------------------
def _fold_bn(bn):
    scale = bn["gamma"] / jnp.sqrt(bn["var"] + _BN_EPS)
    bias = bn["beta"] - bn["mean"] * scale
    return scale.astype(jnp.float32), bias.astype(jnp.float32)


def fixed_padding_nhwc(x, kernel_size, dilation):
    # Matches fixed_padding() in the PyTorch reference (symmetric H/W zero pad).
    keff = kernel_size + (kernel_size - 1) * (dilation - 1)
    pad_total = keff - 1
    pad_beg = pad_total // 2
    pad_end = pad_total - pad_beg
    xp = jnp.pad(x, ((0, 0), (pad_beg, pad_end), (pad_beg, pad_end), (0, 0)))
    return xp, pad_beg


def _pick_row_tile(hout, *, wout, max_rows, min_row_tiles):
    """Largest divisor of hout <= max_rows whose (th*wout) output block keeps its sublane
    dim 8-aligned (or covers the whole height, where the block equals the full dim)."""
    cap = max(1, min(hout, max_rows))
    if min_row_tiles > 1:
        cap = max(1, min(cap, hout // min_row_tiles))
    best = 0
    for t in range(1, cap + 1):
        if hout % t == 0 and (t == hout or (t * wout) % 8 == 0):
            best = t
    if best == 0:
        # No aligned divisor: fall back to one whole-height tile per image.
        # TODO(synk): very large images with awkward heights could exceed the VMEM budget.
        best = hout
    elif best <= 2 < hout and hout <= max_rows and min_row_tiles <= 1:
        # Prime/awkward heights: one whole-height tile beats 1-2 row micro-steps.
        best = hout
    return best


@functools.partial(jax.jit, static_argnames=("stride", "dilation", "expand_ratio",
                                              "bf16_compute", "min_row_tiles",
                                              "out_dtype_name"))
def _inverted_residual_impl(x_nchw, params, *, stride, dilation, expand_ratio,
                            bf16_compute, min_row_tiles, out_dtype_name):
    assert stride in (1, 2)
    n, inp, h, w = x_nchw.shape
    has_expand = expand_ratio != 1
    # The PyTorch forward reads `dilation` from conv[0]; for the expanded variant conv[0]
    # is the 1x1 conv whose dilation is 1 -- reproduce that exactly.
    pad_dil = 1 if has_expand else dilation
    out_dtype = jnp.dtype(out_dtype_name)
    cdt = jnp.bfloat16 if bf16_compute else jnp.float32

    # NHWC; the resident activation is kept in bf16 (halves the per-image HBM read and the
    # double-buffered VMEM footprint; the 1x1 expansion matmul consumes bf16 anyway).
    x = jnp.transpose(x_nchw, (0, 2, 3, 1)).astype(jnp.bfloat16)
    xpad, pad_beg = fixed_padding_nhwc(x, 3, pad_dil)
    hp, wp = xpad.shape[1], xpad.shape[2]

    hout = (hp - dilation * 2 - 1) // stride + 1
    wout = (wp - dilation * 2 - 1) // stride + 1

    # ---- fold BN scales into the conv weights (host side, once) ----
    if has_expand:
        s1, b1 = _fold_bn(params["bn1"])
        w1 = (jnp.transpose(params["w1"][:, :, 0, 0], (1, 0)) * s1[None, :])
        w1 = w1.astype(jnp.bfloat16)                             # (Cin, Chid)
        b1 = b1[None, :]
        chid = w1.shape[1]
    else:
        chid = inp
    s2, b2 = _fold_bn(params["bn2"])
    dw = (jnp.transpose(params["dw"][:, 0].reshape(chid, 9), (1, 0))
          * s2[None, :]).astype(cdt)                             # (9, Chid)
    b2 = b2[None, :]
    s3, b3 = _fold_bn(params["bn3"])
    w3 = (jnp.transpose(params["w3"][:, :, 0, 0], (1, 0)) * s3[None, :])
    w3 = w3.astype(jnp.bfloat16)                                 # (Chid, Cout)
    b3 = b3[None, :]
    cout = w3.shape[1]

    use_res = (stride == 1 and inp == cout)
    res_in_kernel = use_res and (hout == h) and (wout == w)

    # ---- generation-aware row tiling / VMEM budget ----
    vmem_cap = _vmem_capacity_bytes()
    ceiling = (3 * vmem_cap) // 4                 # headroom for compiler/internal scratch
    cbytes = jnp.dtype(cdt).itemsize
    fixed = 2 * hp * wp * inp * 2                 # double-buffered bf16 resident input
    fixed += 2 * (inp * chid + chid * cout) * 2 + 16 * (chid + cout) * 4
    per_row = ((stride * wp + 3 * wout) * chid * cbytes   # h + 3 column-shifted copies
               + wout * chid * 4                          # depthwise accumulator (f32 stage)
               + stride * wp * chid * 4                   # expansion matmul f32 result
               + 2 * 2 * wout * cout * 4)                 # double-buffered output tile
    budget = max(ceiling // 2 - fixed, per_row)
    max_rows = int(max(1, min(budget // per_row, 256, hout)))
    th = _pick_row_tile(hout, wout=wout, max_rows=max_rows, min_row_tiles=min_row_tiles)
    th_in = (th - 1) * stride + 2 * dilation + 1
    nt = hout // th

    need = fixed + th * per_row + th_in * wp * max(chid, inp) * (cbytes + 4)
    vmem_limit = int(min(max(need * 2, 24 * 1024 * 1024), ceiling))

    kernel = _make_kernel(
        has_expand=has_expand, stride=stride, dilation=dilation, th=th, th_in=th_in,
        wout=wout, cin=inp, chid=chid, cout=cout, pad_beg=pad_beg,
        use_res=res_in_kernel, compute_dtype=cdt)

    def full_spec(a):
        nd = a.ndim
        return pl.BlockSpec(a.shape, lambda nn, tt, _nd=nd: (0,) * _nd)

    # Padded input: one resident block per image (the block index ignores the row-tile
    # axis, so Pallas fetches it once per image); it doubles as the residual source.
    in_specs = [pl.BlockSpec((None, hp, wp, inp), lambda nn, tt: (nn, 0, 0, 0))]
    operands = [xpad]
    if has_expand:
        in_specs += [full_spec(w1), full_spec(b1)]
        operands += [w1, b1]
    in_specs += [full_spec(dw), full_spec(b2), full_spec(w3), full_spec(b3)]
    operands += [dw, b2, w3, b3]

    # Output is written as contiguous (th*wout, cout) blocks of an (N, Hout*Wout, Cout)
    # array -- exactly the projection matmul layout, so no in-kernel sublane->lane repack.
    out_shape = jax.ShapeDtypeStruct((n, hout * wout, cout), out_dtype)
    out_spec = pl.BlockSpec((None, th * wout, cout), lambda nn, tt: (nn, tt, 0))

    out = pl.pallas_call(
        kernel,
        out_shape=out_shape,
        grid=(n, nt),
        in_specs=in_specs,
        out_specs=out_spec,
        compiler_params=pltpu.CompilerParams(
            dimension_semantics=("parallel", "parallel"),
            vmem_limit_bytes=vmem_limit),
    )(*operands)

    out = out.reshape(n, hout, wout, cout)

    if use_res and not res_in_kernel:
        # Rare corner (expanded block with dilation > 1, mismatched spatial sizes):
        # reproduce the PyTorch crop-then-add on the host side, including its slicing /
        # broadcasting semantics for negative size differences.
        diff_h, diff_w = hout - h, wout - w
        cropped = out[:, diff_h // 2: diff_h // 2 + h, diff_w // 2: diff_w // 2 + w, :]
        out = jnp.transpose(x_nchw, (0, 2, 3, 1)).astype(out.dtype) + cropped

    return jnp.transpose(out, (0, 3, 1, 2))                      # back to NCHW


def inverted_residual(x_nchw, params, *, stride, dilation, expand_ratio, out_dtype=None):
    """Public entry point mirroring InvertedResidual.forward (NCHW in / NCHW out)."""
    out_dtype = x_nchw.dtype if out_dtype is None else out_dtype
    # Guarantee >=2 parallel grid steps when batch == 1 on a 2-TensorCore part (v7x).
    min_row_tiles = 2 if (x_nchw.shape[0] < 2 and _num_tensorcores() > 1) else 1
    return _inverted_residual_impl(
        x_nchw, params, stride=stride, dilation=dilation, expand_ratio=expand_ratio,
        bf16_compute=_has_bf16_vpu(), min_row_tiles=min_row_tiles,
        out_dtype_name=jnp.dtype(out_dtype).name)


# --------------------------------------------------------------------------------------
# Pure-JAX (XLA) reference of the PyTorch module, used for a numerical check.
# --------------------------------------------------------------------------------------
def _reference(x, params, *, stride, dilation, expand_ratio):
    inp = x.shape[1]
    has_expand = expand_ratio != 1
    pad_dil = 1 if has_expand else dilation
    keff = 3 + 2 * (pad_dil - 1)
    pt = keff - 1
    pb, pe = pt // 2, pt - pt // 2
    out = jnp.pad(x, ((0, 0), (0, 0), (pb, pe), (pb, pe)))

    def bn(y, p):
        s = p["gamma"] / jnp.sqrt(p["var"] + _BN_EPS)
        b = p["beta"] - p["mean"] * s
        return y * s[None, :, None, None] + b[None, :, None, None]

    dn = ("NCHW", "OIHW", "NCHW")
    if has_expand:
        out = lax.conv_general_dilated(out, params["w1"], (1, 1), "VALID",
                                       dimension_numbers=dn)
        out = jnp.clip(bn(out, params["bn1"]), 0.0, 6.0)
    chid = out.shape[1]
    out = lax.conv_general_dilated(out, params["dw"], (stride, stride), "VALID",
                                   rhs_dilation=(dilation, dilation),
                                   dimension_numbers=dn, feature_group_count=chid)
    out = jnp.clip(bn(out, params["bn2"]), 0.0, 6.0)
    out = lax.conv_general_dilated(out, params["w3"], (1, 1), "VALID",
                                   dimension_numbers=dn)
    out = bn(out, params["bn3"])
    if stride == 1 and inp == out.shape[1] and out.shape[2:] == x.shape[2:]:
        out = out + x
    return out


# --------------------------------------------------------------------------------------
# Deterministic synthetic parameters
# --------------------------------------------------------------------------------------
def _bn_params(c, tag):
    i = jnp.arange(c, dtype=jnp.float32)
    return {
        "gamma": 1.0 + 0.01 * (i + tag),
        "beta": 0.02 * (i - tag),
        "mean": 0.05 * i,
        "var": 1.0 + 0.1 * i,
    }


def init_params(key, inp, oup, expand_ratio):
    hidden = int(round(inp * expand_ratio))
    k1, k2, k3 = jax.random.split(key, 3)
    params = {}
    if expand_ratio != 1:
        params["w1"] = 0.1 * jax.random.normal(k1, (hidden, inp, 1, 1), jnp.float32)
        params["bn1"] = _bn_params(hidden, 1)
    params["dw"] = 0.1 * jax.random.normal(k2, (hidden, 1, 3, 3), jnp.float32)
    params["bn2"] = _bn_params(hidden, 2)
    params["w3"] = 0.1 * jax.random.normal(k3, (oup, hidden, 1, 1), jnp.float32)
    params["bn3"] = _bn_params(oup, 3)
    return params


if __name__ == "__main__":
    key = jax.random.PRNGKey(0)
    kx, kp = jax.random.split(key)

    N, INP, OUP, H, W = 2, 4, 4, 16, 16
    STRIDE, DILATION, EXPAND = 1, 1, 2          # hidden_dim = 8, residual connection used

    x = jax.random.normal(kx, (N, INP, H, W), jnp.float32)
    params = init_params(kp, INP, OUP, EXPAND)

    out = inverted_residual(x, params, stride=STRIDE, dilation=DILATION,
                            expand_ratio=EXPAND)
    out = jax.block_until_ready(out)
    assert out.shape == (N, OUP, H, W), out.shape
    assert bool(jnp.all(jnp.isfinite(out)))

    ref = _reference(x, params, stride=STRIDE, dilation=DILATION, expand_ratio=EXPAND)
    err = float(jnp.max(jnp.abs(out - ref)))
    # bf16 MXU matmuls everywhere; bf16 activations + depthwise MAC on v6e/v7x.
    tol = 1e-1 if _has_bf16_vpu() else 5e-2
    assert err < tol, f"max abs error vs reference: {err}"
    print("KERNEL_OK")
</pallas_src>

<mosaic_0001>
module attributes {stable_mosaic.version = 11 : i64} {
  func.func @kernel(%arg0: i32, %arg1: i32, %arg2: memref<1x18x18x4xbf16, #tpu.memory_space<vmem>>, %arg3: memref<4x8xbf16, #tpu.memory_space<vmem>>, %arg4: memref<1x8xf32, #tpu.memory_space<vmem>>, %arg5: memref<9x8xf32, #tpu.memory_space<vmem>>, %arg6: memref<1x8xf32, #tpu.memory_space<vmem>>, %arg7: memref<8x4xbf16, #tpu.memory_space<vmem>>, %arg8: memref<1x4xf32, #tpu.memory_space<vmem>>, %arg9: memref<1x256x4xf32, #tpu.memory_space<vmem>>) attributes {dimension_semantics = [#tpu.dimension_semantics<parallel>, #tpu.dimension_semantics<parallel>], iteration_bounds = array<i64: 2, 1>, scalar_prefetch = 0 : i64, scratch_operands = 0 : i64, tpu.core_type = #tpu.core_type<tc>, window_params = [{transform_indices = @transform_0, window_bounds = array<i64: 1, 18, 18, 4>}, {pipeline_mode = #tpu.pipeline_mode<synchronous>, transform_indices = @transform_1, window_bounds = array<i64: 4, 8>}, {pipeline_mode = #tpu.pipeline_mode<synchronous>, transform_indices = @transform_2, window_bounds = array<i64: 1, 8>}, {pipeline_mode = #tpu.pipeline_mode<synchronous>, transform_indices = @transform_3, window_bounds = array<i64: 9, 8>}, {pipeline_mode = #tpu.pipeline_mode<synchronous>, transform_indices = @transform_4, window_bounds = array<i64: 1, 8>}, {pipeline_mode = #tpu.pipeline_mode<synchronous>, transform_indices = @transform_5, window_bounds = array<i64: 8, 4>}, {pipeline_mode = #tpu.pipeline_mode<synchronous>, transform_indices = @transform_6, window_bounds = array<i64: 1, 4>}, {transform_indices = @transform_7, window_bounds = array<i64: 1, 256, 4>}]} {
    %c16_i32 = arith.constant 16 : i32
    %0 = arith.muli %arg1, %c16_i32 : i32
    %1 = tpu.assume_multiple %0, 16 : i32
    %c0 = arith.constant 0 : index
    %2 = arith.index_cast %1 : i32 to index
    %c0_0 = arith.constant 0 : index
    %c0_1 = arith.constant 0 : index
    %3 = vector.load %arg2[%c0, %2, %c0_0, %c0_1] : memref<1x18x18x4xbf16, #tpu.memory_space<vmem>>, vector<1x18x18x4xbf16>
    %4 = vector.shape_cast %3 : vector<1x18x18x4xbf16> to vector<18x18x4xbf16>
    %5 = vector.shape_cast %4 : vector<18x18x4xbf16> to vector<324x4xbf16>
    %c0_2 = arith.constant 0 : index
    %c0_3 = arith.constant 0 : index
    %6 = vector.load %arg3[%c0_2, %c0_3] : memref<4x8xbf16, #tpu.memory_space<vmem>>, vector<4x8xbf16>
    %cst = arith.constant dense<0.000000e+00> : vector<324x8xf32>
    %7 = tpu.matmul %5, %6, %cst {dimension_numbers = #tpu.dot_dimension_numbers<[1], [0], [0], [1], [0, 0, 1, 1], [], []>} : vector<324x4xbf16>, vector<4x8xbf16>, vector<324x8xf32> -> vector<324x8xf32>
    %c0_4 = arith.constant 0 : index
    %c0_5 = arith.constant 0 : index
    %8 = vector.load %arg4[%c0_4, %c0_5] : memref<1x8xf32, #tpu.memory_space<vmem>>, vector<1x8xf32>
    %9 = vector.broadcast %8 : vector<1x8xf32> to vector<324x8xf32>
    %10 = arith.addf %7, %9 : vector<324x8xf32>
    %cst_6 = arith.constant 0.000000e+00 : f32
    %11 = vector.broadcast %cst_6 : f32 to vector<324x8xf32>
    %12 = arith.maximumf %10, %11 : vector<324x8xf32>
    %cst_7 = arith.constant 6.000000e+00 : f32
    %13 = vector.broadcast %cst_7 : f32 to vector<324x8xf32>
    %14 = arith.minimumf %12, %13 : vector<324x8xf32>
    %15 = vector.shape_cast %14 : vector<324x8xf32> to vector<18x18x8xf32>
    %16 = vector.extract_strided_slice %15 {offsets = [0, 0, 0], sizes = [18, 16, 8], strides = [1, 1, 1]} : vector<18x18x8xf32> to vector<18x16x8xf32>
    %17 = vector.extract_strided_slice %15 {offsets = [0, 1, 0], sizes = [18, 16, 8], strides = [1, 1, 1]} : vector<18x18x8xf32> to vector<18x16x8xf32>
    %18 = vector.extract_strided_slice %15 {offsets = [0, 2, 0], sizes = [18, 16, 8], strides = [1, 1, 1]} : vector<18x18x8xf32> to vector<18x16x8xf32>
    %c0_8 = arith.constant 0 : index
    %c0_9 = arith.constant 0 : index
    %19 = vector.load %arg5[%c0_8, %c0_9] : memref<9x8xf32, #tpu.memory_space<vmem>>, vector<9x8xf32>
    %20 = vector.extract_strided_slice %16 {offsets = [0, 0, 0], sizes = [16, 16, 8], strides = [1, 1, 1]} : vector<18x16x8xf32> to vector<16x16x8xf32>
    %21 = vector.extract_strided_slice %19 {offsets = [0, 0], sizes = [1, 8], strides = [1, 1]} : vector<9x8xf32> to vector<1x8xf32>
    %22 = vector.shape_cast %21 : vector<1x8xf32> to vector<8xf32>
    %23 = vector.shape_cast %22 : vector<8xf32> to vector<1x1x8xf32>
    %24 = vector.broadcast %23 : vector<1x1x8xf32> to vector<16x16x8xf32>
    %25 = arith.mulf %20, %24 : vector<16x16x8xf32>
    %26 = vector.extract_strided_slice %17 {offsets = [0, 0, 0], sizes = [16, 16, 8], strides = [1, 1, 1]} : vector<18x16x8xf32> to vector<16x16x8xf32>
    %27 = vector.extract_strided_slice %19 {offsets = [1, 0], sizes = [1, 8], strides = [1, 1]} : vector<9x8xf32> to vector<1x8xf32>
    %28 = vector.shape_cast %27 : vector<1x8xf32> to vector<8xf32>
    %29 = vector.shape_cast %28 : vector<8xf32> to vector<1x1x8xf32>
    %30 = vector.broadcast %29 : vector<1x1x8xf32> to vector<16x16x8xf32>
    %31 = arith.mulf %26, %30 : vector<16x16x8xf32>
    %32 = arith.addf %25, %31 : vector<16x16x8xf32>
    %33 = vector.extract_strided_slice %18 {offsets = [0, 0, 0], sizes = [16, 16, 8], strides = [1, 1, 1]} : vector<18x16x8xf32> to vector<16x16x8xf32>
    %34 = vector.extract_strided_slice %19 {offsets = [2, 0], sizes = [1, 8], strides = [1, 1]} : vector<9x8xf32> to vector<1x8xf32>
    %35 = vector.shape_cast %34 : vector<1x8xf32> to vector<8xf32>
    %36 = vector.shape_cast %35 : vector<8xf32> to vector<1x1x8xf32>
    %37 = vector.broadcast %36 : vector<1x1x8xf32> to vector<16x16x8xf32>
    %38 = arith.mulf %33, %37 : vector<16x16x8xf32>
    %39 = arith.addf %32, %38 : vector<16x16x8xf32>
    %40 = vector.extract_strided_slice %16 {offsets = [1, 0, 0], sizes = [16, 16, 8], strides = [1, 1, 1]} : vector<18x16x8xf32> to vector<16x16x8xf32>
    %41 = vector.extract_strided_slice %19 {offsets = [3, 0], sizes = [1, 8], strides = [1, 1]} : vector<9x8xf32> to vector<1x8xf32>
    %42 = vector.shape_cast %41 : vector<1x8xf32> to vector<8xf32>
    %43 = vector.shape_cast %42 : vector<8xf32> to vector<1x1x8xf32>
    %44 = vector.broadcast %43 : vector<1x1x8xf32> to vector<16x16x8xf32>
    %45 = arith.mulf %40, %44 : vector<16x16x8xf32>
    %46 = arith.addf %39, %45 : vector<16x16x8xf32>
    %47 = vector.extract_strided_slice %17 {offsets = [1, 0, 0], sizes = [16, 16, 8], strides = [1, 1, 1]} : vector<18x16x8xf32> to vector<16x16x8xf32>
    %48 = vector.extract_strided_slice %19 {offsets = [4, 0], sizes = [1, 8], strides = [1, 1]} : vector<9x8xf32> to vector<1x8xf32>
    %49 = vector.shape_cast %48 : vector<1x8xf32> to vector<8xf32>
    %50 = vector.shape_cast %49 : vector<8xf32> to vector<1x1x8xf32>
    %51 = vector.broadcast %50 : vector<1x1x8xf32> to vector<16x16x8xf32>
    %52 = arith.mulf %47, %51 : vector<16x16x8xf32>
    %53 = arith.addf %46, %52 : vector<16x16x8xf32>
    %54 = vector.extract_strided_slice %18 {offsets = [1, 0, 0], sizes = [16, 16, 8], strides = [1, 1, 1]} : vector<18x16x8xf32> to vector<16x16x8xf32>
    %55 = vector.extract_strided_slice %19 {offsets = [5, 0], sizes = [1, 8], strides = [1, 1]} : vector<9x8xf32> to vector<1x8xf32>
    %56 = vector.shape_cast %55 : vector<1x8xf32> to vector<8xf32>
    %57 = vector.shape_cast %56 : vector<8xf32> to vector<1x1x8xf32>
    %58 = vector.broadcast %57 : vector<1x1x8xf32> to vector<16x16x8xf32>
    %59 = arith.mulf %54, %58 : vector<16x16x8xf32>
    %60 = arith.addf %53, %59 : vector<16x16x8xf32>
    %61 = vector.extract_strided_slice %16 {offsets = [2, 0, 0], sizes = [16, 16, 8], strides = [1, 1, 1]} : vector<18x16x8xf32> to vector<16x16x8xf32>
    %62 = vector.extract_strided_slice %19 {offsets = [6, 0], sizes = [1, 8], strides = [1, 1]} : vector<9x8xf32> to vector<1x8xf32>
    %63 = vector.shape_cast %62 : vector<1x8xf32> to vector<8xf32>
    %64 = vector.shape_cast %63 : vector<8xf32> to vector<1x1x8xf32>
    %65 = vector.broadcast %64 : vector<1x1x8xf32> to vector<16x16x8xf32>
    %66 = arith.mulf %61, %65 : vector<16x16x8xf32>
    %67 = arith.addf %60, %66 : vector<16x16x8xf32>
    %68 = vector.extract_strided_slice %17 {offsets = [2, 0, 0], sizes = [16, 16, 8], strides = [1, 1, 1]} : vector<18x16x8xf32> to vector<16x16x8xf32>
    %69 = vector.extract_strided_slice %19 {offsets = [7, 0], sizes = [1, 8], strides = [1, 1]} : vector<9x8xf32> to vector<1x8xf32>
    %70 = vector.shape_cast %69 : vector<1x8xf32> to vector<8xf32>
    %71 = vector.shape_cast %70 : vector<8xf32> to vector<1x1x8xf32>
    %72 = vector.broadcast %71 : vector<1x1x8xf32> to vector<16x16x8xf32>
    %73 = arith.mulf %68, %72 : vector<16x16x8xf32>
    %74 = arith.addf %67, %73 : vector<16x16x8xf32>
    %75 = vector.extract_strided_slice %18 {offsets = [2, 0, 0], sizes = [16, 16, 8], strides = [1, 1, 1]} : vector<18x16x8xf32> to vector<16x16x8xf32>
    %76 = vector.extract_strided_slice %19 {offsets = [8, 0], sizes = [1, 8], strides = [1, 1]} : vector<9x8xf32> to vector<1x8xf32>
    %77 = vector.shape_cast %76 : vector<1x8xf32> to vector<8xf32>
    %78 = vector.shape_cast %77 : vector<8xf32> to vector<1x1x8xf32>
    %79 = vector.broadcast %78 : vector<1x1x8xf32> to vector<16x16x8xf32>
    %80 = arith.mulf %75, %79 : vector<16x16x8xf32>
    %81 = arith.addf %74, %80 : vector<16x16x8xf32>
    %c0_10 = arith.constant 0 : index
    %c0_11 = arith.constant 0 : index
    %82 = vector.load %arg6[%c0_10, %c0_11] : memref<1x8xf32, #tpu.memory_space<vmem>>, vector<1x8xf32>
    %83 = vector.shape_cast %82 : vector<1x8xf32> to vector<1x1x8xf32>
    %84 = vector.broadcast %83 : vector<1x1x8xf32> to vector<16x16x8xf32>
    %85 = arith.addf %81, %84 : vector<16x16x8xf32>
    %cst_12 = arith.constant 0.000000e+00 : f32
    %86 = vector.broadcast %cst_12 : f32 to vector<16x16x8xf32>
    %87 = arith.maximumf %85, %86 : vector<16x16x8xf32>
    %cst_13 = arith.constant 6.000000e+00 : f32
    %88 = vector.broadcast %cst_13 : f32 to vector<16x16x8xf32>
    %89 = arith.minimumf %87, %88 : vector<16x16x8xf32>
    %90 = vector.shape_cast %89 : vector<16x16x8xf32> to vector<256x8xf32>
    %91 = arith.truncf %90 : vector<256x8xf32> to vector<256x8xbf16>
    %c0_14 = arith.constant 0 : index
    %c0_15 = arith.constant 0 : index
    %92 = vector.load %arg7[%c0_14, %c0_15] : memref<8x4xbf16, #tpu.memory_space<vmem>>, vector<8x4xbf16>
    %cst_16 = arith.constant dense<0.000000e+00> : vector<256x4xf32>
    %93 = tpu.matmul %91, %92, %cst_16 {dimension_numbers = #tpu.dot_dimension_numbers<[1], [0], [0], [1], [0, 0, 1, 1], [], []>} : vector<256x8xbf16>, vector<8x4xbf16>, vector<256x4xf32> -> vector<256x4xf32>
    %c0_17 = arith.constant 0 : index
    %c0_18 = arith.constant 0 : index
    %94 = vector.load %arg8[%c0_17, %c0_18] : memref<1x4xf32, #tpu.memory_space<vmem>>, vector<1x4xf32>
    %95 = vector.broadcast %94 : vector<1x4xf32> to vector<256x4xf32>
    %96 = arith.addf %93, %95 : vector<256x4xf32>
    %c1_i32 = arith.constant 1 : i32
    %97 = arith.addi %1, %c1_i32 : i32
    %c0_19 = arith.constant 0 : index
    %98 = arith.index_cast %97 : i32 to index
    %c0_20 = arith.constant 0 : index
    %c0_21 = arith.constant 0 : index
    %99 = vector.load %arg2[%c0_19, %98, %c0_20, %c0_21] : memref<1x18x18x4xbf16, #tpu.memory_space<vmem>>, vector<1x16x18x4xbf16>
    %100 = vector.shape_cast %99 : vector<1x16x18x4xbf16> to vector<16x18x4xbf16>
    %101 = vector.extract_strided_slice %100 {offsets = [0, 1, 0], sizes = [16, 16, 4], strides = [1, 1, 1]} : vector<16x18x4xbf16> to vector<16x16x4xbf16>
    %102 = vector.shape_cast %101 : vector<16x16x4xbf16> to vector<256x4xbf16>
    %103 = arith.extf %102 : vector<256x4xbf16> to vector<256x4xf32>
    %104 = arith.addf %96, %103 : vector<256x4xf32>
    %c0_22 = arith.constant 0 : index
    %c0_23 = arith.constant 0 : index
    %c0_24 = arith.constant 0 : index
    %105 = vector.load %arg9[%c0_22, %c0_23, %c0_24] : memref<1x256x4xf32, #tpu.memory_space<vmem>>, vector<1x256x4xf32>
    %106 = vector.shape_cast %105 : vector<1x256x4xf32> to vector<256x4xf32>
    %107 = vector.shape_cast %104 : vector<256x4xf32> to vector<1x256x4xf32>
    tpu.vector_store %arg9[%c0_22, %c0_23, %c0_24], %107 {strides = array<i32>} : memref<1x256x4xf32, #tpu.memory_space<vmem>>, vector<1x256x4xf32>,
    return
  }
  func.func @transform_0(%arg0: i32, %arg1: i32) -> (i32, i32, i32, i32) {
    %c0_i32 = arith.constant 0 : i32
    %c0_i32_0 = arith.constant 0 : i32
    %c0_i32_1 = arith.constant 0 : i32
    %c0_i32_2 = arith.constant 0 : i32
    return %arg0, %c0_i32, %c0_i32_0, %c0_i32_1 : i32, i32, i32, i32
  }
  func.func @transform_1(%arg0: i32, %arg1: i32) -> (i32, i32) {
    %c0_i32 = arith.constant 0 : i32
    %c0_i32_0 = arith.constant 0 : i32
    %c0_i32_1 = arith.constant 0 : i32
    return %c0_i32, %c0_i32_0 : i32, i32
  }
  func.func @transform_2(%arg0: i32, %arg1: i32) -> (i32, i32) {
    %c0_i32 = arith.constant 0 : i32
    %c0_i32_0 = arith.constant 0 : i32
    %c0_i32_1 = arith.constant 0 : i32
    return %c0_i32, %c0_i32_0 : i32, i32
  }
  func.func @transform_3(%arg0: i32, %arg1: i32) -> (i32, i32) {
    %c0_i32 = arith.constant 0 : i32
    %c0_i32_0 = arith.constant 0 : i32
    %c0_i32_1 = arith.constant 0 : i32
    return %c0_i32, %c0_i32_0 : i32, i32
  }
  func.func @transform_4(%arg0: i32, %arg1: i32) -> (i32, i32) {
    %c0_i32 = arith.constant 0 : i32
    %c0_i32_0 = arith.constant 0 : i32
    %c0_i32_1 = arith.constant 0 : i32
    return %c0_i32, %c0_i32_0 : i32, i32
  }
  func.func @transform_5(%arg0: i32, %arg1: i32) -> (i32, i32) {
    %c0_i32 = arith.constant 0 : i32
    %c0_i32_0 = arith.constant 0 : i32
    %c0_i32_1 = arith.constant 0 : i32
    return %c0_i32, %c0_i32_0 : i32, i32
  }
  func.func @transform_6(%arg0: i32, %arg1: i32) -> (i32, i32) {
    %c0_i32 = arith.constant 0 : i32
    %c0_i32_0 = arith.constant 0 : i32
    %c0_i32_1 = arith.constant 0 : i32
    return %c0_i32, %c0_i32_0 : i32, i32
  }
  func.func @transform_7(%arg0: i32, %arg1: i32) -> (i32, i32, i32) {
    %c0_i32 = arith.constant 0 : i32
    %c0_i32_0 = arith.constant 0 : i32
    return %arg0, %arg1, %c0_i32 : i32, i32, i32
  }
}

</mosaic_0001>

<bundles_post_ra>
// kernel: squeeze.4
= control target key start
LH: loop header
LB: loop body
LE: loop exit
PB: predicated region body
PF: predicated region fallthrough
CT: control target
= control target key end

     0   :  { %vm15_vm0 = vcmask 64512   ;;  %s59_s0 = inlined_call_operand.vmem [shape: f32[8,3,3], index: 0, kind: input, shape index: {}]   ;;  %s60_s1 = inlined_call_operand.vmem [shape: f32[8,9], index: 1, kind: output, shape index: {}]  }
   0x1   :  { %v27_v0 = vld [vmem:[%s59_s0 + $0x8] sm:$0xf]  ;;  %v28_v1 = vld [vmem:[%s59_s0 + $0x4] sm:$0xf]  ;;  %v12_v2 = vld [vmem:[%s59_s0] sm:$0xf] }
   0x2   :  { %7 = vst [vmem:[#allocation0] sm:$0xf] %v27_v0 }
   0x3   :  { %11 = vst [vmem:[#allocation0 + $0x10] sm:$0xf] %v28_v1 }
   0x4   :  { %13 = vst [vmem:[#allocation0 + $0x8] sm:$0xf] %v12_v2 }
   0x9   :  { %v23_v3 = vld [vmem:[#allocation0] sm:$0x7]  }
   0xa   :  { %v18_v4 = vld [vmem:[#allocation0 + $0x10] sm:$0x7]   ;;  %30 = vst.msk [vmem:[%s60_s1 + $0x6] sm:$0x7] %vm15_vm0, %v23_v3  }
   0xb   :  { %v14_v5 = vld [vmem:[#allocation0 + $0x8] sm:$0x7]   ;;  %29 = vst.msk [vmem:[%s60_s1 + $0x3] sm:$0x7] %vm15_vm0, %v18_v4  }
   0xc   :  { %16 = vst.msk [vmem:[%s60_s1] sm:$0x7] %vm15_vm0, %v14_v5  }

// kernel: _inverted_residual_impl.1
= control target key start
LH: loop header
LB: loop body
LE: loop exit
PB: predicated region body
PF: predicated region fallthrough
CT: control target
= control target key end

     0   :  { %s7949_s24 = smov 0   ;;  %s7951_s25 = smov 0   ;;  %s14358_s0 = inlined_call_operand.vmem [shape: bf16[2,18,18,4], index: 0, kind: input, shape index: {}]   ;;  %s14359_s1 = inlined_call_operand.vmem [shape: bf16[4,8], index: 1, kind: input, shape index: {}]   ;;  %s14360_s2 = inlined_call_operand.vmem [shape: f32[1,8], index: 2, kind: input, shape index: {}]   ;;  %s14361_s3 = inlined_call_operand.vmem [shape: f32[9,8], index: 3, kind: input, shape index: {}]   ;;  %s14362_s4 = inlined_call_operand.vmem [shape: f32[1,8], index: 4, kind: input, shape index: {}]   ;;  %s14363_s5 = inlined_call_operand.vmem [shape: bf16[8,4], index: 5, kind: input, shape index: {}]   ;;  %s14364_s6 = inlined_call_operand.vmem [shape: f32[1,4], index: 6, kind: input, shape index: {}]   ;;  %s14365_s7 = inlined_call_operand.vmem [shape: f32[2,256,4], index: 7, kind: output, shape index: {}]  }
   0x1   :  { %s7953_s26 = smov 0  }
   0x2 LB: > { %s29_s27 = sadd.s32 1, %s7903_s25  ;;  %p7693_p0 = scmp.ge.s32.totalorder %s7907_s26, 1  ;;  %s7907_s26 = sphi %s7953_s26, %s17_s26   ;;  %s7903_s25 = sphi %s7951_s25, %s16153_s25   ;;  %s7899_s24 = sphi %s7949_s24, %s16152_s24  }
   0x3   : > { %p31_p1 = scmp.ge.s32.totalorder %s29_s27, 2  ;;  %p251_p2 = scmp.lt.s32.totalorder %s7907_s26, 3 }
   0x5   : > { %s16155_s27 = smov (%p31_p1, %s29_s27), 0  ;;  %p252_p3 = pnand %p7693_p0, %p251_p2 }
   0x7   : > { %255 = sbr.rel (%p252_p3) target bundleno = 1493 (0x5d5), region = 48 }
   0xc   : > { %v959_v0 = vld [vmem:[%s14359_s1] sm:$0x3]  ;;  %vm1305_vm0 = vcmask 1041408   ;;  %p287_p4 = scmp.lt.s32.totalorder %s7899_s24, 1  ;;  %vm469_vm1 = vcmask 1040384   ;;  %vm473_vm2 = vcmask 1041409  }
   0xd   : > { %v1307_v1 = vsel %vm1305_vm0, %v959_v0, 0  ;;  %vm477_vm3 = vcmask 1042434   ;;  %vm481_vm4 = vcmask 1043459   ;;  %vm1262_vm5 = vcmask 31744  }
   0xe   : > { %1316 = vmatpush.bf16.msra.mxu0 %v1307_v1  ;;  %s16157_s24 = smov (!%p287_p4, %s7899_s24), 1  ;;  %7833 = vmatpush.bf16.msra.mxu2 %v1307_v1  ;;  %vm8143_vm6 = vmor %vm469_vm1, %vm477_vm3  ;;  %vm1931_vm7 = vcmask 1044484   ;;  %vm1933_vm9 = vcmask 1046534   ;;  %vm6942_vm11 = vcmask 1043456   ;;  %vm6893_vm12 = vcmask 64512  }
   0xf   : > { %7834 = vmatpush.bf16.msra.mxu3 %v1307_v1  ;;  %s7836_s30 = smul.u32 216, %s16157_s24  ;;  %vm1932_vm8 = vmor %vm8143_vm6, %vm1931_vm7  ;;  %vm7087_vm13 = vsmask.f32 3328  ;;  %vm7088_vm14 = vsmask.f32 7440  ;;  %s7832_s19 = sshll.u32 %s16157_s24, 8 }
  0x10   : > { %vm8176_vm10 = vmor %vm1932_vm8, %vm1933_vm9  ;;  %s13392_s21 = scalar_lea.vmem %s14365_s7, %s7832_s19 }
  0x11   : > { %s7976_s10 = scalar_lea.vmem %s14358_s0, %s7836_s30  ;;  %vm13344_vm15 = vmor %vm7087_vm13, %vm7088_vm14 }
  0x12   : > { %v307_v2 = vld [vmem:[%s7976_s10] sm:$0xf]  ;;  %v308_v3 = vld [vmem:[%s7976_s10 + $0x4] sm:$0xf]  ;;  %v310_v20 = vld [vmem:[%s7976_s10 + $0xc] sm:$0xf] }
  0x13   : > { %v415_v4 = vrot.slane %v307_v2, 3  ;;  %v416_v5 = vrot.slane %v308_v3, 3  ;;  %v309_v21 = vld [vmem:[%s7976_s10 + $0x8] sm:$0x1]  ;;  %v418_v22 = vrot.slane %v310_v20, 3 }
  0x14   : > { %v311_v23 = vld [vmem:[%s7976_s10 + $0x10] sm:$0xf]  ;;  %v417_v24 = vrot.slane %v309_v21, 3  ;;  %v313_v40 = vld [vmem:[%s7976_s10 + $0x18] sm:$0xf] }
  0x15   : > { %v472_v6 = vsel %vm469_vm1, %v307_v2, %v415_v4  ;;  %v474_v7 = vsel %vm473_vm2, %v307_v2, %v415_v4  ;;  %v478_v8 = vsel %vm477_vm3, %v307_v2, %v415_v4  ;;  %v482_v9 = vsel %vm481_vm4, %v307_v2, %v415_v4  ;;  %v312_v41 = vld [vmem:[%s7976_s10 + $0x14] sm:$0x1]  ;;  %v314_v43 = vld [vmem:[%s7976_s10 + $0x1c] sm:$0xf]  ;;  %v316_v60 = vld [vmem:[%s7976_s10 + $0x24] sm:$0xf] }
  0x16   : > { %v476_v10 = vrot.slane %v474_v7, 1  ;;  %v480_v11 = vrot.slane %v478_v8, 2  ;;  %v484_v12 = vrot.slane %v482_v9, 3  ;;  %v487_v13 = vsel %vm469_vm1, %v308_v3, %v416_v5  ;;  %964 = vst [vmem:[#allocation1] ss:$9 sm:$0xff] %v472_v6 }
  0x17   : > { %v488_v14 = vsel %vm473_vm2, %v308_v3, %v416_v5  ;;  %v491_v15 = vsel %vm477_vm3, %v308_v3, %v416_v5  ;;  %v494_v16 = vsel %vm481_vm4, %v308_v3, %v416_v5  ;;  %975 = vst [vmem:[#allocation1 + $0x4] ss:$9 sm:$0xff] %v487_v13  ;;  %v419_v25 = vrot.slane %v311_v23, 3  ;;  %v315_v61 = vld [vmem:[%s7976_s10 + $0x20] sm:$0x1] }
  0x18   : > { %v490_v17 = vrot.slane %v488_v14, 1  ;;  %v493_v18 = vrot.slane %v491_v15, 2  ;;  %967 = vst [vmem:[#allocation1 + $0x1] ss:$9 sm:$0xff] %v476_v10  ;;  %v496_v19 = vrot.slane %v494_v16, 3  ;;  %v503_v26 = vsel %vm473_vm2, %v310_v20, %v418_v22 }
  0x19   : > { %970 = vst [vmem:[#allocation1 + $0x2] ss:$9 sm:$0xff] %v480_v11  ;;  %v506_v27 = vsel %vm477_vm3, %v310_v20, %v418_v22  ;;  %v499_v28 = vsel %vm469_vm1, %v309_v21, %v417_v24  ;;  %v509_v29 = vsel %vm481_vm4, %v310_v20, %v418_v22  ;;  %v502_v30 = vsel %vm469_vm1, %v310_v20, %v418_v22  ;;  %v317_v3 = vld [vmem:[%s7976_s10 + $0x28] sm:$0xf]  ;;  %v319_v16 = vld [vmem:[%s7976_s10 + $0x30] sm:$0xf] }
  0x1a   : > { %973 = vst [vmem:[#allocation1 + $0x3] ss:$9 sm:$0xff] %v484_v12  ;;  %v505_v31 = vrot.slane %v503_v26, 1  ;;  %v508_v33 = vrot.slane %v506_v27, 2  ;;  %v515_v34 = vsel %vm473_vm2, %v311_v23, %v419_v25  ;;  %v511_v35 = vrot.slane %v509_v29, 3 }
  0x1b   : > { %978 = vst [vmem:[#allocation1 + $0x5] ss:$9 sm:$0xff] %v490_v17  ;;  %v518_v36 = vsel %vm477_vm3, %v311_v23, %v419_v25  ;;  %v514_v37 = vsel %vm469_vm1, %v311_v23, %v419_v25  ;;  %v517_v38 = vrot.slane %v515_v34, 1  ;;  %v421_v42 = vrot.slane %v313_v40, 3  ;;  %v318_v17 = vld [vmem:[%s7976_s10 + $0x2c] sm:$0x1] }
  0x1c   : > { %981 = vst [vmem:[#allocation1 + $0x6] ss:$9 sm:$0xff] %v493_v18  ;;  %v520_v39 = vrot.slane %v518_v36, 2  ;;  %v521_v44 = vsel %vm481_vm4, %v311_v23, %v419_v25  ;;  %v420_v45 = vrot.slane %v312_v41, 3  ;;  %v422_v46 = vrot.slane %v314_v43, 3 }
  0x1d   : > { %984 = vst [vmem:[#allocation1 + $0x7] ss:$9 sm:$0xff] %v496_v19  ;;  %v523_v47 = vrot.slane %v521_v44, 3  ;;  %v530_v48 = vsel %vm473_vm2, %v313_v40, %v421_v42  ;;  %v533_v49 = vsel %vm477_vm3, %v313_v40, %v421_v42  ;;  %v536_v51 = vsel %vm481_vm4, %v313_v40, %v421_v42  ;;  %v320_v34 = vld [vmem:[%s7976_s10 + $0x34] sm:$0xf] }
  0x1e   : > { %v526_v50 = vsel %vm469_vm1, %v312_v41, %v420_v45  ;;  %v529_v53 = vsel %vm469_vm1, %v313_v40, %v421_v42  ;;  %v532_v54 = vrot.slane %v530_v48, 1  ;;  %v535_v55 = vrot.slane %v533_v49, 2 }
  0x1f   : > { %v542_v56 = vsel %vm473_vm2, %v314_v43, %v422_v46  ;;  %v538_v57 = vrot.slane %v536_v51, 3  ;;  %v541_v58 = vsel %vm469_vm1, %v314_v43, %v422_v46  ;;  %v424_v62 = vrot.slane %v316_v60, 3 }
  0x20   : > { %v544_v59 = vrot.slane %v542_v56, 1  ;;  %v545_v63 = vsel %vm477_vm3, %v314_v43, %v422_v46  ;;  %v548_v0 = vsel %vm481_vm4, %v314_v43, %v422_v46  ;;  %v423_v1 = vrot.slane %v315_v61, 3 }
  0x21   : > { %v547_v2 = vrot.slane %v545_v63, 2  ;;  %v550_v4 = vrot.slane %v548_v0, 3  ;;  %v557_v5 = vsel %vm473_vm2, %v316_v60, %v424_v62  ;;  %v560_v6 = vsel %vm477_vm3, %v316_v60, %v424_v62 }
  0x22   : > { %v553_v8 = vsel %vm469_vm1, %v315_v61, %v423_v1  ;;  %v563_v9 = vsel %vm481_vm4, %v316_v60, %v424_v62  ;;  %v425_v10 = vrot.slane %v317_v3, 3  ;;  %v556_v11 = vsel %vm469_vm1, %v316_v60, %v424_v62 }
  0x23   : > { %v559_v12 = vrot.slane %v557_v5, 1  ;;  %v562_v13 = vrot.slane %v560_v6, 2  ;;  %v565_v14 = vrot.slane %v563_v9, 3  ;;  %v427_v19 = vrot.slane %v319_v16, 3 }
  0x24   : > { %v985_v32 = vld [vmem:[#allocation1] sm:$0xff]  ;;  %v568_v15 = vsel %vm469_vm1, %v317_v3, %v425_v10  ;;  %v569_v18 = vsel %vm473_vm2, %v317_v3, %v425_v10  ;;  %v572_v20 = vsel %vm477_vm3, %v317_v3, %v425_v10  ;;  %v575_v21 = vsel %vm481_vm4, %v317_v3, %v425_v10 }
  0x25   : > { %7697 = vmatmul.msk.bf16.vlgmr.msra.gmra.mxu0 %vm1262_vm5, %v985_v32  ;;  %986 = vst [vmem:[#allocation1] ss:$9 sm:$0xff] %v499_v28  ;;  %v426_v22 = vrot.slane %v318_v17, 3  ;;  %v571_v23 = vrot.slane %v569_v18, 1  ;;  %v574_v24 = vrot.slane %v572_v20, 2  ;;  %v577_v25 = vrot.slane %v575_v21, 3 }
  0x26   : > { %987 = vst [vmem:[#allocation1 + $0x1] ss:$9 sm:$0xff] %v502_v30  ;;  %v584_v26 = vsel %vm473_vm2, %v319_v16, %v427_v19  ;;  %v587_v28 = vsel %vm477_vm3, %v319_v16, %v427_v19  ;;  %v590_v30 = vsel %vm481_vm4, %v319_v16, %v427_v19  ;;  %v428_v36 = vrot.slane %v320_v34, 3  ;;  %v328_v18 = vld [vmem:[%s7976_s10 + $0x54] sm:$0xf] }
  0x27   : > { %989 = vst [vmem:[#allocation1 + $0x2] ss:$9 sm:$0xff] %v505_v31  ;;  %v580_v29 = vsel %vm469_vm1, %v318_v17, %v426_v22  ;;  %v583_v31 = vsel %vm469_vm1, %v319_v16, %v427_v19  ;;  %v586_v32 = vrot.slane %v584_v26, 1  ;;  %v436_v26 = vrot.slane %v328_v18, 3 }
  0x28   : > { %991 = vst [vmem:[#allocation1 + $0x3] ss:$9 sm:$0xff] %v508_v33  ;;  %v589_v33 = vrot.slane %v587_v28, 2  ;;  %v599_v41 = vsel %vm477_vm3, %v320_v34, %v428_v36  ;;  %v602_v42 = vsel %vm481_vm4, %v320_v34, %v428_v36  ;;  %v595_v44 = vsel %vm469_vm1, %v320_v34, %v428_v36 }
  0x29   : > { %993 = vst [vmem:[#allocation1 + $0x4] ss:$9 sm:$0xff] %v511_v35  ;;  %v592_v35 = vrot.slane %v590_v30, 3  ;;  %v601_v46 = vrot.slane %v599_v41, 2  ;;  %v604_v48 = vrot.slane %v602_v42, 3  ;;  %v664_v30 = vsel %vm469_vm1, %v328_v18, %v436_v26 }
  0x2a   : > { %994 = vst [vmem:[#allocation1 + $0x5] ss:$9 sm:$0xff] %v514_v37  ;;  %v322_v37 = vld [vmem:[%s7976_s10 + $0x3c] sm:$0xf] }
  0x2b   : > { %996 = vst [vmem:[#allocation1 + $0x6] ss:$9 sm:$0xff] %v517_v38  ;;  %v321_v38 = vld [vmem:[%s7976_s10 + $0x38] sm:$0x1]  ;;  %v430_v40 = vrot.slane %v322_v37, 3 }
  0x2c   : > { %998 = vst [vmem:[#allocation1 + $0x7] ss:$9 sm:$0xff] %v520_v39  ;;  %v596_v39 = vsel %vm473_vm2, %v320_v34, %v428_v36  ;;  %v429_v43 = vrot.slane %v321_v38, 3  ;;  %v668_v34 = vsel %vm477_vm3, %v328_v18, %v436_v26 }
  0x2d   : > { %v598_v45 = vrot.slane %v596_v39, 1  ;;  %v611_v49 = vsel %vm473_vm2, %v322_v37, %v430_v40 }
  0x2e   : > { %v607_v51 = vsel %vm469_vm1, %v321_v38, %v429_v43  ;;  %v670_v38 = vrot.slane %v668_v34, 2 }
  0x33   : > { %v999_v52 = vld [vmem:[#allocation1] sm:$0xff] }
  0x34   : > { %1001 = vst [vmem:[#allocation1] ss:$9 sm:$0xff] %v523_v47 }
  0x35   : > { %7698 = vmatmul.msk.bf16.gmra.mxu0 %vm1262_vm5, %v999_v52  ;;  %1002 = vst [vmem:[#allocation1 + $0x1] ss:$9 sm:$0xff] %v526_v50  ;;  %v614_v50 = vsel %vm477_vm3, %v322_v37, %v430_v40  ;;  %v610_v52 = vsel %vm469_vm1, %v322_v37, %v430_v40 }
  0x36   : > { %1003 = vst [vmem:[#allocation1 + $0x2] ss:$9 sm:$0xff] %v529_v53  ;;  %v613_v53 = vrot.slane %v611_v49, 1 }
  0x37   : > { %1005 = vst [vmem:[#allocation1 + $0x3] ss:$9 sm:$0xff] %v532_v54  ;;  %v616_v54 = vrot.slane %v614_v50, 2 }
  0x38   : > { %1007 = vst [vmem:[#allocation1 + $0x4] ss:$9 sm:$0xff] %v535_v55  ;;  %v323_v55 = vld [vmem:[%s7976_s10 + $0x40] sm:$0xf] }
  0x39   : > { %1009 = vst [vmem:[#allocation1 + $0x5] ss:$9 sm:$0xff] %v538_v57  ;;  %v431_v56 = vrot.slane %v323_v55, 3  ;;  %v325_v57 = vld [vmem:[%s7976_s10 + $0x48] sm:$0xf] }
  0x3a   : > { %1010 = vst [vmem:[#allocation1 + $0x6] ss:$9 sm:$0xff] %v541_v58  ;;  %v617_v58 = vsel %vm481_vm4, %v322_v37, %v430_v40  ;;  %v433_v61 = vrot.slane %v325_v57, 3  ;;  %v330_v37 = vld [vmem:[%s7976_s10 + $0x5c] sm:$0x1] }
  0x3b   : > { %1012 = vst [vmem:[#allocation1 + $0x7] ss:$9 sm:$0xff] %v544_v59  ;;  %v324_v59 = vld [vmem:[%s7976_s10 + $0x44] sm:$0x1]  ;;  %v623_v60 = vsel %vm473_vm2, %v323_v55, %v431_v56  ;;  %v619_v62 = vrot.slane %v617_v58, 3  ;;  %v626_v63 = vsel %vm477_vm3, %v323_v55, %v431_v56  ;;  %v629_v0 = vsel %vm481_vm4, %v323_v55, %v431_v56 }
  0x3c   : > { %v432_v1 = vrot.slane %v324_v59, 3  ;;  %v625_v3 = vrot.slane %v623_v60, 1  ;;  %v628_v5 = vrot.slane %v626_v63, 2  ;;  %v631_v6 = vrot.slane %v629_v0, 3 }
  0x3d   : > { %v637_v9 = vsel %vm469_vm1, %v325_v57, %v433_v61 }
  0x42   : > { %v1013_v7 = vld [vmem:[#allocation1] sm:$0xff] }
  0x43   : > { %1015 = vst [vmem:[#allocation1] ss:$9 sm:$0xff] %v547_v2  ;;  %v622_v2 = vsel %vm469_vm1, %v323_v55, %v431_v56 }
  0x44   : > { %1017 = vst [vmem:[#allocation1 + $0x1] ss:$9 sm:$0xff] %v550_v4 }
  0x45   : > { %7699 = vmatmul.msk.bf16.gmra.mxu0 %vm1262_vm5, %v1013_v7  ;;  %1018 = vst [vmem:[#allocation1 + $0x2] ss:$9 sm:$0xff] %v553_v8  ;;  %v638_v7 = vsel %vm473_vm2, %v325_v57, %v433_v61  ;;  %v634_v8 = vsel %vm469_vm1, %v324_v59, %v432_v1 }
  0x46   : > { %1019 = vst [vmem:[#allocation1 + $0x3] ss:$9 sm:$0xff] %v556_v11  ;;  %v640_v10 = vrot.slane %v638_v7, 1  ;;  %v326_v11 = vld [vmem:[%s7976_s10 + $0x4c] sm:$0xf] }
  0x47   : > { %1021 = vst [vmem:[#allocation1 + $0x4] ss:$9 sm:$0xff] %v559_v12  ;;  %v434_v12 = vrot.slane %v326_v11, 3 }
  0x48   : > { %1023 = vst [vmem:[#allocation1 + $0x5] ss:$9 sm:$0xff] %v562_v13  ;;  %v641_v13 = vsel %vm477_vm3, %v325_v57, %v433_v61 }
  0x49   : > { %1025 = vst [vmem:[#allocation1 + $0x6] ss:$9 sm:$0xff] %v565_v14  ;;  %v644_v14 = vsel %vm481_vm4, %v325_v57, %v433_v61  ;;  %v643_v16 = vrot.slane %v641_v13, 2  ;;  %v650_v17 = vsel %vm473_vm2, %v326_v11, %v434_v12  ;;  %v653_v20 = vsel %vm477_vm3, %v326_v11, %v434_v12 }
  0x4a   : > { %1026 = vst [vmem:[#allocation1 + $0x7] ss:$9 sm:$0xff] %v568_v15  ;;  %v327_v15 = vld [vmem:[%s7976_s10 + $0x50] sm:$0x1]  ;;  %v646_v19 = vrot.slane %v644_v14, 3  ;;  %v656_v21 = vsel %vm481_vm4, %v326_v11, %v434_v12 }
  0x4b   : > { %v435_v22 = vrot.slane %v327_v15, 3  ;;  %v658_v28 = vrot.slane %v656_v21, 3 }
  0x51   : > { %v1027_v27 = vld [vmem:[#allocation1] sm:$0xff] }
  0x52   : > { %1029 = vst [vmem:[#allocation1] ss:$9 sm:$0xff] %v571_v23  ;;  %v649_v23 = vsel %vm469_vm1, %v326_v11, %v434_v12 }
  0x53   : > { %1031 = vst [vmem:[#allocation1 + $0x1] ss:$9 sm:$0xff] %v574_v24  ;;  %v652_v24 = vrot.slane %v650_v17, 1 }
  0x54   : > { %1033 = vst [vmem:[#allocation1 + $0x2] ss:$9 sm:$0xff] %v577_v25 }
  0x55   : > { %7700 = vmatmul.msk.bf16.gmra.mxu0 %vm1262_vm5, %v1027_v27  ;;  %1034 = vst [vmem:[#allocation1 + $0x3] ss:$9 sm:$0xff] %v580_v29  ;;  %v655_v27 = vrot.slane %v653_v20, 2  ;;  %v661_v29 = vsel %vm469_vm1, %v327_v15, %v435_v22 }
  0x56   : > { %1035 = vst [vmem:[#allocation1 + $0x4] ss:$9 sm:$0xff] %v583_v31  ;;  %v329_v31 = vld [vmem:[%s7976_s10 + $0x58] sm:$0xf] }
  0x57   : > { %1037 = vst [vmem:[#allocation1 + $0x5] ss:$9 sm:$0xff] %v586_v32  ;;  %v437_v32 = vrot.slane %v329_v31, 3 }
  0x58   : > { %1039 = vst [vmem:[#allocation1 + $0x6] ss:$9 sm:$0xff] %v589_v33  ;;  %v665_v33 = vsel %vm473_vm2, %v328_v18, %v436_v26 }
  0x59   : > { %1041 = vst [vmem:[#allocation1 + $0x7] ss:$9 sm:$0xff] %v592_v35  ;;  %v671_v35 = vsel %vm481_vm4, %v328_v18, %v436_v26  ;;  %v667_v36 = vrot.slane %v665_v33, 1  ;;  %v677_v39 = vsel %vm473_vm2, %v329_v31, %v437_v32  ;;  %v680_v41 = vsel %vm477_vm3, %v329_v31, %v437_v32  ;;  %v338_v26 = vld [vmem:[%s7976_s10 + $0x7c] sm:$0xf] }
  0x5a   : > { %v673_v40 = vrot.slane %v671_v35, 3  ;;  %v683_v42 = vsel %vm481_vm4, %v329_v31, %v437_v32  ;;  %v339_v35 = vld [vmem:[%s7976_s10 + $0x80] sm:$0x1] }
  0x5b   : > { %v685_v49 = vrot.slane %v683_v42, 3  ;;  %v8118_v42 = vld [vmem:[%s7976_s10 + $0x88] sm:$0xf] }
  0x60   : > { %v1042_v47 = vld [vmem:[#allocation1] sm:$0xff] }
  0x61   : > { %1043 = vst [vmem:[#allocation1] ss:$9 sm:$0xff] %v595_v44  ;;  %v438_v44 = vrot.slane %v330_v37, 3 }
  0x62   : > { %1045 = vst [vmem:[#allocation1 + $0x1] ss:$9 sm:$0xff] %v598_v45  ;;  %v676_v45 = vsel %vm469_vm1, %v329_v31, %v437_v32  ;;  %v340_v32 = vld [vmem:[%s7976_s10 + $0x84] sm:$0xf] }
  0x63   : > { %1047 = vst [vmem:[#allocation1 + $0x2] ss:$9 sm:$0xff] %v601_v46  ;;  %v679_v46 = vrot.slane %v677_v39, 1  ;;  %v688_v50 = vsel %vm469_vm1, %v330_v37, %v438_v44  ;;  %v448_v39 = vrot.slane %v340_v32, 3 }
  0x64   : > { %1049 = vst [vmem:[#allocation1 + $0x3] ss:$9 sm:$0xff] %v604_v48  ;;  %v331_v48 = vld [vmem:[%s7976_s10 + $0x60] sm:$0xf] }
  0x65   : > { %7701 = vmatmul.msk.bf16.gmra.mxu0 %vm1262_vm5, %v1042_v47  ;;  %1050 = vst [vmem:[#allocation1 + $0x4] ss:$9 sm:$0xff] %v607_v51  ;;  %v682_v47 = vrot.slane %v680_v41, 2  ;;  %v439_v51 = vrot.slane %v331_v48, 3 }
  0x66   : > { %1051 = vst [vmem:[#allocation1 + $0x5] ss:$9 sm:$0xff] %v610_v52  ;;  %v332_v52 = vld [vmem:[%s7976_s10 + $0x64] sm:$0xf] }
  0x67   : > { %1053 = vst [vmem:[#allocation1 + $0x6] ss:$9 sm:$0xff] %v613_v53  ;;  %v440_v53 = vrot.slane %v332_v52, 3  ;;  %v695_v55 = vsel %vm477_vm3, %v331_v48, %v439_v51  ;;  %v698_v56 = vsel %vm481_vm4, %v331_v48, %v439_v51  ;;  %v691_v57 = vsel %vm469_vm1, %v331_v48, %v439_v51 }
  0x68   : > { %1055 = vst [vmem:[#allocation1 + $0x7] ss:$9 sm:$0xff] %v616_v54  ;;  %v692_v54 = vsel %vm473_vm2, %v331_v48, %v439_v51  ;;  %v697_v59 = vrot.slane %v695_v55, 2  ;;  %v700_v61 = vrot.slane %v698_v56, 3  ;;  %v8139_v55 = vld [vmem:[%s14361_s3] sm:$0xff] }
  0x69   : > { %v694_v58 = vrot.slane %v692_v54, 1  ;;  %v704_v60 = vsel %vm473_vm2, %v332_v52, %v440_v53  ;;  %v710_v0 = vsel %vm481_vm4, %v332_v52, %v440_v53  ;;  %v703_v1 = vsel %vm469_vm1, %v332_v52, %v440_v53 }
  0x6f   : > { %v1056_v4 = vld [vmem:[#allocation1] sm:$0xff] }
  0x70   : > { %1058 = vst [vmem:[#allocation1] ss:$9 sm:$0xff] %v619_v62  ;;  %v707_v62 = vsel %vm477_vm3, %v332_v52, %v440_v53  ;;  %v8129_v52 = vsel %vm473_vm2, %v340_v32, %v448_v39  ;;  %v8134_v53 = vld [vmem:[%s14360_s2] ss:$0 sm:$0xff] }
  0x71   : > { %1059 = vst [vmem:[#allocation1 + $0x1] ss:$9 sm:$0xff] %v622_v2  ;;  %v706_v2 = vrot.slane %v704_v60, 1  ;;  %v1925_v60 = vperm.slane %v8139_v55, 1 }
  0x72   : > { %1061 = vst [vmem:[#allocation1 + $0x2] ss:$9 sm:$0xff] %v625_v3  ;;  %v709_v3 = vrot.slane %v707_v62, 2  ;;  %v8155_v62 = vsel %vm477_vm3, %v340_v32, %v448_v39 }
  0x73   : > { %1063 = vst [vmem:[#allocation1 + $0x3] ss:$9 sm:$0xff] %v628_v5  ;;  %v712_v5 = vrot.slane %v710_v0, 3 }
  0x74   : > { %1065 = vst [vmem:[#allocation1 + $0x4] ss:$9 sm:$0xff] %v631_v6  ;;  %v333_v6 = vld [vmem:[%s7976_s10 + $0x68] sm:$0x1] }
  0x75   : > { %7702 = vmatmul.msk.bf16.gmra.mxu0 %vm1262_vm5, %v1056_v4  ;;  %1066 = vst [vmem:[#allocation1 + $0x5] ss:$9 sm:$0xff] %v634_v8  ;;  %v334_v4 = vld [vmem:[%s7976_s10 + $0x6c] sm:$0xf]  ;;  %v335_v8 = vld [vmem:[%s7976_s10 + $0x70] sm:$0xf] }
  0x76   : > { %1067 = vst [vmem:[#allocation1 + $0x6] ss:$9 sm:$0xff] %v637_v9  ;;  %v442_v7 = vrot.slane %v334_v4, 3  ;;  %v441_v9 = vrot.slane %v333_v6, 3 }
  0x77   : > { %1069 = vst [vmem:[#allocation1 + $0x7] ss:$9 sm:$0xff] %v640_v10  ;;  %v443_v10 = vrot.slane %v335_v8, 3 }
  0x78   : > { %v719_v11 = vsel %vm473_vm2, %v334_v4, %v442_v7  ;;  %v722_v12 = vsel %vm477_vm3, %v334_v4, %v442_v7  ;;  %v715_v13 = vsel %vm469_vm1, %v333_v6, %v441_v9  ;;  %v725_v14 = vsel %vm481_vm4, %v334_v4, %v442_v7 }
  0x79   : > { %v718_v15 = vsel %vm469_vm1, %v334_v4, %v442_v7  ;;  %v724_v17 = vrot.slane %v722_v12, 2  ;;  %v731_v18 = vsel %vm473_vm2, %v335_v8, %v443_v10  ;;  %v727_v20 = vrot.slane %v725_v14, 3 }
  0x7a   : > { %v734_v21 = vsel %vm477_vm3, %v335_v8, %v443_v10  ;;  %v730_v22 = vsel %vm469_vm1, %v335_v8, %v443_v10  ;;  %v1929_v6 = vrot.slane %v1925_v60, 6  ;;  %v8168_v7 = vrot.slane %v1925_v60, 7 }
  0x7c   : > { %14908 = vst [vmem:[#allocation2_spill] sm:$0xff] %v8168_v7  ;;  %v1936_v14 = vrot.slane %v8168_v7, 2 }
  0x7e   : > { %v1070_v25 = vld [vmem:[#allocation1] sm:$0xff] }
  0x7f   : > { %1072 = vst [vmem:[#allocation1] ss:$9 sm:$0xff] %v643_v16  ;;  %v721_v16 = vrot.slane %v719_v11, 1 }
  0x80   : > { %1074 = vst [vmem:[#allocation1 + $0x1] ss:$9 sm:$0xff] %v646_v19 }
  0x81   : > { %1075 = vst [vmem:[#allocation1 + $0x2] ss:$9 sm:$0xff] %v649_v23  ;;  %v733_v23 = vrot.slane %v731_v18, 1 }
  0x82   : > { %1077 = vst [vmem:[#allocation1 + $0x3] ss:$9 sm:$0xff] %v652_v24  ;;  %v736_v24 = vrot.slane %v734_v21, 2 }
  0x83   : > { %1079 = vst [vmem:[#allocation1 + $0x4] ss:$9 sm:$0xff] %v655_v27  ;;  %v336_v27 = vld [vmem:[%s7976_s10 + $0x74] sm:$0x1] }
  0x84   : > { %1081 = vst [vmem:[#allocation1 + $0x5] ss:$9 sm:$0xff] %v658_v28  ;;  %v444_v31 = vrot.slane %v336_v27, 3 }
  0x85   : > { %1082 = vst [vmem:[#allocation1 + $0x6] ss:$9 sm:$0xff] %v661_v29  ;;  %7703 = vmatmul.msk.bf16.gmra.mxu0 %vm1262_vm5, %v1070_v25  ;;  %v337_v25 = vld [vmem:[%s7976_s10 + $0x78] sm:$0xf]  ;;  %v446_v29 = vrot.slane %v338_v26, 3 }
  0x86   : > { %1083 = vst [vmem:[#allocation1 + $0x7] ss:$9 sm:$0xff] %v664_v30  ;;  %v445_v28 = vrot.slane %v337_v25, 3  ;;  %v737_v30 = vsel %vm481_vm4, %v335_v8, %v443_v10  ;;  %v778_v8 = vrot.slane %v8155_v62, 2 }
  0x87   : > { %v739_v33 = vrot.slane %v737_v30, 3  ;;  %v8121_v44 = vsel %vm477_vm3, %v338_v26, %v446_v29  ;;  %v757_v51 = vsel %vm469_vm1, %v338_v26, %v446_v29  ;;  %v8206_v30 = vperm.slane %v8139_v55, 2 }
  0x88   : > { %v746_v34 = vsel %vm473_vm2, %v337_v25, %v445_v28  ;;  %v752_v37 = vsel %vm481_vm4, %v337_v25, %v445_v28  ;;  %v745_v41 = vsel %vm469_vm1, %v337_v25, %v445_v28 }
  0x89   : > { %14914 = vst [vmem:[#allocation6_spill] sm:$0xff] %v8206_v30 }
  0x8d   : > { %v1084_v43 = vld [vmem:[#allocation1] sm:$0xff] }
  0x8e   : > { %1086 = vst [vmem:[#allocation1] ss:$9 sm:$0xff] %v667_v36  ;;  %v749_v36 = vsel %vm477_vm3, %v337_v25, %v445_v28 }
  0x8f   : > { %1088 = vst [vmem:[#allocation1 + $0x1] ss:$9 sm:$0xff] %v670_v38  ;;  %v758_v38 = vsel %vm473_vm2, %v338_v26, %v446_v29  ;;  %v751_v48 = vrot.slane %v749_v36, 2  ;;  %v8222_v36 = vperm.slane %v8139_v55, 5 }
  0x90   : > { %1090 = vst [vmem:[#allocation1 + $0x2] ss:$9 sm:$0xff] %v673_v40  ;;  %v742_v40 = vsel %vm469_vm1, %v336_v27, %v444_v31 }
  0x91   : > { %1091 = vst [vmem:[#allocation1 + $0x3] ss:$9 sm:$0xff] %v676_v45  ;;  %v8124_v45 = vsel %vm481_vm4, %v338_v26, %v446_v29 }
  0x92   : > { %1093 = vst [vmem:[#allocation1 + $0x4] ss:$9 sm:$0xff] %v679_v46 }
  0x93   : > { %1095 = vst [vmem:[#allocation1 + $0x5] ss:$9 sm:$0xff] %v682_v47  ;;  %v748_v47 = vrot.slane %v746_v34, 1 }
  0x94   : > { %1097 = vst [vmem:[#allocation1 + $0x6] ss:$9 sm:$0xff] %v685_v49  ;;  %v754_v49 = vrot.slane %v752_v37, 3 }
  0x95   : > { %1098 = vst [vmem:[#allocation1 + $0x7] ss:$9 sm:$0xff] %v688_v50  ;;  %7704 = vmatmul.msk.bf16.gmra.mxu0 %vm1262_vm5, %v1084_v43  ;;  %v447_v43 = vrot.slane %v339_v35, 3  ;;  %v760_v50 = vrot.slane %v758_v38, 1 }
  0x96   : > { %14917 = vst [vmem:[#allocation9_spill] sm:$0xff] %v8222_v36 }
  0x9c   : > { %v1099_v63 = vld [vmem:[#allocation1] sm:$0xff] }
  0x9d   : > { %1100 = vst [vmem:[#allocation1] ss:$9 sm:$0xff] %v691_v57  ;;  %v449_v57 = vrot.slane %v8118_v42, 3 }
  0x9e   : > { %1102 = vst [vmem:[#allocation1 + $0x1] ss:$9 sm:$0xff] %v694_v58  ;;  %v763_v58 = vrot.slane %v8121_v44, 2  ;;  %v8250_v44 = vrot.slane %v8206_v30, 4 }
  0x9f   : > { %1104 = vst [vmem:[#allocation1 + $0x2] ss:$9 sm:$0xff] %v697_v59  ;;  %v766_v59 = vrot.slane %v8124_v45, 3  ;;  %v8174_v10 = vsel %vm469_vm1, %v8118_v42, %v449_v57 }
  0xa0   : > { %1106 = vst [vmem:[#allocation1 + $0x3] ss:$9 sm:$0xff] %v700_v61  ;;  %v8152_v61 = vsel %vm469_vm1, %v339_v35, %v447_v43  ;;  %v8219_v35 = vperm.slane %v8139_v55, 3 }
  0xa1   : > { %1107 = vst [vmem:[#allocation1 + $0x4] ss:$9 sm:$0xff] %v703_v1  ;;  %v8162_v1 = vsel %vm469_vm1, %v340_v32, %v448_v39 }
  0xa2   : > { %1109 = vst [vmem:[#allocation1 + $0x5] ss:$9 sm:$0xff] %v706_v2  ;;  %v1318_v54 = vpop.f32.mrf.mxu0  ;;  %v775_v2 = vrot.slane %v8129_v52, 1 }
  0xa3   : > { %1111 = vst [vmem:[#allocation1 + $0x6] ss:$9 sm:$0xff] %v709_v3  ;;  %v1319_v0 = vadd.f32 %v8134_v53, %v1318_v54  ;;  %v1927_v3 = vrot.slane %v1925_v60, 2 }
  0xa4   : > { %1113 = vst [vmem:[#allocation1 + $0x7] ss:$9 sm:$0xff] %v712_v5  ;;  %v1928_v5 = vrot.slane %v1925_v60, 4 }
  0xa5   : > { %7705 = vmatmul.msk.bf16.gmra.mxu0 %vm1262_vm5, %v1099_v63  ;;  %v8158_v63 = vsel %vm481_vm4, %v340_v32, %v448_v39  ;;  %v1422_v4 = vmax.f32 %v1319_v0, 0.0  ;;  %v1937_v11 = vrot.slane %v1927_v3, 7  ;;  %v8210_v32 = vsel %vm481_vm4, %v8118_v42, %v449_v57  ;;  %14916 = vst [vmem:[#allocation8_spill] sm:$0xff] %v8219_v35 }
  0xa6   : > { %v781_v9 = vrot.slane %v8158_v63, 3  ;;  %v8247_v3 = vrot.slane %v8206_v30, 2  ;;  %14923 = vst [vmem:[#allocation15_spill] sm:$0xff] %v8250_v44 }
  0xa7   : > { %v1463_v12 = vmin.f32 %v1422_v4, 6.0  ;;  %v1939_v18 = vrot.slane %v1937_v11, 2  ;;  %v8197_v25 = vsel %vm8176_vm10, %v1936_v14, %v1937_v11  ;;  %v343_v11 = vld [vmem:[%s7976_s10 + $0x90] sm:$0xf] }
  0xa8   : > { %14912 = vst [vmem:[#allocation4_spill] sm:$0xff] %v8197_v25 }
  0xa9   : > { %v1545_v21 = vrot.slane %v1463_v12, 2  ;;  %v1953_v28 = vmul.f32 %v8168_v7, %v1463_v12  ;;  %14922 = vst [vmem:[#allocation14_spill] sm:$0xff] %v8247_v3 }
  0xaa   : > { %v1320_v4 = vpop.f32.mrf.mxu0 }
  0xab   : > { %v1114_v19 = vld [vmem:[#allocation1] sm:$0xff]  ;;  %v1954_v29 = vmul.f32 %v8197_v25, %v1545_v21  ;;  %v7718_v38 = vrot.slane %v1953_v28, 9  ;;  %v8267_v28 = vperm.slane %v8139_v55, 6  ;;  %v1321_v52 = vadd.f32 %v8134_v53, %v1320_v4 }
  0xac   : > { %1115 = vst [vmem:[#allocation1] ss:$9 sm:$0xff] %v715_v13 }
  0xad   : > { %1116 = vst [vmem:[#allocation1 + $0x1] ss:$9 sm:$0xff] %v718_v15  ;;  %v1940_v15 = vrot.slane %v1928_v5, 7  ;;  %v2243_v39 = vrot.slane %v1954_v29, 7 }
  0xae   : > { %1118 = vst [vmem:[#allocation1 + $0x2] ss:$9 sm:$0xff] %v721_v16  ;;  %v8183_v16 = vsel %vm473_vm2, %v8118_v42, %v449_v57 }
  0xaf   : > { %1120 = vst [vmem:[#allocation1 + $0x3] ss:$9 sm:$0xff] %v724_v17  ;;  %v8186_v17 = vperm.slane %v8139_v55, 0  ;;  %v8201_v26 = vsel %vm8176_vm10, %v1939_v18, %v1940_v15  ;;  %v1942_v27 = vrot.slane %v1940_v15, 2 }
  0xb0   : > { %1122 = vst [vmem:[#allocation1 + $0x4] ss:$9 sm:$0xff] %v727_v20  ;;  %v8192_v20 = vsel %vm477_vm3, %v8118_v42, %v449_v57 }
  0xb1   : > { %1123 = vst [vmem:[#allocation1 + $0x5] ss:$9 sm:$0xff] %v730_v22  ;;  %v1546_v22 = vrot.slane %v1463_v12, 4  ;;  %v8229_v42 = vrot.slane %v8186_v17, 4  ;;  %v8238_v54 = vrot.slane %v8186_v17, 6  ;;  %v1797_v56 = vmul.f32 %v8186_v17, %v1463_v12 }
  0xb2   : > { %1125 = vst [vmem:[#allocation1 + $0x6] ss:$9 sm:$0xff] %v733_v23  ;;  %v1547_v23 = vrot.slane %v1463_v12, 6 }
  0xb3   : > { %1127 = vst [vmem:[#allocation1 + $0x7] ss:$9 sm:$0xff] %v736_v24  ;;  %v4920_v24 = vperm.slane %v8139_v55, 7  ;;  %v1955_v34 = vmul.f32 %v8201_v26, %v1546_v22  ;;  %v1799_v12 = vmul.f32 %v8229_v42, %v1546_v22  ;;  %v2906_v29 = vmul.f32 %v8247_v3, %v1546_v22 }
  0xb4   : > { %14911 = vst [vmem:[#allocation3_spill] sm:$0xff] %v8186_v17 }
  0xb5   : > { %7706 = vmatmul.msk.bf16.gmra.mxu0 %vm1262_vm5, %v1114_v19  ;;  %v8188_v19 = vrot.slane %v1929_v6, 7  ;;  %14913 = vst [vmem:[#allocation5_spill] sm:$0xff] %v8201_v26  ;;  %v4923_v31 = vrot.slane %v4920_v24, 4  ;;  %v2246_v43 = vrot.slane %v1955_v34, 7  ;;  %v342_v34 = vld [vmem:[%s7976_s10 + $0x8c] sm:$0x1] }
  0xb6   : > { %14919 = vst [vmem:[#allocation11_spill] sm:$0xff] %v8229_v42 }
  0xb7   : > { %14921 = vst [vmem:[#allocation13_spill] sm:$0xff] %v8238_v54  ;;  %v2248_v57 = vrot.slane %v2246_v43, 2 }
  0xb8   : > { %14924 = vst [vmem:[#allocation16_spill] sm:$0xff] %v8267_v28 }
  0xba   : > { %v1128_v46 = vld [vmem:[#allocation1] sm:$0xff] }
  0xbb   : > { %7707 = vmatmul.msk.bf16.vlgmr.msra.gmra.mxu2 %vm1262_vm5, %v1128_v46  ;;  %1130 = vst [vmem:[#allocation1] ss:$9 sm:$0xff] %v739_v33  ;;  %v8215_v33 = vsel %vm8176_vm10, %v1942_v27, %v8188_v19  ;;  %v4924_v46 = vrot.slane %v4920_v24, 6  ;;  %v2905_v27 = vmul.f32 %v8206_v30, %v1545_v21 }
  0xbc   : > { %1131 = vst [vmem:[#allocation1 + $0x1] ss:$9 sm:$0xff] %v742_v40  ;;  %v1956_v37 = vmul.f32 %v8215_v33, %v1547_v23  ;;  %v4922_v40 = vrot.slane %v4920_v24, 2 }
  0xbd   : > { %1132 = vst [vmem:[#allocation1 + $0x2] ss:$9 sm:$0xff] %v745_v41  ;;  %v8226_v41 = vrot.slane %v8186_v17, 2 }
  0xbe   : > { %1134 = vst [vmem:[#allocation1 + $0x3] ss:$9 sm:$0xff] %v748_v47  ;;  %v2249_v60 = vrot.slane %v1956_v37, 7 }
  0xbf   : > { %1136 = vst [vmem:[#allocation1 + $0x4] ss:$9 sm:$0xff] %v751_v48  ;;  %v2244_v48 = vsel %vm8176_vm10, %v7718_v38, %v2243_v39  ;;  %v1798_v5 = vmul.f32 %v8226_v41, %v1545_v21  ;;  %v451_v38 = vrot.slane %v343_v11, 3 }
  0xc0   : > { %1138 = vst [vmem:[#allocation1 + $0x5] ss:$9 sm:$0xff] %v754_v49  ;;  %v2245_v49 = vrot.slane %v2243_v39, 2  ;;  %v2250_v6 = vsel %vm8176_vm10, %v2248_v57, %v2249_v60  ;;  %v2769_v45 = vadd.f32 %v2244_v48, %v1797_v56  ;;  %v787_v39 = vrot.slane %v8183_v16, 1  ;;  %v1323_v48 = vpop.f32.mrf.mxu0 }
  0xc1   : > { %1139 = vst [vmem:[#allocation1 + $0x6] ss:$9 sm:$0xff] %v757_v51  ;;  %v4930_v51 = vrot.slane %v4923_v31, 7  ;;  %v2907_v31 = vmul.f32 %v8250_v44, %v1547_v23 }
  0xc2   : > { %1141 = vst [vmem:[#allocation1 + $0x7] ss:$9 sm:$0xff] %v760_v50  ;;  %v8233_v50 = vrot.slane %v4920_v24, 7  ;;  %v2247_v0 = vsel %vm8176_vm10, %v2245_v49, %v2246_v43  ;;  %v8277_v37 = vadd.f32 %v2905_v27, %v2769_v45  ;;  %v790_v43 = vrot.slane %v8192_v20, 2  ;;  %v8336_v27 = vld [vmem:[%s7976_s10 + $0x98] sm:$0x1] }
  0xc3   : > { %14915 = vst [vmem:[#allocation7_spill] sm:$0xff] %v8215_v33  ;;  %v4932_v18 = vrot.slane %v4930_v51, 2  ;;  %v2770_v24 = vadd.f32 %v2247_v0, %v1798_v5  ;;  %v800_v49 = vsel %vm473_vm2, %v343_v11, %v451_v38  ;;  %v806_v20 = vsel %vm481_vm4, %v343_v11, %v451_v38 }
  0xc4   : > { %14918 = vst [vmem:[#allocation10_spill] sm:$0xff] %v8226_v41  ;;  %v4926_v14 = vrot.slane %v8233_v50, 2  ;;  %v799_v0 = vsel %vm469_vm1, %v343_v11, %v451_v38  ;;  %v802_v5 = vrot.slane %v800_v49, 1 }
  0xc5   : > { %14920 = vst [vmem:[#allocation12_spill] sm:$0xff] %v8233_v50  ;;  %v8294_v22 = vadd.f32 %v2906_v29, %v2770_v24 }
  0xc9   : > { %v1142_v47 = vld [vmem:[#allocation1] sm:$0xff] }
  0xca   : > { %1144 = vst [vmem:[#allocation1] ss:$9 sm:$0xff] %v763_v58  ;;  %v4927_v58 = vrot.slane %v4922_v40, 7 }
  0xcb   : > { %7708 = vmatmul.msk.bf16.gmra.mxu2 %vm1262_vm5, %v1142_v47  ;;  %1146 = vst [vmem:[#allocation1 + $0x1] ss:$9 sm:$0xff] %v766_v59  ;;  %v4933_v59 = vrot.slane %v4924_v46, 7  ;;  %v793_v46 = vrot.slane %v8210_v32, 3 }
  0xcc   : > { %1147 = vst [vmem:[#allocation1 + $0x2] ss:$9 sm:$0xff] %v8152_v61  ;;  %v4929_v15 = vrot.slane %v4927_v58, 2  ;;  %v8263_v61 = vmul.f32 %v8238_v54, %v1547_v23  ;;  %v8284_v62 = vsel %vm8176_vm10, %v4926_v14, %v4927_v58  ;;  %v450_v23 = vrot.slane %v342_v34, 3 }
  0xcd   : > { %1148 = vst [vmem:[#allocation1 + $0x3] ss:$9 sm:$0xff] %v8162_v1  ;;  %v2771_v1 = vadd.f32 %v2250_v6, %v1799_v12  ;;  %v8279_v21 = vrot.slane %v4933_v59, 2  ;;  %v8292_v63 = vsel %vm8176_vm10, %v4932_v18, %v4933_v59  ;;  %v8328_v12 = vld [vmem:[%s7976_s10 + $0x94] sm:$0xf] }
  0xce   : > { %1150 = vst [vmem:[#allocation1 + $0x4] ss:$9 sm:$0xff] %v775_v2  ;;  %v2251_v2 = vrot.slane %v2249_v60, 2  ;;  %v796_v60 = vsel %vm469_vm1, %v342_v34, %v450_v23  ;;  %v8339_v34 = vrot.slane %v8219_v35, 2  ;;  %v8348_v23 = vrot.slane %v8222_v36, 2 }
  0xcf   : > { %1152 = vst [vmem:[#allocation1 + $0x5] ss:$9 sm:$0xff] %v778_v8  ;;  %v8288_v8 = vsel %vm8176_vm10, %v4929_v15, %v4930_v51  ;;  %v8300_v40 = vadd.f32 %v2907_v31, %v2771_v1  ;;  %v803_v51 = vsel %vm477_vm3, %v343_v11, %v451_v38  ;;  %v808_v15 = vrot.slane %v806_v20, 3 }
  0xd0   : > { %1154 = vst [vmem:[#allocation1 + $0x6] ss:$9 sm:$0xff] %v781_v9  ;;  %v1423_v9 = vmax.f32 %v1321_v52, 0.0  ;;  %v805_v6 = vrot.slane %v803_v51, 2  ;;  %v8333_v11 = vrot.slane %v8206_v30, 6  ;;  %v8342_v38 = vrot.slane %v8219_v35, 4 }
  0xd1   : > { %14925 = vst [vmem:[#allocation17_spill] sm:$0xff] %v8279_v21 }
  0xd2   : > { %1155 = vst [vmem:[#allocation1 + $0x7] ss:$9 sm:$0xff] %v8174_v10  ;;  %v8298_v10 = vrot.slane %v8188_v19, 2  ;;  %v8304_v47 = vmin.f32 %v1423_v9, 6.0  ;;  %v1324_v19 = vadd.f32 %v8134_v53, %v1323_v48  ;;  %v8345_v9 = vperm.slane %v8139_v55, 4 }
  0xd3   : > { %14926 = vst [vmem:[#allocation18_spill] sm:$0xff] %v8284_v62  ;;  %v8351_v48 = vld [vmem:[%s7976_s10 + $0x9c] sm:$0xf]  ;;  %v8361_v55 = vrot.slane %v8328_v12, 3 }
  0xd4   : > { %14927 = vst [vmem:[#allocation19_spill] sm:$0xff] %v8288_v8  ;;  %v8312_v16 = vsel %vm8176_vm10, %v8298_v10, %v8168_v7  ;;  %v1548_v32 = vrot.slane %v8304_v47, 2  ;;  %v1549_v56 = vrot.slane %v8304_v47, 4  ;;  %v8319_v57 = vrot.slane %v8304_v47, 6  ;;  %v1325_v8 = vpop.f32.mrf.mxu0 }
  0xd5   : > { %14928 = vst [vmem:[#allocation20_spill] sm:$0xff] %v8292_v63  ;;  %v1957_v58 = vmul.f32 %v8312_v16, %v8304_v47  ;;  %v1424_v4 = vmax.f32 %v1324_v19, 0.0 }
  0xd6   : > { %14929 = vst [vmem:[#allocation21_spill] sm:$0xff] %v8298_v10  ;;  %v1958_v45 = vmul.f32 %v8197_v25, %v1548_v32  ;;  %v1959_v59 = vmul.f32 %v8201_v26, %v1549_v56  ;;  %v1960_v18 = vmul.f32 %v8215_v33, %v8319_v57 }
  0xd7   : > { %14930 = vst [vmem:[#allocation22_spill] sm:$0xff] %v8312_v16  ;;  %v2252_v24 = vrot.slane %v1957_v58, 7  ;;  %v1465_v31 = vmin.f32 %v1424_v4, 6.0 }
  0xd8   : > { %14931 = vst [vmem:[#allocation23_spill] sm:$0xff] %v8333_v11  ;;  %v2255_v1 = vrot.slane %v1958_v45, 7  ;;  %v2258_v29 = vrot.slane %v1959_v59, 7  ;;  %v2261_v19 = vrot.slane %v1960_v18, 7  ;;  %v1803_v18 = vmul.f32 %v8229_v42, %v1549_v56 }
  0xd9   : > { %v1156_v14 = vld [vmem:[#allocation1] sm:$0xff]  ;;  %14932 = vst [vmem:[#allocation24_spill] sm:$0xff] %v8339_v34  ;;  %v2254_v52 = vrot.slane %v2252_v24, 2  ;;  %v8356_v51 = vrot.slane %v1465_v31, 2  ;;  %v8358_v20 = vrot.slane %v1465_v31, 4  ;;  %v8370_v45 = vrot.slane %v1465_v31, 6 }
  0xda   : > { %1158 = vst [vmem:[#allocation1] ss:$9 sm:$0xff] %v787_v39  ;;  %v2253_v39 = vsel %vm8176_vm10, %v2251_v2, %v2252_v24  ;;  %v2257_v49 = vrot.slane %v2255_v1, 2 }
  0xdb   : > { %1160 = vst [vmem:[#allocation1 + $0x1] ss:$9 sm:$0xff] %v790_v43  ;;  %7709 = vmatmul.msk.bf16.gmra.mxu2 %vm1262_vm5, %v1156_v14  ;;  %v2260_v43 = vrot.slane %v2258_v29, 2  ;;  %v2256_v2 = vsel %vm8176_vm10, %v2254_v52, %v2255_v1  ;;  %v2772_v14 = vadd.f32 %v2253_v39, %v8263_v61  ;;  %v1962_v24 = vmul.f32 %v8168_v7, %v8356_v51 }
  0xdc   : > { %14933 = vst [vmem:[#allocation25_spill] sm:$0xff] %v8342_v38  ;;  %v2259_v4 = vsel %vm8176_vm10, %v2257_v49, %v2258_v29  ;;  %v1963_v1 = vmul.f32 %v8197_v25, %v8358_v20  ;;  %v2908_v61 = vmul.f32 %v8333_v11, %v8304_v47  ;;  %v3427_v39 = vrot.slane %v8345_v9, 2 }
  0xdd   : > { %14934 = vst [vmem:[#allocation26_spill] sm:$0xff] %v8348_v23  ;;  %v2262_v59 = vsel %vm8176_vm10, %v2260_v43, %v2261_v19  ;;  %v2909_v49 = vmul.f32 %v8206_v30, %v1548_v32  ;;  %v2910_v43 = vmul.f32 %v8247_v3, %v1549_v56  ;;  %v1964_v58 = vmul.f32 %v8201_v26, %v8370_v45 }
  0xde   : > { %1162 = vst [vmem:[#allocation1 + $0x2] ss:$9 sm:$0xff] %v793_v46  ;;  %v1801_v46 = vmul.f32 %v8186_v17, %v8304_v47  ;;  %v2911_v7 = vmul.f32 %v8250_v44, %v8319_v57  ;;  %v8394_v63 = vadd.f32 %v2908_v61, %v2772_v14  ;;  %v1805_v47 = vmul.f32 %v8186_v17, %v8356_v51 }
  0xdf   : > { %1163 = vst [vmem:[#allocation1 + $0x3] ss:$9 sm:$0xff] %v796_v60  ;;  %v1802_v60 = vmul.f32 %v8226_v41, %v1548_v32  ;;  %v1806_v32 = vmul.f32 %v8226_v41, %v8358_v20  ;;  %v2268_v56 = vrot.slane %v1963_v1, 7  ;;  %v2263_v14 = vrot.slane %v2261_v19, 2 }
  0xe0   : > { %1164 = vst [vmem:[#allocation1 + $0x4] ss:$9 sm:$0xff] %v799_v0  ;;  %v1961_v0 = vmul.f32 %v8298_v10, %v1465_v31  ;;  %v2773_v29 = vadd.f32 %v2256_v2, %v1801_v46  ;;  %v7719_v2 = vrot.slane %v1962_v24, 9  ;;  %v3428_v61 = vrot.slane %v8345_v9, 4 }
  0xe1   : > { %1166 = vst [vmem:[#allocation1 + $0x5] ss:$9 sm:$0xff] %v802_v5  ;;  %v8383_v5 = vrot.slane %v8351_v48, 3  ;;  %v2774_v52 = vadd.f32 %v2259_v4, %v1802_v60  ;;  %v2913_v1 = vmul.f32 %v8206_v30, %v8358_v20 }
  0xe2   : > { %1168 = vst [vmem:[#allocation1 + $0x6] ss:$9 sm:$0xff] %v805_v6  ;;  %v2775_v6 = vadd.f32 %v2262_v59, %v1803_v18  ;;  %v2264_v46 = vrot.slane %v1961_v0, 7  ;;  %v8402_v4 = vadd.f32 %v2909_v49, %v2773_v29  ;;  %v8408_v59 = vmul.f32 %v8229_v42, %v8370_v45 }
  0xe3   : > { %1170 = vst [vmem:[#allocation1 + $0x7] ss:$9 sm:$0xff] %v808_v15  ;;  %v1804_v15 = vmul.f32 %v8238_v54, %v8319_v57  ;;  %v8404_v60 = vadd.f32 %v2910_v43, %v2774_v52  ;;  %v2271_v57 = vrot.slane %v1964_v58, 7  ;;  %v2912_v0 = vmul.f32 %v8333_v11, %v1465_v31 }
  0xe4   : > { %v8410_v18 = vadd.f32 %v2911_v7, %v2775_v6  ;;  %v2265_v24 = vsel %vm8176_vm10, %v2263_v14, %v2264_v46  ;;  %v2914_v29 = vmul.f32 %v8247_v3, %v8370_v45  ;;  %v3169_v52 = vmul.f32 %v8219_v35, %v8356_v51 }
  0xe5   : > { %14935 = vst [vmem:[#allocation27_spill] sm:$0xff] %v8404_v60  ;;  %v2269_v7 = vsel %vm8176_vm10, %v7719_v2, %v2268_v56  ;;  %v8425_v31 = vrot.slane %v8345_v9, 7  ;;  %v3432_v58 = vrot.slane %v3427_v39, 7  ;;  %v3435_v6 = vrot.slane %v3428_v61, 7 }
  0xe6   : > { %14936 = vst [vmem:[#allocation28_spill] sm:$0xff] %v8410_v18  ;;  %v2270_v49 = vrot.slane %v2268_v56, 2  ;;  %v3170_v43 = vmul.f32 %v8339_v34, %v8358_v20  ;;  %v3429_v46 = vrot.slane %v8345_v9, 6  ;;  %v811_v14 = vsel %vm469_vm1, %v8328_v12, %v8361_v55 }
  0xe7   : > { %14937 = vst [vmem:[#allocation29_spill] sm:$0xff] %v8425_v31  ;;  %v8433_v21 = vrot.slane %v2271_v57, 2  ;;  %v2776_v62 = vadd.f32 %v2265_v24, %v1804_v15  ;;  %v3431_v2 = vrot.slane %v8425_v31, 2  ;;  %v3434_v18 = vrot.slane %v3432_v58, 2 }
  0xe8   : > { %v3448_v39 = vmul.f32 %v8425_v31, %v8356_v51  ;;  %v812_v56 = vsel %vm473_vm2, %v8328_v12, %v8361_v55  ;;  %v815_v9 = vsel %vm477_vm3, %v8328_v12, %v8361_v55  ;;  %v818_v61 = vsel %vm481_vm4, %v8328_v12, %v8361_v55 }
  0xe9   : > { %v2777_v15 = vadd.f32 %v2269_v7, %v1805_v47  ;;  %v3171_v24 = vmul.f32 %v8342_v38, %v8370_v45  ;;  %v8452_v51 = vsel %vm8176_vm10, %v3431_v2, %v3432_v58  ;;  %v2272_v50 = vsel %vm8176_vm10, %v2270_v49, %v2271_v57 }
  0xea   : > { %v1171_v19 = vld [vmem:[#allocation1] sm:$0xff]  ;;  %14938 = vst [vmem:[#allocation30_spill] sm:$0xff] %v8452_v51  ;;  %v3438_v60 = vrot.slane %v3429_v46, 7  ;;  %v3449_v12 = vmul.f32 %v8452_v51, %v8358_v20  ;;  %v814_v55 = vrot.slane %v812_v56, 1  ;;  %v817_v7 = vrot.slane %v815_v9, 2 }
  0xeb   : > { %1172 = vst [vmem:[#allocation1] ss:$9 sm:$0xff] %v811_v14  ;;  %7710 = vmatmul.msk.bf16.gmra.mxu2 %vm1262_vm5, %v1171_v19  ;;  %v8456_v14 = vsel %vm8176_vm10, %v3434_v18, %v3435_v6  ;;  %v7734_v19 = vrot.slane %v3448_v39, 9  ;;  %v820_v28 = vrot.slane %v818_v61, 3  ;;  %v14940_v2 = vrot.slane %v8336_v27, 3 }
  0xec   : > { %14939 = vst [vmem:[#allocation31_spill] sm:$0xff] %v8456_v14  ;;  %v3450_v47 = vmul.f32 %v8456_v14, %v8370_v45  ;;  %v3738_v58 = vrot.slane %v3449_v12, 7  ;;  %v827_v57 = vsel %vm473_vm2, %v8351_v48, %v8383_v5  ;;  %v830_v49 = vsel %vm477_vm3, %v8351_v48, %v8383_v5 }
  0xed   : > { %v823_v18 = vsel %vm469_vm1, %v8336_v27, %v14940_v2  ;;  %1174 = vst [vmem:[#allocation1 + $0x1] ss:$9 sm:$0xff] %v814_v55  ;;  %v2778_v46 = vadd.f32 %v2272_v50, %v1806_v32  ;;  %v826_v39 = vsel %vm469_vm1, %v8351_v48, %v8383_v5  ;;  %v829_v56 = vrot.slane %v827_v57, 1 }
  0xee   : > { %1176 = vst [vmem:[#allocation1 + $0x2] ss:$9 sm:$0xff] %v817_v7  ;;  %v1326_v9 = vadd.f32 %v8134_v53, %v1325_v8  ;;  %v3297_v27 = vadd.f32 %v3169_v52, %v8277_v37  ;;  %v3437_v61 = vrot.slane %v3435_v6, 2  ;;  %v3740_v12 = vrot.slane %v3738_v58, 2 }
  0xef   : > { %v832_v2 = vrot.slane %v830_v49, 2  ;;  %1178 = vst [vmem:[#allocation1 + $0x3] ss:$9 sm:$0xff] %v820_v28  ;;  %v3298_v38 = vadd.f32 %v3170_v43, %v8294_v22  ;;  %v3739_v50 = vsel %vm8176_vm10, %v7734_v19, %v3738_v58  ;;  %v3741_v32 = vrot.slane %v3450_v47, 7  ;;  %v1328_v28 = vpop.f32.mrf.mxu0  ;;  %v8522_v19 = vld [vmem:[%s7976_s10 + $0xa8] sm:$0xf] }
  0xf0   : > { %1179 = vst [vmem:[#allocation1 + $0x4] ss:$9 sm:$0xff] %v823_v18  ;;  %v1425_v55 = vmax.f32 %v1326_v9, 0.0  ;;  %v8482_v14 = vadd.f32 %v2912_v0, %v2776_v62  ;;  %v8484_v7 = vadd.f32 %v2913_v1, %v2777_v15  ;;  %v8487_v37 = vadd.f32 %v3171_v24, %v8300_v40  ;;  %v8500_v1 = vld [vmem:[%s7976_s10 + $0xa0] sm:$0xf] }
  0xf1   : > { %v8489_v8 = vrot.slane %v3438_v60, 2  ;;  %1180 = vst [vmem:[#allocation1 + $0x5] ss:$9 sm:$0xff] %v826_v39  ;;  %v8491_v22 = vadd.f32 %v2914_v29, %v2778_v46  ;;  %v3742_v52 = vsel %vm8176_vm10, %v3740_v12, %v3741_v32  ;;  %v4400_v62 = vmul.f32 %v8222_v36, %v8358_v20  ;;  %v8512_v15 = vld [vmem:[%s7976_s10 + $0xa4] sm:$0x1] }
  0xf2   : > { %1182 = vst [vmem:[#allocation1 + $0x6] ss:$9 sm:$0xff] %v829_v56  ;;  %v8497_v0 = vmin.f32 %v1425_v55, 6.0  ;;  %v8504_v40 = vsel %vm8176_vm10, %v3437_v61, %v3438_v60  ;;  %v4264_v6 = vadd.f32 %v3739_v50, %v3297_v27  ;;  %v4401_v29 = vmul.f32 %v8348_v23, %v8370_v45 }
  0xf3   : > { %14941 = vst [vmem:[#allocation32_spill] sm:$0xff] %v8489_v8  ;;  %v8509_v43 = vrot.slane %v8219_v35, 6  ;;  %v3743_v20 = vrot.slane %v3741_v32, 2  ;;  %v1329_v60 = vadd.f32 %v8134_v53, %v1328_v28  ;;  %v4265_v58 = vadd.f32 %v3742_v52, %v3298_v38 }
  0xf4   : > { %14942 = vst [vmem:[#allocation33_spill] sm:$0xff] %v8491_v22  ;;  %v8515_v24 = vrot.slane %v8497_v0, 2  ;;  %v8518_v47 = vrot.slane %v8497_v0, 4  ;;  %v1965_v45 = vmul.f32 %v8215_v33, %v8497_v0  ;;  %v8530_v18 = vsel %vm8176_vm10, %v8489_v8, %v8425_v31 }
  0xf5   : > { %14943 = vst [vmem:[#allocation34_spill] sm:$0xff] %v8504_v40  ;;  %v8533_v57 = vrot.slane %v8500_v1, 3  ;;  %v8538_v46 = vrot.slane %v8222_v36, 4  ;;  %v8541_v38 = vrot.slane %v8222_v36, 6  ;;  %v8544_v56 = vadd.f32 %v4400_v62, %v4264_v6 }
  0xf6   : > { %1184 = vst [vmem:[#allocation1 + $0x7] ss:$9 sm:$0xff] %v832_v2  ;;  %v1966_v49 = vmul.f32 %v8312_v16, %v8515_v24  ;;  %v8548_v9 = vmul.f32 %v8197_v25, %v8518_v47  ;;  %v2274_v27 = vrot.slane %v1965_v45, 7  ;;  %v8551_v61 = vrot.slane %v8522_v19, 3 }
  0xf7   : > { %14944 = vst [vmem:[#allocation35_spill] sm:$0xff] %v8509_v43  ;;  %v1426_v2 = vmax.f32 %v1329_v60, 0.0  ;;  %v8556_v50 = vsel %vm481_vm4, %v8351_v48, %v8383_v5  ;;  %v838_v32 = vsel %vm469_vm1, %v8500_v1, %v8533_v57  ;;  %v8561_v55 = vadd.f32 %v4401_v29, %v4265_v58 }
  0xf8   : > { %14945 = vst [vmem:[#allocation36_spill] sm:$0xff] %v8522_v19  ;;  %v2277_v12 = vrot.slane %v1966_v49, 7  ;;  %v2276_v28 = vrot.slane %v2274_v27, 2  ;;  %v3451_v52 = vmul.f32 %v8504_v40, %v8497_v0  ;;  %v8568_v62 = vsel %vm473_vm2, %v8500_v1, %v8533_v57 }
  0xf9   : > { %14946 = vst [vmem:[#allocation37_spill] sm:$0xff] %v8530_v18  ;;  %v8571_v60 = vrot.slane %v8497_v0, 6  ;;  %v2275_v48 = vsel %vm8176_vm10, %v8433_v21, %v2274_v27  ;;  %v3452_v29 = vmul.f32 %v8530_v18, %v8515_v24  ;;  %v1808_v58 = vmul.f32 %v8238_v54, %v8497_v0 }
  0xfa   : > { %14947 = vst [vmem:[#allocation38_spill] sm:$0xff] %v8538_v46  ;;  %v2279_v5 = vrot.slane %v2277_v12, 2  ;;  %v2278_v45 = vsel %vm8176_vm10, %v2276_v28, %v2277_v12  ;;  %v2280_v49 = vrot.slane %v8548_v9, 7  ;;  %v3744_v39 = vrot.slane %v3451_v52, 7 }
  0xfb   : > { %14948 = vst [vmem:[#allocation39_spill] sm:$0xff] %v8541_v38  ;;  %v1809_v16 = vmul.f32 %v8186_v17, %v8515_v24  ;;  %v2915_v21 = vmul.f32 %v8250_v44, %v8497_v0  ;;  %v3172_v27 = vmul.f32 %v8509_v43, %v8497_v0  ;;  %v8592_v25 = vmul.f32 %v8226_v41, %v8518_v47 }
  0xfc   : > { %14949 = vst [vmem:[#allocation40_spill] sm:$0xff] %v8551_v61  ;;  %v2281_v12 = vsel %vm8176_vm10, %v2279_v5, %v2280_v49  ;;  %v2779_v9 = vadd.f32 %v2275_v48, %v8408_v59  ;;  %v2780_v28 = vadd.f32 %v2278_v45, %v1808_v58  ;;  %v2916_v52 = vmul.f32 %v8333_v11, %v8515_v24 }
  0xfd   : > { %14950 = vst [vmem:[#allocation41_spill] sm:$0xff] %v8561_v55  ;;  %v1185_v6 = vld [vmem:[#allocation1] sm:$0xff]  ;;  %v2917_v17 = vmul.f32 %v8206_v30, %v8518_v47  ;;  %v8607_v41 = vmul.f32 %v8247_v3, %v8571_v60  ;;  %v8611_v59 = vmul.f32 %v8339_v34, %v8518_v47  ;;  %v3745_v48 = vsel %vm8176_vm10, %v3743_v20, %v3744_v39 }
  0xfe   : > { %7711 = vmatmul.msk.bf16.gmra.mxu2 %vm1262_vm5, %v1185_v6  ;;  %1188 = vst [vmem:[#allocation1 + $0x1] ss:$9 sm:$0xff] %v838_v32  ;;  %v3747_v6 = vrot.slane %v3452_v29, 7  ;;  %v3173_v32 = vmul.f32 %v8219_v35, %v8515_v24  ;;  %v3453_v29 = vmul.f32 %v8452_v51, %v8518_v47  ;;  %v3746_v5 = vrot.slane %v3744_v39, 2 }
  0xff   : > { %14951 = vst [vmem:[#allocation42_spill] sm:$0xff] %v8607_v41  ;;  %v2781_v58 = vadd.f32 %v2281_v12, %v1809_v16  ;;  %v3300_v45 = vadd.f32 %v3172_v27, %v8394_v63  ;;  %v8616_v30 = vmin.f32 %v1426_v2, 6.0  ;;  %v8618_v18 = vadd.f32 %v2915_v21, %v2779_v9 }
 0x100   : > { %v3749_v55 = vrot.slane %v3747_v6, 2  ;;  %v3301_v22 = vadd.f32 %v3173_v32, %v8402_v4  ;;  %v4402_v3 = vmul.f32 %v8538_v46, %v8497_v0  ;;  %v1968_v34 = vmul.f32 %v8201_v26, %v8571_v60 }
 0x101   : > { %v8625_v41 = vadd.f32 %v2916_v52, %v2780_v28  ;;  %v3750_v20 = vrot.slane %v3453_v29, 7  ;;  %v4266_v16 = vadd.f32 %v3745_v48, %v8487_v37  ;;  %v8629_v63 = vrot.slane %v8616_v30, 2 }
 0x102   : > { %v3748_v39 = vsel %vm8176_vm10, %v3746_v5, %v3747_v6  ;;  %v4403_v4 = vmul.f32 %v8541_v38, %v8515_v24  ;;  %v1969_v0 = vmul.f32 %v8215_v33, %v8616_v30  ;;  %v2283_v2 = vrot.slane %v1968_v34, 7 }
 0x103   : > { %v8637_v21 = vadd.f32 %v2917_v17, %v2781_v58  ;;  %v3751_v27 = vsel %vm8176_vm10, %v3749_v55, %v3750_v20  ;;  %v4404_v37 = vmul.f32 %v8222_v36, %v8518_v47  ;;  %v1970_v12 = vmul.f32 %v8298_v10, %v8629_v63 }
 0x104   : > { %v8647_v6 = vmul.f32 %v8348_v23, %v8571_v60  ;;  %v8650_v24 = vrot.slane %v8616_v30, 4  ;;  %v2285_v9 = vrot.slane %v2283_v2, 2  ;;  %v2286_v34 = vrot.slane %v1969_v0, 7 }
 0x105   : > { %14952 = vst [vmem:[#allocation43_spill] sm:$0xff] %v8637_v21  ;;  %v4267_v17 = vadd.f32 %v3748_v39, %v3300_v45  ;;  %v8653_v32 = vrot.slane %v8616_v30, 6  ;;  %v1811_v55 = vmul.f32 %v8229_v42, %v8571_v60  ;;  %v2289_v47 = vrot.slane %v1970_v12, 7  ;;  %v14955_v39 = vld [vmem:[#allocation31_spill] sm:$0xff] }
 0x106   : > { %14953 = vst [vmem:[#allocation44_spill] sm:$0xff] %v8650_v24  ;;  %v4268_v28 = vadd.f32 %v3751_v27, %v3301_v22  ;;  %v2282_v52 = vrot.slane %v2280_v49, 2  ;;  %v2287_v29 = vsel %vm8176_vm10, %v2285_v9, %v2286_v34  ;;  %v2288_v48 = vrot.slane %v2286_v34, 2 }
 0x107   : > { %14954 = vst [vmem:[#allocation45_spill] sm:$0xff] %v8653_v32  ;;  %v1812_v5 = vmul.f32 %v8238_v54, %v8616_v30  ;;  %v2783_v58 = vadd.f32 %v2287_v29, %v1811_v55  ;;  %v2919_v45 = vmul.f32 %v8250_v44, %v8616_v30  ;;  %v3454_v0 = vmul.f32 %v14955_v39, %v8571_v60 }
 0x108   : > { %v2290_v10 = vsel %vm8176_vm10, %v2288_v48, %v2289_v47  ;;  %v2920_v22 = vmul.f32 %v8333_v11, %v8629_v63  ;;  %v3455_v49 = vmul.f32 %v8504_v40, %v8616_v30  ;;  %v3457_v27 = vmul.f32 %v8425_v31, %v8650_v24  ;;  %v14956_v47 = vld [vmem:[#allocation25_spill] sm:$0xff] }
 0x109   : > { %v2784_v12 = vadd.f32 %v2290_v10, %v1812_v5  ;;  %v8673_v9 = vadd.f32 %v2919_v45, %v2783_v58  ;;  %v3458_v34 = vmul.f32 %v8452_v51, %v8653_v32  ;;  %v3752_v55 = vrot.slane %v3750_v20, 2 }
 0x10a   : > { %v2284_v29 = vsel %vm8176_vm10, %v2282_v52, %v2283_v2  ;;  %v3175_v48 = vmul.f32 %v14956_v47, %v8571_v60  ;;  %v3456_v11 = vmul.f32 %v8489_v8, %v8629_v63  ;;  %v3756_v44 = vrot.slane %v3455_v49, 7  ;;  %v14958_v49 = vld [vmem:[#allocation16_spill] sm:$0xff] }
 0x10b   : > { %v8683_v54 = vadd.f32 %v2920_v22, %v2784_v12  ;;  %v3176_v10 = vmul.f32 %v8509_v43, %v8616_v30  ;;  %v3177_v5 = vmul.f32 %v8219_v35, %v8650_v24  ;;  %v3753_v58 = vrot.slane %v3454_v0, 7 }
 0x10c   : > { %v8689_v20 = vadd.f32 %v4402_v3, %v4266_v16  ;;  %v8691_v45 = vadd.f32 %v4403_v4, %v4267_v17  ;;  %v7735_v2 = vrot.slane %v3457_v27, 9  ;;  %v3763_v52 = vrot.slane %v3458_v34, 7  ;;  %v14960_v16 = vld [vmem:[#allocation12_spill] sm:$0xff] }
 0x10d   : > { %14957 = vst [vmem:[#allocation46_spill] sm:$0xff] %v8683_v54  ;;  %v8693_v60 = vadd.f32 %v4404_v37, %v4268_v28  ;;  %v2782_v8 = vadd.f32 %v2284_v29, %v8592_v25  ;;  %v3754_v22 = vsel %vm8176_vm10, %v3752_v55, %v3753_v58  ;;  %v4664_v12 = vmul.f32 %v14958_v49, %v8650_v24  ;;  %v14959_v54 = vld [vmem:[#allocation27_spill] sm:$0xff]  ;;  %v14961_v17 = vld [vmem:[#allocation28_spill] sm:$0xff]  ;;  %v14962_v29 = vld [vmem:[#allocation18_spill] sm:$0xff] }
 0x10e   : > { %v3302_v31 = vadd.f32 %v8611_v59, %v14959_v54  ;;  %v3758_v0 = vrot.slane %v3756_v44, 2  ;;  %v3759_v3 = vrot.slane %v3456_v11, 7  ;;  %v4943_v4 = vmul.f32 %v14960_v16, %v8650_v24 }
 0x10f   : > { %v3303_v27 = vadd.f32 %v3175_v48, %v14961_v17  ;;  %v3304_v37 = vadd.f32 %v3176_v10, %v8482_v14  ;;  %v3305_v25 = vadd.f32 %v3177_v5, %v8484_v7  ;;  %v3755_v28 = vrot.slane %v3753_v58, 2  ;;  %v1330_v10 = vpop.f32.mrf.mxu0 }
 0x110   : > { %v3764_v34 = vsel %vm8176_vm10, %v7735_v2, %v3763_v52  ;;  %v4269_v55 = vadd.f32 %v3754_v22, %v3302_v31  ;;  %v4944_v21 = vmul.f32 %v14962_v29, %v8653_v32  ;;  %v7750_v54 = vrot.slane %v4943_v4, 9  ;;  %v8721_v31 = vld [vmem:[%s14361_s3 + $0x8] ss:$0 sm:$0xff] }
 0x111   : > { %v3757_v11 = vsel %vm8176_vm10, %v3755_v28, %v3756_v44  ;;  %v4792_v59 = vadd.f32 %v4664_v12, %v8544_v56  ;;  %v835_v48 = vrot.slane %v8556_v50, 3  ;;  %v841_v14 = vrot.slane %v8568_v62, 1  ;;  %14963 = vst [vmem:[#allocation27_spill] sm:$0xff] %v8721_v31 }
 0x112   : > { %v3760_v7 = vsel %vm8176_vm10, %v3758_v0, %v3759_v3  ;;  %v5233_v5 = vrot.slane %v4944_v21, 7  ;;  %v842_v44 = vsel %vm477_vm3, %v8500_v1, %v8533_v57  ;;  %v845_v56 = vsel %vm481_vm4, %v8500_v1, %v8533_v57 }
 0x113   : > { %v4272_v50 = vadd.f32 %v3764_v34, %v3305_v25  ;;  %v844_v62 = vrot.slane %v842_v44, 2  ;;  %v847_v58 = vrot.slane %v845_v56, 3  ;;  %v854_v21 = vsel %vm473_vm2, %v8522_v19, %v8551_v61  ;;  %1187 = vst [vmem:[#allocation1] ss:$9 sm:$0xff] %v835_v48 }
 0x114   : > { %v4270_v2 = vadd.f32 %v3757_v11, %v3303_v27  ;;  %v5234_v22 = vsel %vm8176_vm10, %v7750_v54, %v5233_v5  ;;  %v14964_v12 = vrot.slane %v8512_v15, 3  ;;  %1190 = vst [vmem:[#allocation1 + $0x2] ss:$9 sm:$0xff] %v841_v14  ;;  %v1331_v1 = vadd.f32 %v8134_v53, %v1330_v10  ;;  %v14965_v27 = vld [vmem:[#allocation42_spill] sm:$0xff]  ;;  %v8762_v14 = vld [vmem:[%s14362_s4] ss:$0 sm:$0xff] }
 0x115   : > { %v4271_v57 = vadd.f32 %v3760_v7, %v3304_v37  ;;  %v5759_v3 = vadd.f32 %v5234_v22, %v4792_v59  ;;  %v853_v4 = vsel %vm469_vm1, %v8522_v19, %v8551_v61  ;;  %v856_v17 = vrot.slane %v854_v21, 1  ;;  %1192 = vst [vmem:[#allocation1 + $0x3] ss:$9 sm:$0xff] %v844_v62 }
 0x116   : > { %v850_v0 = vsel %vm469_vm1, %v8512_v15, %v14964_v12  ;;  %v8743_v25 = vadd.f32 %v14965_v27, %v2782_v8  ;;  %v5895_v28 = vmul.f32 %v8721_v31, %v8653_v32  ;;  %1194 = vst [vmem:[#allocation1 + $0x4] ss:$9 sm:$0xff] %v847_v58  ;;  %v1427_v34 = vmax.f32 %v1331_v1, 0.0 }
 0x117   : > { %v8748_v15 = vrot.slane %v14958_v49, 2  ;;  %v3765_v54 = vrot.slane %v3763_v52, 2  ;;  %v4406_v37 = vmul.f32 %v8538_v46, %v8616_v30  ;;  %v4407_v11 = vmul.f32 %v8541_v38, %v8629_v63  ;;  %1195 = vst [vmem:[#allocation1 + $0x5] ss:$9 sm:$0xff] %v850_v0  ;;  %v14968_v30 = vld [vmem:[#allocation24_spill] sm:$0xff]  ;;  %v14976_v0 = vld [vmem:[#allocation33_spill] sm:$0xff] }
 0x118   : > { %v4408_v59 = vmul.f32 %v8222_v36, %v8653_v32  ;;  %v8757_v8 = vadd.f32 %v8647_v6, %v4269_v55  ;;  %v6023_v48 = vadd.f32 %v5895_v28, %v5759_v3  ;;  %14967 = vst [vmem:[#allocation42_spill] sm:$0xff] %v8762_v14  ;;  %v8764_v52 = vmin.f32 %v1427_v34, 6.0 }
 0x119   : > { %14966 = vst [vmem:[#allocation28_spill] sm:$0xff] %v8748_v15  ;;  %v3178_v10 = vmul.f32 %v14968_v30, %v8653_v32  ;;  %v8768_v63 = vadd.f32 %v4406_v37, %v4270_v2  ;;  %v8770_v7 = vadd.f32 %v4407_v11, %v4271_v57  ;;  %v5235_v6 = vrot.slane %v5233_v5, 2  ;;  %v14973_v5 = vld [vmem:[#allocation17_spill] sm:$0xff] }
 0x11a   : > { %1196 = vst [vmem:[#allocation1 + $0x6] ss:$9 sm:$0xff] %v853_v4  ;;  %v8772_v44 = vadd.f32 %v4408_v59, %v4272_v50  ;;  %v8775_v55 = vrot.slane %v8764_v52, 2  ;;  %v8778_v56 = vrot.slane %v8764_v52, 4  ;;  %v8781_v62 = vrot.slane %v14958_v49, 4  ;;  %v1333_v4 = vpop.f32.mrf.mxu0  ;;  %v14981_v37 = vld [vmem:[#allocation37_spill] sm:$0xff] }
 0x11b   : > { %14969 = vst [vmem:[#allocation47_spill] sm:$0xff] %v8770_v7  ;;  %v4665_v58 = vmul.f32 %v8748_v15, %v8653_v32  ;;  %v3459_v21 = vmul.f32 %v14955_v39, %v8764_v52  ;;  %v8788_v50 = vrot.slane %v14958_v49, 6  ;;  %v8794_v2 = vsel %vm8176_vm10, %v14973_v5, %v14960_v16  ;;  %v14986_v16 = vld [vmem:[#allocation19_spill] sm:$0xff] }
 0x11c   : > { %14970 = vst [vmem:[#allocation48_spill] sm:$0xff] %v8772_v44  ;;  %v8797_v22 = vrot.slane %v8721_v31, 2  ;;  %v6161_v12 = vadd.f32 %v8762_v14, %v6023_v48  ;;  %v3306_v1 = vadd.f32 %v3178_v10, %v14976_v0  ;;  %v3460_v57 = vmul.f32 %v8504_v40, %v8775_v55  ;;  %v14983_v48 = vld [vmem:[#allocation41_spill] sm:$0xff] }
 0x11d   : > { %1198 = vst [vmem:[#allocation1 + $0x7] ss:$9 sm:$0xff] %v856_v17  ;;  %v8804_v3 = vrot.slane %v8721_v31, 4  ;;  %v3766_v17 = vrot.slane %v3459_v21, 7  ;;  %v8807_v27 = vrot.slane %v8721_v31, 6  ;;  %v8810_v28 = vrot.slane %v8762_v14, 2 }
 0x11e   : > { %14971 = vst [vmem:[#allocation49_spill] sm:$0xff] %v8781_v62  ;;  %v8813_v34 = vrot.slane %v8762_v14, 4  ;;  %v8817_v11 = vmul.f32 %v14981_v37, %v8778_v56  ;;  %v3769_v59 = vrot.slane %v3460_v57, 7  ;;  %v4793_v10 = vadd.f32 %v4665_v58, %v14983_v48  ;;  %v14987_v48 = vld [vmem:[#allocation20_spill] sm:$0xff] }
 0x11f   : > { %14972 = vst [vmem:[#allocation50_spill] sm:$0xff] %v8788_v50  ;;  %v8821_v0 = vrot.slane %v8762_v14, 6  ;;  %v8824_v21 = vrot.slane %v8764_v52, 6  ;;  %v8828_v44 = vmul.f32 %v8229_v42, %v8764_v52  ;;  %v4945_v36 = vmul.f32 %v14986_v16, %v8764_v52 }
 0x120   : > { %14974 = vst [vmem:[#allocation51_spill] sm:$0xff] %v8794_v2  ;;  %v1334_v33 = vadd.f32 %v8134_v53, %v1333_v4  ;;  %v6289_v37 = vmax.f32 %v6161_v12, 0.0  ;;  %v3179_v58 = vmul.f32 %v14956_v47, %v8764_v52  ;;  %v3768_v57 = vrot.slane %v3766_v17, 2 }
 0x121   : > { %14975 = vst [vmem:[#allocation52_spill] sm:$0xff] %v8797_v22  ;;  %v4946_v32 = vmul.f32 %v14987_v48, %v8775_v55  ;;  %v3771_v24 = vrot.slane %v3769_v59, 2  ;;  %v8842_v42 = vmul.f32 %v8794_v2, %v8778_v56  ;;  %v5236_v53 = vrot.slane %v4945_v36, 7 }
 0x122   : > { %14977 = vst [vmem:[#allocation33_spill] sm:$0xff] %v8804_v3  ;;  %v3180_v12 = vmul.f32 %v8509_v43, %v8775_v55  ;;  %v4409_v14 = vmul.f32 %v8348_v23, %v8764_v52  ;;  %v4667_v61 = vmul.f32 %v8788_v50, %v8775_v55  ;;  %v3307_v36 = vadd.f32 %v3179_v58, %v8618_v18 }
 0x123   : > { %14978 = vst [vmem:[#allocation53_spill] sm:$0xff] %v8807_v27  ;;  %v5239_v19 = vrot.slane %v4946_v32, 7  ;;  %v5237_v2 = vsel %vm8176_vm10, %v5235_v6, %v5236_v53  ;;  %v5238_v31 = vrot.slane %v5236_v53, 2  ;;  %v3770_v43 = vsel %vm8176_vm10, %v3768_v57, %v3769_v59 }
 0x124   : > { %14979 = vst [vmem:[#allocation54_spill] sm:$0xff] %v8810_v28  ;;  %v1199_v35 = vld [vmem:[#allocation1] sm:$0xff]  ;;  %v4410_v4 = vmul.f32 %v8538_v46, %v8775_v55  ;;  %v14988_v32 = vrot.slane %v8817_v11, 7  ;;  %v14436_v53 = vrot.slane %v8842_v42, 7  ;;  %v3308_v18 = vadd.f32 %v3180_v12, %v8625_v41  ;;  %v14990_v41 = vld [vmem:[#allocation4_spill] sm:$0xff] }
 0x125   : > { %14980 = vst [vmem:[#allocation55_spill] sm:$0xff] %v8813_v34  ;;  %7712 = vmatmul.msk.bf16.gmra.mxu2 %vm1262_vm5, %v1199_v35  ;;  %v3767_v35 = vsel %vm8176_vm10, %v3765_v54, %v3766_v17  ;;  %v5241_v23 = vrot.slane %v5239_v19, 2  ;;  %v5240_v6 = vsel %vm8176_vm10, %v5238_v31, %v5239_v19  ;;  %v5760_v59 = vadd.f32 %v5237_v2, %v4793_v10 }
 0x126   : > { %14982 = vst [vmem:[#allocation56_spill] sm:$0xff] %v8817_v11  ;;  %v3773_v54 = vsel %vm8176_vm10, %v3771_v24, %v14988_v32  ;;  %v4273_v58 = vadd.f32 %v3767_v35, %v3306_v1  ;;  %v1428_v57 = vmax.f32 %v1334_v33, 0.0  ;;  %v4274_v7 = vadd.f32 %v3770_v43, %v3307_v36 }
 0x127   : > { %14984 = vst [vmem:[#allocation41_spill] sm:$0xff] %v8821_v0  ;;  %v4795_v46 = vadd.f32 %v4667_v61, %v8691_v45  ;;  %v5243_v24 = vsel %vm8176_vm10, %v5241_v23, %v14436_v53  ;;  %v5896_v19 = vmul.f32 %v8797_v22, %v8764_v52  ;;  %v8882_v33 = vmin.f32 %v6289_v37, 6.0 }
 0x128   : > { %14985 = vst [vmem:[#allocation57_spill] sm:$0xff] %v8828_v44  ;;  %v4666_v44 = vmul.f32 %v8781_v62, %v8764_v52  ;;  %v8876_v31 = vmin.f32 %v1428_v57, 6.0  ;;  %v4411_v43 = vmul.f32 %v8541_v38, %v8778_v56  ;;  %v5897_v61 = vmul.f32 %v8804_v3, %v8775_v55 }
 0x129   : > { %14992 = vst [vmem:[#allocation60_spill] sm:$0xff] %v8882_v33  ;;  %v8890_v23 = vmul.f32 %v8452_v51, %v8824_v21  ;;  %v8892_v45 = vadd.f32 %v4409_v14, %v4273_v58  ;;  %v5762_v2 = vadd.f32 %v5243_v24, %v4795_v46  ;;  %v6024_v1 = vadd.f32 %v5896_v19, %v5760_v59  ;;  %v351_v33 = vld [vmem:[%s7976_s10 + $0xb0] sm:$0x1] }
 0x12a   : > { %v4794_v17 = vadd.f32 %v4666_v44, %v8689_v20  ;;  %v4275_v20 = vadd.f32 %v3773_v54, %v3308_v18  ;;  %14989 = vst [vmem:[#allocation58_spill] sm:$0xff] %v8876_v31  ;;  %v8880_v44 = vmul.f32 %v14990_v41, %v8824_v21  ;;  %v8895_v10 = vrot.slane %v8876_v31, 2 }
 0x12b   : > { %14993 = vst [vmem:[#allocation61_spill] sm:$0xff] %v8890_v23  ;;  %v8897_v12 = vadd.f32 %v4410_v4, %v4274_v7  ;;  %v8901_v35 = vmul.f32 %v8201_v26, %v8876_v31  ;;  %v3182_v36 = vmul.f32 %v14968_v30, %v8824_v21  ;;  %v5898_v14 = vmul.f32 %v8807_v27, %v8778_v56  ;;  %v14997_v7 = vld [vmem:[#allocation10_spill] sm:$0xff] }
 0x12c   : > { %v5761_v32 = vadd.f32 %v5240_v6, %v4794_v17  ;;  %14991 = vst [vmem:[#allocation59_spill] sm:$0xff] %v8880_v44  ;;  %v8905_v54 = vadd.f32 %v4411_v43, %v4275_v20  ;;  %v14437_v46 = vrot.slane %v8880_v44, 7  ;;  %v3463_v17 = vmul.f32 %v14955_v39, %v8876_v31  ;;  %v15003_v39 = vld [vmem:[#allocation27_spill] sm:$0xff] }
 0x12d   : > { %14994 = vst [vmem:[#allocation62_spill] sm:$0xff] %v8895_v10  ;;  %v8914_v4 = vmul.f32 %v14997_v7, %v8824_v21  ;;  %v3183_v6 = vmul.f32 %v14956_v47, %v8876_v31  ;;  %v8920_v18 = vmul.f32 %v8504_v40, %v8895_v10  ;;  %v14438_v58 = vrot.slane %v8890_v23, 7  ;;  %v15006_v23 = vld [vmem:[#allocation42_spill] sm:$0xff] }
 0x12e   : > { %v6025_v37 = vadd.f32 %v5897_v61, %v5761_v32  ;;  %14995 = vst [vmem:[#allocation63_spill] sm:$0xff] %v8901_v35  ;;  %v6026_v59 = vadd.f32 %v5898_v14, %v5762_v2  ;;  %v8924_v57 = vadd.f32 %v8810_v28, %v6024_v1  ;;  %v14444_v24 = vrot.slane %v8901_v35, 7 }
 0x12f   : > { %14996 = vst [vmem:[#allocation64_spill] sm:$0xff] %v8905_v54  ;;  %v3778_v32 = vrot.slane %v3463_v17, 7  ;;  %v8931_v19 = vadd.f32 %v3182_v36, %v8743_v25  ;;  %v4668_v61 = vmul.f32 %v14958_v49, %v8778_v56  ;;  %v8937_v53 = vrot.slane %v8876_v31, 4 }
 0x130   : > { %14998 = vst [vmem:[#allocation65_spill] sm:$0xff] %v8920_v18  ;;  %v8928_v20 = vadd.f32 %v8813_v34, %v6025_v37  ;;  %v2307_v2 = vrot.slane %v14437_v46, 2  ;;  %v4669_v14 = vmul.f32 %v8748_v15, %v8824_v21  ;;  %v3311_v37 = vadd.f32 %v3183_v6, %v8673_v9 }
 0x131   : > { %14999 = vst [vmem:[#allocation66_spill] sm:$0xff] %v8937_v53  ;;  %v3780_v1 = vrot.slane %v3778_v32, 2  ;;  %v3777_v25 = vrot.slane %v14438_v58, 2  ;;  %v4670_v36 = vmul.f32 %v8781_v62, %v8876_v31  ;;  %v4671_v17 = vmul.f32 %v8788_v50, %v8895_v10 }
 0x132   : > { %v8951_v43 = vadd.f32 %v8821_v0, %v6026_v59  ;;  %v2309_v9 = vsel %vm8176_vm10, %v2307_v2, %v14444_v24  ;;  %v15000_v6 = vrot.slane %v8920_v18, 7  ;;  %v4796_v59 = vadd.f32 %v4668_v61, %v8693_v60 }
 0x133   : > { %v3779_v38 = vsel %vm8176_vm10, %v3777_v25, %v3778_v32  ;;  %v4948_v46 = vmul.f32 %v14962_v29, %v8824_v21  ;;  %v4797_v35 = vadd.f32 %v4669_v14, %v8757_v8  ;;  %v4949_v2 = vmul.f32 %v14986_v16, %v8876_v31  ;;  %v15001_v32 = vld [vmem:[#allocation47_spill] sm:$0xff] }
 0x134   : > { %v3782_v58 = vsel %vm8176_vm10, %v3780_v1, %v15000_v6  ;;  %v4950_v24 = vmul.f32 %v14987_v48, %v8895_v10  ;;  %v4951_v1 = vmul.f32 %v14973_v5, %v8937_v53  ;;  %v15002_v60 = vrot.slane %v8842_v42, 7  ;;  %v350_v6 = vld [vmem:[%s7976_s10 + $0xac] sm:$0xf] }
 0x135   : > { %v8964_v40 = vadd.f32 %v3782_v58, %v3311_v37  ;;  %v4798_v58 = vadd.f32 %v4670_v36, %v8768_v63  ;;  %v4799_v37 = vadd.f32 %v4671_v17, %v15001_v32  ;;  %v5245_v25 = vrot.slane %v4948_v46, 7 }
 0x136   : > { %v5244_v61 = vrot.slane %v15002_v60, 2  ;;  %v5248_v18 = vrot.slane %v4949_v2, 7  ;;  %v5251_v8 = vrot.slane %v4950_v24, 7  ;;  %v5254_v14 = vrot.slane %v4951_v1, 7  ;;  %v15004_v60 = vld [vmem:[#allocation40_spill] sm:$0xff] }
 0x137   : > { %v5899_v47 = vmul.f32 %v15003_v39, %v8824_v21  ;;  %v5247_v5 = vrot.slane %v5245_v25, 2  ;;  %v5900_v63 = vmul.f32 %v8797_v22, %v8876_v31  ;;  %v5901_v42 = vmul.f32 %v8804_v3, %v8895_v10 }
 0x138   : > { %v5246_v30 = vsel %vm8176_vm10, %v5244_v61, %v5245_v25  ;;  %v5250_v46 = vrot.slane %v5248_v18, 2  ;;  %v5253_v36 = vrot.slane %v5251_v8, 2  ;;  %v5902_v24 = vmul.f32 %v8807_v27, %v8937_v53  ;;  %v15005_v61 = vld [vmem:[#allocation36_spill] sm:$0xff] }
 0x139   : > { %v5763_v17 = vadd.f32 %v5246_v30, %v4796_v59  ;;  %v5249_v2 = vsel %vm8176_vm10, %v5247_v5, %v5248_v18  ;;  %v458_v1 = vrot.slane %v350_v6, 3  ;;  %v459_v32 = vrot.slane %v351_v33, 3  ;;  %v9002_v59 = vld [vmem:[%s7976_s10 + $0xb4] sm:$0xf] }
 0x13a   : > { %v857_v25 = vsel %vm477_vm3, %v15005_v61, %v15004_v60  ;;  %v5252_v54 = vsel %vm8176_vm10, %v5250_v46, %v5251_v8  ;;  %v5255_v51 = vsel %vm8176_vm10, %v5253_v36, %v5254_v14  ;;  %v5764_v49 = vadd.f32 %v5249_v2, %v4797_v35 }
 0x13b   : > { %v6027_v30 = vadd.f32 %v5899_v47, %v5763_v17  ;;  %v5765_v53 = vadd.f32 %v5252_v54, %v4798_v58  ;;  %v5766_v27 = vadd.f32 %v5255_v51, %v4799_v37  ;;  %v859_v50 = vrot.slane %v857_v25, 2 }
 0x13c   : > { %v860_v5 = vsel %vm481_vm4, %v15005_v61, %v15004_v60  ;;  %v6028_v18 = vadd.f32 %v5900_v63, %v5764_v49  ;;  %v865_v8 = vsel %vm469_vm1, %v350_v6, %v458_v1  ;;  %v460_v14 = vrot.slane %v9002_v59, 3  ;;  %v1335_v49 = vpop.f32.mrf.mxu0 }
 0x13d   : > { %v6165_v44 = vadd.f32 %v15006_v23, %v6027_v30  ;;  %v862_v11 = vrot.slane %v860_v5, 3  ;;  %v6029_v46 = vadd.f32 %v5901_v42, %v5765_v53  ;;  %v866_v47 = vsel %vm473_vm2, %v350_v6, %v458_v1  ;;  %1201 = vst [vmem:[#allocation1] ss:$9 sm:$0xff] %v859_v50 }
 0x13e   : > { %v869_v35 = vsel %vm477_vm3, %v350_v6, %v458_v1  ;;  %v6030_v51 = vadd.f32 %v5902_v24, %v5766_v27  ;;  %v6166_v54 = vadd.f32 %v8810_v28, %v6028_v18  ;;  %v868_v58 = vrot.slane %v866_v47, 1  ;;  %1204 = vst [vmem:[#allocation1 + $0x2] ss:$9 sm:$0xff] %v865_v8 }
 0x13f   : > { %v871_v37 = vrot.slane %v869_v35, 2  ;;  %1203 = vst [vmem:[#allocation1 + $0x1] ss:$9 sm:$0xff] %v862_v11  ;;  %v6291_v63 = vmax.f32 %v8928_v20, 0.0  ;;  %v6292_v36 = vmax.f32 %v8951_v43, 0.0  ;;  %v2790_v53 = vadd.f32 %v2309_v9, %v8914_v4  ;;  %v15007_v11 = vld [vmem:[#allocation14_spill] sm:$0xff] }
 0x140   : > { %v872_v42 = vsel %vm481_vm4, %v350_v6, %v458_v1  ;;  %v4277_v17 = vadd.f32 %v3779_v38, %v8931_v19  ;;  %v6293_v50 = vmax.f32 %v6165_v44, 0.0  ;;  %v877_v24 = vsel %vm469_vm1, %v351_v33, %v459_v32  ;;  %1206 = vst [vmem:[#allocation1 + $0x3] ss:$9 sm:$0xff] %v868_v58  ;;  %v15008_v20 = vld [vmem:[#allocation26_spill] sm:$0xff]  ;;  %v9028_v38 = vld [vmem:[%s14360_s2] ss:$0 sm:$0xff] }
 0x141   : > { %v874_v27 = vrot.slane %v872_v42, 3  ;;  %v2926_v2 = vmul.f32 %v15007_v11, %v8876_v31  ;;  %v4413_v60 = vmul.f32 %v15008_v20, %v8876_v31  ;;  %v880_v4 = vsel %vm469_vm1, %v9002_v59, %v460_v14  ;;  %1208 = vst [vmem:[#allocation1 + $0x4] ss:$9 sm:$0xff] %v871_v37  ;;  %v353_v19 = vld [vmem:[%s7976_s10 + $0xb8] sm:$0xf]  ;;  %v15009_v33 = vld [vmem:[#allocation38_spill] sm:$0xff] }
 0x142   : > { %v1336_v44 = vadd.f32 %v9028_v38, %v1335_v49  ;;  %v4414_v43 = vmul.f32 %v15009_v33, %v8895_v10  ;;  %v6167_v9 = vadd.f32 %v8813_v34, %v6029_v46  ;;  %v6168_v6 = vadd.f32 %v8821_v0, %v6030_v51  ;;  %v9037_v32 = vld [vmem:[%s7976_s10 + $0xbc] sm:$0x1]  ;;  %1211 = vst [vmem:[#allocation1 + $0x6] ss:$9 sm:$0xff] %v877_v24  ;;  %v9057_v51 = vld [vmem:[%s7976_s10 + $0xc0] sm:$0xf] }
 0x143   : > { %v6294_v1 = vmax.f32 %v6166_v54, 0.0  ;;  %1210 = vst [vmem:[#allocation1 + $0x5] ss:$9 sm:$0xff] %v874_v27  ;;  %v15010_v61 = vmax.f32 %v8924_v57, 0.0  ;;  %v9043_v30 = vmin.f32 %v6291_v63, 6.0  ;;  %v9045_v5 = vmin.f32 %v6292_v36, 6.0 }
 0x144   : > { %v1429_v18 = vmax.f32 %v1336_v44, 0.0  ;;  %v9047_v8 = vadd.f32 %v2926_v2, %v2790_v53  ;;  %v9049_v46 = vadd.f32 %v4413_v60, %v4277_v17  ;;  %v9052_v47 = vadd.f32 %v4414_v43, %v8964_v40  ;;  %1212 = vst [vmem:[#allocation1 + $0x7] ss:$9 sm:$0xff] %v880_v4  ;;  %v9062_v54 = vld [vmem:[%s7976_s10 + $0xc4] sm:$0xf] }
 0x145   : > { %v9041_v25 = vmin.f32 %v15010_v61, 6.0  ;;  %15012 = vst [vmem:[#allocation27_spill] sm:$0xff] %v9043_v30  ;;  %v9054_v35 = vmin.f32 %v6293_v50, 6.0  ;;  %v461_v58 = vrot.slane %v353_v19, 3  ;;  %v881_v37 = vsel %vm473_vm2, %v9002_v59, %v460_v14  ;;  %v9103_v61 = vld [vmem:[%s7976_s10 + $0xcc] sm:$0xf] }
 0x146   : > { %15013 = vst [vmem:[#allocation40_spill] sm:$0xff] %v9045_v5  ;;  %v9059_v57 = vmin.f32 %v1429_v18, 6.0  ;;  %v884_v49 = vsel %vm477_vm3, %v9002_v59, %v460_v14  ;;  %v6295_v63 = vmax.f32 %v6167_v9, 0.0  ;;  %v6296_v40 = vmax.f32 %v6168_v6, 0.0  ;;  %v9111_v33 = vld [vmem:[%s7976_s10 + $0xd0] sm:$0xf] }
 0x147   : > { %15011 = vst [vmem:[#allocation47_spill] sm:$0xff] %v9041_v25  ;;  %v9068_v36 = vmin.f32 %v6294_v1, 6.0  ;;  %v462_v53 = vrot.slane %v9037_v32, 3  ;;  %v463_v50 = vrot.slane %v9057_v51, 3  ;;  %v887_v27 = vsel %vm481_vm4, %v9002_v59, %v460_v14  ;;  %v9096_v59 = vld [vmem:[%s7976_s10 + $0xc8] sm:$0x1] }
 0x148   : > { %15014 = vst [vmem:[#allocation36_spill] sm:$0xff] %v9052_v47  ;;  %v9072_v42 = vrot.slane %v9059_v57, 2  ;;  %v9075_v17 = vrot.slane %v9059_v57, 4  ;;  %v9082_v24 = vmul.f32 %v14962_v29, %v9059_v57  ;;  %v9085_v2 = vrot.slane %v9062_v54, 3 }
 0x149   : > { %15015 = vst [vmem:[#allocation42_spill] sm:$0xff] %v9054_v35  ;;  %v883_v60 = vrot.slane %v881_v37, 1  ;;  %v886_v4 = vrot.slane %v884_v49, 2  ;;  %v4673_v44 = vmul.f32 %v8748_v15, %v9059_v57  ;;  %v893_v14 = vsel %vm473_vm2, %v353_v19, %v461_v58 }
 0x14a   : > { %15016 = vst [vmem:[#allocation67_spill] sm:$0xff] %v9068_v36  ;;  %v4954_v43 = vmul.f32 %v14986_v16, %v9072_v42  ;;  %v9093_v9 = vmul.f32 %v14987_v48, %v9075_v17  ;;  %v4674_v6 = vmul.f32 %v8781_v62, %v9072_v42  ;;  %v14468_v1 = vrot.slane %v9082_v24, 7 }
 0x14b   : > { %15017 = vst [vmem:[#allocation68_spill] sm:$0xff] %v9072_v42  ;;  %v889_v18 = vrot.slane %v887_v27, 3  ;;  %v896_v37 = vsel %vm477_vm3, %v353_v19, %v461_v58  ;;  %v9106_v49 = vmin.f32 %v6295_v63, 6.0  ;;  %v9108_v47 = vmin.f32 %v6296_v40, 6.0  ;;  %v1213_v10 = vld [vmem:[#allocation1] sm:$0xff] }
 0x14c   : > { %15018 = vst [vmem:[#allocation69_spill] sm:$0xff] %v9082_v24  ;;  %v5261_v48 = vrot.slane %v4954_v43, 7  ;;  %v899_v20 = vsel %vm481_vm4, %v353_v19, %v461_v58  ;;  %7713 = vmatmul.msk.bf16.gmra.mxu2 %vm1262_vm5, %v1213_v10  ;;  %v5260_v62 = vrot.slane %v14468_v1, 2  ;;  %v465_v27 = vrot.slane %v9096_v59, 3  ;;  %v360_v24 = vld [vmem:[%s7976_s10 + $0xd4] sm:$0x1] }
 0x14d   : > { %15019 = vst [vmem:[#allocation70_spill] sm:$0xff] %v9106_v49  ;;  %v892_v5 = vsel %vm469_vm1, %v353_v19, %v461_v58  ;;  %v895_v63 = vrot.slane %v893_v14, 1  ;;  %v4801_v40 = vadd.f32 %v4673_v44, %v8892_v45  ;;  %v14469_v43 = vrot.slane %v9093_v9, 7 }
 0x14e   : > { %15020 = vst [vmem:[#allocation71_spill] sm:$0xff] %v9108_v47  ;;  %v5263_v30 = vrot.slane %v5261_v48, 2  ;;  %v898_v25 = vrot.slane %v896_v37, 2  ;;  %v4802_v47 = vadd.f32 %v4674_v6, %v8897_v12  ;;  %v5262_v10 = vsel %vm8176_vm10, %v5260_v62, %v5261_v48 }
 0x14f   : > { %1215 = vst [vmem:[#allocation1] ss:$9 sm:$0xff] %v883_v60  ;;  %v466_v1 = vrot.slane %v9103_v61, 3  ;;  %v901_v49 = vrot.slane %v899_v20, 3  ;;  %v5768_v19 = vadd.f32 %v5262_v10, %v4801_v40  ;;  %v5904_v58 = vmul.f32 %v8797_v22, %v9072_v42 }
 0x150   : > { %1217 = vst [vmem:[#allocation1 + $0x1] ss:$9 sm:$0xff] %v886_v4  ;;  %v5265_v45 = vsel %vm8176_vm10, %v5263_v30, %v14469_v43  ;;  %v467_v60 = vrot.slane %v9111_v33, 3  ;;  %v5905_v62 = vmul.f32 %v8804_v3, %v9075_v17  ;;  %v904_v48 = vsel %vm469_vm1, %v9037_v32, %v462_v53 }
 0x151   : > { %1219 = vst [vmem:[#allocation1 + $0x2] ss:$9 sm:$0xff] %v889_v18  ;;  %v5769_v12 = vadd.f32 %v5265_v45, %v4802_v47  ;;  %v908_v20 = vsel %vm473_vm2, %v9057_v51, %v463_v50  ;;  %v6032_v4 = vadd.f32 %v5904_v58, %v5768_v19  ;;  %v468_v30 = vrot.slane %v360_v24, 3 }
 0x152   : > { %1220 = vst [vmem:[#allocation1 + $0x3] ss:$9 sm:$0xff] %v892_v5  ;;  %v911_v44 = vsel %vm477_vm3, %v9057_v51, %v463_v50  ;;  %v914_v14 = vsel %vm481_vm4, %v9057_v51, %v463_v50  ;;  %v9144_v5 = vrot.slane %v9059_v57, 6  ;;  %v9149_v32 = vsel %vm473_vm2, %v9062_v54, %v9085_v2 }
 0x153   : > { %1222 = vst [vmem:[#allocation1 + $0x4] ss:$9 sm:$0xff] %v895_v63  ;;  %v6033_v47 = vadd.f32 %v5905_v62, %v5769_v12  ;;  %v9154_v53 = vsel %vm477_vm3, %v9062_v54, %v9085_v2  ;;  %v9158_v6 = vmul.f32 %v15003_v39, %v9059_v57  ;;  %v910_v18 = vrot.slane %v908_v20, 1  ;;  %v15023_v20 = vld [vmem:[#allocation2_spill] sm:$0xff] }
 0x154   : > { %1224 = vst [vmem:[#allocation1 + $0x5] ss:$9 sm:$0xff] %v898_v25  ;;  %v907_v25 = vsel %vm469_vm1, %v9057_v51, %v463_v50  ;;  %v9165_v37 = vsel %vm481_vm4, %v9062_v54, %v9085_v2  ;;  %v6170_v63 = vadd.f32 %v8810_v28, %v6032_v4  ;;  %v913_v40 = vrot.slane %v911_v44, 2 }
 0x155   : > { %1226 = vst [vmem:[#allocation1 + $0x6] ss:$9 sm:$0xff] %v901_v49  ;;  %v916_v10 = vrot.slane %v914_v14, 3  ;;  %v919_v49 = vsel %vm469_vm1, %v9062_v54, %v9085_v2  ;;  %v6171_v45 = vadd.f32 %v8813_v34, %v6033_v47  ;;  %v922_v19 = vrot.slane %v9149_v32, 1  ;;  %v15029_v14 = vld [vmem:[#allocation8_spill] sm:$0xff] }
 0x156   : > { %15021 = vst [vmem:[#allocation72_spill] sm:$0xff] %v9158_v6  ;;  %v925_v51 = vrot.slane %v9154_v53, 2  ;;  %v9176_v50 = vsel %vm473_vm2, %v9103_v61, %v466_v1  ;;  %v928_v58 = vrot.slane %v9165_v37, 3  ;;  %v9181_v12 = vsel %vm469_vm1, %v9096_v59, %v465_v27  ;;  %v15022_v27 = vld [vmem:[#allocation44_spill] sm:$0xff] }
 0x157   : > { %1227 = vst [vmem:[#allocation1 + $0x7] ss:$9 sm:$0xff] %v904_v48  ;;  %v9185_v62 = vsel %vm477_vm3, %v9103_v61, %v466_v1  ;;  %v9189_v54 = vsel %vm481_vm4, %v9103_v61, %v466_v1  ;;  %v9193_v2 = vsel %vm469_vm1, %v9103_v61, %v466_v1  ;;  %v9197_v48 = vsel %vm473_vm2, %v9111_v33, %v467_v60  ;;  %v15025_v1 = vld [vmem:[#allocation45_spill] sm:$0xff] }
 0x158   : > { %v9201_v59 = vsel %vm477_vm3, %v9111_v33, %v467_v60  ;;  %v1971_v4 = vmul.f32 %v15023_v20, %v15022_v27  ;;  %v6298_v44 = vmax.f32 %v6170_v63, 0.0  ;;  %v9208_v47 = vsel %vm481_vm4, %v9111_v33, %v467_v60 }
 0x159   : > { %15024 = vst [vmem:[#allocation44_spill] sm:$0xff] %v9208_v47  ;;  %v1972_v61 = vmul.f32 %v14990_v41, %v15025_v1  ;;  %v6299_v32 = vmax.f32 %v6171_v45, 0.0  ;;  %v9216_v43 = vsel %vm469_vm1, %v9111_v33, %v467_v60  ;;  %v9222_v35 = vsel %vm469_vm1, %v360_v24, %v468_v30  ;;  %v15027_v45 = vld [vmem:[#allocation22_spill] sm:$0xff]  ;;  %v15031_v30 = vld [vmem:[#allocation7_spill] sm:$0xff] }
 0x15a   : > { %v7720_v6 = vrot.slane %v1971_v4, 9  ;;  %15026 = vst [vmem:[#allocation45_spill] sm:$0xff] %v9222_v35  ;;  %v9226_v37 = vmul.f32 %v15027_v45, %v8778_v56  ;;  %v1973_v33 = vmul.f32 %v8201_v26, %v8764_v52  ;;  %v9230_v60 = vmin.f32 %v6298_v44, 6.0  ;;  %v15033_v44 = vld [vmem:[#allocation6_spill] sm:$0xff]  ;;  %v15037_v35 = vld [vmem:[#allocation9_spill] sm:$0xff] }
 0x15b   : > { %v2293_v3 = vrot.slane %v1972_v61, 7  ;;  %v3181_v4 = vmul.f32 %v15029_v14, %v8778_v56  ;;  %v15030_v61 = vld [vmem:[#allocation3_spill] sm:$0xff]  ;;  %v9241_v36 = vmin.f32 %v6299_v32, 6.0  ;;  %v2921_v53 = vmul.f32 %v15033_v44, %v15025_v1 }
 0x15c   : > { %15028 = vst [vmem:[#allocation73_spill] sm:$0xff] %v9230_v60  ;;  %v1813_v24 = vmul.f32 %v15030_v61, %v15022_v27  ;;  %v14481_v63 = vrot.slane %v9226_v37, 7  ;;  %v2925_v27 = vmul.f32 %v15033_v44, %v8824_v21  ;;  %v15035_v60 = vld [vmem:[#allocation56_spill] sm:$0xff]  ;;  %v4412_v47 = vmul.f32 %v15037_v35, %v8824_v21 }
 0x15d   : > { %15032 = vst [vmem:[#allocation74_spill] sm:$0xff] %v9241_v36  ;;  %v2294_v32 = vsel %vm8176_vm10, %v7720_v6, %v2293_v3  ;;  %v2296_v28 = vrot.slane %v1973_v33, 7  ;;  %v15039_v6 = vld [vmem:[#allocation13_spill] sm:$0xff] }
 0x15e   : > { %v1228_v34 = vld [vmem:[#allocation1] sm:$0xff]  ;;  %v2304_v36 = vrot.slane %v14481_v63, 2  ;;  %v9267_v42 = vmul.f32 %v15039_v6, %v8775_v55  ;;  %v2785_v33 = vadd.f32 %v2294_v32, %v1813_v24 }
 0x15f   : > { %1229 = vst [vmem:[#allocation1] ss:$9 sm:$0xff] %v907_v25  ;;  %7714 = vmatmul.msk.bf16.gmra.mxu2 %vm1262_vm5, %v1228_v34  ;;  %v9239_v25 = vmul.f32 %v15031_v30, %v8775_v55  ;;  %v1817_v34 = vmul.f32 %v15030_v61, %v8778_v56  ;;  %v15038_v30 = vld [vmem:[#allocation43_spill] sm:$0xff] }
 0x160   : > { %1231 = vst [vmem:[#allocation1 + $0x1] ss:$9 sm:$0xff] %v910_v18  ;;  %v1814_v18 = vmul.f32 %v14997_v7, %v15025_v1  ;;  %v15036_v1 = vrot.slane %v15035_v60, 7  ;;  %v3309_v26 = vadd.f32 %v3181_v4, %v15038_v30  ;;  %v9272_v60 = vmul.f32 %v15027_v45, %v9144_v5 }
 0x161   : > { %1233 = vst [vmem:[#allocation1 + $0x2] ss:$9 sm:$0xff] %v913_v40  ;;  %v9256_v40 = vmul.f32 %v15007_v11, %v8764_v52  ;;  %v2295_v52 = vrot.slane %v2293_v3, 2 }
 0x162   : > { %1235 = vst [vmem:[#allocation1 + $0x3] ss:$9 sm:$0xff] %v916_v10  ;;  %v3774_v10 = vrot.slane %v15036_v1, 2  ;;  %v15040_v1 = vld [vmem:[#allocation59_spill] sm:$0xff] }
 0x163   : > { %15034 = vst [vmem:[#allocation75_spill] sm:$0xff] %v9256_v40  ;;  %v1338_v40 = vpop.f32.mrf.mxu0  ;;  %v15041_v63 = vrot.slane %v15040_v1, 7 }
 0x164   : > { %1236 = vst [vmem:[#allocation1 + $0x4] ss:$9 sm:$0xff] %v919_v49  ;;  %v2299_v49 = vrot.slane %v9239_v25, 7  ;;  %v1339_v3 = vadd.f32 %v9028_v38, %v1338_v40  ;;  %v15043_v25 = vld [vmem:[#allocation61_spill] sm:$0xff] }
 0x165   : > { %1238 = vst [vmem:[#allocation1 + $0x5] ss:$9 sm:$0xff] %v922_v19  ;;  %v2306_v21 = vsel %vm8176_vm10, %v2304_v36, %v15041_v63  ;;  %v3189_v19 = vmul.f32 %v15029_v14, %v9144_v5  ;;  %v15044_v45 = vrot.slane %v15043_v25, 7  ;;  %v2297_v36 = vsel %vm8176_vm10, %v2295_v52, %v2296_v28  ;;  %v15045_v63 = vld [vmem:[#allocation15_spill] sm:$0xff]  ;;  %v15049_v52 = vld [vmem:[#allocation16_spill] sm:$0xff] }
 0x166   : > { %1240 = vst [vmem:[#allocation1 + $0x6] ss:$9 sm:$0xff] %v925_v51  ;;  %v2789_v4 = vadd.f32 %v2306_v21, %v1817_v34  ;;  %v15042_v51 = vld [vmem:[#allocation37_spill] sm:$0xff]  ;;  %v9293_v24 = vmul.f32 %v15045_v63, %v8775_v55  ;;  %v1430_v32 = vmax.f32 %v1339_v3, 0.0  ;;  %v15047_v25 = vld [vmem:[#allocation51_spill] sm:$0xff]  ;;  %v4676_v55 = vmul.f32 %v15049_v52, %v9144_v5 }
 0x167   : > { %1242 = vst [vmem:[#allocation1 + $0x7] ss:$9 sm:$0xff] %v928_v58  ;;  %v9283_v30 = vmul.f32 %v15042_v51, %v9144_v5  ;;  %v3776_v1 = vsel %vm8176_vm10, %v3774_v10, %v15044_v45  ;;  %v15046_v58 = vld [vmem:[#allocation23_spill] sm:$0xff]  ;;  %v4956_v51 = vmul.f32 %v15047_v25, %v9144_v5  ;;  %v15048_v45 = vld [vmem:[#allocation50_spill] sm:$0xff]  ;;  %v9311_v3 = vadd.f32 %v2297_v36, %v1814_v18 }
 0x168   : > { %v4276_v11 = vadd.f32 %v3776_v1, %v3309_v26  ;;  %v9297_v34 = vmul.f32 %v15046_v58, %v8778_v56  ;;  %v3053_v21 = vadd.f32 %v2925_v27, %v2789_v4  ;;  %v4675_v10 = vmul.f32 %v15048_v45, %v9075_v17 }
 0x169   : > { %v2298_v1 = vrot.slane %v2296_v28, 2  ;;  %v9307_v14 = vmin.f32 %v1430_v32, 6.0  ;;  %v9309_v58 = vrot.slane %v2299_v49, 2  ;;  %v1825_v27 = vmul.f32 %v15030_v61, %v9144_v5 }
 0x16a   : > { %v3317_v56 = vadd.f32 %v3189_v19, %v3053_v21  ;;  %v4540_v4 = vadd.f32 %v4412_v47, %v4276_v11  ;;  %v15051_v26 = vrot.slane %v9093_v9, 7  ;;  %v9317_v25 = vadd.f32 %v2921_v53, %v2785_v33  ;;  %v15056_v21 = vld [vmem:[#allocation30_spill] sm:$0xff]  ;;  %v15059_v53 = vld [vmem:[#allocation64_spill] sm:$0xff] }
 0x16b   : > { %15050 = vst [vmem:[#allocation56_spill] sm:$0xff] %v9307_v14  ;;  %v9320_v45 = vrot.slane %v9307_v14, 2  ;;  %v9324_v28 = vmul.f32 %v14990_v41, %v9307_v14  ;;  %v15055_v19 = vrot.slane %v9272_v60, 7  ;;  %v5267_v36 = vrot.slane %v4956_v51, 7 }
 0x16c   : > { %v5266_v40 = vrot.slane %v15051_v26, 2  ;;  %15052 = vst [vmem:[#allocation43_spill] sm:$0xff] %v9317_v25  ;;  %v9330_v11 = vmul.f32 %v15056_v21, %v9307_v14  ;;  %v15058_v9 = vrot.slane %v9283_v30, 7  ;;  %v4803_v33 = vadd.f32 %v4675_v10, %v15059_v53 }
 0x16d   : > { %15053 = vst [vmem:[#allocation59_spill] sm:$0xff] %v9320_v45  ;;  %v2329_v18 = vrot.slane %v15055_v19, 2  ;;  %v4804_v26 = vadd.f32 %v4676_v55, %v4540_v4  ;;  %v14487_v52 = vrot.slane %v9324_v28, 7  ;;  %v4957_v25 = vmul.f32 %v14962_v29, %v9307_v14  ;;  %v15061_v19 = vld [vmem:[#allocation53_spill] sm:$0xff] }
 0x16e   : > { %15054 = vst [vmem:[#allocation61_spill] sm:$0xff] %v9324_v28  ;;  %v1243_v32 = vld [vmem:[#allocation1] sm:$0xff]  ;;  %v3799_v47 = vrot.slane %v15058_v9, 2  ;;  %v9341_v51 = vmul.f32 %v14986_v16, %v9320_v45  ;;  %v5906_v21 = vmul.f32 %v15061_v19, %v9144_v5  ;;  %v4677_v10 = vmul.f32 %v8748_v15, %v9307_v14 }
 0x16f   : > { %15057 = vst [vmem:[#allocation76_spill] sm:$0xff] %v9330_v11  ;;  %v9352_v55 = vrot.slane %v8876_v31, 6  ;;  %v15062_v4 = vrot.slane %v9176_v50, 1  ;;  %v2331_v53 = vsel %vm8176_vm10, %v2329_v18, %v14487_v52  ;;  %v5270_v19 = vrot.slane %v4957_v25, 7  ;;  %7715 = vmatmul.msk.bf16.gmra.mxu2 %vm1262_vm5, %v1243_v32  ;;  %v15065_v50 = vld [vmem:[#allocation24_spill] sm:$0xff] }
 0x170   : > { %1244 = vst [vmem:[#allocation1] ss:$9 sm:$0xff] %v9181_v12  ;;  %v5268_v12 = vsel %vm8176_vm10, %v5266_v40, %v5267_v36  ;;  %v9362_v9 = vsel %vm8176_vm10, %v2298_v1, %v2299_v49  ;;  %v15063_v40 = vrot.slane %v9185_v62, 2  ;;  %v9368_v31 = vrot.slane %v9307_v14, 4 }
 0x171   : > { %15060 = vst [vmem:[#allocation64_spill] sm:$0xff] %v9341_v51  ;;  %v15066_v28 = vrot.slane %v9330_v11, 7  ;;  %v15067_v49 = vrot.slane %v9189_v54, 3  ;;  %v5770_v32 = vadd.f32 %v5268_v12, %v4803_v33  ;;  %v4805_v52 = vadd.f32 %v4677_v10, %v9049_v46 }
 0x172   : > { %1245 = vst [vmem:[#allocation1 + $0x1] ss:$9 sm:$0xff] %v9193_v2  ;;  %v5269_v2 = vrot.slane %v5267_v36, 2  ;;  %v5272_v36 = vrot.slane %v5270_v19, 2  ;;  %v15068_v18 = vrot.slane %v9197_v48, 1  ;;  %v2933_v54 = vmul.f32 %v15033_v44, %v9307_v14 }
 0x173   : > { %1247 = vst [vmem:[#allocation1 + $0x2] ss:$9 sm:$0xff] %v15062_v4  ;;  %v3190_v4 = vmul.f32 %v15065_v50, %v9307_v14  ;;  %v3801_v25 = vsel %vm8176_vm10, %v3799_v47, %v15066_v28  ;;  %v5907_v28 = vmul.f32 %v15003_v39, %v9307_v14  ;;  %v1340_v47 = vpop.f32.mrf.mxu0  ;;  %v15070_v46 = vrot.slane %v9201_v59, 2 }
 0x174   : > { %1249 = vst [vmem:[#allocation1 + $0x3] ss:$9 sm:$0xff] %v15063_v40  ;;  %v4284_v1 = vadd.f32 %v3801_v25, %v3317_v56  ;;  %v5271_v62 = vsel %vm8176_vm10, %v5269_v2, %v5270_v19  ;;  %v2797_v40 = vadd.f32 %v2331_v53, %v1825_v27  ;;  %v15069_v56 = vrot.slane %v9341_v51, 7  ;;  %v15081_v51 = vld [vmem:[#allocation44_spill] sm:$0xff] }
 0x175   : > { %15064 = vst [vmem:[#allocation77_spill] sm:$0xff] %v9368_v31  ;;  %v5771_v31 = vadd.f32 %v5271_v62, %v4804_v26  ;;  %v1341_v27 = vadd.f32 %v9028_v38, %v1340_v47  ;;  %v4420_v39 = vmul.f32 %v15037_v35, %v9307_v14  ;;  %v5908_v48 = vmul.f32 %v8797_v22, %v9320_v45  ;;  %v15075_v62 = vld [vmem:[#allocation68_spill] sm:$0xff] }
 0x176   : > { %1251 = vst [vmem:[#allocation1 + $0x4] ss:$9 sm:$0xff] %v15067_v49  ;;  %v5274_v33 = vsel %vm8176_vm10, %v5272_v36, %v15069_v56  ;;  %v9402_v10 = vmul.f32 %v14997_v7, %v9307_v14  ;;  %v9405_v12 = vadd.f32 %v3190_v4, %v9047_v8  ;;  %v9408_v59 = vadd.f32 %v2933_v54, %v2797_v40  ;;  %v15076_v36 = vld [vmem:[#allocation11_spill] sm:$0xff]  ;;  %v15083_v14 = vld [vmem:[#allocation45_spill] sm:$0xff] }
 0x177   : > { %1252 = vst [vmem:[#allocation1 + $0x5] ss:$9 sm:$0xff] %v9216_v43  ;;  %v6034_v43 = vadd.f32 %v5906_v21, %v5770_v32  ;;  %v5772_v26 = vadd.f32 %v5274_v33, %v4805_v52  ;;  %v6035_v19 = vadd.f32 %v5907_v28, %v5771_v31  ;;  %v1431_v53 = vmax.f32 %v1341_v27, 0.0  ;;  %v15078_v56 = vld [vmem:[#allocation7_spill] sm:$0xff] }
 0x178   : > { %1254 = vst [vmem:[#allocation1 + $0x6] ss:$9 sm:$0xff] %v15068_v18  ;;  %v9410_v2 = vadd.f32 %v4420_v39, %v4284_v1  ;;  %v1821_v31 = vmul.f32 %v15030_v61, %v9352_v55  ;;  %v1822_v49 = vmul.f32 %v14997_v7, %v9059_v57  ;;  %v1980_v8 = vmul.f32 %v15023_v20, %v9352_v55 }
 0x179   : > { %1256 = vst [vmem:[#allocation1 + $0x7] ss:$9 sm:$0xff] %v15070_v46  ;;  %v6172_v21 = vadd.f32 %v8821_v0, %v6034_v43  ;;  %v6036_v25 = vadd.f32 %v5908_v48, %v5772_v26  ;;  %v6173_v52 = vadd.f32 %v15006_v23, %v6035_v19  ;;  %v9413_v18 = vmin.f32 %v1431_v53, 6.0  ;;  %v15077_v23 = vld [vmem:[#allocation5_spill] sm:$0xff]  ;;  %v15079_v43 = vld [vmem:[#allocation54_spill] sm:$0xff] }
 0x17a   : > { %15071 = vst [vmem:[#allocation78_spill] sm:$0xff] %v9402_v10  ;;  %v1823_v32 = vmul.f32 %v15076_v36, %v15075_v62  ;;  %v1981_v1 = vmul.f32 %v14990_v41, %v9059_v57  ;;  %v1982_v40 = vmul.f32 %v15077_v23, %v15075_v62  ;;  %v1983_v33 = vmul.f32 %v15078_v56, %v9075_v17 }
 0x17b   : > { %15072 = vst [vmem:[#allocation79_spill] sm:$0xff] %v9405_v12  ;;  %v6300_v4 = vmax.f32 %v6172_v21, 0.0  ;;  %v9428_v28 = vrot.slane %v9413_v18, 2  ;;  %v9431_v47 = vrot.slane %v9413_v18, 4  ;;  %v9434_v54 = vrot.slane %v9413_v18, 6 }
 0x17c   : > { %15073 = vst [vmem:[#allocation80_spill] sm:$0xff] %v9408_v59  ;;  %v6174_v27 = vadd.f32 %v15079_v43, %v6036_v25  ;;  %v6301_v46 = vmax.f32 %v6173_v52, 0.0  ;;  %v1824_v39 = vmul.f32 %v15039_v6, %v9075_v17  ;;  %v1989_v26 = vmul.f32 %v15023_v20, %v9413_v18 }
 0x17d   : > { %15074 = vst [vmem:[#allocation81_spill] sm:$0xff] %v9410_v2  ;;  %v1990_v19 = vmul.f32 %v14990_v41, %v9428_v28  ;;  %v1991_v21 = vmul.f32 %v15077_v23, %v9431_v47  ;;  %v15080_v53 = vrot.slane %v9226_v37, 7  ;;  %v7721_v52 = vrot.slane %v1980_v8, 9  ;;  %v15084_v41 = vld [vmem:[#allocation42_spill] sm:$0xff] }
 0x17e   : > { %v15082_v12 = vrot.slane %v15081_v51, 3  ;;  %v9454_v10 = vmin.f32 %v6300_v4, 6.0  ;;  %v1992_v20 = vmul.f32 %v15078_v56, %v9434_v54  ;;  %v2318_v45 = vrot.slane %v1981_v1, 7 }
 0x17f   : > { %v2303_v25 = vsel %vm8176_vm10, %v9309_v58, %v15080_v53  ;;  %v2321_v0 = vrot.slane %v1982_v40, 7  ;;  %v2324_v23 = vrot.slane %v1983_v33, 7  ;;  %v7722_v11 = vrot.slane %v1989_v26, 9  ;;  %v15086_v33 = vld [vmem:[#allocation70_spill] sm:$0xff]  ;;  %v15087_v26 = vld [vmem:[#allocation71_spill] sm:$0xff] }
 0x180   : > { %v1257_v48 = vld [vmem:[#allocation1] sm:$0xff]  ;;  %v2343_v37 = vrot.slane %v1990_v19, 7  ;;  %v2346_v2 = vrot.slane %v1991_v21, 7  ;;  %v6302_v59 = vmax.f32 %v6174_v27, 0.0  ;;  %v2320_v58 = vrot.slane %v2318_v45, 2 }
 0x181   : > { %1259 = vst [vmem:[#allocation1] ss:$9 sm:$0xff] %v15082_v12  ;;  %v2323_v8 = vrot.slane %v2321_v0, 2  ;;  %v2349_v51 = vrot.slane %v1992_v20, 7  ;;  %v15085_v12 = vld [vmem:[#allocation67_spill] sm:$0xff]  ;;  %v2326_v4 = vrot.slane %v2324_v23, 2  ;;  %7716 = vmatmul.msk.bf16.gmra.mxu2 %vm1262_vm5, %v1257_v48  ;;  %v1829_v27 = vmul.f32 %v15030_v61, %v9413_v18 }
 0x182   : > { %1260 = vst [vmem:[#allocation1 + $0x1] ss:$9 sm:$0xff] %v15083_v14  ;;  %v2344_v53 = vsel %vm8176_vm10, %v7722_v11, %v2343_v37  ;;  %v2345_v1 = vrot.slane %v2343_v37, 2  ;;  %v2348_v40 = vrot.slane %v2346_v2, 2  ;;  %v6429_v14 = vmin.f32 %v6301_v46, 6.0 }
 0x183   : > { %6681 = vst [vmem:[#allocation1 + $0x20] ss:$4 sm:$0xff] %v15084_v41  ;;  %v1830_v41 = vmul.f32 %v14997_v7, %v9428_v28  ;;  %v1831_v20 = vmul.f32 %v15076_v36, %v9431_v47  ;;  %v2319_v11 = vsel %vm8176_vm10, %v7721_v52, %v2318_v45  ;;  %v2322_v48 = vsel %vm8176_vm10, %v2320_v58, %v2321_v0  ;;  %v15089_v45 = vld [vmem:[#allocation57_spill] sm:$0xff] }
 0x184   : > { %6683 = vst [vmem:[#allocation1 + $0x21] ss:$4 sm:$0xff] %v15085_v12  ;;  %v2347_v46 = vsel %vm8176_vm10, %v2345_v1, %v2346_v2  ;;  %v2350_v19 = vsel %vm8176_vm10, %v2348_v40, %v2349_v51  ;;  %v6430_v21 = vmin.f32 %v6302_v59, 6.0  ;;  %v2325_v37 = vsel %vm8176_vm10, %v2323_v8, %v2324_v23  ;;  %v15107_v7 = vld [vmem:[#allocation73_spill] sm:$0xff] }
 0x185   : > { %6685 = vst [vmem:[#allocation1 + $0x22] ss:$4 sm:$0xff] %v15086_v33  ;;  %v15088_v12 = vrot.slane %v9272_v60, 7  ;;  %v2787_v0 = vadd.f32 %v9362_v9, %v15089_v45  ;;  %v2801_v52 = vadd.f32 %v2344_v53, %v1829_v27  ;;  %v2802_v58 = vadd.f32 %v2347_v46, %v1830_v41  ;;  %v15090_v60 = vld [vmem:[#allocation60_spill] sm:$0xff]  ;;  %v15092_v53 = vld [vmem:[#allocation47_spill] sm:$0xff] }
 0x186   : > { %6687 = vst [vmem:[#allocation1 + $0x23] ss:$4 sm:$0xff] %v15087_v26  ;;  %v9486_v26 = vrot.slane %v2349_v51, 2  ;;  %v2803_v2 = vadd.f32 %v2350_v19, %v1831_v20  ;;  %v2788_v40 = vadd.f32 %v2303_v25, %v9267_v42  ;;  %v2793_v59 = vadd.f32 %v2319_v11, %v1821_v31  ;;  %v15091_v51 = vld [vmem:[#allocation14_spill] sm:$0xff]  ;;  %v15095_v25 = vld [vmem:[#allocation75_spill] sm:$0xff]  ;;  %v15099_v45 = vld [vmem:[#allocation8_spill] sm:$0xff] }
 0x187   : > { %v2328_v33 = vsel %vm8176_vm10, %v2326_v4, %v15088_v12  ;;  %v2794_v56 = vadd.f32 %v2322_v48, %v1822_v49  ;;  %v2937_v23 = vmul.f32 %v15033_v44, %v9428_v28  ;;  %v2795_v8 = vadd.f32 %v2325_v37, %v1823_v32  ;;  %v15098_v48 = vld [vmem:[#allocation40_spill] sm:$0xff] }
 0x188   : > { %v9494_v4 = vadd.f32 %v2328_v33, %v1824_v39  ;;  %v2938_v12 = vmul.f32 %v15091_v51, %v9431_v47  ;;  %v2939_v9 = vmul.f32 %v15045_v63, %v9434_v54  ;;  %v2929_v42 = vmul.f32 %v15033_v44, %v9059_v57  ;;  %v15094_v39 = vld [vmem:[#allocation27_spill] sm:$0xff] }
 0x189   : > { %v1261_v1 = vld [vmem:[#allocation1] sm:$0xff]  ;;  %v2930_v31 = vmul.f32 %v15091_v51, %v15075_v62  ;;  %v2931_v49 = vmul.f32 %v15045_v63, %v9075_v17  ;;  %v9507_v32 = vadd.f32 %v2937_v23, %v2801_v52  ;;  %v3050_v27 = vadd.f32 %v15095_v25, %v9311_v3 }
 0x18a   : > { %6673 = vst [vmem:[#allocation1] ss:$4 sm:$0xff] %v15090_v60  ;;  %v3051_v41 = vadd.f32 %v9293_v24, %v2787_v0  ;;  %v9513_v20 = vadd.f32 %v2938_v12, %v2802_v58  ;;  %v9515_v11 = vadd.f32 %v2939_v9, %v2803_v2  ;;  %v3052_v19 = vadd.f32 %v9297_v34, %v2788_v40  ;;  %v15100_v0 = vld [vmem:[#allocation25_spill] sm:$0xff]  ;;  %v15101_v2 = vld [vmem:[#allocation35_spill] sm:$0xff] }
 0x18b   : > { %6675 = vst [vmem:[#allocation1 + $0x1] ss:$4 sm:$0xff] %v15092_v53  ;;  %v3057_v37 = vadd.f32 %v2929_v42, %v2793_v59  ;;  %v3058_v33 = vadd.f32 %v2930_v31, %v2794_v56  ;;  %v3193_v52 = vmul.f32 %v15099_v45, %v9413_v18  ;;  %v3059_v23 = vadd.f32 %v2931_v49, %v2795_v8  ;;  %v15103_v8 = vld [vmem:[#allocation30_spill] sm:$0xff]  ;;  %v15104_v9 = vld [vmem:[#allocation31_spill] sm:$0xff] }
 0x18c   : > { %15093 = vst [vmem:[#allocation68_spill] sm:$0xff] %v9507_v32  ;;  %v3185_v24 = vmul.f32 %v15099_v45, %v9352_v55  ;;  %v3186_v3 = vmul.f32 %v15065_v50, %v9059_v57  ;;  %v3187_v58 = vmul.f32 %v15100_v0, %v15075_v62  ;;  %v3188_v34 = vmul.f32 %v15101_v2, %v9075_v17 }
 0x18d   : > { %6677 = vst [vmem:[#allocation1 + $0x2] ss:$4 sm:$0xff] %v15094_v39  ;;  %v9518_v46 = vld.sshfl [vmem:[#allocation1 + $0x20] sm:$0xff pattern:$0x73625140]  ;;  %v3194_v56 = vmul.f32 %v15065_v50, %v9428_v28  ;;  %v3321_v40 = vadd.f32 %v3193_v52, %v3057_v37  ;;  %v3195_v60 = vmul.f32 %v15100_v0, %v9431_v47  ;;  %v3467_v12 = vmul.f32 %v15103_v8, %v9059_v57 }
 0x18e   : > { %15096 = vst [vmem:[#allocation44_spill] sm:$0xff] %v9513_v20  ;;  %v3468_v53 = vmul.f32 %v15104_v9, %v15075_v62  ;;  %7717 = vmatmul.msk.bf16.vlgmr.msra.gmra.mxu3 %vm1262_vm5, %v1261_v1  ;;  %v3476_v49 = vmul.f32 %v15103_v8, %v9428_v28  ;;  %v3477_v39 = vmul.f32 %v15104_v9, %v9431_v47 }
 0x18f   : > { %15097 = vst [vmem:[#allocation45_spill] sm:$0xff] %v9515_v11  ;;  %v3788_v52 = vrot.slane %v3467_v12, 7  ;;  %v3314_v63 = vadd.f32 %v3186_v3, %v3050_v27  ;;  %v3315_v3 = vadd.f32 %v3187_v58, %v3051_v41 }
 0x190   : > { %6679 = vst [vmem:[#allocation1 + $0x3] ss:$4 sm:$0xff] %v15098_v48  ;;  %v15106_v48 = vld [vmem:[#allocation43_spill] sm:$0xff]  ;;  %v3791_v11 = vrot.slane %v3468_v53, 7  ;;  %v3813_v50 = vrot.slane %v3476_v49, 7  ;;  %v3816_v0 = vrot.slane %v3477_v39, 7 }
 0x191   : > { %6694 = vst [vmem:[#allocation1 + $0x20] ss:$4 sm:$0xff] %v6429_v14  ;;  %v15102_v14 = vld [vmem:[#allocation29_spill] sm:$0xff]  ;;  %v3313_v37 = vadd.f32 %v3185_v24, %v15106_v48  ;;  %v3790_v8 = vrot.slane %v3788_v52, 2 }
 0x192   : > { %6695 = vst [vmem:[#allocation1 + $0x21] ss:$4 sm:$0xff] %v6430_v21  ;;  %v3466_v59 = vmul.f32 %v15102_v14, %v9352_v55  ;;  %v15105_v21 = vld [vmem:[#allocation34_spill] sm:$0xff]  ;;  %v3475_v31 = vmul.f32 %v15102_v14, %v9413_v18  ;;  %v3793_v51 = vrot.slane %v3791_v11, 2  ;;  %v3815_v12 = vrot.slane %v3813_v50, 2 }
 0x193   : > { %v3469_v42 = vmul.f32 %v15105_v21, %v9075_v17  ;;  %v9552_v25 = vmul.f32 %v15105_v21, %v9434_v54  ;;  %v3818_v53 = vrot.slane %v3816_v0, 2  ;;  %v3792_v27 = vsel %vm8176_vm10, %v3790_v8, %v3791_v11  ;;  %v15110_v8 = vld [vmem:[#allocation26_spill] sm:$0xff] }
 0x194   : > { %v7736_v32 = vrot.slane %v3466_v59, 9  ;;  %v7737_v1 = vrot.slane %v3475_v31, 9  ;;  %v3322_v59 = vadd.f32 %v3194_v56, %v3058_v33  ;;  %v3323_v31 = vadd.f32 %v3195_v60, %v3059_v23 }
 0x195   : > { %v3794_v20 = vrot.slane %v3469_v42, 7  ;;  %v3819_v9 = vrot.slane %v9552_v25, 7  ;;  %v15108_v42 = vld [vmem:[#allocation74_spill] sm:$0xff]  ;;  %v3316_v23 = vadd.f32 %v3188_v34, %v3052_v19  ;;  %v15109_v11 = vrot.slane %v9283_v30, 7 }
 0x196   : > { %v3814_v24 = vsel %vm8176_vm10, %v7737_v1, %v3813_v50  ;;  %v3789_v49 = vsel %vm8176_vm10, %v7736_v32, %v3788_v52  ;;  %v3817_v50 = vsel %vm8176_vm10, %v3815_v12, %v3816_v0  ;;  %v4281_v58 = vadd.f32 %v3792_v27, %v3314_v63  ;;  %v15111_v34 = vld [vmem:[#allocation38_spill] sm:$0xff]  ;;  %v15113_v63 = vld [vmem:[#allocation16_spill] sm:$0xff] }
 0x197   : > { %v9555_v14 = vld.sshfl [vmem:[#allocation1] sm:$0xff pattern:$0x73625140]  ;;  %v3796_v21 = vrot.slane %v3794_v20, 2  ;;  %v3820_v33 = vsel %vm8176_vm10, %v3818_v53, %v3819_v9  ;;  %v4288_v56 = vadd.f32 %v3814_v24, %v3321_v40  ;;  %v4289_v32 = vadd.f32 %v3817_v50, %v3322_v59  ;;  %v15117_v53 = vld [vmem:[#allocation12_spill] sm:$0xff] }
 0x198   : > { %6691 = vst [vmem:[#allocation1 + $0x1] ss:$4 sm:$0xff] %v15107_v7  ;;  %v3795_v7 = vsel %vm8176_vm10, %v3793_v51, %v3794_v20  ;;  %v4290_v60 = vadd.f32 %v3820_v33, %v3323_v31  ;;  %v4280_v41 = vadd.f32 %v3789_v49, %v3313_v37  ;;  %v4424_v51 = vmul.f32 %v15037_v35, %v9428_v28 }
 0x199   : > { %6692 = vst [vmem:[#allocation1 + $0x2] ss:$4 sm:$0xff] %v15108_v42  ;;  %v4282_v20 = vadd.f32 %v3795_v7, %v3315_v3  ;;  %v4416_v0 = vmul.f32 %v15037_v35, %v9059_v57  ;;  %v4425_v19 = vmul.f32 %v15110_v8, %v9431_v47  ;;  %v4426_v40 = vmul.f32 %v15111_v34, %v9434_v54  ;;  %v1343_v3 = vpop.f32.mrf.mxu0  ;;  %v15118_v7 = vld [vmem:[#allocation48_spill] sm:$0xff] }
 0x19a   : > { %6693 = vst [vmem:[#allocation1 + $0x3] ss:$4 sm:$0xff] %v9454_v10  ;;  %v3798_v10 = vsel %vm8176_vm10, %v3796_v21, %v15109_v11  ;;  %v4417_v30 = vmul.f32 %v15110_v8, %v15075_v62  ;;  %v9589_v39 = vadd.f32 %v4424_v51, %v4288_v56  ;;  %v4672_v21 = vmul.f32 %v15113_v63, %v9352_v55  ;;  %v15116_v62 = vld [vmem:[#allocation49_spill] sm:$0xff]  ;;  %v15119_v56 = vld [vmem:[#allocation20_spill] sm:$0xff] }
 0x19b   : > { %v4680_v48 = vmul.f32 %v15113_v63, %v9413_v18  ;;  %v4418_v57 = vmul.f32 %v15111_v34, %v9075_v17  ;;  %v9597_v37 = vadd.f32 %v4425_v19, %v4289_v32  ;;  %v9599_v52 = vadd.f32 %v4426_v40, %v4290_v60  ;;  %v15120_v51 = vld [vmem:[#allocation69_spill] sm:$0xff] }
 0x19c   : > { %15112 = vst [vmem:[#allocation42_spill] sm:$0xff] %v9589_v39  ;;  %v4681_v1 = vmul.f32 %v8748_v15, %v9428_v28  ;;  %v4544_v24 = vadd.f32 %v4416_v0, %v4280_v41  ;;  %v4682_v12 = vmul.f32 %v15116_v62, %v9431_v47  ;;  %v4952_v42 = vmul.f32 %v15117_v53, %v9352_v55  ;;  %v15167_v39 = vld [vmem:[#allocation17_spill] sm:$0xff] }
 0x19d   : > { %15114 = vst [vmem:[#allocation67_spill] sm:$0xff] %v9597_v37  ;;  %v4961_v59 = vmul.f32 %v15117_v53, %v9413_v18  ;;  %v4545_v31 = vadd.f32 %v4417_v30, %v4281_v58  ;;  %v4546_v49 = vadd.f32 %v4418_v57, %v4282_v20  ;;  %v4962_v17 = vmul.f32 %v14962_v29, %v9428_v28  ;;  %v15165_v37 = vld [vmem:[#allocation32_spill] sm:$0xff] }
 0x19e   : > { %15115 = vst [vmem:[#allocation70_spill] sm:$0xff] %v9599_v52  ;;  %v4963_v27 = vmul.f32 %v14986_v16, %v9431_v47  ;;  %v4800_v50 = vadd.f32 %v4672_v21, %v15118_v7  ;;  %v4808_v33 = vadd.f32 %v4680_v48, %v4544_v24  ;;  %v4964_v32 = vmul.f32 %v15119_v56, %v9434_v54 }
 0x19f   : > { %v7751_v60 = vrot.slane %v4952_v42, 9  ;;  %v4809_v55 = vadd.f32 %v4681_v1, %v4545_v31  ;;  %v7752_v11 = vrot.slane %v4961_v59, 9  ;;  %v5283_v41 = vrot.slane %v4962_v17, 7  ;;  %v9626_v1 = vld [vmem:[%s14361_s3 + $0x8] ss:$0 sm:$0xff]  ;;  %v15123_v17 = vld [vmem:[#allocation33_spill] sm:$0xff] }
 0x1a0   : > { %v5286_v18 = vrot.slane %v4963_v27, 7  ;;  %v4810_v58 = vadd.f32 %v4682_v12, %v4546_v49  ;;  %v15121_v20 = vrot.slane %v15120_v51, 7  ;;  %v5289_v19 = vrot.slane %v4964_v32, 7  ;;  %15122 = vst [vmem:[#allocation71_spill] sm:$0xff] %v9626_v1 }
 0x1a1   : > { %v1344_v40 = vadd.f32 %v9028_v38, %v1343_v3  ;;  %v5284_v30 = vsel %vm8176_vm10, %v7752_v11, %v5283_v41  ;;  %v5285_v21 = vrot.slane %v5283_v41, 2  ;;  %v5911_v12 = vmul.f32 %v9626_v1, %v9428_v28  ;;  %v15124_v3 = vld [vmem:[#allocation72_spill] sm:$0xff]  ;;  %v9646_v11 = vld [vmem:[%s14362_s4] ss:$0 sm:$0xff] }
 0x1a2   : > { %v5259_v0 = vsel %vm8176_vm10, %v7751_v60, %v15121_v20  ;;  %v5288_v48 = vrot.slane %v5286_v18, 2  ;;  %v5775_v24 = vadd.f32 %v5284_v30, %v4808_v33  ;;  %v5912_v42 = vmul.f32 %v8797_v22, %v9431_v47  ;;  %15125 = vst [vmem:[#allocation57_spill] sm:$0xff] %v9646_v11  ;;  %v15127_v30 = vld [vmem:[#allocation55_spill] sm:$0xff] }
 0x1a3   : > { %v5767_v57 = vadd.f32 %v5259_v0, %v4800_v50  ;;  %v1432_v59 = vmax.f32 %v1344_v40, 0.0  ;;  %v5287_v31 = vsel %vm8176_vm10, %v5285_v21, %v5286_v18  ;;  %v5913_v27 = vmul.f32 %v15123_v17, %v9434_v54  ;;  %v15126_v18 = vld [vmem:[#allocation23_spill] sm:$0xff] }
 0x1a4   : > { %v5290_v49 = vsel %vm8176_vm10, %v5288_v48, %v5289_v19  ;;  %v5776_v50 = vadd.f32 %v5287_v31, %v4809_v55  ;;  %v6039_v32 = vadd.f32 %v5911_v12, %v5775_v24  ;;  %v3821_v28 = vrot.slane %v3819_v9, 2  ;;  %v15128_v48 = vld [vmem:[#allocation22_spill] sm:$0xff]  ;;  %v15130_v31 = vld [vmem:[#allocation39_spill] sm:$0xff] }
 0x1a5   : > { %v6031_v7 = vadd.f32 %v15124_v3, %v5767_v57  ;;  %v5777_v33 = vadd.f32 %v5290_v49, %v4810_v58  ;;  %v9639_v60 = vmin.f32 %v1432_v59, 6.0  ;;  %v4283_v47 = vadd.f32 %v3798_v10, %v3316_v23 }
 0x1a6   : > { %v2932_v51 = vmul.f32 %v15126_v18, %v9144_v5  ;;  %v6040_v20 = vadd.f32 %v5912_v42, %v5776_v50  ;;  %v6177_v58 = vadd.f32 %v9646_v11, %v6039_v32  ;;  %v5291_v25 = vrot.slane %v5289_v19, 2  ;;  %v15129_v19 = vld [vmem:[#allocation4_spill] sm:$0xff]  ;;  %v15131_v50 = vld [vmem:[#allocation50_spill] sm:$0xff] }
 0x1a7   : > { %v6169_v41 = vadd.f32 %v9646_v11, %v6031_v7  ;;  %v6041_v55 = vadd.f32 %v5913_v27, %v5777_v33  ;;  %v9653_v0 = vrot.slane %v9639_v60, 2  ;;  %v1832_v23 = vmul.f32 %v15039_v6, %v9434_v54  ;;  %v15162_v11 = vld [vmem:[#allocation2_spill] sm:$0xff] }
 0x1a8   : > { %v3196_v10 = vmul.f32 %v15101_v2, %v9434_v54  ;;  %v6178_v40 = vadd.f32 %v15079_v43, %v6040_v20  ;;  %v1993_v57 = vmul.f32 %v15128_v48, %v9639_v60  ;;  %v3060_v24 = vadd.f32 %v2932_v51, %v9494_v4  ;;  %v15132_v51 = vld [vmem:[#allocation37_spill] sm:$0xff] }
 0x1a9   : > { %v6297_v9 = vmax.f32 %v6169_v41, 0.0  ;;  %v6179_v21 = vadd.f32 %v15127_v30, %v6041_v55  ;;  %v6305_v12 = vmax.f32 %v6177_v58, 0.0  ;;  %v9666_v59 = vmul.f32 %v15129_v19, %v9653_v0 }
 0x1aa   : > { %v4419_v49 = vmul.f32 %v15130_v31, %v9144_v5  ;;  %v6306_v27 = vmax.f32 %v6178_v40, 0.0  ;;  %v2352_v7 = vrot.slane %v1993_v57, 7  ;;  %v4683_v33 = vmul.f32 %v15131_v50, %v9434_v54 }
 0x1ab   : > { %v6425_v42 = vmin.f32 %v6297_v9, 6.0  ;;  %v6307_v3 = vmax.f32 %v6179_v21, 0.0  ;;  %v14509_v32 = vrot.slane %v9666_v59, 7  ;;  %v3197_v4 = vmul.f32 %v15099_v45, %v9639_v60  ;;  %v15133_v21 = vld [vmem:[#allocation80_spill] sm:$0xff] }
 0x1ac   : > { %v3324_v41 = vadd.f32 %v3196_v10, %v3060_v24  ;;  %v3479_v20 = vmul.f32 %v15132_v51, %v9639_v60  ;;  %v1833_v55 = vmul.f32 %v15030_v61, %v9639_v60  ;;  %v2353_v5 = vsel %vm8176_vm10, %v9486_v26, %v2352_v7  ;;  %v15134_v26 = vld [vmem:[#allocation51_spill] sm:$0xff] }
 0x1ad   : > { %6690 = vst [vmem:[#allocation1] ss:$4 sm:$0xff] %v6425_v42  ;;  %v2354_v58 = vrot.slane %v2352_v7, 2  ;;  %v2940_v54 = vmul.f32 %v15126_v18, %v9639_v60  ;;  %v6433_v9 = vmin.f32 %v6305_v12, 6.0  ;;  %v2804_v40 = vadd.f32 %v2353_v5, %v1832_v23  ;;  %v15136_v5 = vld [vmem:[#allocation81_spill] sm:$0xff] }
 0x1ae   : > { %v9685_v57 = vadd.f32 %v3197_v4, %v15133_v21  ;;  %v3822_v10 = vrot.slane %v3479_v20, 7  ;;  %v6434_v24 = vmin.f32 %v6306_v27, 6.0  ;;  %v4684_v51 = vmul.f32 %v15113_v63, %v9639_v60  ;;  %v6888_v27 = vld [vmem:[%s14363_s5] sm:$0xf] }
 0x1af   : > { %v2356_v42 = vsel %vm8176_vm10, %v2354_v58, %v14509_v32  ;;  %v4965_v7 = vmul.f32 %v15134_v26, %v9639_v60  ;;  %v6435_v48 = vmin.f32 %v6307_v3, 6.0  ;;  %v9695_v52 = vadd.f32 %v2940_v54, %v2804_v40  ;;  %v1345_v32 = vpop.f32.mrf.mxu0  ;;  %v15138_v40 = vld [vmem:[#allocation53_spill] sm:$0xff] }
 0x1b0   : > { %v3823_v23 = vsel %vm8176_vm10, %v3821_v28, %v3822_v10  ;;  %v4547_v12 = vadd.f32 %v4419_v49, %v4283_v47  ;;  %v4427_v20 = vmul.f32 %v15130_v31, %v9639_v60  ;;  %v9705_v58 = vadd.f32 %v4684_v51, %v15136_v5 }
 0x1b1   : > { %15135 = vst [vmem:[#allocation60_spill] sm:$0xff] %v9695_v52  ;;  %v4291_v4 = vadd.f32 %v3823_v23, %v3324_v41  ;;  %v5292_v21 = vrot.slane %v4965_v7, 7  ;;  %v2805_v3 = vadd.f32 %v2356_v42, %v1833_v55  ;;  %v5914_v26 = vmul.f32 %v15138_v40, %v9639_v60  ;;  %v1368_v23 = vpop.f32.mrf.mxu2  ;;  %v15141_v42 = vld [vmem:[#allocation61_spill] sm:$0xff]  ;;  %v15159_v52 = vld [vmem:[#allocation66_spill] sm:$0xff] }
 0x1b2   : > { %15137 = vst [vmem:[#allocation47_spill] sm:$0xff] %v9705_v58  ;;  %v4811_v54 = vadd.f32 %v4683_v33, %v4547_v12  ;;  %v6944_v41 = vsel %vm6942_vm11, %v6888_v27, 0  ;;  %v6872_v51 = vpack.c.bf16 %v9518_v46, %v9555_v14  ;;  %v1369_v33 = vadd.f32 %v9028_v38, %v1368_v23 }
 0x1b3   : > { %v9711_v47 = vadd.f32 %v4427_v20, %v4291_v4  ;;  %v5293_v49 = vsel %vm8176_vm10, %v5291_v25, %v5292_v21  ;;  %6953 = vmatpush.bf16.msra.mxu1 %v6944_v41  ;;  %v1346_v55 = vadd.f32 %v9028_v38, %v1345_v32  ;;  %7835 = vmatpush.bf16.msrb.mxu3 %v6944_v41  ;;  %v15142_v12 = vrot.slane %v15141_v42, 7  ;;  %v15143_v20 = vld [vmem:[#allocation76_spill] sm:$0xff]  ;;  %v15148_v42 = vld [vmem:[#allocation41_spill] sm:$0xff] }
 0x1b4   : > { %v9709_v28 = vld.sshfl [vmem:[#allocation1] sm:$0xff pattern:$0x73625140]  ;;  %v5778_v7 = vadd.f32 %v5293_v49, %v4811_v54  ;;  %v15144_v25 = vrot.slane %v15143_v20, 7  ;;  %v9728_v46 = vrot.slane %v9639_v60, 4  ;;  %v2941_v14 = vmul.f32 %v15033_v44, %v9653_v0  ;;  %v15147_v41 = vld [vmem:[#allocation56_spill] sm:$0xff] }
 0x1b5   : > { %15139 = vst [vmem:[#allocation27_spill] sm:$0xff] %v9709_v28  ;;  %v9721_v4 = vrot.slane %v15142_v12, 2  ;;  %v9735_v38 = vrot.slane %v3822_v10, 2  ;;  %v1442_v5 = vmax.f32 %v1369_v33, 0.0  ;;  %v9739_v49 = vrot.slane %v5292_v21, 2  ;;  %v15149_v20 = vld [vmem:[#allocation58_spill] sm:$0xff] }
 0x1b6   : > { %15140 = vst [vmem:[#allocation75_spill] sm:$0xff] %v9711_v47  ;;  %v9725_v27 = vrot.slane %v15144_v25, 2  ;;  %v6042_v32 = vadd.f32 %v5914_v26, %v5778_v7  ;;  %v9737_v54 = vadd.f32 %v2941_v14, %v2805_v3  ;;  %7766 = vmatmul.msk.bf16.vlgmr.msra.gmra.mxu1 %vm6893_vm12, %v6872_v51  ;;  %v9743_v23 = vrot.slane %v15147_v41, 6  ;;  %v15150_v10 = vld [vmem:[#allocation62_spill] sm:$0xff]  ;;  %v15151_v3 = vld [vmem:[#allocation59_spill] sm:$0xff]  ;;  %v15152_v51 = vld [vmem:[#allocation77_spill] sm:$0xff] }
 0x1b7   : > { %6700 = vst [vmem:[#allocation1] ss:$4 sm:$0xff] %v6433_v9  ;;  %v9733_v9 = vrot.slane %v9639_v60, 6  ;;  %v9748_v60 = vmul.f32 %v15076_v36, %v15149_v20  ;;  %v9752_v26 = vmul.f32 %v15039_v6, %v15150_v10  ;;  %v9756_v21 = vmul.f32 %v15076_v36, %v15151_v3  ;;  %v15153_v33 = vld [vmem:[#allocation10_spill] sm:$0xff]  ;;  %v15158_v47 = vld [vmem:[#allocation7_spill] sm:$0xff] }
 0x1b8   : > { %6701 = vst [vmem:[#allocation1 + $0x1] ss:$4 sm:$0xff] %v6434_v24  ;;  %v1433_v24 = vmax.f32 %v1346_v55, 0.0  ;;  %v6180_v12 = vadd.f32 %v15148_v42, %v6042_v32  ;;  %v9760_v7 = vmul.f32 %v15039_v6, %v15152_v51  ;;  %v9764_v55 = vmul.f32 %v15153_v33, %v9653_v0 }
 0x1b9   : > { %6702 = vst [vmem:[#allocation1 + $0x2] ss:$4 sm:$0xff] %v6435_v48  ;;  %v1483_v48 = vmin.f32 %v1442_v5, 6.0  ;;  %v9768_v25 = vmul.f32 %v15076_v36, %v9728_v46  ;;  %v9780_v28 = vmul.f32 %v15039_v6, %v9733_v9  ;;  %v1987_v1 = vmul.f32 %v15158_v47, %v15152_v51 }
 0x1ba   : > { %15145 = vst [vmem:[#allocation40_spill] sm:$0xff] %v9737_v54  ;;  %v6308_v14 = vmax.f32 %v6180_v12, 0.0  ;;  %v9776_v20 = vmin.f32 %v1433_v24, 6.0  ;;  %v1978_v54 = vmul.f32 %v15158_v47, %v15150_v10  ;;  %v15163_v24 = vld [vmem:[#allocation5_spill] sm:$0xff] }
 0x1bb   : > { %15146 = vst [vmem:[#allocation43_spill] sm:$0xff] %v9739_v49  ;;  %v9770_v32 = vrot.slane %v1483_v48, 2  ;;  %v9772_v5 = vrot.slane %v1483_v48, 4  ;;  %v9774_v41 = vrot.slane %v1483_v48, 6  ;;  %v1986_v30 = vmul.f32 %v15163_v24, %v15151_v3 }
 0x1bc   : > { %15154 = vst [vmem:[#allocation73_spill] sm:$0xff] %v9764_v55  ;;  %v15160_v55 = vld [vmem:[#allocation21_spill] sm:$0xff]  ;;  %v6436_v12 = vmin.f32 %v6308_v14, 6.0  ;;  %v9804_v58 = vmul.f32 %v15126_v18, %v1483_v48  ;;  %v9807_v49 = vmul.f32 %v15165_v37, %v1483_v48  ;;  %v9811_v53 = vmul.f32 %v15163_v24, %v9728_v46 }
 0x1bd   : > { %15155 = vst [vmem:[#allocation74_spill] sm:$0xff] %v9770_v32  ;;  %v9786_v36 = vmul.f32 %v15160_v55, %v15159_v52  ;;  %v9789_v43 = vmul.f32 %v15160_v55, %v1483_v48  ;;  %v2034_v42 = vmul.f32 %v15162_v11, %v9770_v32  ;;  %v2035_v6 = vmul.f32 %v15129_v19, %v9772_v5 }
 0x1be   : > { %15156 = vst [vmem:[#allocation48_spill] sm:$0xff] %v9772_v5  ;;  %v2036_v22 = vmul.f32 %v15163_v24, %v9774_v41  ;;  %v1988_v14 = vmul.f32 %v15160_v55, %v9743_v23  ;;  %v9814_v56 = vmul.f32 %v15167_v39, %v1483_v48  ;;  %v9817_v63 = vrot.slane %v9776_v20, 2 }
 0x1bf   : > { %15157 = vst [vmem:[#allocation69_spill] sm:$0xff] %v9774_v41  ;;  %v7727_v17 = vrot.slane %v2034_v42, 9  ;;  %v2468_v16 = vrot.slane %v2035_v6, 7  ;;  %v1869_v42 = vmul.f32 %v15030_v61, %v9770_v32  ;;  %v9825_v15 = vmul.f32 %v15130_v31, %v1483_v48  ;;  %v15170_v32 = vld [vmem:[#allocation14_spill] sm:$0xff] }
 0x1c0   : > { %15161 = vst [vmem:[#allocation72_spill] sm:$0xff] %v9789_v43  ;;  %v2471_v29 = vrot.slane %v2036_v22, 7  ;;  %v2977_v39 = vmul.f32 %v15033_v44, %v9772_v5  ;;  %v9832_v50 = vrot.slane %v9776_v20, 4  ;;  %v2978_v62 = vmul.f32 %v15170_v32, %v9774_v41 }
 0x1c1   : > { %6703 = vst [vmem:[#allocation1 + $0x3] ss:$4 sm:$0xff] %v6436_v12  ;;  %v1870_v12 = vmul.f32 %v15153_v33, %v9772_v5  ;;  %v2469_v22 = vsel %vm8176_vm10, %v7727_v17, %v2468_v16  ;;  %v2470_v6 = vrot.slane %v2468_v16, 2  ;;  %v1837_v17 = vmul.f32 %v15030_v61, %v9817_v63 }
 0x1c2   : > { %15164 = vst [vmem:[#allocation80_spill] sm:$0xff] %v9804_v58  ;;  %v9838_v58 = vmul.f32 %v15138_v40, %v1483_v48  ;;  %v9843_v43 = vrot.slane %v2471_v29, 2  ;;  %v1996_v5 = vmul.f32 %v15158_v47, %v9733_v9  ;;  %v2841_v34 = vadd.f32 %v2469_v22, %v1869_v42  ;;  %v15173_v22 = vld [vmem:[#allocation63_spill] sm:$0xff] }
 0x1c3   : > { %15166 = vst [vmem:[#allocation81_spill] sm:$0xff] %v9807_v49  ;;  %v1997_v35 = vmul.f32 %v15160_v55, %v9776_v20  ;;  %v1998_v48 = vmul.f32 %v15162_v11, %v9817_v63  ;;  %v2472_v49 = vsel %vm8176_vm10, %v2470_v6, %v2471_v29  ;;  %v1838_v16 = vmul.f32 %v15153_v33, %v9832_v50 }
 0x1c4   : > { %15168 = vst [vmem:[#allocation61_spill] sm:$0xff] %v9814_v56  ;;  %v2333_v56 = vrot.slane %v1986_v30, 7  ;;  %v1999_v61 = vmul.f32 %v15129_v19, %v9832_v50  ;;  %v15174_v55 = vrot.slane %v15173_v22, 7  ;;  %v2339_v11 = vrot.slane %v1988_v14, 7 }
 0x1c5   : > { %15169 = vst [vmem:[#allocation76_spill] sm:$0xff] %v9825_v15  ;;  %v9841_v15 = vrot.slane %v9776_v20, 6  ;;  %v14547_v29 = vrot.slane %v9811_v53, 7  ;;  %v2842_v6 = vadd.f32 %v2472_v49, %v1870_v12  ;;  %v2361_v33 = vrot.slane %v1996_v5, 7  ;;  %v15176_v49 = vld [vmem:[#allocation15_spill] sm:$0xff] }
 0x1c6   : > { %15171 = vst [vmem:[#allocation56_spill] sm:$0xff] %v9838_v58  ;;  %v2311_v58 = vrot.slane %v1978_v54, 7  ;;  %v2310_v47 = vrot.slane %v15174_v55, 2  ;;  %v2335_v41 = vrot.slane %v2333_v56, 2  ;;  %v2364_v30 = vrot.slane %v1997_v35, 7 }
 0x1c7   : > { %15172 = vst [vmem:[#allocation58_spill] sm:$0xff] %v9843_v43  ;;  %v2336_v43 = vrot.slane %v1987_v1, 7  ;;  %v9862_v42 = vmul.f32 %v15163_v24, %v9841_v15  ;;  %v7723_v1 = vrot.slane %v1998_v48, 9  ;;  %v9867_v8 = vadd.f32 %v2977_v39, %v2841_v34  ;;  %v15179_v48 = vld [vmem:[#allocation78_spill] sm:$0xff] }
 0x1c8   : > { %v2313_v54 = vrot.slane %v2311_v58, 2  ;;  %v2314_v19 = vrot.slane %v9786_v36, 7  ;;  %v2360_v55 = vrot.slane %v14547_v29, 2  ;;  %v2312_v14 = vsel %vm8176_vm10, %v2310_v47, %v2311_v58 }
 0x1c9   : > { %v2338_v40 = vrot.slane %v2336_v43, 2  ;;  %15175 = vst [vmem:[#allocation62_spill] sm:$0xff] %v9867_v8  ;;  %v2363_v22 = vrot.slane %v2361_v33, 2  ;;  %v2368_v31 = vrot.slane %v1999_v61, 7  ;;  %v2927_v5 = vmul.f32 %v15176_v49, %v15150_v10 }
 0x1ca   : > { %v2315_v35 = vsel %vm8176_vm10, %v2313_v54, %v2314_v19  ;;  %v2334_v36 = vsel %vm8176_vm10, %v9721_v4, %v2333_v56  ;;  %v2337_v34 = vsel %vm8176_vm10, %v2335_v41, %v2336_v43  ;;  %v2362_v39 = vsel %vm8176_vm10, %v2360_v55, %v2361_v33 }
 0x1cb   : > { %v2340_v24 = vsel %vm8176_vm10, %v2338_v40, %v2339_v11  ;;  %v2365_v11 = vsel %vm8176_vm10, %v2363_v22, %v2364_v30  ;;  %v2369_v61 = vsel %vm8176_vm10, %v7723_v1, %v2368_v31  ;;  %v2370_v58 = vrot.slane %v2368_v31, 2 }
 0x1cc   : > { %v14546_v40 = vrot.slane %v9862_v42, 7  ;;  %v9892_v19 = vadd.f32 %v2978_v62, %v2842_v6  ;;  %v2800_v47 = vadd.f32 %v2340_v24, %v9760_v7  ;;  %v2807_v56 = vadd.f32 %v2362_v39, %v9768_v25 }
 0x1cd   : > { %v2808_v43 = vadd.f32 %v2365_v11, %v9780_v28  ;;  %v15178_v4 = vrot.slane %v9666_v59, 7  ;;  %v2791_v31 = vadd.f32 %v2312_v14, %v9748_v60  ;;  %v2809_v12 = vadd.f32 %v2369_v61, %v1837_v17  ;;  %v15184_v11 = vld [vmem:[#allocation25_spill] sm:$0xff] }
 0x1ce   : > { %15177 = vst [vmem:[#allocation59_spill] sm:$0xff] %v9892_v19  ;;  %v2372_v41 = vsel %vm8176_vm10, %v2370_v58, %v14546_v40  ;;  %v2792_v62 = vadd.f32 %v2315_v35, %v9752_v26  ;;  %v2798_v7 = vadd.f32 %v2334_v36, %v15179_v48  ;;  %v2799_v25 = vadd.f32 %v2337_v34, %v9756_v21  ;;  %v15187_v48 = vld [vmem:[#allocation68_spill] sm:$0xff] }
 0x1cf   : > { %v9899_v33 = vrot.slane %v15178_v4, 2  ;;  %v2810_v24 = vadd.f32 %v2372_v41, %v1838_v16  ;;  %v2928_v59 = vmul.f32 %v15126_v18, %v15159_v52  ;;  %v2936_v28 = vmul.f32 %v15126_v18, %v9743_v23  ;;  %v15186_v41 = vld [vmem:[#allocation46_spill] sm:$0xff] }
 0x1d0   : > { %v2943_v54 = vmul.f32 %v15176_v49, %v9733_v9  ;;  %v2944_v60 = vmul.f32 %v15126_v18, %v9776_v20  ;;  %v2934_v26 = vmul.f32 %v15170_v32, %v15151_v3  ;;  %v2935_v17 = vmul.f32 %v15176_v49, %v15152_v51 }
 0x1d1   : > { %v2945_v21 = vmul.f32 %v15033_v44, %v9832_v50  ;;  %v2946_v16 = vmul.f32 %v15170_v32, %v9841_v15  ;;  %v3055_v6 = vadd.f32 %v2927_v5, %v2791_v31  ;;  %v3064_v30 = vadd.f32 %v2936_v28, %v2800_v47  ;;  %v15189_v28 = vld [vmem:[#allocation31_spill] sm:$0xff] }
 0x1d2   : > { %v9925_v1 = vadd.f32 %v2943_v54, %v2807_v56  ;;  %v9927_v55 = vadd.f32 %v2944_v60, %v2808_v43  ;;  %v3056_v14 = vadd.f32 %v2928_v59, %v2792_v62  ;;  %v3184_v36 = vmul.f32 %v15101_v2, %v15150_v10  ;;  %v15185_v43 = vld [vmem:[#allocation24_spill] sm:$0xff]  ;;  %v15190_v60 = vld [vmem:[#allocation34_spill] sm:$0xff] }
 0x1d3   : > { %v9929_v22 = vadd.f32 %v2945_v21, %v2809_v12  ;;  %v9931_v35 = vadd.f32 %v2946_v16, %v2810_v24  ;;  %v3062_v34 = vadd.f32 %v2934_v26, %v2798_v7  ;;  %v3063_v39 = vadd.f32 %v2935_v17, %v2799_v25  ;;  %v15188_v25 = vld [vmem:[#allocation44_spill] sm:$0xff]  ;;  %v15191_v21 = vld [vmem:[#allocation30_spill] sm:$0xff] }
 0x1d4   : > { %15180 = vst [vmem:[#allocation77_spill] sm:$0xff] %v9925_v1  ;;  %v3199_v61 = vmul.f32 %v15184_v11, %v9728_v46  ;;  %v3200_v5 = vmul.f32 %v15101_v2, %v9733_v9  ;;  %v3191_v58 = vmul.f32 %v15184_v11, %v15151_v3  ;;  %v3192_v47 = vmul.f32 %v15101_v2, %v15152_v51 }
 0x1d5   : > { %15181 = vst [vmem:[#allocation66_spill] sm:$0xff] %v9927_v55  ;;  %v3201_v56 = vmul.f32 %v15099_v45, %v9817_v63  ;;  %v3202_v10 = vmul.f32 %v15185_v43, %v9832_v50  ;;  %v3198_v4 = vmul.f32 %v15185_v43, %v9653_v0  ;;  %v3312_v31 = vadd.f32 %v3184_v36, %v15186_v41 }
 0x1d6   : > { %15182 = vst [vmem:[#allocation63_spill] sm:$0xff] %v9929_v22  ;;  %v3327_v12 = vadd.f32 %v3199_v61, %v3063_v39  ;;  %v3328_v62 = vadd.f32 %v3200_v5, %v3064_v30  ;;  %v3465_v59 = vmul.f32 %v15165_v37, %v15159_v52  ;;  %v3472_v54 = vmul.f32 %v15189_v28, %v15151_v3 }
 0x1d7   : > { %15183 = vst [vmem:[#allocation78_spill] sm:$0xff] %v9931_v35  ;;  %v3329_v7 = vadd.f32 %v3201_v56, %v15187_v48  ;;  %v3330_v24 = vadd.f32 %v3202_v10, %v15188_v25  ;;  %v3473_v26 = vmul.f32 %v15190_v60, %v15152_v51  ;;  %v3474_v17 = vmul.f32 %v15165_v37, %v9743_v23  ;;  %v15192_v56 = vld [vmem:[#allocation29_spill] sm:$0xff] }
 0x1d8   : > { %v3480_v16 = vmul.f32 %v15191_v21, %v9653_v0  ;;  %v3481_v30 = vmul.f32 %v15189_v28, %v9728_v46  ;;  %v3319_v36 = vadd.f32 %v3191_v58, %v3055_v6  ;;  %v3320_v39 = vadd.f32 %v3192_v47, %v3056_v14  ;;  %v15193_v48 = vld [vmem:[#allocation65_spill] sm:$0xff] }
 0x1d9   : > { %v3482_v61 = vmul.f32 %v15190_v60, %v9733_v9  ;;  %v3483_v5 = vmul.f32 %v15165_v37, %v9776_v20  ;;  %v3484_v10 = vmul.f32 %v15192_v56, %v9817_v63  ;;  %v3485_v41 = vmul.f32 %v15191_v21, %v9832_v50  ;;  %v15220_v37 = vld [vmem:[#allocation67_spill] sm:$0xff] }
 0x1da   : > { %v15194_v25 = vrot.slane %v15193_v48, 7  ;;  %v3803_v29 = vrot.slane %v3472_v54, 7  ;;  %v3784_v44 = vrot.slane %v3465_v59, 7  ;;  %v3806_v35 = vrot.slane %v3473_v26, 7 }
 0x1db   : > { %v3825_v6 = vrot.slane %v3480_v16, 7  ;;  %v3828_v14 = vrot.slane %v3481_v30, 7  ;;  %v9976_v58 = vmul.f32 %v15189_v28, %v9841_v15  ;;  %v3809_v22 = vrot.slane %v3474_v17, 7 }
 0x1dc   : > { %v3783_v40 = vrot.slane %v15194_v25, 2  ;;  %v3805_v47 = vrot.slane %v3803_v29, 2  ;;  %v3831_v19 = vrot.slane %v3482_v61, 7  ;;  %v3808_v43 = vrot.slane %v3806_v35, 2  ;;  %v15195_v25 = vld [vmem:[#allocation79_spill] sm:$0xff] }
 0x1dd   : > { %v3827_v55 = vrot.slane %v3825_v6, 2  ;;  %v3830_v1 = vrot.slane %v3828_v14, 2  ;;  %v3804_v59 = vsel %vm8176_vm10, %v9725_v27, %v3803_v29  ;;  %v3834_v26 = vrot.slane %v3483_v5, 7 }
 0x1de   : > { %v3785_v8 = vsel %vm8176_vm10, %v3783_v40, %v3784_v44  ;;  %v3833_v54 = vrot.slane %v3831_v19, 2  ;;  %v7738_v16 = vrot.slane %v3484_v10, 9  ;;  %v3807_v30 = vsel %vm8176_vm10, %v3805_v47, %v3806_v35 }
 0x1df   : > { %v3826_v17 = vsel %vm8176_vm10, %v9735_v38, %v3825_v6  ;;  %v3832_v44 = vsel %vm8176_vm10, %v3830_v1, %v3831_v19  ;;  %v3838_v40 = vrot.slane %v3485_v41, 7  ;;  %v3326_v61 = vadd.f32 %v3198_v4, %v3062_v34 }
 0x1e0   : > { %v3810_v48 = vsel %vm8176_vm10, %v3808_v43, %v3809_v22  ;;  %v3829_v27 = vsel %vm8176_vm10, %v3827_v55, %v3828_v14  ;;  %v3835_v29 = vsel %vm8176_vm10, %v3833_v54, %v3834_v26  ;;  %v14550_v38 = vrot.slane %v9976_v58, 7  ;;  %v15198_v14 = vld [vmem:[#allocation26_spill] sm:$0xff] }
 0x1e1   : > { %v3839_v35 = vsel %vm8176_vm10, %v7738_v16, %v3838_v40  ;;  %v3840_v5 = vrot.slane %v3838_v40, 2  ;;  %v4279_v10 = vadd.f32 %v3785_v8, %v3312_v31  ;;  %v4285_v19 = vadd.f32 %v3804_v59, %v15195_v25  ;;  %v15199_v59 = vld [vmem:[#allocation38_spill] sm:$0xff] }
 0x1e2   : > { %v4286_v1 = vadd.f32 %v3807_v30, %v3319_v36  ;;  %v10001_v34 = vadd.f32 %v3826_v17, %v9685_v57  ;;  %v4294_v22 = vadd.f32 %v3832_v44, %v3327_v12  ;;  %v4293_v43 = vadd.f32 %v3829_v27, %v3326_v61  ;;  %v15197_v57 = vld [vmem:[#allocation39_spill] sm:$0xff]  ;;  %v15206_v27 = vld [vmem:[#allocation49_spill] sm:$0xff] }
 0x1e3   : > { %v3842_v55 = vsel %vm8176_vm10, %v3840_v5, %v14550_v38  ;;  %v4295_v4 = vadd.f32 %v3835_v29, %v3328_v62  ;;  %v4296_v41 = vadd.f32 %v3839_v35, %v3329_v7  ;;  %v15196_v6 = vrot.slane %v9811_v53, 7  ;;  %v15207_v35 = vld [vmem:[#allocation50_spill] sm:$0xff]  ;;  %v15215_v38 = vld [vmem:[#allocation19_spill] sm:$0xff] }
 0x1e4   : > { %v4287_v31 = vadd.f32 %v3810_v48, %v3320_v39  ;;  %v4297_v36 = vadd.f32 %v3842_v55, %v3330_v24  ;;  %v4415_v12 = vmul.f32 %v15197_v57, %v15159_v52  ;;  %v4421_v47 = vmul.f32 %v15198_v14, %v15151_v3  ;;  %v15200_v52 = vld [vmem:[#allocation9_spill] sm:$0xff]  ;;  %v15209_v55 = vld [vmem:[#allocation16_spill] sm:$0xff] }
 0x1e5   : > { %v10012_v8 = vsel %vm8176_vm10, %v9899_v33, %v15196_v6  ;;  %v4422_v54 = vmul.f32 %v15199_v59, %v15152_v51  ;;  %v4423_v62 = vmul.f32 %v15197_v57, %v9743_v23  ;;  %v4429_v53 = vmul.f32 %v15198_v14, %v9728_v46 }
 0x1e6   : > { %v4430_v33 = vmul.f32 %v15199_v59, %v9733_v9  ;;  %v4431_v7 = vmul.f32 %v15197_v57, %v9776_v20  ;;  %v4432_v24 = vmul.f32 %v15200_v52, %v9832_v50  ;;  %v4433_v39 = vmul.f32 %v15198_v14, %v9841_v15 }
 0x1e7   : > { %v4543_v26 = vadd.f32 %v4415_v12, %v4279_v10  ;;  %v4549_v16 = vadd.f32 %v4421_v47, %v4285_v19  ;;  %v4550_v30 = vadd.f32 %v4422_v54, %v4286_v1  ;;  %v10032_v17 = vadd.f32 %v4429_v53, %v4293_v43  ;;  %v15208_v10 = vld [vmem:[#allocation28_spill] sm:$0xff] }
 0x1e8   : > { %v10034_v44 = vadd.f32 %v4430_v33, %v4294_v22  ;;  %v10036_v40 = vadd.f32 %v4431_v7, %v4295_v4  ;;  %v10038_v61 = vadd.f32 %v4432_v24, %v4296_v41  ;;  %v10040_v48 = vadd.f32 %v4433_v39, %v4297_v36  ;;  %v15211_v12 = vld [vmem:[#allocation20_spill] sm:$0xff]  ;;  %v15212_v33 = vld [vmem:[#allocation42_spill] sm:$0xff] }
 0x1e9   : > { %15201 = vst [vmem:[#allocation46_spill] sm:$0xff] %v10032_v17  ;;  %v4678_v29 = vmul.f32 %v15206_v27, %v15151_v3  ;;  %v4679_v5 = vmul.f32 %v15207_v35, %v15152_v51  ;;  %v4685_v25 = vmul.f32 %v15208_v10, %v9653_v0  ;;  %v4686_v19 = vmul.f32 %v15206_v27, %v9728_v46  ;;  %v15210_v3 = vld [vmem:[#allocation36_spill] sm:$0xff]  ;;  %v15214_v24 = vld [vmem:[#allocation18_spill] sm:$0xff] }
 0x1ea   : > { %15202 = vst [vmem:[#allocation68_spill] sm:$0xff] %v10034_v44  ;;  %v4551_v1 = vadd.f32 %v4423_v62, %v4287_v31  ;;  %v4687_v22 = vmul.f32 %v15207_v35, %v9733_v9  ;;  %v4688_v43 = vmul.f32 %v15209_v55, %v9817_v63  ;;  %v4689_v4 = vmul.f32 %v15208_v10, %v9832_v50  ;;  %v15213_v62 = vld [vmem:[#allocation17_spill] sm:$0xff]  ;;  %v15219_v10 = vld [vmem:[#allocation43_spill] sm:$0xff] }
 0x1eb   : > { %15203 = vst [vmem:[#allocation44_spill] sm:$0xff] %v10036_v40  ;;  %v4806_v41 = vadd.f32 %v4678_v29, %v15210_v3  ;;  %v4807_v6 = vadd.f32 %v4679_v5, %v4543_v26  ;;  %v4813_v36 = vadd.f32 %v4685_v25, %v4549_v16  ;;  %v4959_v47 = vmul.f32 %v15211_v12, %v15152_v51 }
 0x1ec   : > { %15204 = vst [vmem:[#allocation65_spill] sm:$0xff] %v10038_v61  ;;  %v4814_v54 = vadd.f32 %v4686_v19, %v4550_v30  ;;  %v4815_v53 = vadd.f32 %v4687_v22, %v4551_v1  ;;  %v4816_v31 = vadd.f32 %v4688_v43, %v15212_v33  ;;  %v4960_v7 = vmul.f32 %v15213_v62, %v9743_v23  ;;  %v15216_v30 = vld [vmem:[#allocation12_spill] sm:$0xff] }
 0x1ed   : > { %15205 = vst [vmem:[#allocation79_spill] sm:$0xff] %v10040_v48  ;;  %v4966_v39 = vmul.f32 %v15214_v24, %v9653_v0  ;;  %v4967_v48 = vmul.f32 %v15215_v38, %v9728_v46  ;;  %v4968_v26 = vmul.f32 %v15211_v12, %v9733_v9  ;;  %v4969_v16 = vmul.f32 %v15213_v62, %v9776_v20  ;;  %v15217_v19 = vld [vmem:[#allocation64_spill] sm:$0xff] }
 0x1ee   : > { %v4970_v29 = vmul.f32 %v15216_v30, %v9817_v63  ;;  %v4971_v5 = vmul.f32 %v15214_v24, %v9832_v50  ;;  %v10076_v25 = vmul.f32 %v15215_v38, %v9841_v15  ;;  %v15218_v1 = vrot.slane %v15217_v19, 7 }
 0x1ef   : > { %v5276_v43 = vrot.slane %v4959_v47, 7  ;;  %v5279_v3 = vrot.slane %v4960_v7, 7  ;;  %v5295_v33 = vrot.slane %v4966_v39, 7  ;;  %v5298_v61 = vrot.slane %v4967_v48, 7 }
 0x1f0   : > { %v5275_v22 = vrot.slane %v15218_v1, 2  ;;  %v5301_v14 = vrot.slane %v4968_v26, 7  ;;  %v5304_v40 = vrot.slane %v4969_v16, 7  ;;  %v7753_v44 = vrot.slane %v4970_v29, 9  ;;  %v15221_v29 = vld [vmem:[#allocation47_spill] sm:$0xff] }
 0x1f1   : > { %v5308_v17 = vrot.slane %v4971_v5, 7  ;;  %v5278_v30 = vrot.slane %v5276_v43, 2  ;;  %v5296_v62 = vsel %vm8176_vm10, %v15219_v10, %v5295_v33  ;;  %v5297_v56 = vrot.slane %v5295_v33, 2  ;;  %v15223_v33 = vld [vmem:[#allocation53_spill] sm:$0xff] }
 0x1f2   : > { %v5277_v63 = vsel %vm8176_vm10, %v5275_v22, %v5276_v43  ;;  %v4817_v19 = vadd.f32 %v4689_v4, %v15220_v37  ;;  %v5300_v1 = vrot.slane %v5298_v61, 2  ;;  %v5303_v47 = vrot.slane %v5301_v14, 2 }
 0x1f3   : > { %v5310_v7 = vrot.slane %v5308_v17, 2  ;;  %v5280_v48 = vsel %vm8176_vm10, %v5278_v30, %v5279_v3  ;;  %v5299_v39 = vsel %vm8176_vm10, %v5297_v56, %v5298_v61  ;;  %v5309_v26 = vsel %vm8176_vm10, %v7753_v44, %v5308_v17  ;;  %v15222_v3 = vld [vmem:[#allocation33_spill] sm:$0xff] }
 0x1f4   : > { %v14555_v16 = vrot.slane %v10076_v25, 7  ;;  %v5302_v10 = vsel %vm8176_vm10, %v5300_v1, %v5301_v14  ;;  %v5305_v37 = vsel %vm8176_vm10, %v5303_v47, %v5304_v40  ;;  %v5773_v4 = vadd.f32 %v5277_v63, %v4806_v41  ;;  %v15224_v41 = vld [vmem:[#allocation71_spill] sm:$0xff]  ;;  %v15225_v63 = vld [vmem:[#allocation52_spill] sm:$0xff] }
 0x1f5   : > { %v5779_v5 = vadd.f32 %v5296_v62, %v15221_v29  ;;  %v5774_v56 = vadd.f32 %v5280_v48, %v4807_v6  ;;  %v5780_v61 = vadd.f32 %v5299_v39, %v4813_v36  ;;  %v5781_v22 = vadd.f32 %v5302_v10, %v4814_v54 }
 0x1f6   : > { %v5312_v30 = vsel %vm8176_vm10, %v5310_v7, %v14555_v16  ;;  %v5782_v17 = vadd.f32 %v5305_v37, %v4815_v53  ;;  %v5783_v44 = vadd.f32 %v5309_v26, %v4816_v31  ;;  %v5909_v14 = vmul.f32 %v15222_v3, %v15152_v51  ;;  %v15226_v26 = vld [vmem:[#allocation55_spill] sm:$0xff]  ;;  %v15227_v37 = vld [vmem:[#allocation41_spill] sm:$0xff]  ;;  %v15229_v16 = vld [vmem:[#allocation54_spill] sm:$0xff] }
 0x1f7   : > { %v5784_v43 = vadd.f32 %v5312_v30, %v4817_v19  ;;  %v5910_v40 = vmul.f32 %v15223_v33, %v9743_v23  ;;  %v5915_v62 = vmul.f32 %v15224_v41, %v9653_v0  ;;  %v5916_v1 = vmul.f32 %v15225_v63, %v9728_v46 }
 0x1f8   : > { %v5917_v6 = vmul.f32 %v15222_v3, %v9733_v9  ;;  %v5918_v36 = vmul.f32 %v15223_v33, %v9776_v20  ;;  %v5919_v54 = vmul.f32 %v15224_v41, %v9832_v50  ;;  %v5920_v51 = vmul.f32 %v15225_v63, %v9841_v15  ;;  %v1348_v9 = vpop.f32.mrf.mxu0  ;;  %v15228_v20 = vld [vmem:[#allocation57_spill] sm:$0xff] }
 0x1f9   : > { %v6037_v53 = vadd.f32 %v5909_v14, %v5773_v4  ;;  %v6038_v23 = vadd.f32 %v5910_v40, %v5774_v56  ;;  %v6043_v31 = vadd.f32 %v5915_v62, %v5779_v5  ;;  %v6044_v19 = vadd.f32 %v5916_v1, %v5780_v61 }
 0x1fa   : > { %v6045_v47 = vadd.f32 %v5917_v6, %v5781_v22  ;;  %v6046_v7 = vadd.f32 %v5918_v36, %v5782_v17  ;;  %v6047_v48 = vadd.f32 %v5919_v54, %v5783_v44  ;;  %v6048_v39 = vadd.f32 %v5920_v51, %v5784_v43  ;;  %v15231_v44 = vld [vmem:[#allocation73_spill] sm:$0xff] }
 0x1fb   : > { %v6175_v10 = vadd.f32 %v15226_v26, %v6037_v53  ;;  %v6176_v29 = vadd.f32 %v15227_v37, %v6038_v23  ;;  %v6181_v30 = vadd.f32 %v15228_v20, %v6043_v31  ;;  %v6182_v50 = vadd.f32 %v15229_v16, %v6044_v19 }
 0x1fc   : > { %v6183_v38 = vadd.f32 %v15226_v26, %v6045_v47  ;;  %v6184_v4 = vadd.f32 %v15227_v37, %v6046_v7  ;;  %v6185_v5 = vadd.f32 %v15228_v20, %v6047_v48  ;;  %v6186_v56 = vadd.f32 %v15229_v16, %v6048_v39 }
 0x1fd   : > { %v6303_v61 = vmax.f32 %v6175_v10, 0.0  ;;  %v15230_v22 = vrot.slane %v9862_v42, 7  ;;  %v2806_v43 = vadd.f32 %v10012_v8, %v15231_v44  ;;  %v2942_v14 = vmul.f32 %v15170_v32, %v9728_v46  ;;  %v1370_v42 = vpop.f32.mrf.mxu2  ;;  %v10139_v46 = vld [vmem:[%s14360_s2] ss:$0 sm:$0xff] }
 0x1fe   : > { %v6304_v40 = vmax.f32 %v6176_v29, 0.0  ;;  %v4428_v62 = vmul.f32 %v15200_v52, %v9653_v0  ;;  %v6313_v1 = vmax.f32 %v6185_v5, 0.0  ;;  %v6314_v6 = vmax.f32 %v6186_v56, 0.0  ;;  %v10142_v0 = vld.sshfl [vmem:[#allocation1] sm:$0xff pattern:$0x73625140] }
 0x1ff   : > { %v10128_v17 = vrot.slane %v15230_v22, 2  ;;  %v6431_v36 = vmin.f32 %v6303_v61, 6.0  ;;  %v6309_v54 = vmax.f32 %v6181_v30, 0.0  ;;  %v6310_v51 = vmax.f32 %v6182_v50, 0.0  ;;  %15232 = vst [vmem:[#allocation36_spill] sm:$0xff] %v10142_v0 }
 0x200   : > { %v6311_v53 = vmax.f32 %v6183_v38, 0.0  ;;  %v6432_v23 = vmin.f32 %v6304_v40, 6.0  ;;  %v6312_v31 = vmax.f32 %v6184_v4, 0.0  ;;  %v6441_v19 = vmin.f32 %v6313_v1, 6.0  ;;  %v1350_v40 = vpop.f32.mrf.mxu0 }
 0x201   : > { %v6442_v47 = vmin.f32 %v6314_v6, 6.0  ;;  %6696 = vst [vmem:[#allocation1 + $0x22] ss:$4 sm:$0xff] %v6431_v36  ;;  %v1371_v8 = vadd.f32 %v10139_v46, %v1370_v42  ;;  %v10144_v7 = vadd.f32 %v2942_v14, %v2806_v43  ;;  %v15234_v48 = vrot.slane %v9976_v58, 7  ;;  %v15237_v43 = vld [vmem:[#allocation69_spill] sm:$0xff]  ;;  %v15238_v14 = vld [vmem:[#allocation11_spill] sm:$0xff] }
 0x202   : > { %6697 = vst [vmem:[#allocation1 + $0x23] ss:$4 sm:$0xff] %v6432_v23  ;;  %v1349_v39 = vadd.f32 %v10139_v46, %v1348_v9  ;;  %v3203_v10 = vmul.f32 %v15184_v11, %v9841_v15  ;;  %v10154_v29 = vadd.f32 %v4428_v62, %v10001_v34  ;;  %v15235_v20 = vrot.slane %v10076_v25, 7  ;;  %v15236_v9 = vld [vmem:[#allocation45_spill] sm:$0xff]  ;;  %v15239_v6 = vld [vmem:[#allocation70_spill] sm:$0xff] }
 0x203   : > { %15233 = vst [vmem:[#allocation42_spill] sm:$0xff] %v10144_v7  ;;  %v10148_v38 = vrot.slane %v15234_v48, 2  ;;  %v1443_v50 = vmax.f32 %v1371_v8, 0.0  ;;  %v4690_v58 = vmul.f32 %v15206_v27, %v9841_v15  ;;  %v6437_v4 = vmin.f32 %v6309_v54, 6.0  ;;  %v15243_v42 = vld [vmem:[#allocation13_spill] sm:$0xff] }
 0x204   : > { %v10158_v30 = vrot.slane %v15235_v20, 2  ;;  %6710 = vst [vmem:[#allocation1] ss:$4 sm:$0xff] %v6441_v19  ;;  %v6438_v5 = vmin.f32 %v6310_v51, 6.0  ;;  %v1434_v56 = vmax.f32 %v1349_v39, 0.0  ;;  %v10163_v61 = vadd.f32 %v3203_v10, %v15236_v9  ;;  %v15244_v19 = vld [vmem:[#allocation7_spill] sm:$0xff] }
 0x205   : > { %6711 = vst [vmem:[#allocation1 + $0x1] ss:$4 sm:$0xff] %v6442_v47  ;;  %v6439_v22 = vmin.f32 %v6311_v53, 6.0  ;;  %v6440_v44 = vmin.f32 %v6312_v31, 6.0  ;;  %v1484_v34 = vmin.f32 %v1443_v50, 6.0  ;;  %v1871_v25 = vmul.f32 %v15238_v14, %v15237_v43  ;;  %v15247_v10 = vld [vmem:[#allocation3_spill] sm:$0xff] }
 0x206   : > { %v10167_v62 = vmin.f32 %v1434_v56, 6.0  ;;  %v10171_v1 = vmul.f32 %v15238_v14, %v9841_v15  ;;  %v10174_v36 = vadd.f32 %v4690_v58, %v15239_v6  ;;  %v10177_v54 = vadd.f32 %v10139_v46, %v1350_v40  ;;  %v15248_v50 = vld [vmem:[#allocation22_spill] sm:$0xff]  ;;  %v15249_v56 = vld [vmem:[#allocation4_spill] sm:$0xff] }
 0x207   : > { %v10179_v51 = vrot.slane %v1484_v34, 2  ;;  %v10181_v53 = vrot.slane %v1484_v34, 4  ;;  %v10183_v23 = vrot.slane %v1484_v34, 6  ;;  %v1872_v31 = vmul.f32 %v15243_v42, %v1484_v34 }
 0x208   : > { %v2037_v47 = vmul.f32 %v15244_v19, %v1484_v34  ;;  %v2979_v8 = vmul.f32 %v15176_v49, %v1484_v34  ;;  %v10189_v15 = vmul.f32 %v15101_v2, %v1484_v34  ;;  %v10192_v48 = vmul.f32 %v15190_v60, %v1484_v34 }
 0x209   : > { %15240 = vst [vmem:[#allocation64_spill] sm:$0xff] %v10179_v51  ;;  %v10194_v39 = vld.sshfl [vmem:[#allocation1 + $0x20] sm:$0xff pattern:$0x73625140]  ;;  %v1873_v20 = vmul.f32 %v15247_v10, %v10179_v51  ;;  %v2038_v58 = vmul.f32 %v15248_v50, %v10179_v51  ;;  %v10202_v9 = vmul.f32 %v15249_v56, %v10181_v53  ;;  %v2980_v40 = vmul.f32 %v15126_v18, %v10179_v51 }
 0x20a   : > { %15241 = vst [vmem:[#allocation43_spill] sm:$0xff] %v10181_v53  ;;  %v2474_v6 = vrot.slane %v2037_v47, 7  ;;  %v10208_v43 = vmul.f32 %v15199_v59, %v1484_v34  ;;  %v10211_v0 = vmul.f32 %v15207_v35, %v1484_v34  ;;  %v10215_v53 = vmul.f32 %v15211_v12, %v1484_v34 }
 0x20b   : > { %15242 = vst [vmem:[#allocation67_spill] sm:$0xff] %v10183_v23  ;;  %v2477_v7 = vrot.slane %v2038_v58, 7  ;;  %v10218_v16 = vmul.f32 %v15222_v3, %v1484_v34  ;;  %v15256_v51 = vrot.slane %v10192_v48, 7  ;;  %v10232_v34 = vrot.slane %v10167_v62, 4 }
 0x20c   : > { %15245 = vst [vmem:[#allocation47_spill] sm:$0xff] %v10189_v15  ;;  %v2476_v15 = vrot.slane %v2474_v6, 2 }
 0x20d   : > { %15246 = vst [vmem:[#allocation71_spill] sm:$0xff] %v10192_v48  ;;  %v2479_v58 = vrot.slane %v2477_v7, 2 }
 0x20e   : > { %15250 = vst [vmem:[#allocation57_spill] sm:$0xff] %v10202_v9 }
 0x20f   : > { %6704 = vst [vmem:[#allocation1 + $0x20] ss:$4 sm:$0xff] %v6437_v4  ;;  %v15255_v4 = vld [vmem:[#allocation58_spill] sm:$0xff] }
 0x210   : > { %15251 = vst [vmem:[#allocation73_spill] sm:$0xff] %v10208_v43  ;;  %v2475_v47 = vsel %vm8176_vm10, %v15255_v4, %v2474_v6  ;;  %v10225_v43 = vrot.slane %v15256_v51, 2  ;;  %v10237_v6 = vrot.slane %v10167_v62, 6  ;;  %v1840_v51 = vmul.f32 %v15243_v42, %v10167_v62 }
 0x211   : > { %15252 = vst [vmem:[#allocation45_spill] sm:$0xff] %v10211_v0  ;;  %v2843_v32 = vadd.f32 %v2475_v47, %v1871_v25 }
 0x212   : > { %6705 = vst [vmem:[#allocation1 + $0x21] ss:$4 sm:$0xff] %v6438_v5  ;;  %v10228_v5 = vrot.slane %v10167_v62, 2 }
 0x213   : > { %15253 = vst [vmem:[#allocation70_spill] sm:$0xff] %v10215_v53  ;;  %v10247_v0 = vadd.f32 %v2979_v8, %v2843_v32  ;;  %v2947_v32 = vmul.f32 %v15176_v49, %v10167_v62 }
 0x214   : > { %15254 = vst [vmem:[#allocation82_spill] sm:$0xff] %v10218_v16  ;;  %v1841_v4 = vmul.f32 %v15247_v10, %v10228_v5  ;;  %v2001_v16 = vmul.f32 %v15244_v19, %v10167_v62  ;;  %v2002_v48 = vmul.f32 %v15248_v50, %v10228_v5  ;;  %v10261_v10 = vmul.f32 %v15249_v56, %v10232_v34  ;;  %v15270_v50 = vld [vmem:[#allocation40_spill] sm:$0xff] }
 0x215   : > { %6706 = vst [vmem:[#allocation1 + $0x22] ss:$4 sm:$0xff] %v6439_v22  ;;  %v2478_v22 = vsel %vm8176_vm10, %v2476_v15, %v2477_v7 }
 0x216   : > { %15257 = vst [vmem:[#allocation58_spill] sm:$0xff] %v10225_v43  ;;  %v2844_v47 = vadd.f32 %v2478_v22, %v1872_v31  ;;  %v15262_v43 = vrot.slane %v10215_v53, 7  ;;  %v3204_v31 = vmul.f32 %v15101_v2, %v10167_v62  ;;  %v2374_v8 = vrot.slane %v2001_v16, 7 }
 0x217   : > { %6707 = vst [vmem:[#allocation1 + $0x23] ss:$4 sm:$0xff] %v6440_v44  ;;  %v15260_v44 = vrot.slane %v10202_v9, 7 }
 0x218   : > { %15258 = vst [vmem:[#allocation83_spill] sm:$0xff] %v10232_v34  ;;  %v10251_v7 = vrot.slane %v15262_v43, 2  ;;  %v2948_v43 = vmul.f32 %v15126_v18, %v10228_v5  ;;  %v2375_v16 = vsel %vm8176_vm10, %v10128_v17, %v2374_v8  ;;  %v4434_v17 = vmul.f32 %v15199_v59, %v10167_v62 }
 0x219   : > { %15259 = vst [vmem:[#allocation84_spill] sm:$0xff] %v10237_v6  ;;  %v2481_v25 = vsel %vm8176_vm10, %v2479_v58, %v15260_v44  ;;  %v10263_v58 = vadd.f32 %v2980_v40, %v2844_v47  ;;  %v3205_v44 = vmul.f32 %v15099_v45, %v10228_v5  ;;  %v3487_v40 = vmul.f32 %v15190_v60, %v10167_v62  ;;  %v15268_v47 = vld [vmem:[#allocation37_spill] sm:$0xff] }
 0x21a   : > { %15261 = vst [vmem:[#allocation85_spill] sm:$0xff] %v10247_v0  ;;  %v10253_v15 = vadd.f32 %v2481_v25, %v1873_v20  ;;  %v2377_v20 = vrot.slane %v2002_v48, 7  ;;  %v15267_v25 = vld [vmem:[#allocation60_spill] sm:$0xff]  ;;  %v3488_v53 = vmul.f32 %v15268_v47, %v10228_v5  ;;  %v2376_v48 = vrot.slane %v2374_v8, 2 }
 0x21b   : > { %15263 = vst [vmem:[#allocation86_spill] sm:$0xff] %v10251_v7  ;;  %v3332_v7 = vadd.f32 %v3204_v31, %v15267_v25  ;;  %v3333_v9 = vadd.f32 %v3205_v44, %v15270_v50  ;;  %v2811_v31 = vadd.f32 %v2375_v16, %v10171_v1  ;;  %v3844_v25 = vrot.slane %v3487_v40, 7 }
 0x21c   : > { %15264 = vst [vmem:[#allocation87_spill] sm:$0xff] %v10253_v15  ;;  %v10281_v15 = vmul.f32 %v15191_v21, %v10232_v34  ;;  %v2379_v22 = vrot.slane %v2377_v20, 2  ;;  %v3847_v56 = vrot.slane %v3488_v53, 7  ;;  %v2378_v0 = vsel %vm8176_vm10, %v2376_v48, %v2377_v20 }
 0x21d   : > { %15265 = vst [vmem:[#allocation88_spill] sm:$0xff] %v10261_v10  ;;  %v15271_v47 = vrot.slane %v10261_v10, 7  ;;  %v4435_v50 = vmul.f32 %v15197_v57, %v10228_v5  ;;  %v2812_v8 = vadd.f32 %v2378_v0, %v1840_v51  ;;  %v10301_v53 = vadd.f32 %v2947_v32, %v2811_v31  ;;  %v15273_v32 = vld [vmem:[#allocation51_spill] sm:$0xff] }
 0x21e   : > { %15266 = vst [vmem:[#allocation89_spill] sm:$0xff] %v10263_v58  ;;  %v14570_v58 = vrot.slane %v10281_v15, 7  ;;  %v3845_v20 = vsel %vm8176_vm10, %v10148_v38, %v3844_v25  ;;  %v3846_v44 = vrot.slane %v3844_v25, 2  ;;  %v3849_v40 = vrot.slane %v3847_v56, 2  ;;  %v15274_v25 = vld [vmem:[#allocation75_spill] sm:$0xff] }
 0x21f   : > { %15269 = vst [vmem:[#allocation60_spill] sm:$0xff] %v10281_v15  ;;  %v2381_v21 = vsel %vm8176_vm10, %v2379_v22, %v15271_v47  ;;  %v4298_v16 = vadd.f32 %v3845_v20, %v10163_v61  ;;  %v4436_v22 = vmul.f32 %v15200_v52, %v10232_v34  ;;  %v10309_v47 = vadd.f32 %v2948_v43, %v2812_v8 }
 0x220   : > { %v10299_v1 = vadd.f32 %v2381_v21, %v1841_v4  ;;  %v4691_v0 = vmul.f32 %v15207_v35, %v10167_v62  ;;  %v4692_v21 = vmul.f32 %v15209_v55, %v10228_v5  ;;  %v4973_v51 = vmul.f32 %v15211_v12, %v10167_v62 }
 0x221   : > { %v3848_v38 = vsel %vm8176_vm10, %v3846_v44, %v3847_v56  ;;  %v3851_v61 = vsel %vm8176_vm10, %v3849_v40, %v14570_v58  ;;  %v10323_v4 = vadd.f32 %v4434_v17, %v4298_v16  ;;  %v4974_v43 = vmul.f32 %v15273_v32, %v10228_v5 }
 0x222   : > { %15272 = vst [vmem:[#allocation40_spill] sm:$0xff] %v10299_v1  ;;  %v4299_v48 = vadd.f32 %v3848_v38, %v3332_v7  ;;  %v4300_v31 = vadd.f32 %v3851_v61, %v3333_v9  ;;  %v4819_v8 = vadd.f32 %v4691_v0, %v15274_v25  ;;  %v4820_v20 = vadd.f32 %v4692_v21, %v10154_v29  ;;  %v1373_v38 = vpop.f32.mrf.mxu2 }
 0x223   : > { %v10331_v1 = vmul.f32 %v15214_v24, %v10232_v34  ;;  %v5314_v56 = vrot.slane %v4973_v51, 7  ;;  %v5317_v44 = vrot.slane %v4974_v43, 7  ;;  %v5921_v40 = vmul.f32 %v15222_v3, %v10167_v62  ;;  %v15277_v43 = vld [vmem:[#allocation5_spill] sm:$0xff] }
 0x224   : > { %v10335_v17 = vadd.f32 %v4435_v50, %v4299_v48  ;;  %v10337_v16 = vadd.f32 %v4436_v22, %v4300_v31  ;;  %v5922_v9 = vmul.f32 %v15223_v33, %v10228_v5  ;;  %v5923_v7 = vmul.f32 %v15224_v41, %v10232_v34  ;;  %v15276_v50 = vld [vmem:[#allocation27_spill] sm:$0xff] }
 0x225   : > { %v5315_v29 = vsel %vm8176_vm10, %v10158_v30, %v5314_v56  ;;  %v5316_v0 = vrot.slane %v5314_v56, 2  ;;  %v5319_v21 = vrot.slane %v5317_v44, 2  ;;  %v14571_v51 = vrot.slane %v10331_v1, 7 }
 0x226   : > { %15275 = vst [vmem:[#allocation75_spill] sm:$0xff] %v10337_v16  ;;  %v5785_v62 = vadd.f32 %v5315_v29, %v10174_v36  ;;  %v6873_v22 = vpack.c.bf16 %v10194_v39, %v15276_v50  ;;  %v1374_v61 = vadd.f32 %v10139_v46, %v1373_v38  ;;  %v1875_v5 = vmul.f32 %v15238_v14, %v10183_v23 }
 0x227   : > { %v5318_v41 = vsel %vm8176_vm10, %v5316_v0, %v5317_v44  ;;  %v5321_v30 = vsel %vm8176_vm10, %v5319_v21, %v14571_v51  ;;  %v10361_v48 = vmul.f32 %v15277_v43, %v10183_v23  ;;  %v10365_v36 = vmul.f32 %v15189_v28, %v10183_v23  ;;  %v15280_v0 = vld [vmem:[#allocation19_spill] sm:$0xff] }
 0x228   : > { %v5786_v39 = vadd.f32 %v5318_v41, %v4819_v8  ;;  %v5787_v31 = vadd.f32 %v5321_v30, %v4820_v20  ;;  %v6049_v25 = vadd.f32 %v5921_v40, %v5785_v62  ;;  %7767 = vmatmul.msk.bf16.gmra.mxu1 %vm6893_vm12, %v6873_v22  ;;  %v1444_v56 = vmax.f32 %v1374_v61, 0.0 }
 0x229   : > { %15278 = vst [vmem:[#allocation27_spill] sm:$0xff] %v10361_v48  ;;  %v14573_v44 = vrot.slane %v10361_v48, 7  ;;  %v14572_v29 = vrot.slane %v10365_v36, 7  ;;  %v10372_v21 = vmul.f32 %v15280_v0, %v10183_v23  ;;  %v1435_v38 = vmax.f32 %v10177_v54, 0.0  ;;  %v10387_v54 = vld [vmem:[%s14362_s4] ss:$0 sm:$0xff] }
 0x22a   : > { %15279 = vst [vmem:[#allocation90_spill] sm:$0xff] %v10365_v36  ;;  %v6050_v50 = vadd.f32 %v5922_v9, %v5786_v39  ;;  %v6051_v58 = vadd.f32 %v5923_v7, %v5787_v31  ;;  %v6187_v51 = vadd.f32 %v15226_v26, %v6049_v25  ;;  %v1485_v8 = vmin.f32 %v1444_v56, 6.0  ;;  %v10410_v23 = vld.sshfl [vmem:[#allocation1 + $0x20] sm:$0xff pattern:$0x73625140] }
 0x22b   : > { %15281 = vst [vmem:[#allocation91_spill] sm:$0xff] %v10372_v21  ;;  %v2485_v20 = vrot.slane %v14573_v44, 2  ;;  %v3955_v40 = vrot.slane %v14572_v29, 2  ;;  %v10381_v22 = vmin.f32 %v1435_v38, 6.0  ;;  %v15285_v29 = vld [vmem:[#allocation21_spill] sm:$0xff] }
 0x22c   : > { %v6188_v61 = vadd.f32 %v15227_v37, %v6050_v50  ;;  %15282 = vst [vmem:[#allocation92_spill] sm:$0xff] %v10387_v54  ;;  %v6189_v9 = vadd.f32 %v10387_v54, %v6051_v58  ;;  %v6315_v7 = vmax.f32 %v6187_v51, 0.0  ;;  %v1611_v41 = vrot.slane %v1485_v8, 2 }
 0x22d   : > { %v10390_v30 = vrot.slane %v1485_v8, 4  ;;  %v10392_v39 = vrot.slane %v1485_v8, 6  ;;  %v1876_v31 = vmul.f32 %v15243_v42, %v1485_v8  ;;  %v2041_v25 = vmul.f32 %v15244_v19, %v1485_v8  ;;  %15288 = vst [vmem:[#allocation96_spill] sm:$0xff] %v10410_v23 }
 0x22e   : > { %v6316_v56 = vmax.f32 %v6188_v61, 0.0  ;;  %v6317_v38 = vmax.f32 %v6189_v9, 0.0  ;;  %v6443_v50 = vmin.f32 %v6315_v7, 6.0  ;;  %v2042_v44 = vmul.f32 %v15285_v29, %v1611_v41 }
 0x22f   : > { %15283 = vst [vmem:[#allocation93_spill] sm:$0xff] %v10390_v30  ;;  %v2486_v62 = vrot.slane %v2041_v25, 7  ;;  %v2983_v36 = vmul.f32 %v15176_v49, %v1485_v8  ;;  %v2984_v58 = vmul.f32 %v15126_v18, %v1611_v41  ;;  %v10400_v51 = vmul.f32 %v15101_v2, %v1485_v8  ;;  %v15287_v25 = vld [vmem:[#allocation32_spill] sm:$0xff] }
 0x230   : > { %15284 = vst [vmem:[#allocation94_spill] sm:$0xff] %v10392_v39  ;;  %v6444_v52 = vmin.f32 %v6316_v56, 6.0  ;;  %v6445_v16 = vmin.f32 %v6317_v38, 6.0  ;;  %v2489_v15 = vrot.slane %v2042_v44, 7  ;;  %v10404_v10 = vmul.f32 %v15099_v45, %v10390_v30  ;;  %v15289_v56 = vld [vmem:[#allocation29_spill] sm:$0xff] }
 0x231   : > { %15286 = vst [vmem:[#allocation95_spill] sm:$0xff] %v10400_v51  ;;  %v2487_v61 = vsel %vm8176_vm10, %v2485_v20, %v2486_v62  ;;  %v2488_v9 = vrot.slane %v2486_v62, 2  ;;  %v3527_v7 = vmul.f32 %v15190_v60, %v1485_v8  ;;  %v3528_v48 = vmul.f32 %v15287_v25, %v1611_v41 }
 0x232   : > { %6712 = vst [vmem:[#allocation1 + $0x2] ss:$4 sm:$0xff] %v6443_v50  ;;  %v2847_v51 = vadd.f32 %v2487_v61, %v1875_v5  ;;  %v10414_v38 = vmul.f32 %v15289_v56, %v10390_v30  ;;  %v10417_v44 = vmul.f32 %v15199_v59, %v1485_v8  ;;  %v10420_v50 = vmul.f32 %v15197_v57, %v1611_v41 }
 0x233   : > { %6713 = vst [vmem:[#allocation1 + $0x3] ss:$4 sm:$0xff] %v6444_v52  ;;  %v2490_v20 = vsel %vm8176_vm10, %v2488_v9, %v2489_v15  ;;  %v3956_v62 = vrot.slane %v3527_v7, 7  ;;  %v3959_v54 = vrot.slane %v3528_v48, 7  ;;  %v10425_v23 = vmul.f32 %v15207_v35, %v1485_v8 }
 0x234   : > { %15290 = vst [vmem:[#allocation97_spill] sm:$0xff] %v10417_v44  ;;  %v2848_v52 = vadd.f32 %v2490_v20, %v1876_v31  ;;  %v10427_v5 = vadd.f32 %v2983_v36, %v2847_v51  ;;  %v5013_v30 = vmul.f32 %v15211_v12, %v1485_v8  ;;  %v15296_v15 = vrot.slane %v10372_v21, 7 }
 0x235   : > { %15291 = vst [vmem:[#allocation98_spill] sm:$0xff] %v10420_v50  ;;  %v10433_v44 = vsel %vm8176_vm10, %v3955_v40, %v3956_v62  ;;  %v15295_v50 = vld [vmem:[#allocation17_spill] sm:$0xff]  ;;  %v10441_v36 = vmul.f32 %v15222_v3, %v1485_v8  ;;  %v10444_v31 = vmul.f32 %v15223_v33, %v1611_v41  ;;  %v10451_v20 = vrot.slane %v10381_v22, 2 }
 0x236   : > { %6714 = vst [vmem:[#allocation1 + $0x20] ss:$4 sm:$0xff] %v6445_v16  ;;  %v3958_v16 = vrot.slane %v3956_v62, 2  ;;  %v5014_v32 = vmul.f32 %v15295_v50, %v1611_v41  ;;  %v5425_v48 = vrot.slane %v15296_v15, 2  ;;  %v10438_v9 = vadd.f32 %v2984_v58, %v2848_v52 }
 0x237   : > { %15292 = vst [vmem:[#allocation99_spill] sm:$0xff] %v10425_v23  ;;  %v5426_v7 = vrot.slane %v5013_v30, 7  ;;  %v10454_v62 = vrot.slane %v10381_v22, 4  ;;  %v10461_v58 = vrot.slane %v10381_v22, 6  ;;  %v1843_v41 = vmul.f32 %v15238_v14, %v10237_v6 }
 0x238   : > { %15293 = vst [vmem:[#allocation100_spill] sm:$0xff] %v10427_v5  ;;  %v10448_v51 = vsel %vm8176_vm10, %v3958_v16, %v3959_v54  ;;  %v5429_v40 = vrot.slane %v5014_v32, 7  ;;  %v1844_v32 = vmul.f32 %v15243_v42, %v10381_v22  ;;  %v10469_v54 = vmul.f32 %v15277_v43, %v10237_v6 }
 0x239   : > { %15294 = vst [vmem:[#allocation101_spill] sm:$0xff] %v10433_v44  ;;  %v10458_v30 = vsel %vm8176_vm10, %v5425_v48, %v5426_v7  ;;  %v5428_v8 = vrot.slane %v5426_v7, 2  ;;  %v2005_v52 = vmul.f32 %v15244_v19, %v10381_v22  ;;  %v2006_v16 = vmul.f32 %v15285_v29, %v10451_v20  ;;  %v15308_v44 = vld [vmem:[#allocation66_spill] sm:$0xff] }
 0x23a   : > { %15297 = vst [vmem:[#allocation102_spill] sm:$0xff] %v10438_v9  ;;  %v2951_v48 = vmul.f32 %v15176_v49, %v10381_v22  ;;  %v2952_v7 = vmul.f32 %v15126_v18, %v10451_v20  ;;  %v3207_v61 = vmul.f32 %v15184_v11, %v10237_v6  ;;  %v10495_v23 = vmul.f32 %v15189_v28, %v10237_v6  ;;  %v15309_v9 = vld [vmem:[#allocation28_spill] sm:$0xff] }
 0x23b   : > { %15298 = vst [vmem:[#allocation103_spill] sm:$0xff] %v10441_v36  ;;  %v10477_v15 = vsel %vm8176_vm10, %v5428_v8, %v5429_v40  ;;  %v2386_v36 = vrot.slane %v2005_v52, 7  ;;  %v2389_v21 = vrot.slane %v2006_v16, 7  ;;  %v10490_v40 = vmul.f32 %v15099_v45, %v10454_v62  ;;  %v15306_v8 = vld [vmem:[#allocation77_spill] sm:$0xff] }
 0x23c   : > { %15299 = vst [vmem:[#allocation104_spill] sm:$0xff] %v10444_v31  ;;  %v14591_v31 = vrot.slane %v10469_v54, 7  ;;  %v3492_v49 = vmul.f32 %v15287_v25, %v10451_v20  ;;  %v10506_v45 = vmul.f32 %v15289_v56, %v10454_v62  ;;  %v4438_v29 = vmul.f32 %v15199_v59, %v10381_v22 }
 0x23d   : > { %15300 = vst [vmem:[#allocation105_spill] sm:$0xff] %v10448_v51  ;;  %v3491_v51 = vmul.f32 %v15190_v60, %v10381_v22  ;;  %v2388_v16 = vrot.slane %v2386_v36, 2  ;;  %v4693_v5 = vmul.f32 %v15309_v9, %v10232_v34 }
 0x23e   : > { %15301 = vst [vmem:[#allocation106_spill] sm:$0xff] %v10454_v62  ;;  %v2385_v52 = vrot.slane %v14591_v31, 2 }
 0x23f   : > { %15302 = vst [vmem:[#allocation107_spill] sm:$0xff] %v10458_v30  ;;  %v3208_v30 = vmul.f32 %v15101_v2, %v10381_v22  ;;  %v2390_v31 = vsel %vm8176_vm10, %v2388_v16, %v2389_v21  ;;  %v10536_v16 = vmul.f32 %v15209_v55, %v10454_v62 }
 0x240   : > { %15303 = vst [vmem:[#allocation108_spill] sm:$0xff] %v10461_v58  ;;  %v2387_v19 = vsel %vm8176_vm10, %v2385_v52, %v2386_v36  ;;  %v4694_v36 = vmul.f32 %v15206_v27, %v10237_v6 }
 0x241   : > { %15304 = vst [vmem:[#allocation109_spill] sm:$0xff] %v10469_v54  ;;  %v3336_v18 = vadd.f32 %v3208_v30, %v15308_v44  ;;  %v3859_v44 = vrot.slane %v3492_v49, 7  ;;  %v4439_v30 = vmul.f32 %v15197_v57, %v10451_v20  ;;  %v2815_v42 = vadd.f32 %v2387_v19, %v1843_v41 }
 0x242   : > { %15305 = vst [vmem:[#allocation110_spill] sm:$0xff] %v10477_v15  ;;  %v3335_v15 = vadd.f32 %v3207_v61, %v15306_v8  ;;  %v14596_v61 = vrot.slane %v10495_v23, 7  ;;  %v3856_v8 = vrot.slane %v3491_v51, 7  ;;  %v2816_v54 = vadd.f32 %v2390_v31, %v1844_v32 }
 0x243   : > { %15307 = vst [vmem:[#allocation77_spill] sm:$0xff] %v10495_v23  ;;  %v4695_v49 = vmul.f32 %v15207_v35, %v10381_v22  ;;  %v10526_v21 = vadd.f32 %v2951_v48, %v2815_v42  ;;  %v15313_v23 = vld [vmem:[#allocation68_spill] sm:$0xff] }
 0x244   : > { %v3855_v56 = vrot.slane %v14596_v61, 2  ;;  %v3858_v25 = vrot.slane %v3856_v8, 2  ;;  %v10528_v52 = vadd.f32 %v2952_v7, %v2816_v54  ;;  %v15312_v61 = vld [vmem:[#allocation46_spill] sm:$0xff]  ;;  %v4822_v34 = vadd.f32 %v4694_v36, %v15313_v23  ;;  %v15314_v42 = vld [vmem:[#allocation44_spill] sm:$0xff]  ;;  %v1375_v23 = vpop.f32.mrf.mxu2 }
 0x245   : > { %15310 = vst [vmem:[#allocation66_spill] sm:$0xff] %v10526_v21  ;;  %v4821_v51 = vadd.f32 %v4693_v5, %v15312_v61  ;;  %v4823_v48 = vadd.f32 %v4695_v49, %v15314_v42  ;;  %v4976_v54 = vmul.f32 %v15280_v0, %v10237_v6  ;;  %v15318_v61 = vrot.slane %v10331_v1, 7 }
 0x246   : > { %15311 = vst [vmem:[#allocation111_spill] sm:$0xff] %v10528_v52  ;;  %v3857_v19 = vsel %vm8176_vm10, %v3855_v56, %v3856_v8  ;;  %v3860_v31 = vsel %vm8176_vm10, %v3858_v25, %v3859_v44  ;;  %v4977_v56 = vmul.f32 %v15211_v12, %v10381_v22  ;;  %v5924_v49 = vmul.f32 %v15225_v63, %v10237_v6 }
 0x247   : > { %v4302_v41 = vadd.f32 %v3857_v19, %v3335_v15  ;;  %v4303_v32 = vadd.f32 %v3860_v31, %v3336_v18  ;;  %v4978_v18 = vmul.f32 %v15295_v50, %v10451_v20  ;;  %v15317_v15 = vld [vmem:[#allocation12_spill] sm:$0xff]  ;;  %v5322_v8 = vrot.slane %v15318_v61, 2 }
 0x248   : > { %v10553_v5 = vmul.f32 %v15317_v15, %v10454_v62  ;;  %v5323_v44 = vrot.slane %v4976_v54, 7  ;;  %v5326_v36 = vrot.slane %v4977_v56, 7  ;;  %v5925_v19 = vmul.f32 %v15222_v3, %v10381_v22  ;;  %v15319_v61 = vld [vmem:[#allocation24_spill] sm:$0xff]  ;;  %v15320_v62 = vld [vmem:[#allocation62_spill] sm:$0xff] }
 0x249   : > { %v10545_v7 = vadd.f32 %v4438_v29, %v4302_v41  ;;  %v10547_v25 = vadd.f32 %v4439_v30, %v4303_v32  ;;  %v5329_v29 = vrot.slane %v4978_v18, 7  ;;  %v5926_v31 = vmul.f32 %v15223_v33, %v10451_v20  ;;  %v1353_v41 = vpop.f32.mrf.mxu0  ;;  %v15321_v22 = vld [vmem:[#allocation30_spill] sm:$0xff] }
 0x24a   : > { %v5324_v32 = vsel %vm8176_vm10, %v5322_v8, %v5323_v44  ;;  %v5325_v1 = vrot.slane %v5323_v44, 2  ;;  %v5328_v42 = vrot.slane %v5326_v36, 2  ;;  %v1376_v54 = vadd.f32 %v10139_v46, %v1375_v23 }
 0x24b   : > { %15315 = vst [vmem:[#allocation46_spill] sm:$0xff] %v10545_v7  ;;  %v5788_v56 = vadd.f32 %v5324_v32, %v4821_v51  ;;  %v3242_v18 = vmul.f32 %v15319_v61, %v10392_v39  ;;  %v3369_v30 = vadd.f32 %v10404_v10, %v15320_v62  ;;  %v3530_v15 = vmul.f32 %v15321_v22, %v10392_v39  ;;  %v15322_v7 = vld [vmem:[#allocation59_spill] sm:$0xff] }
 0x24c   : > { %15316 = vst [vmem:[#allocation68_spill] sm:$0xff] %v10547_v25  ;;  %v5327_v20 = vsel %vm8176_vm10, %v5325_v1, %v5326_v36  ;;  %v5330_v8 = vsel %vm8176_vm10, %v5328_v42, %v5329_v29  ;;  %v1445_v44 = vmax.f32 %v1376_v54, 0.0  ;;  %v1354_v25 = vadd.f32 %v10139_v46, %v1353_v41  ;;  %v15324_v1 = vld [vmem:[#allocation54_spill] sm:$0xff]  ;;  %v15325_v29 = vld [vmem:[#allocation63_spill] sm:$0xff] }
 0x24d   : > { %v5789_v23 = vadd.f32 %v5327_v20, %v4822_v34  ;;  %v5790_v51 = vadd.f32 %v5330_v8, %v4823_v48  ;;  %v6052_v32 = vadd.f32 %v5924_v49, %v5788_v56  ;;  %v3370_v52 = vadd.f32 %v3242_v18, %v15322_v7  ;;  %v15330_v56 = vld [vmem:[#allocation37_spill] sm:$0xff] }
 0x24e   : > { %v10579_v21 = vmin.f32 %v1445_v44, 6.0  ;;  %v3963_v10 = vrot.slane %v3530_v15, 7  ;;  %v1436_v62 = vmax.f32 %v1354_v25, 0.0  ;;  %v3210_v39 = vmul.f32 %v15319_v61, %v10461_v58 }
 0x24f   : > { %v6053_v55 = vadd.f32 %v5925_v19, %v5789_v23  ;;  %v6054_v36 = vadd.f32 %v5926_v31, %v5790_v51  ;;  %v6190_v6 = vadd.f32 %v15324_v1, %v6052_v32  ;;  %v10586_v42 = vadd.f32 %v10490_v40, %v15325_v29  ;;  %v15333_v23 = vld [vmem:[#allocation89_spill] sm:$0xff] }
 0x250   : > { %15323 = vst [vmem:[#allocation44_spill] sm:$0xff] %v10579_v21  ;;  %v10589_v34 = vrot.slane %v10579_v21, 2  ;;  %v10592_v48 = vrot.slane %v10579_v21, 4  ;;  %v10595_v7 = vrot.slane %v10579_v21, 6  ;;  %v10599_v25 = vmul.f32 %v15238_v14, %v10579_v21 }
 0x251   : > { %v6191_v15 = vadd.f32 %v15226_v26, %v6053_v55  ;;  %v6192_v49 = vadd.f32 %v15227_v37, %v6054_v36  ;;  %v6318_v19 = vmax.f32 %v6190_v6, 0.0  ;;  %v3243_v40 = vmul.f32 %v15184_v11, %v10579_v21  ;;  %v15332_v6 = vld [vmem:[#allocation85_spill] sm:$0xff] }
 0x252   : > { %15326 = vst [vmem:[#allocation62_spill] sm:$0xff] %v10589_v34  ;;  %v3244_v31 = vmul.f32 %v15101_v2, %v10589_v34  ;;  %v3531_v41 = vmul.f32 %v15189_v28, %v10579_v21  ;;  %v3532_v54 = vmul.f32 %v15190_v60, %v10589_v34  ;;  %v10613_v18 = vmul.f32 %v15330_v56, %v10592_v48 }
 0x253   : > { %15327 = vst [vmem:[#allocation59_spill] sm:$0xff] %v10592_v48  ;;  %v6319_v55 = vmax.f32 %v6191_v15, 0.0  ;;  %v6320_v20 = vmax.f32 %v6192_v49, 0.0  ;;  %v6446_v8 = vmin.f32 %v6318_v19, 6.0  ;;  %v3371_v44 = vadd.f32 %v3243_v40, %v15332_v6  ;;  %v15336_v40 = vld [vmem:[#allocation26_spill] sm:$0xff] }
 0x254   : > { %15328 = vst [vmem:[#allocation63_spill] sm:$0xff] %v10595_v7  ;;  %v3372_v51 = vadd.f32 %v3244_v31, %v15333_v23  ;;  %v15334_v32 = vrot.slane %v10414_v38, 9  ;;  %v3965_v29 = vrot.slane %v3963_v10, 2  ;;  %v3969_v43 = vrot.slane %v3532_v54, 7 }
 0x255   : > { %15329 = vst [vmem:[#allocation112_spill] sm:$0xff] %v10599_v25  ;;  %v3966_v25 = vrot.slane %v3531_v41, 7  ;;  %v6447_v50 = vmin.f32 %v6319_v55, 6.0  ;;  %v6448_v61 = vmin.f32 %v6320_v20, 6.0  ;;  %v14611_v37 = vrot.slane %v10613_v18, 7  ;;  %v15339_v55 = vld [vmem:[#allocation78_spill] sm:$0xff] }
 0x256   : > { %15331 = vst [vmem:[#allocation113_spill] sm:$0xff] %v10613_v18  ;;  %v3964_v36 = vsel %vm8176_vm10, %v15334_v32, %v3963_v10  ;;  %v4473_v38 = vmul.f32 %v15336_v40, %v10579_v21  ;;  %v3971_v31 = vrot.slane %v3969_v43, 2  ;;  %v4474_v10 = vmul.f32 %v15199_v59, %v10589_v34 }
 0x257   : > { %6715 = vst [vmem:[#allocation1 + $0x21] ss:$4 sm:$0xff] %v6446_v8  ;;  %v3967_v15 = vsel %vm8176_vm10, %v3965_v29, %v3966_v25  ;;  %v3968_v49 = vrot.slane %v3966_v25, 2  ;;  %v10624_v19 = vadd.f32 %v3964_v36, %v3369_v30  ;;  %v4475_v41 = vmul.f32 %v15197_v57, %v10592_v48 }
 0x258   : > { %6716 = vst [vmem:[#allocation1 + $0x22] ss:$4 sm:$0xff] %v6447_v50  ;;  %v4337_v6 = vadd.f32 %v3967_v15, %v3370_v52  ;;  %v10636_v30 = vmul.f32 %v15206_v27, %v10579_v21  ;;  %v10638_v25 = vmin.f32 %v1436_v62, 6.0  ;;  %v3338_v50 = vadd.f32 %v3210_v39, %v15339_v55 }
 0x259   : > { %15335 = vst [vmem:[#allocation85_spill] sm:$0xff] %v10624_v19  ;;  %v3970_v54 = vsel %vm8176_vm10, %v3968_v49, %v3969_v43  ;;  %v3973_v52 = vsel %vm8176_vm10, %v3971_v31, %v14611_v37  ;;  %v15351_v19 = vld [vmem:[#allocation79_spill] sm:$0xff] }
 0x25a   : > { %6717 = vst [vmem:[#allocation1 + $0x23] ss:$4 sm:$0xff] %v6448_v61  ;;  %v4338_v20 = vadd.f32 %v3970_v54, %v3371_v44  ;;  %v10645_v8 = vadd.f32 %v4473_v38, %v4337_v6  ;;  %v3494_v61 = vmul.f32 %v15321_v22, %v10461_v58  ;;  %v4339_v43 = vadd.f32 %v3973_v52, %v3372_v51 }
 0x25b   : > { %15337 = vst [vmem:[#allocation89_spill] sm:$0xff] %v10636_v30  ;;  %v10650_v23 = vrot.slane %v10638_v25, 2  ;;  %v10653_v62 = vrot.slane %v10638_v25, 4  ;;  %v10656_v39 = vrot.slane %v10638_v25, 6  ;;  %v10662_v44 = vmul.f32 %v15238_v14, %v10638_v25 }
 0x25c   : > { %15338 = vst [vmem:[#allocation114_spill] sm:$0xff] %v10638_v25  ;;  %v10658_v32 = vadd.f32 %v4474_v10, %v4338_v20  ;;  %v3211_v36 = vmul.f32 %v15184_v11, %v10638_v25  ;;  %v3495_v51 = vmul.f32 %v15189_v28, %v10638_v25  ;;  %v10668_v29 = vadd.f32 %v4475_v41, %v4339_v43 }
 0x25d   : > { %15340 = vst [vmem:[#allocation78_spill] sm:$0xff] %v10645_v8  ;;  %v3212_v15 = vmul.f32 %v15101_v2, %v10650_v23  ;;  %v3496_v49 = vmul.f32 %v15190_v60, %v10650_v23  ;;  %v10676_v38 = vmul.f32 %v15330_v56, %v10653_v62  ;;  %v3863_v6 = vrot.slane %v3494_v61, 7  ;;  %v15364_v56 = vld [vmem:[#allocation92_spill] sm:$0xff] }
 0x25e   : > { %15341 = vst [vmem:[#allocation115_spill] sm:$0xff] %v10650_v23  ;;  %v3339_v31 = vadd.f32 %v3211_v36, %v10301_v53  ;;  %v3866_v10 = vrot.slane %v3495_v51, 7  ;;  %v4441_v54 = vmul.f32 %v15336_v40, %v10638_v25  ;;  %v4442_v20 = vmul.f32 %v15199_v59, %v10650_v23 }
 0x25f   : > { %15342 = vst [vmem:[#allocation116_spill] sm:$0xff] %v10653_v62  ;;  %v3340_v41 = vadd.f32 %v3212_v15, %v10309_v47  ;;  %v3869_v55 = vrot.slane %v3496_v49, 7  ;;  %v15347_v43 = vrot.slane %v10506_v45, 9  ;;  %v3865_v30 = vrot.slane %v3863_v6, 2 }
 0x260   : > { %15343 = vst [vmem:[#allocation117_spill] sm:$0xff] %v10658_v32  ;;  %v3868_v53 = vrot.slane %v3866_v10, 2  ;;  %v4443_v61 = vmul.f32 %v15197_v57, %v10653_v62  ;;  %v4697_v47 = vmul.f32 %v15309_v9, %v10461_v58  ;;  %v4698_v15 = vmul.f32 %v15206_v27, %v10638_v25 }
 0x261   : > { %15344 = vst [vmem:[#allocation118_spill] sm:$0xff] %v10662_v44  ;;  %v3864_v37 = vsel %vm8176_vm10, %v15347_v43, %v3863_v6  ;;  %v3871_v36 = vrot.slane %v3869_v55, 2  ;;  %v3867_v45 = vsel %vm8176_vm10, %v3865_v30, %v3866_v10  ;;  %v4699_v6 = vmul.f32 %v15207_v35, %v10650_v23  ;;  %v15349_v43 = vld [vmem:[#allocation65_spill] sm:$0xff] }
 0x262   : > { %15345 = vst [vmem:[#allocation119_spill] sm:$0xff] %v10668_v29  ;;  %v10692_v51 = vadd.f32 %v3864_v37, %v10586_v42  ;;  %v3870_v49 = vsel %vm8176_vm10, %v3868_v53, %v3869_v55  ;;  %v4824_v52 = vadd.f32 %v10536_v16, %v15349_v43  ;;  %v15350_v37 = vrot.slane %v10676_v38, 7 }
 0x263   : > { %15346 = vst [vmem:[#allocation120_spill] sm:$0xff] %v10676_v38  ;;  %v4306_v44 = vadd.f32 %v3870_v49, %v3339_v31  ;;  %v4825_v21 = vadd.f32 %v4697_v47, %v15351_v19  ;;  %v4826_v30 = vadd.f32 %v4698_v15, %v10323_v4  ;;  %v4827_v10 = vadd.f32 %v4699_v6, %v10335_v17  ;;  %v15355_v19 = vld [vmem:[#allocation51_spill] sm:$0xff]  ;;  %v15362_v38 = vld [vmem:[#allocation57_spill] sm:$0xff] }
 0x264   : > { %15348 = vst [vmem:[#allocation121_spill] sm:$0xff] %v10692_v51  ;;  %v3873_v42 = vsel %vm8176_vm10, %v3871_v36, %v15350_v37  ;;  %v4305_v51 = vadd.f32 %v3867_v45, %v3338_v50  ;;  %v4980_v55 = vmul.f32 %v15214_v24, %v10461_v58  ;;  %v4981_v43 = vmul.f32 %v15280_v0, %v10638_v25 }
 0x265   : > { %v4307_v34 = vadd.f32 %v3873_v42, %v3340_v41  ;;  %v10717_v16 = vadd.f32 %v4442_v20, %v4306_v44  ;;  %v4982_v50 = vmul.f32 %v15211_v12, %v10650_v23  ;;  %v10727_v4 = vmul.f32 %v15355_v19, %v10653_v62  ;;  %v1378_v41 = vpop.f32.mrf.mxu2 }
 0x266   : > { %v10715_v53 = vadd.f32 %v4441_v54, %v4305_v51  ;;  %v5333_v17 = vrot.slane %v4980_v55, 7  ;;  %v10732_v54 = vld [vmem:[%s14361_s3 + $0x8] ss:$0 sm:$0xff]  ;;  %v5336_v20 = vrot.slane %v4981_v43, 7  ;;  %v15356_v51 = vrot.slane %v10553_v5, 9 }
 0x267   : > { %15353 = vst [vmem:[#allocation79_spill] sm:$0xff] %v10717_v16  ;;  %v10723_v31 = vadd.f32 %v4443_v61, %v4307_v34  ;;  %v5927_v44 = vmul.f32 %v10732_v54, %v10461_v58  ;;  %v5339_v36 = vrot.slane %v4982_v50, 7  ;;  %v5928_v34 = vmul.f32 %v15225_v63, %v10638_v25  ;;  %v15357_v50 = vld [vmem:[#allocation43_spill] sm:$0xff]  ;;  %v15358_v25 = vld [vmem:[#allocation10_spill] sm:$0xff] }
 0x268   : > { %15352 = vst [vmem:[#allocation65_spill] sm:$0xff] %v10715_v53  ;;  %v5929_v61 = vmul.f32 %v15222_v3, %v10650_v23  ;;  %v5334_v47 = vsel %vm8176_vm10, %v15356_v51, %v5333_v17  ;;  %v5335_v15 = vrot.slane %v5333_v17, 2  ;;  %v5930_v49 = vmul.f32 %v15223_v33, %v10653_v62  ;;  %v15359_v17 = vld [vmem:[#allocation4_spill] sm:$0xff]  ;;  %v15365_v53 = vld [vmem:[#allocation67_spill] sm:$0xff] }
 0x269   : > { %15354 = vst [vmem:[#allocation122_spill] sm:$0xff] %v10723_v31  ;;  %v5338_v6 = vrot.slane %v5336_v20, 2  ;;  %v5341_v37 = vrot.slane %v5339_v36, 2  ;;  %v5791_v42 = vadd.f32 %v5334_v47, %v4824_v52  ;;  %v1379_v55 = vadd.f32 %v10139_v46, %v1378_v41 }
 0x26a   : > { %v5337_v43 = vsel %vm8176_vm10, %v5335_v15, %v5336_v20  ;;  %v1874_v5 = vmul.f32 %v15358_v25, %v15357_v50  ;;  %v1882_v51 = vmul.f32 %v15358_v25, %v10595_v7  ;;  %v10756_v45 = vmul.f32 %v15359_v17, %v10595_v7 }
 0x26b   : > { %v5340_v23 = vsel %vm8176_vm10, %v5338_v6, %v5339_v36  ;;  %v15361_v52 = vrot.slane %v10727_v4, 7  ;;  %v5792_v47 = vadd.f32 %v5337_v43, %v4825_v21  ;;  %v6055_v20 = vadd.f32 %v5927_v44, %v5791_v42  ;;  %v15366_v36 = vld [vmem:[#allocation14_spill] sm:$0xff]  ;;  %v15368_v21 = vld [vmem:[#allocation27_spill] sm:$0xff] }
 0x26c   : > { %15360 = vst [vmem:[#allocation123_spill] sm:$0xff] %v10756_v45  ;;  %v5793_v15 = vadd.f32 %v5340_v23, %v4826_v30  ;;  %v1446_v31 = vmax.f32 %v1379_v55, 0.0  ;;  %v15363_v19 = vrot.slane %v15362_v38, 7  ;;  %v14629_v16 = vrot.slane %v10756_v45, 7 }
 0x26d   : > { %v5343_v41 = vsel %vm8176_vm10, %v5341_v37, %v15361_v52  ;;  %v6056_v18 = vadd.f32 %v5928_v34, %v5792_v47  ;;  %v6193_v50 = vadd.f32 %v15364_v56, %v6055_v20  ;;  %v2982_v6 = vmul.f32 %v15366_v36, %v15365_v53  ;;  %v10779_v34 = vld.sshfl [vmem:[#allocation1] sm:$0xff pattern:$0x73625140] }
 0x26e   : > { %v5794_v58 = vadd.f32 %v5343_v41, %v4827_v10  ;;  %v2482_v29 = vrot.slane %v15363_v19, 2  ;;  %v6057_v32 = vadd.f32 %v5929_v61, %v5793_v15  ;;  %v10770_v48 = vmin.f32 %v1446_v31, 6.0  ;;  %15370 = vst [vmem:[#allocation92_spill] sm:$0xff] %v10779_v34  ;;  %v15371_v61 = vld [vmem:[#allocation41_spill] sm:$0xff] }
 0x26f   : > { %v15369_v44 = vrot.slane %v15368_v21, 7  ;;  %v6194_v38 = vadd.f32 %v15324_v1, %v6056_v18  ;;  %v6321_v30 = vmax.f32 %v6193_v50, 0.0  ;;  %v2507_v10 = vrot.slane %v14629_v16, 2  ;;  %v15374_v18 = vld [vmem:[#allocation5_spill] sm:$0xff] }
 0x270   : > { %v6058_v8 = vadd.f32 %v5930_v49, %v5794_v58  ;;  %15367 = vst [vmem:[#allocation57_spill] sm:$0xff] %v10770_v48  ;;  %v6195_v37 = vadd.f32 %v15226_v26, %v6057_v32  ;;  %v10784_v31 = vrot.slane %v10770_v48, 2  ;;  %v10787_v49 = vrot.slane %v10770_v48, 4 }
 0x271   : > { %v2484_v23 = vsel %vm8176_vm10, %v2482_v29, %v15369_v44  ;;  %v6322_v29 = vmax.f32 %v6194_v38, 0.0  ;;  %v6449_v42 = vmin.f32 %v6321_v30, 6.0  ;;  %v10791_v55 = vmul.f32 %v15374_v18, %v10770_v48  ;;  %v15378_v30 = vld [vmem:[#allocation100_spill] sm:$0xff] }
 0x272   : > { %v2846_v19 = vadd.f32 %v2484_v23, %v1874_v5  ;;  %v6196_v58 = vadd.f32 %v15371_v61, %v6058_v8  ;;  %15372 = vst [vmem:[#allocation27_spill] sm:$0xff] %v10784_v31  ;;  %v2990_v43 = vmul.f32 %v15366_v36, %v10770_v48  ;;  %v6323_v50 = vmax.f32 %v6195_v37, 0.0  ;;  %v15376_v8 = vld [vmem:[#allocation24_spill] sm:$0xff]  ;;  %v15379_v37 = vld [vmem:[#allocation102_spill] sm:$0xff] }
 0x273   : > { %15373 = vst [vmem:[#allocation124_spill] sm:$0xff] %v10787_v49  ;;  %v3246_v52 = vmul.f32 %v15376_v8, %v10595_v7  ;;  %v6450_v41 = vmin.f32 %v6322_v29, 6.0  ;;  %v14627_v47 = vrot.slane %v10791_v55, 7  ;;  %v3247_v20 = vmul.f32 %v15184_v11, %v10770_v48 }
 0x274   : > { %15375 = vst [vmem:[#allocation125_spill] sm:$0xff] %v10791_v55  ;;  %v6324_v5 = vmax.f32 %v6196_v58, 0.0  ;;  %v3110_v32 = vadd.f32 %v2982_v6, %v2846_v19  ;;  %v3248_v15 = vmul.f32 %v15101_v2, %v10784_v31  ;;  %v6451_v21 = vmin.f32 %v6323_v50, 6.0  ;;  %v15385_v55 = vld [vmem:[#allocation17_spill] sm:$0xff] }
 0x275   : > { %6720 = vst [vmem:[#allocation1] ss:$4 sm:$0xff] %v6449_v42  ;;  %v10804_v38 = vmul.f32 %v15321_v22, %v10595_v7  ;;  %v2509_v6 = vsel %vm8176_vm10, %v2507_v10, %v14627_v47  ;;  %v3375_v19 = vadd.f32 %v3247_v20, %v15378_v30  ;;  %v3535_v29 = vmul.f32 %v15189_v28, %v10770_v48 }
 0x276   : > { %v6452_v44 = vmin.f32 %v6324_v5, 6.0  ;;  %v3374_v23 = vadd.f32 %v3246_v52, %v3110_v32  ;;  %6721 = vst [vmem:[#allocation1 + $0x1] ss:$4 sm:$0xff] %v6450_v41  ;;  %v3376_v58 = vadd.f32 %v3248_v15, %v15379_v37  ;;  %v2854_v42 = vadd.f32 %v2509_v6, %v1882_v51  ;;  %v15380_v5 = vld [vmem:[#allocation32_spill] sm:$0xff] }
 0x277   : > { %15377 = vst [vmem:[#allocation126_spill] sm:$0xff] %v10804_v38  ;;  %v3536_v50 = vmul.f32 %v15190_v60, %v10784_v31  ;;  %v3537_v32 = vmul.f32 %v15380_v5, %v10787_v49  ;;  %v14628_v52 = vrot.slane %v10804_v38, 7  ;;  %v3978_v41 = vrot.slane %v3535_v29, 7 }
 0x278   : > { %6722 = vst [vmem:[#allocation1 + $0x2] ss:$4 sm:$0xff] %v6451_v21  ;;  %v4477_v10 = vmul.f32 %v15336_v40, %v10770_v48  ;;  %v4478_v20 = vmul.f32 %v15199_v59, %v10784_v31  ;;  %v4479_v15 = vmul.f32 %v15197_v57, %v10787_v49  ;;  %v10825_v51 = vadd.f32 %v2990_v43, %v2854_v42 }
 0x279   : > { %6723 = vst [vmem:[#allocation1 + $0x3] ss:$4 sm:$0xff] %v6452_v44  ;;  %v3977_v21 = vrot.slane %v14628_v52, 2  ;;  %v3981_v6 = vrot.slane %v3536_v50, 7  ;;  %v3984_v30 = vrot.slane %v3537_v32, 7  ;;  %v3980_v37 = vrot.slane %v3978_v41, 2 }
 0x27a   : > { %15381 = vst [vmem:[#allocation100_spill] sm:$0xff] %v10825_v51  ;;  %v10831_v44 = vmul.f32 %v15206_v27, %v10770_v48  ;;  %v10835_v29 = vmul.f32 %v15207_v35, %v10784_v31  ;;  %v10839_v47 = vmul.f32 %v15214_v24, %v10595_v7  ;;  %v5021_v50 = vmul.f32 %v15280_v0, %v10770_v48 }
 0x27b   : > { %v3979_v43 = vsel %vm8176_vm10, %v3977_v21, %v3978_v41  ;;  %v3983_v42 = vrot.slane %v3981_v6, 2  ;;  %v5022_v32 = vmul.f32 %v15211_v12, %v10784_v31  ;;  %v3982_v52 = vsel %vm8176_vm10, %v3980_v37, %v3981_v6  ;;  %v1355_v6 = vpop.f32.mrf.mxu0 }
 0x27c   : > { %15382 = vst [vmem:[#allocation102_spill] sm:$0xff] %v10831_v44  ;;  %v4341_v16 = vadd.f32 %v3979_v43, %v3374_v23  ;;  %v14635_v44 = vrot.slane %v10839_v47, 7  ;;  %v4342_v41 = vadd.f32 %v3982_v52, %v3375_v19  ;;  %v5448_v21 = vrot.slane %v5021_v50, 7  ;;  %v15399_v50 = vld [vmem:[#allocation84_spill] sm:$0xff] }
 0x27d   : > { %15383 = vst [vmem:[#allocation127_spill] sm:$0xff] %v10835_v29  ;;  %v5023_v29 = vmul.f32 %v15385_v55, %v10787_v49  ;;  %v3985_v53 = vsel %vm8176_vm10, %v3983_v42, %v3984_v30  ;;  %v5451_v34 = vrot.slane %v5022_v32, 7  ;;  %v10862_v61 = vmul.f32 %v15225_v63, %v10770_v48 }
 0x27e   : > { %15384 = vst [vmem:[#allocation128_spill] sm:$0xff] %v10839_v47  ;;  %v4343_v38 = vadd.f32 %v3985_v53, %v3376_v58  ;;  %v10854_v51 = vadd.f32 %v4477_v10, %v4341_v16  ;;  %v5447_v7 = vrot.slane %v14635_v44, 2  ;;  %v10858_v23 = vadd.f32 %v4478_v20, %v4342_v41  ;;  %v15412_v47 = vld [vmem:[#allocation21_spill] sm:$0xff] }
 0x27f   : > { %v5454_v45 = vrot.slane %v5023_v29, 7  ;;  %v5450_v37 = vrot.slane %v5448_v21, 2  ;;  %v5453_v43 = vrot.slane %v5451_v34, 2  ;;  %15388 = vst [vmem:[#allocation131_spill] sm:$0xff] %v10862_v61  ;;  %v10872_v16 = vmul.f32 %v15222_v3, %v10784_v31  ;;  %v15397_v29 = vld [vmem:[#allocation88_spill] sm:$0xff] }
 0x280   : > { %15386 = vst [vmem:[#allocation129_spill] sm:$0xff] %v10854_v51  ;;  %v10864_v30 = vadd.f32 %v4479_v15, %v4343_v38  ;;  %v10868_v53 = vsel %vm8176_vm10, %v5447_v7, %v5448_v21  ;;  %v10876_v19 = vmul.f32 %v15223_v33, %v10787_v49  ;;  %v1356_v52 = vadd.f32 %v10139_v46, %v1355_v6  ;;  %v15395_v7 = vld [vmem:[#allocation83_spill] sm:$0xff]  ;;  %v15401_v6 = vld [vmem:[#allocation109_spill] sm:$0xff] }
 0x281   : > { %15387 = vst [vmem:[#allocation130_spill] sm:$0xff] %v10858_v23  ;;  %v10880_v58 = vsel %vm8176_vm10, %v5450_v37, %v5451_v34  ;;  %v10884_v38 = vsel %vm8176_vm10, %v5453_v43, %v5454_v45  ;;  %v1842_v10 = vmul.f32 %v15358_v25, %v15395_v7  ;;  %v1850_v20 = vmul.f32 %v15358_v25, %v10656_v39  ;;  %v15415_v23 = vld [vmem:[#allocation66_spill] sm:$0xff] }
 0x282   : > { %15389 = vst [vmem:[#allocation132_spill] sm:$0xff] %v10864_v30  ;;  %v10893_v15 = vmul.f32 %v15359_v17, %v10656_v39  ;;  %v15398_v42 = vrot.slane %v15397_v29, 7  ;;  %v2950_v32 = vmul.f32 %v15366_v36, %v15399_v50  ;;  %v1437_v45 = vmax.f32 %v1356_v52, 0.0 }
 0x283   : > { %15390 = vst [vmem:[#allocation133_spill] sm:$0xff] %v10868_v53  ;;  %v3206_v46 = vmul.f32 %v15376_v8, %v15395_v7  ;;  %v3214_v41 = vmul.f32 %v15376_v8, %v10656_v39  ;;  %v10905_v21 = vmul.f32 %v15321_v22, %v10656_v39  ;;  %v15402_v37 = vrot.slane %v15401_v6, 7 }
 0x284   : > { %15391 = vst [vmem:[#allocation134_spill] sm:$0xff] %v10872_v16  ;;  %v2382_v34 = vrot.slane %v15398_v42, 2  ;;  %v14640_v29 = vrot.slane %v10893_v15, 7  ;;  %v15403_v42 = vld [vmem:[#allocation60_spill] sm:$0xff]  ;;  %v4437_v30 = vmul.f32 %v15336_v40, %v15399_v50  ;;  %v10916_v49 = vmin.f32 %v1437_v45, 6.0 }
 0x285   : > { %15392 = vst [vmem:[#allocation135_spill] sm:$0xff] %v10876_v19  ;;  %v15404_v44 = vrot.slane %v15403_v42, 7  ;;  %v15406_v19 = vld [vmem:[#allocation42_spill] sm:$0xff]  ;;  %v4701_v50 = vmul.f32 %v15309_v9, %v10656_v39 }
 0x286   : > { %15393 = vst [vmem:[#allocation136_spill] sm:$0xff] %v10880_v58  ;;  %v2384_v43 = vsel %vm8176_vm10, %v2382_v34, %v15402_v37  ;;  %v3334_v16 = vadd.f32 %v3206_v46, %v15406_v19  ;;  %v2407_v6 = vrot.slane %v14640_v29, 2  ;;  %v10934_v19 = vrot.slane %v10916_v49, 4  ;;  %v15410_v29 = vld [vmem:[#allocation13_spill] sm:$0xff]  ;;  %v15411_v58 = vld [vmem:[#allocation7_spill] sm:$0xff] }
 0x287   : > { %15394 = vst [vmem:[#allocation137_spill] sm:$0xff] %v10884_v38  ;;  %v3852_v52 = vrot.slane %v15404_v44, 2  ;;  %v2814_v31 = vadd.f32 %v2384_v43, %v1842_v10  ;;  %v15407_v38 = vld [vmem:[#allocation77_spill] sm:$0xff]  ;;  %v15409_v44 = vld [vmem:[#allocation16_spill] sm:$0xff]  ;;  %v10931_v10 = vrot.slane %v10916_v49, 2  ;;  %v1851_v45 = vmul.f32 %v15238_v14, %v10916_v49 }
 0x288   : > { %15396 = vst [vmem:[#allocation138_spill] sm:$0xff] %v10893_v15  ;;  %v15408_v34 = vrot.slane %v15407_v38, 7  ;;  %v4700_v42 = vmul.f32 %v15409_v44, %v10653_v62  ;;  %v2013_v38 = vmul.f32 %v15374_v18, %v10916_v49  ;;  %v2958_v46 = vmul.f32 %v15366_v36, %v10916_v49  ;;  %v15413_v18 = vld [vmem:[#allocation15_spill] sm:$0xff] }
 0x289   : > { %15400 = vst [vmem:[#allocation88_spill] sm:$0xff] %v10905_v21  ;;  %v3078_v43 = vadd.f32 %v2950_v32, %v2814_v31  ;;  %v1852_v61 = vmul.f32 %v15410_v29, %v10931_v10  ;;  %v2014_v53 = vmul.f32 %v15411_v58, %v10931_v10  ;;  %v2015_v48 = vmul.f32 %v15412_v47, %v10934_v19  ;;  %v15414_v31 = vld [vmem:[#allocation23_spill] sm:$0xff] }
 0x28a   : > { %15405 = vst [vmem:[#allocation84_spill] sm:$0xff] %v10916_v49  ;;  %v3854_v37 = vsel %vm8176_vm10, %v3852_v52, %v15408_v34  ;;  %v3215_v52 = vmul.f32 %v15184_v11, %v10916_v49  ;;  %v3499_v34 = vmul.f32 %v15189_v28, %v10916_v49  ;;  %v2408_v15 = vrot.slane %v2013_v38, 7  ;;  %v15416_v38 = vld [vmem:[#allocation111_spill] sm:$0xff] }
 0x28b   : > { %v2959_v36 = vmul.f32 %v15413_v18, %v10931_v10  ;;  %v2960_v32 = vmul.f32 %v15414_v31, %v10934_v19  ;;  %v3216_v11 = vmul.f32 %v15101_v2, %v10931_v10  ;;  %v3342_v28 = vadd.f32 %v3214_v41, %v3078_v43 }
 0x28c   : > { %v2409_v29 = vsel %vm8176_vm10, %v2407_v6, %v2408_v15  ;;  %v2410_v14 = vrot.slane %v2408_v15, 2  ;;  %v2411_v7 = vrot.slane %v2014_v53, 7  ;;  %v2414_v58 = vrot.slane %v2015_v48, 7 }
 0x28d   : > { %v2822_v62 = vadd.f32 %v2409_v29, %v1850_v20  ;;  %v3343_v47 = vadd.f32 %v3215_v52, %v15415_v23  ;;  %v3344_v51 = vadd.f32 %v3216_v11, %v15416_v38  ;;  %v3500_v18 = vmul.f32 %v15190_v60, %v10931_v10  ;;  %v1380_v29 = vpop.f32.mrf.mxu2 }
 0x28e   : > { %v2412_v31 = vsel %vm8176_vm10, %v2410_v14, %v2411_v7  ;;  %v2413_v44 = vrot.slane %v2411_v7, 2  ;;  %v3501_v41 = vmul.f32 %v15380_v5, %v10934_v19  ;;  %v15417_v6 = vrot.slane %v10905_v21, 7  ;;  %v15460_v5 = vld [vmem:[#allocation123_spill] sm:$0xff] }
 0x28f   : > { %v2823_v53 = vadd.f32 %v2412_v31, %v1851_v45  ;;  %v10970_v48 = vadd.f32 %v2958_v46, %v2822_v62  ;;  %v3878_v20 = vrot.slane %v3499_v34, 7  ;;  %v3881_v23 = vrot.slane %v3500_v18, 7 }
 0x290   : > { %v3877_v15 = vrot.slane %v15417_v6, 2  ;;  %v2415_v11 = vsel %vm8176_vm10, %v2413_v44, %v2414_v58  ;;  %v3884_v43 = vrot.slane %v3501_v41, 7  ;;  %v4301_v52 = vadd.f32 %v3854_v37, %v3334_v16 }
 0x291   : > { %v4445_v14 = vmul.f32 %v15336_v40, %v10916_v49  ;;  %v2824_v7 = vadd.f32 %v2415_v11, %v1852_v61  ;;  %v10976_v38 = vadd.f32 %v2959_v36, %v2823_v53  ;;  %v3880_v45 = vrot.slane %v3878_v20, 2 }
 0x292   : > { %v3879_v6 = vsel %vm8176_vm10, %v3877_v15, %v3878_v20  ;;  %v3883_v62 = vrot.slane %v3881_v23, 2  ;;  %v4446_v18 = vmul.f32 %v15199_v59, %v10931_v10  ;;  %v4447_v58 = vmul.f32 %v15197_v57, %v10934_v19  ;;  %v15419_v15 = vld [vmem:[#allocation75_spill] sm:$0xff]  ;;  %v15420_v20 = vld [vmem:[#allocation46_spill] sm:$0xff] }
 0x293   : > { %v4309_v46 = vadd.f32 %v3879_v6, %v3342_v28  ;;  %v10984_v44 = vadd.f32 %v2960_v32, %v2824_v7  ;;  %v3882_v16 = vsel %vm8176_vm10, %v3880_v45, %v3881_v23  ;;  %v4565_v61 = vadd.f32 %v4437_v30, %v4301_v52  ;;  %v15422_v30 = vld [vmem:[#allocation68_spill] sm:$0xff] }
 0x294   : > { %v4702_v36 = vmul.f32 %v15206_v27, %v10916_v49  ;;  %v3885_v37 = vsel %vm8176_vm10, %v3883_v62, %v3884_v43  ;;  %v4310_v34 = vadd.f32 %v3882_v16, %v3343_v47  ;;  %v4703_v31 = vmul.f32 %v15207_v35, %v10931_v10 }
 0x295   : > { %v10992_v28 = vadd.f32 %v4445_v14, %v4309_v46  ;;  %v4311_v41 = vadd.f32 %v3885_v37, %v3344_v51  ;;  %v4828_v32 = vadd.f32 %v4700_v42, %v15419_v15  ;;  %v4829_v53 = vadd.f32 %v4701_v50, %v4565_v61  ;;  %v1383_v37 = vpop.f32.mrf.mxu2  ;;  %v15426_v15 = vld [vmem:[#allocation96_spill] sm:$0xff] }
 0x296   : > { %v4830_v11 = vadd.f32 %v4702_v36, %v15420_v20  ;;  %v10998_v23 = vadd.f32 %v4446_v18, %v4310_v34  ;;  %v4831_v52 = vadd.f32 %v4703_v31, %v15422_v30  ;;  %v4984_v7 = vmul.f32 %v15214_v24, %v10656_v39  ;;  %v1358_v18 = vpop.f32.mrf.mxu0 }
 0x297   : > { %15418 = vst [vmem:[#allocation109_spill] sm:$0xff] %v10992_v28  ;;  %v4985_v47 = vmul.f32 %v15280_v0, %v10916_v49  ;;  %v11005_v43 = vadd.f32 %v4447_v58, %v4311_v41  ;;  %v4986_v51 = vmul.f32 %v15211_v12, %v10931_v10  ;;  %v4987_v42 = vmul.f32 %v15385_v55, %v10934_v19  ;;  %v15425_v41 = vld [vmem:[#allocation36_spill] sm:$0xff] }
 0x298   : > { %15421 = vst [vmem:[#allocation60_spill] sm:$0xff] %v10998_v23  ;;  %v15424_v50 = vrot.slane %v10727_v4, 7  ;;  %v5345_v6 = vrot.slane %v4984_v7, 7  ;;  %v5931_v62 = vmul.f32 %v10732_v54, %v10656_v39  ;;  %v5932_v46 = vmul.f32 %v15225_v63, %v10916_v49 }
 0x299   : > { %15423 = vst [vmem:[#allocation42_spill] sm:$0xff] %v11005_v43  ;;  %v5348_v45 = vrot.slane %v4985_v47, 7  ;;  %v5351_v58 = vrot.slane %v4986_v51, 7  ;;  %v5354_v16 = vrot.slane %v4987_v42, 7  ;;  %v5933_v61 = vmul.f32 %v15222_v3, %v10931_v10  ;;  %v11028_v47 = vld [vmem:[%s14360_s2] ss:$0 sm:$0xff] }
 0x29a   : > { %v5344_v14 = vrot.slane %v15424_v50, 2  ;;  %v5934_v36 = vmul.f32 %v15223_v33, %v10934_v19  ;;  %v5347_v34 = vrot.slane %v5345_v6, 2  ;;  %v6874_v20 = vpack.c.bf16 %v15426_v15, %v15425_v41 }
 0x29b   : > { %v5350_v31 = vrot.slane %v5348_v45, 2  ;;  %v5353_v30 = vrot.slane %v5351_v58, 2  ;;  %v1381_v10 = vadd.f32 %v11028_v47, %v1380_v29  ;;  %v1359_v19 = vadd.f32 %v11028_v47, %v1358_v18 }
 0x29c   : > { %v5346_v4 = vsel %vm8176_vm10, %v5344_v14, %v5345_v6  ;;  %v5349_v51 = vsel %vm8176_vm10, %v5347_v34, %v5348_v45  ;;  %7768 = vmatmul.msk.bf16.gmra.mxu1 %vm6893_vm12, %v6874_v20  ;;  %v1384_v50 = vadd.f32 %v11028_v47, %v1383_v37  ;;  %v15428_v14 = vld [vmem:[#allocation3_spill] sm:$0xff]  ;;  %v15429_v37 = vld [vmem:[#allocation22_spill] sm:$0xff] }
 0x29d   : > { %v5795_v7 = vadd.f32 %v5346_v4, %v4828_v32  ;;  %v5352_v42 = vsel %vm8176_vm10, %v5350_v31, %v5351_v58  ;;  %v15427_v32 = vld [vmem:[#allocation59_spill] sm:$0xff]  ;;  %v5355_v4 = vsel %vm8176_vm10, %v5353_v30, %v5354_v16  ;;  %v5796_v29 = vadd.f32 %v5349_v51, %v4829_v53  ;;  %v15434_v16 = vld [vmem:[#allocation41_spill] sm:$0xff] }
 0x29e   : > { %v11040_v6 = vmul.f32 %v15428_v14, %v15427_v32  ;;  %v5797_v41 = vadd.f32 %v5352_v42, %v4830_v11  ;;  %v5798_v15 = vadd.f32 %v5355_v4, %v4831_v52  ;;  %v1447_v49 = vmax.f32 %v1381_v10, 0.0  ;;  %v11070_v51 = vld.sshfl [vmem:[#allocation1 + $0x20] sm:$0xff pattern:$0x73625140] }
 0x29f   : > { %v6059_v18 = vadd.f32 %v5931_v62, %v5795_v7  ;;  %v1438_v45 = vmax.f32 %v1359_v19, 0.0  ;;  %v1448_v34 = vmax.f32 %v1384_v50, 0.0  ;;  %v6060_v55 = vadd.f32 %v5932_v46, %v5796_v29  ;;  %15438 = vst [vmem:[#allocation96_spill] sm:$0xff] %v11070_v51 }
 0x2a0   : > { %v6061_v58 = vadd.f32 %v5933_v61, %v5797_v41  ;;  %v11047_v20 = vmul.f32 %v15429_v37, %v15427_v32  ;;  %v6062_v43 = vadd.f32 %v5934_v36, %v5798_v15  ;;  %v11049_v23 = vmin.f32 %v1447_v49, 6.0  ;;  %v15440_v41 = vld [vmem:[#allocation78_spill] sm:$0xff] }
 0x2a1   : > { %v6197_v31 = vadd.f32 %v15364_v56, %v6059_v18  ;;  %v11051_v28 = vmin.f32 %v1438_v45, 6.0  ;;  %v11053_v53 = vmin.f32 %v1448_v34, 6.0  ;;  %v6198_v11 = vadd.f32 %v15324_v1, %v6060_v55  ;;  %v15441_v34 = vld [vmem:[#allocation117_spill] sm:$0xff] }
 0x2a2   : > { %15430 = vst [vmem:[#allocation77_spill] sm:$0xff] %v11047_v20  ;;  %v6199_v52 = vadd.f32 %v15226_v26, %v6061_v58  ;;  %v6200_v56 = vadd.f32 %v15434_v16, %v6062_v43  ;;  %v11060_v61 = vrot.slane %v11049_v23, 2  ;;  %v11063_v36 = vrot.slane %v11049_v23, 4 }
 0x2a3   : > { %15431 = vst [vmem:[#allocation66_spill] sm:$0xff] %v11049_v23  ;;  %v6325_v62 = vmax.f32 %v6197_v31, 0.0  ;;  %v11066_v49 = vrot.slane %v11049_v23, 6  ;;  %v6326_v30 = vmax.f32 %v6198_v11, 0.0  ;;  %v4737_v55 = vmul.f32 %v15309_v9, %v11049_v23 }
 0x2a4   : > { %15432 = vst [vmem:[#allocation111_spill] sm:$0xff] %v11051_v28  ;;  %v6327_v7 = vmax.f32 %v6199_v52, 0.0  ;;  %v6328_v19 = vmax.f32 %v6200_v56, 0.0  ;;  %v4738_v43 = vmul.f32 %v15206_v27, %v11060_v61  ;;  %v11076_v42 = vmul.f32 %v15214_v24, %v11049_v23 }
 0x2a5   : > { %15433 = vst [vmem:[#allocation75_spill] sm:$0xff] %v11053_v53  ;;  %v6453_v10 = vmin.f32 %v6325_v62, 6.0  ;;  %v5026_v50 = vmul.f32 %v15280_v0, %v11060_v61  ;;  %v6454_v4 = vmin.f32 %v6326_v30, 6.0  ;;  %v4865_v18 = vadd.f32 %v4737_v55, %v15440_v41 }
 0x2a6   : > { %15435 = vst [vmem:[#allocation46_spill] sm:$0xff] %v11060_v61  ;;  %v6455_v29 = vmin.f32 %v6327_v7, 6.0  ;;  %v11083_v15 = vmul.f32 %v15211_v12, %v11063_v36  ;;  %v6456_v45 = vmin.f32 %v6328_v19, 6.0  ;;  %v4866_v58 = vadd.f32 %v4738_v43, %v15441_v34 }
 0x2a7   : > { %15436 = vst [vmem:[#allocation68_spill] sm:$0xff] %v11063_v36  ;;  %v14655_v31 = vrot.slane %v11076_v42, 7  ;;  %v5461_v11 = vrot.slane %v5026_v50, 7  ;;  %v11090_v62 = vmul.f32 %v10732_v54, %v11049_v23  ;;  %v5968_v56 = vmul.f32 %v15225_v63, %v11060_v61 }
 0x2a8   : > { %15437 = vst [vmem:[#allocation36_spill] sm:$0xff] %v11066_v49  ;;  %v14663_v52 = vrot.slane %v11083_v15, 7  ;;  %v5969_v30 = vmul.f32 %v15222_v3, %v11063_v36  ;;  %v11099_v55 = vrot.slane %v11051_v28, 2  ;;  %v11102_v19 = vrot.slane %v11051_v28, 4 }
 0x2a9   : > { %15439 = vst [vmem:[#allocation139_spill] sm:$0xff] %v11076_v42  ;;  %v5460_v7 = vrot.slane %v14655_v31, 2  ;;  %v11105_v43 = vrot.slane %v11051_v28, 6  ;;  %v4705_v50 = vmul.f32 %v15309_v9, %v11051_v28  ;;  %v15448_v42 = vld [vmem:[#allocation65_spill] sm:$0xff] }
 0x2aa   : > { %6724 = vst [vmem:[#allocation1 + $0x20] ss:$4 sm:$0xff] %v6453_v10  ;;  %v5463_v10 = vrot.slane %v5461_v11, 2  ;;  %v4706_v34 = vmul.f32 %v15206_v27, %v11099_v55  ;;  %v4990_v31 = vmul.f32 %v15280_v0, %v11099_v55 }
 0x2ab   : > { %6725 = vst [vmem:[#allocation1 + $0x21] ss:$4 sm:$0xff] %v6454_v4  ;;  %v11111_v4 = vmul.f32 %v15214_v24, %v11051_v28  ;;  %v5462_v41 = vsel %vm8176_vm10, %v5460_v7, %v5461_v11  ;;  %v4833_v61 = vadd.f32 %v4705_v50, %v15448_v42  ;;  %v15450_v11 = vld [vmem:[#allocation79_spill] sm:$0xff]  ;;  %v11142_v50 = vrot.slane %v11053_v53, 2 }
 0x2ac   : > { %15442 = vst [vmem:[#allocation78_spill] sm:$0xff] %v11090_v62  ;;  %v5832_v46 = vadd.f32 %v5462_v41, %v4865_v18  ;;  %v4834_v7 = vadd.f32 %v4706_v34, %v15450_v11  ;;  %v5361_v23 = vrot.slane %v4990_v31, 7  ;;  %v5937_v18 = vmul.f32 %v15222_v3, %v11102_v19 }
 0x2ad   : > { %6726 = vst [vmem:[#allocation1 + $0x22] ss:$4 sm:$0xff] %v6455_v29  ;;  %v11115_v29 = vmul.f32 %v10732_v54, %v11051_v28  ;;  %v14665_v28 = vrot.slane %v11111_v4, 7  ;;  %v11145_v41 = vrot.slane %v11053_v53, 4 }
 0x2ae   : > { %15443 = vst [vmem:[#allocation117_spill] sm:$0xff] %v11099_v55 }
 0x2af   : > { %15444 = vst [vmem:[#allocation140_spill] sm:$0xff] %v11102_v19  ;;  %v5360_v42 = vrot.slane %v14665_v28, 2 }
 0x2b0   : > { %6727 = vst [vmem:[#allocation1 + $0x23] ss:$4 sm:$0xff] %v6456_v45  ;;  %v5465_v45 = vsel %vm8176_vm10, %v5463_v10, %v14663_v52  ;;  %v5936_v10 = vmul.f32 %v15225_v63, %v11099_v55  ;;  %v6096_v52 = vadd.f32 %v5968_v56, %v5832_v46  ;;  %v11153_v56 = vmul.f32 %v15358_v25, %v11053_v53 }
 0x2b1   : > { %15445 = vst [vmem:[#allocation141_spill] sm:$0xff] %v11105_v43  ;;  %v5833_v62 = vadd.f32 %v5465_v45, %v4866_v58  ;;  %v5363_v58 = vrot.slane %v5361_v23, 2 }
 0x2b2   : > { %15446 = vst [vmem:[#allocation142_spill] sm:$0xff] %v11111_v4  ;;  %v6234_v31 = vadd.f32 %v15324_v1, %v6096_v52  ;;  %v11163_v52 = vmul.f32 %v15429_v37, %v11066_v49 }
 0x2b3   : > { %15447 = vst [vmem:[#allocation143_spill] sm:$0xff] %v11115_v29  ;;  %v11130_v29 = vmul.f32 %v15211_v12, %v11102_v19  ;;  %v6097_v51 = vadd.f32 %v5969_v30, %v5833_v62  ;;  %v1889_v62 = vmul.f32 %v15428_v14, %v11066_v49  ;;  %v5362_v30 = vsel %vm8176_vm10, %v5360_v42, %v5361_v23  ;;  %v15457_v19 = vld [vmem:[#allocation6_spill] sm:$0xff] }
 0x2b4   : > { %15451 = vst [vmem:[#allocation79_spill] sm:$0xff] %v11142_v50  ;;  %v6362_v34 = vmax.f32 %v6234_v31, 0.0  ;;  %v5800_v28 = vadd.f32 %v5362_v30, %v4833_v61  ;;  %v14677_v23 = vrot.slane %v11163_v52, 7  ;;  %v15461_v31 = vrot.slane %v15460_v5, 7 }
 0x2b5   : > { %15449 = vst [vmem:[#allocation65_spill] sm:$0xff] %v11130_v29  ;;  %v14672_v57 = vrot.slane %v11130_v29, 7  ;;  %v6235_v46 = vadd.f32 %v15226_v26, %v6097_v51  ;;  %v2057_v51 = vmul.f32 %v15359_v17, %v11053_v53  ;;  %v15456_v29 = vld [vmem:[#allocation43_spill] sm:$0xff]  ;;  %v2997_v5 = vmul.f32 %v15457_v19, %v11053_v53 }
 0x2b6   : > { %15452 = vst [vmem:[#allocation144_spill] sm:$0xff] %v11145_v41  ;;  %v6064_v40 = vadd.f32 %v5936_v10, %v5800_v28 }
 0x2b7   : > { %15453 = vst [vmem:[#allocation145_spill] sm:$0xff] %v11153_v56  ;;  %v5365_v45 = vsel %vm8176_vm10, %v5363_v58, %v14672_v57  ;;  %v6363_v11 = vmax.f32 %v6235_v46, 0.0  ;;  %v15455_v56 = vrot.slane %v11047_v20, 7  ;;  %v2530_v42 = vrot.slane %v2057_v51, 7 }
 0x2b8   : > { %15454 = vst [vmem:[#allocation146_spill] sm:$0xff] %v11163_v52  ;;  %v5801_v4 = vadd.f32 %v5365_v45, %v4834_v7  ;;  %v2981_v58 = vmul.f32 %v15457_v19, %v15456_v29  ;;  %v11172_v57 = vmin.f32 %v6362_v34, 6.0  ;;  %v2529_v7 = vrot.slane %v14677_v23, 2  ;;  %v15474_v29 = vld [vmem:[#allocation9_spill] sm:$0xff] }
 0x2b9   : > { %v2504_v55 = vrot.slane %v15455_v56, 2  ;;  %v11174_v59 = vmin.f32 %v6363_v11, 6.0  ;;  %v11182_v46 = vrot.slane %v2530_v42, 2  ;;  %v15463_v56 = vld [vmem:[#allocation63_spill] sm:$0xff]  ;;  %v6202_v45 = vadd.f32 %v15324_v1, %v6064_v40 }
 0x2ba   : > { %15458 = vst [vmem:[#allocation147_spill] sm:$0xff] %v11172_v57  ;;  %v6065_v21 = vadd.f32 %v5937_v18, %v5801_v4  ;;  %v2989_v30 = vmul.f32 %v15457_v19, %v15463_v56  ;;  %v15464_v4 = vld [vmem:[#allocation87_spill] sm:$0xff]  ;;  %v15465_v18 = vld [vmem:[#allocation8_spill] sm:$0xff] }
 0x2bb   : > { %15459 = vst [vmem:[#allocation148_spill] sm:$0xff] %v11174_v59  ;;  %v2506_v61 = vsel %vm8176_vm10, %v2504_v55, %v15461_v31  ;;  %v2531_v55 = vsel %vm8176_vm10, %v2529_v7, %v2530_v42  ;;  %v3109_v10 = vadd.f32 %v2981_v58, %v15464_v4  ;;  %v3245_v34 = vmul.f32 %v15465_v18, %v15427_v32  ;;  %v15466_v59 = vld [vmem:[#allocation37_spill] sm:$0xff] }
 0x2bc   : > { %15462 = vst [vmem:[#allocation123_spill] sm:$0xff] %v11182_v46  ;;  %v6203_v51 = vadd.f32 %v15226_v26, %v6065_v21  ;;  %v2853_v28 = vadd.f32 %v2506_v61, %v11040_v6  ;;  %v3253_v11 = vmul.f32 %v15465_v18, %v11066_v49  ;;  %v6330_v31 = vmax.f32 %v6202_v45, 0.0  ;;  %v11208_v45 = vld.sshfl [vmem:[#allocation1] sm:$0xff pattern:$0x73625140] }
 0x2bd   : > { %v2861_v23 = vadd.f32 %v2531_v55, %v1889_v62  ;;  %v3254_v6 = vmul.f32 %v15376_v8, %v11053_v53  ;;  %v3373_v61 = vadd.f32 %v3245_v34, %v3109_v10  ;;  %v11202_v57 = vmul.f32 %v15466_v59, %v11066_v49  ;;  %15469 = vst [vmem:[#allocation150_spill] sm:$0xff] %v11208_v45  ;;  %v15470_v62 = vld [vmem:[#allocation100_spill] sm:$0xff] }
 0x2be   : > { %v6331_v40 = vmax.f32 %v6203_v51, 0.0  ;;  %v3117_v21 = vadd.f32 %v2989_v30, %v2853_v28  ;;  %v3543_v42 = vmul.f32 %v15321_v22, %v11053_v53  ;;  %v6458_v58 = vmin.f32 %v6330_v31, 6.0  ;;  %v15472_v51 = vld [vmem:[#allocation113_spill] sm:$0xff] }
 0x2bf   : > { %15467 = vst [vmem:[#allocation87_spill] sm:$0xff] %v11202_v57  ;;  %v11206_v4 = vadd.f32 %v2997_v5, %v2861_v23  ;;  %v11211_v30 = vadd.f32 %v3254_v6, %v15470_v62  ;;  %v15473_v28 = vrot.slane %v15472_v51, 7  ;;  %v14680_v10 = vrot.slane %v11202_v57, 7 }
 0x2c0   : > { %v6459_v7 = vmin.f32 %v6331_v40, 6.0  ;;  %v3381_v46 = vadd.f32 %v3253_v11, %v3117_v21  ;;  %v4000_v34 = vrot.slane %v3543_v42, 7  ;;  %6731 = vst [vmem:[#allocation1 + $0x1] ss:$4 sm:$0xff] %v6458_v58  ;;  %v4476_v32 = vmul.f32 %v15474_v29, %v15463_v56  ;;  %v15475_v11 = vld [vmem:[#allocation16_spill] sm:$0xff]  ;;  %v15476_v40 = vld [vmem:[#allocation126_spill] sm:$0xff] }
 0x2c1   : > { %15468 = vst [vmem:[#allocation149_spill] sm:$0xff] %v11206_v4  ;;  %v3974_v55 = vrot.slane %v15473_v28, 2  ;;  %v4484_v23 = vmul.f32 %v15474_v29, %v11053_v53  ;;  %v4739_v5 = vmul.f32 %v15207_v35, %v11063_v36  ;;  %v4740_v31 = vmul.f32 %v15475_v11, %v11066_v49  ;;  %v15482_v4 = vld [vmem:[#allocation130_spill] sm:$0xff] }
 0x2c2   : > { %15471 = vst [vmem:[#allocation100_spill] sm:$0xff] %v11211_v30  ;;  %v15477_v21 = vrot.slane %v15476_v40, 7  ;;  %v3999_v42 = vrot.slane %v14680_v10, 2  ;;  %v11230_v58 = vrot.slane %v4000_v34, 2  ;;  %v4741_v62 = vmul.f32 %v15309_v9, %v11053_v53  ;;  %v15479_v30 = vld [vmem:[#allocation119_spill] sm:$0xff] }
 0x2c3   : > { %6732 = vst [vmem:[#allocation1 + $0x2] ss:$4 sm:$0xff] %v6459_v7  ;;  %v4742_v28 = vmul.f32 %v15206_v27, %v11142_v50  ;;  %v4867_v45 = vadd.f32 %v4739_v5, %v15479_v30  ;;  %v15480_v7 = vld [vmem:[#allocation51_spill] sm:$0xff]  ;;  %v5029_v10 = vmul.f32 %v15214_v24, %v11053_v53  ;;  %v5031_v30 = vmul.f32 %v15211_v12, %v11145_v41 }
 0x2c4   : > { %v3976_v6 = vsel %vm8176_vm10, %v3974_v55, %v15477_v21  ;;  %15478 = vst [vmem:[#allocation113_spill] sm:$0xff] %v11230_v58  ;;  %v5028_v40 = vmul.f32 %v15480_v7, %v11066_v49  ;;  %v4001_v55 = vsel %vm8176_vm10, %v3999_v42, %v4000_v34  ;;  %v15481_v21 = vld [vmem:[#allocation129_spill] sm:$0xff]  ;;  %v5030_v58 = vmul.f32 %v15280_v0, %v11142_v50 }
 0x2c5   : > { %v4340_v51 = vadd.f32 %v3976_v6, %v3373_v61  ;;  %v4869_v56 = vadd.f32 %v4741_v62, %v15481_v21  ;;  %v4348_v61 = vadd.f32 %v4001_v55, %v3381_v46  ;;  %v4870_v57 = vadd.f32 %v4742_v28, %v15482_v4 }
 0x2c6   : > { %v15483_v5 = vrot.slane %v11083_v15, 7  ;;  %v5467_v20 = vrot.slane %v5028_v40, 7  ;;  %v5470_v34 = vrot.slane %v5029_v10, 7  ;;  %v5473_v42 = vrot.slane %v5030_v58, 7 }
 0x2c7   : > { %v4604_v6 = vadd.f32 %v4476_v32, %v4340_v51  ;;  %v11251_v62 = vadd.f32 %v4484_v23, %v4348_v61  ;;  %v5476_v36 = vrot.slane %v5031_v30, 7  ;;  %v5970_v0 = vmul.f32 %v15223_v33, %v11066_v49  ;;  %v15486_v30 = vld [vmem:[#allocation116_spill] sm:$0xff] }
 0x2c8   : > { %v5466_v52 = vrot.slane %v15483_v5, 2  ;;  %v5469_v46 = vrot.slane %v5467_v20, 2  ;;  %v5472_v4 = vrot.slane %v5470_v34, 2  ;;  %v5475_v51 = vrot.slane %v5473_v42, 2 }
 0x2c9   : > { %15484 = vst [vmem:[#allocation126_spill] sm:$0xff] %v11251_v62  ;;  %v4868_v21 = vadd.f32 %v4740_v31, %v4604_v6  ;;  %v11257_v28 = vrot.slane %v5476_v36, 2  ;;  %v5971_v10 = vmul.f32 %v10732_v54, %v11053_v53  ;;  %v5972_v23 = vmul.f32 %v15225_v63, %v11142_v50  ;;  %v1360_v31 = vpop.f32.mrf.mxu0 }
 0x2ca   : > { %v5468_v32 = vsel %vm8176_vm10, %v5466_v52, %v5467_v20  ;;  %v5471_v58 = vsel %vm8176_vm10, %v5469_v46, %v5470_v34  ;;  %v5474_v40 = vsel %vm8176_vm10, %v5472_v4, %v5473_v42  ;;  %v5477_v20 = vsel %vm8176_vm10, %v5475_v51, %v5476_v36  ;;  %v15489_v4 = vld [vmem:[#allocation83_spill] sm:$0xff] }
 0x2cb   : > { %15485 = vst [vmem:[#allocation119_spill] sm:$0xff] %v11257_v28  ;;  %v5834_v15 = vadd.f32 %v5468_v32, %v4867_v45  ;;  %v5973_v52 = vmul.f32 %v15222_v3, %v11145_v41  ;;  %v5835_v45 = vadd.f32 %v5471_v58, %v4868_v21  ;;  %v5836_v55 = vadd.f32 %v5474_v40, %v4869_v56  ;;  %v15498_v41 = vld [vmem:[#allocation7_spill] sm:$0xff] }
 0x2cc   : > { %v5837_v61 = vadd.f32 %v5477_v20, %v4870_v57  ;;  %v1361_v6 = vadd.f32 %v11028_v47, %v1360_v31  ;;  %v1849_v5 = vmul.f32 %v15428_v14, %v15486_v30  ;;  %v1857_v34 = vmul.f32 %v15428_v14, %v11105_v43 }
 0x2cd   : > { %v6098_v54 = vadd.f32 %v5970_v0, %v5834_v15  ;;  %v11278_v42 = vmul.f32 %v15429_v37, %v15486_v30  ;;  %v6099_v36 = vadd.f32 %v5971_v10, %v5835_v45  ;;  %v6100_v32 = vadd.f32 %v5972_v23, %v5836_v55  ;;  %v11291_v15 = vld [vmem:[%s14362_s4] ss:$0 sm:$0xff] }
 0x2ce   : > { %v6101_v46 = vadd.f32 %v5973_v52, %v5837_v61  ;;  %v1439_v56 = vmax.f32 %v1361_v6, 0.0  ;;  %v11283_v57 = vmul.f32 %v15429_v37, %v11105_v43  ;;  %v2949_v51 = vmul.f32 %v15457_v19, %v15489_v4  ;;  %15490 = vst [vmem:[#allocation83_spill] sm:$0xff] %v11291_v15 }
 0x2cf   : > { %15487 = vst [vmem:[#allocation129_spill] sm:$0xff] %v11278_v42  ;;  %v6236_v21 = vadd.f32 %v15434_v16, %v6098_v54  ;;  %v14687_v0 = vrot.slane %v11278_v42, 7  ;;  %v6237_v10 = vadd.f32 %v11291_v15, %v6099_v36  ;;  %v6238_v23 = vadd.f32 %v15324_v1, %v6100_v32 }
 0x2d0   : > { %15488 = vst [vmem:[#allocation130_spill] sm:$0xff] %v11283_v57  ;;  %v6239_v31 = vadd.f32 %v15226_v26, %v6101_v46  ;;  %v11296_v40 = vmin.f32 %v1439_v56, 6.0  ;;  %v2957_v45 = vmul.f32 %v15457_v19, %v10656_v39  ;;  %v15502_v50 = vrot.slane %v11283_v57, 7 }
 0x2d1   : > { %v6364_v58 = vmax.f32 %v6236_v21, 0.0  ;;  %v2404_v20 = vrot.slane %v14687_v0, 2  ;;  %v6365_v55 = vmax.f32 %v6237_v10, 0.0  ;;  %v6366_v61 = vmax.f32 %v6238_v23, 0.0  ;;  %v15496_v0 = vld [vmem:[#allocation13_spill] sm:$0xff] }
 0x2d2   : > { %v6367_v54 = vmax.f32 %v6239_v31, 0.0  ;;  %v11306_v36 = vrot.slane %v11296_v40, 2  ;;  %v11309_v32 = vrot.slane %v11296_v40, 4  ;;  %v11312_v46 = vrot.slane %v11296_v40, 6  ;;  %v15495_v31 = vld [vmem:[#allocation11_spill] sm:$0xff] }
 0x2d3   : > { %v11303_v6 = vmin.f32 %v6364_v58, 6.0  ;;  %v1858_v21 = vmul.f32 %v15358_v25, %v11296_v40  ;;  %v11316_v56 = vmin.f32 %v6365_v55, 6.0  ;;  %v11318_v4 = vmin.f32 %v6366_v61, 6.0  ;;  %v15499_v61 = vld [vmem:[#allocation21_spill] sm:$0xff] }
 0x2d4   : > { %v11320_v10 = vmin.f32 %v6367_v54, 6.0  ;;  %v2021_v23 = vmul.f32 %v15359_v17, %v11296_v40  ;;  %v1859_v58 = vmul.f32 %v15495_v31, %v11306_v36  ;;  %v1860_v52 = vmul.f32 %v15496_v0, %v11309_v32  ;;  %v15500_v54 = vld [vmem:[#allocation138_spill] sm:$0xff] }
 0x2d5   : > { %15491 = vst [vmem:[#allocation151_spill] sm:$0xff] %v11303_v6  ;;  %v15497_v6 = vld [vmem:[#allocation5_spill] sm:$0xff]  ;;  %v2023_v55 = vmul.f32 %v15498_v41, %v11309_v32  ;;  %v2429_v53 = vrot.slane %v15502_v50, 2  ;;  %v15504_v50 = vld [vmem:[#allocation15_spill] sm:$0xff] }
 0x2d6   : > { %15492 = vst [vmem:[#allocation152_spill] sm:$0xff] %v11316_v56  ;;  %v2022_v28 = vmul.f32 %v15497_v6, %v11306_v36  ;;  %v2430_v62 = vrot.slane %v2021_v23, 7  ;;  %v2965_v6 = vmul.f32 %v15457_v19, %v11296_v40  ;;  %v2967_v23 = vmul.f32 %v15504_v50, %v11309_v32 }
 0x2d7   : > { %15493 = vst [vmem:[#allocation153_spill] sm:$0xff] %v11318_v4  ;;  %v2024_v4 = vmul.f32 %v15499_v61, %v11312_v46  ;;  %v2436_v49 = vrot.slane %v2023_v55, 7  ;;  %v15506_v55 = vld [vmem:[#allocation40_spill] sm:$0xff] }
 0x2d8   : > { %15494 = vst [vmem:[#allocation154_spill] sm:$0xff] %v11320_v10  ;;  %v15501_v10 = vrot.slane %v15500_v54, 7  ;;  %v2433_v37 = vrot.slane %v2022_v28, 7  ;;  %v2431_v41 = vsel %vm8176_vm10, %v2429_v53, %v2430_v62  ;;  %v2432_v17 = vrot.slane %v2430_v62, 2  ;;  %v15503_v54 = vld [vmem:[#allocation14_spill] sm:$0xff] }
 0x2d9   : > { %v2439_v61 = vrot.slane %v2024_v4, 7  ;;  %v2966_v31 = vmul.f32 %v15503_v54, %v11306_v36  ;;  %v3077_v57 = vadd.f32 %v2949_v51, %v15506_v55  ;;  %v3224_v51 = vmul.f32 %v15101_v2, %v11309_v32 }
 0x2da   : > { %v2406_v56 = vsel %vm8176_vm10, %v2404_v20, %v15501_v10  ;;  %v2435_v26 = vrot.slane %v2433_v37, 2  ;;  %v2438_v20 = vrot.slane %v2436_v49, 2  ;;  %v2829_v10 = vadd.f32 %v2431_v41, %v1857_v34 }
 0x2db   : > { %v2821_v42 = vadd.f32 %v2406_v56, %v1849_v5  ;;  %v2434_v28 = vsel %vm8176_vm10, %v2432_v17, %v2433_v37  ;;  %v15505_v5 = vld [vmem:[#allocation23_spill] sm:$0xff]  ;;  %v3213_v17 = vmul.f32 %v15465_v18, %v15486_v30  ;;  %v3221_v37 = vmul.f32 %v15465_v18, %v11105_v43 }
 0x2dc   : > { %v2968_v56 = vmul.f32 %v15505_v5, %v11312_v46  ;;  %v2437_v62 = vsel %vm8176_vm10, %v2435_v26, %v2436_v49  ;;  %v2440_v4 = vsel %vm8176_vm10, %v2438_v20, %v2439_v61  ;;  %v2830_v54 = vadd.f32 %v2434_v28, %v1858_v21  ;;  %v15509_v26 = vld [vmem:[#allocation25_spill] sm:$0xff]  ;;  %v15515_v28 = vld [vmem:[#allocation120_spill] sm:$0xff] }
 0x2dd   : > { %v3085_v53 = vadd.f32 %v2957_v45, %v2821_v42  ;;  %v11357_v41 = vadd.f32 %v2965_v6, %v2829_v10  ;;  %v2831_v34 = vadd.f32 %v2437_v62, %v1859_v58  ;;  %v2832_v50 = vadd.f32 %v2440_v4, %v1860_v52  ;;  %v15513_v10 = vld [vmem:[#allocation31_spill] sm:$0xff] }
 0x2de   : > { %v11363_v5 = vadd.f32 %v2966_v31, %v2830_v54  ;;  %v3222_v42 = vmul.f32 %v15376_v8, %v11296_v40  ;;  %v3223_v49 = vmul.f32 %v15509_v26, %v11306_v36  ;;  %v3341_v6 = vadd.f32 %v3213_v17, %v3077_v57 }
 0x2df   : > { %15507 = vst [vmem:[#allocation138_spill] sm:$0xff] %v11357_v41  ;;  %v11371_v45 = vadd.f32 %v2967_v23, %v2831_v34  ;;  %v11373_v52 = vadd.f32 %v2968_v56, %v2832_v50  ;;  %v3349_v21 = vadd.f32 %v3221_v37, %v3085_v53  ;;  %v3352_v61 = vadd.f32 %v3224_v51, %v10984_v44  ;;  %v15514_v50 = vld [vmem:[#allocation32_spill] sm:$0xff] }
 0x2e0   : > { %15508 = vst [vmem:[#allocation40_spill] sm:$0xff] %v11363_v5  ;;  %v3350_v58 = vadd.f32 %v3222_v42, %v10970_v48  ;;  %v3351_v31 = vadd.f32 %v3223_v49, %v10976_v38  ;;  %v11380_v54 = vmul.f32 %v15466_v59, %v11105_v43  ;;  %v3507_v20 = vmul.f32 %v15321_v22, %v11296_v40  ;;  %v15517_v37 = vld [vmem:[#allocation88_spill] sm:$0xff] }
 0x2e1   : > { %15510 = vst [vmem:[#allocation155_spill] sm:$0xff] %v11371_v45  ;;  %v3508_v23 = vmul.f32 %v15513_v10, %v11306_v36  ;;  %v3509_v57 = vmul.f32 %v15190_v60, %v11309_v32  ;;  %v3510_v48 = vmul.f32 %v15514_v50, %v11312_v46  ;;  %v15516_v38 = vrot.slane %v15515_v28, 7  ;;  %v15519_v28 = vld [vmem:[#allocation26_spill] sm:$0xff] }
 0x2e2   : > { %15511 = vst [vmem:[#allocation156_spill] sm:$0xff] %v11373_v52  ;;  %v14700_v44 = vrot.slane %v11380_v54, 7  ;;  %v4444_v55 = vmul.f32 %v15474_v29, %v10656_v39  ;;  %v4452_v53 = vmul.f32 %v15474_v29, %v11296_v40  ;;  %v3900_v62 = vrot.slane %v3507_v20, 7  ;;  %v15520_v39 = vld [vmem:[#allocation38_spill] sm:$0xff] }
 0x2e3   : > { %15512 = vst [vmem:[#allocation157_spill] sm:$0xff] %v11380_v54  ;;  %v3874_v56 = vrot.slane %v15516_v38, 2  ;;  %v3903_v4 = vrot.slane %v3508_v23, 7  ;;  %v3906_v34 = vrot.slane %v3509_v57, 7  ;;  %v3909_v17 = vrot.slane %v3510_v48, 7  ;;  %v15521_v48 = vld [vmem:[#allocation39_spill] sm:$0xff] }
 0x2e4   : > { %v15518_v42 = vrot.slane %v15517_v37, 7  ;;  %v3899_v51 = vrot.slane %v14700_v44, 2  ;;  %v4453_v38 = vmul.f32 %v15519_v28, %v11306_v36  ;;  %v4454_v50 = vmul.f32 %v15520_v39, %v11309_v32 }
 0x2e5   : > { %v3902_v52 = vrot.slane %v3900_v62, 2  ;;  %v3905_v45 = vrot.slane %v3903_v4, 2  ;;  %v3908_v20 = vrot.slane %v3906_v34, 2  ;;  %v4455_v37 = vmul.f32 %v15521_v48, %v11312_v46 }
 0x2e6   : > { %v3876_v49 = vsel %vm8176_vm10, %v3874_v56, %v15518_v42  ;;  %v3901_v57 = vsel %vm8176_vm10, %v3899_v51, %v3900_v62  ;;  %v15522_v56 = vld [vmem:[#allocation140_spill] sm:$0xff]  ;;  %v4708_v44 = vmul.f32 %v15475_v11, %v11105_v43  ;;  %v4709_v30 = vmul.f32 %v15309_v9, %v11296_v40 }
 0x2e7   : > { %v4308_v23 = vadd.f32 %v3876_v49, %v3341_v6  ;;  %v4707_v42 = vmul.f32 %v15207_v35, %v15522_v56  ;;  %v3904_v5 = vsel %vm8176_vm10, %v3902_v52, %v3903_v4  ;;  %v3907_v41 = vsel %vm8176_vm10, %v3905_v45, %v3906_v34  ;;  %v15530_v34 = vld [vmem:[#allocation42_spill] sm:$0xff] }
 0x2e8   : > { %v3910_v6 = vsel %vm8176_vm10, %v3908_v20, %v3909_v17  ;;  %v4316_v49 = vadd.f32 %v3901_v57, %v3349_v21  ;;  %v4317_v62 = vadd.f32 %v3904_v5, %v3350_v58  ;;  %v4318_v51 = vadd.f32 %v3907_v41, %v3351_v31  ;;  %v15527_v5 = vld [vmem:[#allocation122_spill] sm:$0xff]  ;;  %v15528_v31 = vld [vmem:[#allocation109_spill] sm:$0xff] }
 0x2e9   : > { %v4319_v59 = vadd.f32 %v3910_v6, %v3352_v61  ;;  %v4572_v48 = vadd.f32 %v4444_v55, %v4308_v23  ;;  %v4710_v56 = vmul.f32 %v15206_v27, %v11306_v36  ;;  %v4711_v52 = vmul.f32 %v15207_v35, %v11309_v32  ;;  %v15529_v55 = vld [vmem:[#allocation60_spill] sm:$0xff] }
 0x2ea   : > { %v11421_v54 = vadd.f32 %v4452_v53, %v4316_v49  ;;  %v11429_v45 = vadd.f32 %v4453_v38, %v4317_v62  ;;  %v11431_v4 = vadd.f32 %v4454_v50, %v4318_v51  ;;  %v4835_v41 = vadd.f32 %v4707_v42, %v15527_v5  ;;  %v15531_v50 = vld [vmem:[#allocation19_spill] sm:$0xff]  ;;  %v11456_v42 = vld [vmem:[%s14361_s3 + $0x8] ss:$0 sm:$0xff]  ;;  %v1385_v5 = vpop.f32.mrf.mxu2 }
 0x2eb   : > { %v11433_v21 = vadd.f32 %v4455_v37, %v4319_v59  ;;  %v4836_v58 = vadd.f32 %v4708_v44, %v4572_v48  ;;  %v4837_v61 = vadd.f32 %v4709_v30, %v15528_v31  ;;  %v4838_v53 = vadd.f32 %v4710_v56, %v15529_v55  ;;  %v15532_v44 = vld [vmem:[#allocation17_spill] sm:$0xff]  ;;  %15535 = vst [vmem:[#allocation122_spill] sm:$0xff] %v11456_v42 }
 0x2ec   : > { %15523 = vst [vmem:[#allocation120_spill] sm:$0xff] %v11421_v54  ;;  %v4839_v17 = vadd.f32 %v4711_v52, %v15530_v34  ;;  %v4992_v20 = vmul.f32 %v15480_v7, %v11105_v43  ;;  %v4993_v38 = vmul.f32 %v15214_v24, %v11296_v40  ;;  %v4994_v23 = vmul.f32 %v15531_v50, %v11306_v36  ;;  %v15533_v30 = vld [vmem:[#allocation65_spill] sm:$0xff] }
 0x2ed   : > { %15524 = vst [vmem:[#allocation88_spill] sm:$0xff] %v11429_v45  ;;  %v4995_v59 = vmul.f32 %v15211_v12, %v11309_v32  ;;  %v4996_v57 = vmul.f32 %v15532_v44, %v11312_v46  ;;  %v15534_v48 = vrot.slane %v15533_v30, 7  ;;  %v5938_v56 = vmul.f32 %v15223_v33, %v11105_v43 }
 0x2ee   : > { %15525 = vst [vmem:[#allocation158_spill] sm:$0xff] %v11431_v4  ;;  %v5939_v6 = vmul.f32 %v11456_v42, %v11296_v40  ;;  %v5367_v49 = vrot.slane %v4992_v20, 7  ;;  %v5370_v62 = vrot.slane %v4993_v38, 7  ;;  %v5373_v51 = vrot.slane %v4994_v23, 7 }
 0x2ef   : > { %15526 = vst [vmem:[#allocation159_spill] sm:$0xff] %v11433_v21  ;;  %v5366_v37 = vrot.slane %v15534_v48, 2  ;;  %v5376_v52 = vrot.slane %v4995_v59, 7  ;;  %v5379_v31 = vrot.slane %v4996_v57, 7  ;;  %v5940_v55 = vmul.f32 %v15225_v63, %v11306_v36  ;;  %v15536_v59 = vld [vmem:[#allocation92_spill] sm:$0xff] }
 0x2f0   : > { %v5941_v34 = vmul.f32 %v15222_v3, %v11309_v32  ;;  %v5942_v30 = vmul.f32 %v15223_v33, %v11312_v46  ;;  %v5369_v44 = vrot.slane %v5367_v49, 2  ;;  %v5372_v40 = vrot.slane %v5370_v62, 2  ;;  %v15537_v21 = vld [vmem:[#allocation96_spill] sm:$0xff] }
 0x2f1   : > { %v5368_v48 = vsel %vm8176_vm10, %v5366_v37, %v5367_v49  ;;  %v5375_v20 = vrot.slane %v5373_v51, 2  ;;  %v5378_v38 = vrot.slane %v5376_v52, 2  ;;  %v6875_v57 = vpack.c.bf16 %v15537_v21, %v15536_v59  ;;  %v15538_v37 = vld [vmem:[#allocation57_spill] sm:$0xff]  ;;  %v15540_v59 = vld [vmem:[#allocation94_spill] sm:$0xff]  ;;  %v15551_v33 = vld [vmem:[#allocation44_spill] sm:$0xff] }
 0x2f2   : > { %v5802_v23 = vadd.f32 %v5368_v48, %v4835_v41  ;;  %v1386_v4 = vadd.f32 %v11028_v47, %v1385_v5  ;;  %v5371_v36 = vsel %vm8176_vm10, %v5369_v44, %v5370_v62  ;;  %v5374_v32 = vsel %vm8176_vm10, %v5372_v40, %v5373_v51  ;;  %v15539_v62 = vld [vmem:[#allocation93_spill] sm:$0xff] }
 0x2f3   : > { %v5377_v46 = vsel %vm8176_vm10, %v5375_v20, %v5376_v52  ;;  %v11478_v49 = vrot.slane %v15538_v37, 6  ;;  %v5380_v41 = vsel %vm8176_vm10, %v5378_v38, %v5379_v31  ;;  %v5803_v48 = vadd.f32 %v5371_v36, %v4836_v58  ;;  %7769 = vmatmul.msk.bf16.gmra.mxu1 %vm6893_vm12, %v6875_v57 }
 0x2f4   : > { %v5804_v45 = vadd.f32 %v5374_v32, %v4837_v61  ;;  %v5805_v21 = vadd.f32 %v5377_v46, %v4838_v53  ;;  %v5806_v47 = vadd.f32 %v5380_v41, %v4839_v17  ;;  %v6066_v5 = vadd.f32 %v5938_v56, %v5802_v23  ;;  %v15541_v53 = vld [vmem:[#allocation62_spill] sm:$0xff] }
 0x2f5   : > { %v1449_v44 = vmax.f32 %v1386_v4, 0.0  ;;  %v11485_v51 = vmul.f32 %v15428_v14, %v15539_v62  ;;  %v6067_v40 = vadd.f32 %v5939_v6, %v5803_v48  ;;  %v11489_v37 = vmul.f32 %v15358_v25, %v15540_v59  ;;  %v15542_v6 = vld [vmem:[#allocation55_spill] sm:$0xff] }
 0x2f6   : > { %v6068_v52 = vadd.f32 %v5940_v55, %v5804_v45  ;;  %v6069_v20 = vadd.f32 %v5941_v34, %v5805_v21  ;;  %v6070_v31 = vadd.f32 %v5942_v30, %v5806_v47  ;;  %v6204_v58 = vadd.f32 %v15434_v16, %v6066_v5  ;;  %v15544_v21 = vld [vmem:[#allocation66_spill] sm:$0xff] }
 0x2f7   : > { %v11492_v61 = vmin.f32 %v1449_v44, 6.0  ;;  %v11496_v17 = vmul.f32 %v15496_v0, %v15541_v53  ;;  %v6205_v4 = vadd.f32 %v11291_v15, %v6067_v40  ;;  %v11503_v55 = vmul.f32 %v15428_v14, %v11478_v49  ;;  %v15545_v5 = vld [vmem:[#allocation46_spill] sm:$0xff]  ;;  %v15546_v44 = vld [vmem:[#allocation11_spill] sm:$0xff] }
 0x2f8   : > { %v6206_v56 = vadd.f32 %v15324_v1, %v6068_v52  ;;  %v6207_v45 = vadd.f32 %v15542_v6, %v6069_v20  ;;  %v6208_v34 = vadd.f32 %v15434_v16, %v6070_v31  ;;  %v6332_v30 = vmax.f32 %v6204_v58, 0.0  ;;  %v15547_v58 = vld [vmem:[#allocation68_spill] sm:$0xff] }
 0x2f9   : > { %v11507_v38 = vrot.slane %v11492_v61, 2  ;;  %v11510_v23 = vrot.slane %v11492_v61, 4  ;;  %v6333_v57 = vmax.f32 %v6205_v4, 0.0  ;;  %v11513_v46 = vrot.slane %v11492_v61, 6 }
 0x2fa   : > { %v6334_v36 = vmax.f32 %v6206_v56, 0.0  ;;  %v6335_v32 = vmax.f32 %v6207_v45, 0.0  ;;  %v6336_v41 = vmax.f32 %v6208_v34, 0.0  ;;  %v6460_v48 = vmin.f32 %v6332_v30, 6.0 }
 0x2fb   : > { %15543 = vst [vmem:[#allocation109_spill] sm:$0xff] %v11513_v46  ;;  %v11517_v47 = vmul.f32 %v15358_v25, %v15544_v21  ;;  %v11521_v40 = vmul.f32 %v15546_v44, %v15545_v5  ;;  %v6461_v52 = vmin.f32 %v6333_v57, 6.0  ;;  %v1888_v4 = vmul.f32 %v15496_v0, %v15547_v58  ;;  %v11525_v56 = vld.sshfl [vmem:[#allocation1 + $0x20] sm:$0xff pattern:$0x73625140]  ;;  %v15549_v57 = vld [vmem:[#allocation2_spill] sm:$0xff] }
 0x2fc   : > { %v6462_v20 = vmin.f32 %v6334_v36, 6.0  ;;  %v6463_v31 = vmin.f32 %v6335_v32, 6.0  ;;  %15548 = vst [vmem:[#allocation60_spill] sm:$0xff] %v11525_v56  ;;  %v6464_v45 = vmin.f32 %v6336_v41, 6.0  ;;  %v1893_v34 = vmul.f32 %v15428_v14, %v11492_v61  ;;  %v15550_v32 = vld [vmem:[#allocation4_spill] sm:$0xff]  ;;  %v15552_v56 = vld [vmem:[#allocation5_spill] sm:$0xff] }
 0x2fd   : > { %6733 = vst [vmem:[#allocation1 + $0x3] ss:$4 sm:$0xff] %v6460_v48  ;;  %v1894_v30 = vmul.f32 %v15358_v25, %v11507_v38  ;;  %v1895_v54 = vmul.f32 %v15546_v44, %v11510_v23  ;;  %v2043_v36 = vmul.f32 %v15549_v57, %v15539_v62  ;;  %v2044_v16 = vmul.f32 %v15550_v32, %v15540_v59  ;;  %v15553_v48 = vld [vmem:[#allocation7_spill] sm:$0xff] }
 0x2fe   : > { %6734 = vst [vmem:[#allocation1 + $0x20] ss:$4 sm:$0xff] %v6461_v52  ;;  %v2045_v41 = vmul.f32 %v15552_v56, %v15551_v33  ;;  %v2046_v7 = vmul.f32 %v15553_v48, %v15541_v53  ;;  %v2052_v43 = vmul.f32 %v15549_v57, %v11478_v49  ;;  %v2053_v35 = vmul.f32 %v15550_v32, %v15544_v21 }
 0x2ff   : > { %6735 = vst [vmem:[#allocation1 + $0x21] ss:$4 sm:$0xff] %v6462_v20  ;;  %v2054_v52 = vmul.f32 %v15552_v56, %v15545_v5  ;;  %v2055_v62 = vmul.f32 %v15553_v48, %v15547_v58  ;;  %v2061_v6 = vmul.f32 %v15549_v57, %v11492_v61  ;;  %v2062_v1 = vmul.f32 %v15550_v32, %v11507_v38 }
 0x300   : > { %6736 = vst [vmem:[#allocation1 + $0x22] ss:$4 sm:$0xff] %v6463_v31  ;;  %v2063_v20 = vmul.f32 %v15552_v56, %v11510_v23  ;;  %v2064_v44 = vmul.f32 %v15553_v48, %v11513_v46  ;;  %v7728_v15 = vrot.slane %v2043_v36, 9  ;;  %v2493_v0 = vrot.slane %v2044_v16, 7 }
 0x301   : > { %6737 = vst [vmem:[#allocation1 + $0x23] ss:$4 sm:$0xff] %v6464_v45  ;;  %v2496_v25 = vrot.slane %v2045_v41, 7  ;;  %v2499_v14 = vrot.slane %v2046_v7, 7  ;;  %v7729_v3 = vrot.slane %v2052_v43, 9  ;;  %v2518_v63 = vrot.slane %v2053_v35, 7 }
 0x302   : > { %v2521_v31 = vrot.slane %v2054_v52, 7  ;;  %v2524_v42 = vrot.slane %v2055_v62, 7  ;;  %v2494_v57 = vsel %vm8176_vm10, %v7728_v15, %v2493_v0  ;;  %v2495_v12 = vrot.slane %v2493_v0, 2  ;;  %v15554_v43 = vld [vmem:[#allocation77_spill] sm:$0xff] }
 0x303   : > { %v2498_v32 = vrot.slane %v2496_v25, 2  ;;  %v2501_v50 = vrot.slane %v2499_v14, 2  ;;  %v2519_v56 = vsel %vm8176_vm10, %v7729_v3, %v2518_v63  ;;  %v2520_v24 = vrot.slane %v2518_v63, 2  ;;  %v15556_v63 = vld [vmem:[#allocation146_spill] sm:$0xff] }
 0x304   : > { %v2523_v48 = vrot.slane %v2521_v31, 2  ;;  %v2526_v45 = vrot.slane %v2524_v42, 2  ;;  %v2497_v16 = vsel %vm8176_vm10, %v2495_v12, %v2496_v25  ;;  %v15555_v7 = vrot.slane %v15554_v43, 7 }
 0x305   : > { %v2500_v35 = vsel %vm8176_vm10, %v2498_v32, %v2499_v14  ;;  %v7730_v0 = vrot.slane %v2061_v6, 9  ;;  %v2522_v62 = vsel %vm8176_vm10, %v2520_v24, %v2521_v31  ;;  %v15557_v36 = vrot.slane %v15556_v63, 7  ;;  %v15558_v24 = vld [vmem:[#allocation112_spill] sm:$0xff] }
 0x306   : > { %v2503_v15 = vsel %vm8176_vm10, %v2501_v50, %v15555_v7  ;;  %v2525_v3 = vsel %vm8176_vm10, %v2523_v48, %v2524_v42  ;;  %v2543_v25 = vrot.slane %v2062_v1, 7  ;;  %v2546_v41 = vrot.slane %v2063_v20, 7 }
 0x307   : > { %v2528_v12 = vsel %vm8176_vm10, %v2526_v45, %v15557_v36  ;;  %v2549_v14 = vrot.slane %v2064_v44, 7  ;;  %v2849_v32 = vadd.f32 %v2494_v57, %v11485_v51  ;;  %v2850_v52 = vadd.f32 %v2497_v16, %v11489_v37 }
 0x308   : > { %v2544_v50 = vsel %vm8176_vm10, %v7730_v0, %v2543_v25  ;;  %v2545_v6 = vrot.slane %v2543_v25, 2  ;;  %v2851_v31 = vadd.f32 %v2500_v35, %v15558_v24  ;;  %v2852_v42 = vadd.f32 %v2503_v15, %v11496_v17  ;;  %v15561_v35 = vld [vmem:[#allocation14_spill] sm:$0xff]  ;;  %v15563_v15 = vld [vmem:[#allocation59_spill] sm:$0xff] }
 0x309   : > { %v2548_v48 = vrot.slane %v2546_v41, 2  ;;  %v11583_v43 = vrot.slane %v2549_v14, 2  ;;  %v2857_v45 = vadd.f32 %v2519_v56, %v11503_v55  ;;  %v2858_v1 = vadd.f32 %v2522_v62, %v11517_v47  ;;  %v15562_v47 = vld [vmem:[#allocation15_spill] sm:$0xff] }
 0x30a   : > { %v2547_v51 = vsel %vm8176_vm10, %v2545_v6, %v2546_v41  ;;  %v2859_v37 = vadd.f32 %v2525_v3, %v11521_v40  ;;  %v11590_v44 = vadd.f32 %v2528_v12, %v1888_v4  ;;  %v2865_v57 = vadd.f32 %v2544_v50, %v1893_v34  ;;  %v15564_v0 = vld [vmem:[#allocation23_spill] sm:$0xff] }
 0x30b   : > { %15559 = vst [vmem:[#allocation42_spill] sm:$0xff] %v11583_v43  ;;  %v2550_v20 = vsel %vm8176_vm10, %v2548_v48, %v2549_v14  ;;  %v2866_v16 = vadd.f32 %v2547_v51, %v1894_v30  ;;  %v2985_v17 = vmul.f32 %v15457_v19, %v15540_v59  ;;  %v2986_v55 = vmul.f32 %v15561_v35, %v15551_v33 }
 0x30c   : > { %15560 = vst [vmem:[#allocation65_spill] sm:$0xff] %v11590_v44  ;;  %v2867_v56 = vadd.f32 %v2550_v20, %v1895_v54  ;;  %v2987_v7 = vmul.f32 %v15562_v47, %v15541_v53  ;;  %v2988_v40 = vmul.f32 %v15564_v0, %v15563_v15  ;;  %v2993_v4 = vmul.f32 %v15457_v19, %v15544_v21 }
 0x30d   : > { %v2994_v34 = vmul.f32 %v15561_v35, %v15545_v5  ;;  %v2995_v30 = vmul.f32 %v15562_v47, %v15547_v58  ;;  %v3001_v62 = vmul.f32 %v15457_v19, %v11507_v38  ;;  %v3002_v54 = vmul.f32 %v15561_v35, %v11510_v23 }
 0x30e   : > { %v3003_v3 = vmul.f32 %v15562_v47, %v11513_v46  ;;  %v3113_v63 = vadd.f32 %v2985_v17, %v2849_v32  ;;  %v3114_v36 = vadd.f32 %v2986_v55, %v2850_v52  ;;  %v3115_v12 = vadd.f32 %v2987_v7, %v2851_v31 }
 0x30f   : > { %v3116_v25 = vadd.f32 %v2988_v40, %v2852_v42  ;;  %v3121_v41 = vadd.f32 %v2993_v4, %v2857_v45  ;;  %v3122_v14 = vadd.f32 %v2994_v34, %v2858_v1  ;;  %v3123_v50 = vadd.f32 %v2995_v30, %v2859_v37  ;;  %v15568_v37 = vld [vmem:[#allocation29_spill] sm:$0xff] }
 0x310   : > { %v11614_v6 = vadd.f32 %v3001_v62, %v2865_v57  ;;  %v11616_v24 = vadd.f32 %v3002_v54, %v2866_v16  ;;  %v11618_v48 = vadd.f32 %v3003_v3, %v2867_v56  ;;  %v3249_v51 = vmul.f32 %v15465_v18, %v11478_v49 }
 0x311   : > { %v3250_v20 = vmul.f32 %v15376_v8, %v15544_v21  ;;  %v3251_v32 = vmul.f32 %v15509_v26, %v15545_v5  ;;  %v3252_v52 = vmul.f32 %v15101_v2, %v15547_v58  ;;  %v3257_v31 = vmul.f32 %v15465_v18, %v11492_v61 }
 0x312   : > { %15565 = vst [vmem:[#allocation92_spill] sm:$0xff] %v11614_v6  ;;  %v3258_v42 = vmul.f32 %v15376_v8, %v11507_v38  ;;  %v3259_v45 = vmul.f32 %v15509_v26, %v11510_v23  ;;  %v3377_v1 = vadd.f32 %v3249_v51, %v3113_v63  ;;  %v3538_v57 = vmul.f32 %v15568_v37, %v11478_v49  ;;  %v15593_v6 = vld [vmem:[#allocation10_spill] sm:$0xff] }
 0x313   : > { %15566 = vst [vmem:[#allocation96_spill] sm:$0xff] %v11616_v24  ;;  %v3378_v16 = vadd.f32 %v3250_v20, %v3114_v36  ;;  %v3379_v17 = vadd.f32 %v3251_v32, %v3115_v12  ;;  %v3380_v55 = vadd.f32 %v3252_v52, %v3116_v25  ;;  %v3385_v56 = vadd.f32 %v3257_v31, %v3121_v41 }
 0x314   : > { %15567 = vst [vmem:[#allocation66_spill] sm:$0xff] %v11618_v48  ;;  %v3386_v7 = vadd.f32 %v3258_v42, %v3122_v14  ;;  %v3387_v40 = vadd.f32 %v3259_v45, %v3123_v50  ;;  %v3539_v4 = vmul.f32 %v15321_v22, %v15544_v21  ;;  %v3540_v34 = vmul.f32 %v15513_v10, %v15545_v5 }
 0x315   : > { %v3541_v30 = vmul.f32 %v15190_v60, %v15547_v58  ;;  %v3547_v62 = vmul.f32 %v15568_v37, %v11492_v61  ;;  %v3548_v54 = vmul.f32 %v15321_v22, %v11507_v38  ;;  %v3549_v3 = vmul.f32 %v15513_v10, %v11510_v23 }
 0x316   : > { %v3550_v63 = vmul.f32 %v15190_v60, %v11513_v46  ;;  %v7744_v36 = vrot.slane %v3538_v57, 9  ;;  %v3988_v12 = vrot.slane %v3539_v4, 7  ;;  %v3991_v25 = vrot.slane %v3540_v34, 7 }
 0x317   : > { %v3994_v41 = vrot.slane %v3541_v30, 7  ;;  %v7745_v14 = vrot.slane %v3547_v62, 9  ;;  %v4013_v50 = vrot.slane %v3548_v54, 7  ;;  %v4016_v51 = vrot.slane %v3549_v3, 7  ;;  %v15570_v62 = vld [vmem:[#allocation87_spill] sm:$0xff] }
 0x318   : > { %v3989_v20 = vsel %vm8176_vm10, %v7744_v36, %v3988_v12  ;;  %v3990_v32 = vrot.slane %v3988_v12, 2  ;;  %v3993_v52 = vrot.slane %v3991_v25, 2  ;;  %v4019_v31 = vrot.slane %v3550_v63, 7 }
 0x319   : > { %v3996_v42 = vrot.slane %v3994_v41, 2  ;;  %v4014_v45 = vsel %vm8176_vm10, %v7745_v14, %v4013_v50  ;;  %v4015_v48 = vrot.slane %v4013_v50, 2  ;;  %v4018_v24 = vrot.slane %v4016_v51, 2 }
 0x31a   : > { %v3992_v57 = vsel %vm8176_vm10, %v3990_v32, %v3991_v25  ;;  %v3995_v4 = vsel %vm8176_vm10, %v3993_v52, %v3994_v41  ;;  %v11658_v34 = vrot.slane %v4019_v31, 2  ;;  %v4344_v30 = vadd.f32 %v3989_v20, %v3377_v1 }
 0x31b   : > { %v15571_v54 = vrot.slane %v15570_v62, 7  ;;  %v4017_v63 = vsel %vm8176_vm10, %v4015_v48, %v4016_v51  ;;  %v4020_v36 = vsel %vm8176_vm10, %v4018_v24, %v4019_v31  ;;  %v4345_v12 = vadd.f32 %v3992_v57, %v3378_v16 }
 0x31c   : > { %15569 = vst [vmem:[#allocation46_spill] sm:$0xff] %v11658_v34  ;;  %v4346_v14 = vadd.f32 %v3995_v4, %v3379_v17  ;;  %v4352_v50 = vadd.f32 %v4014_v45, %v3385_v56  ;;  %v4353_v41 = vadd.f32 %v4017_v63, %v3386_v7  ;;  %v4354_v32 = vadd.f32 %v4020_v36, %v3387_v40  ;;  %v15579_v36 = vld [vmem:[#allocation19_spill] sm:$0xff]  ;;  %v15600_v34 = vld [vmem:[#allocation140_spill] sm:$0xff] }
 0x31d   : > { %v3998_v3 = vsel %vm8176_vm10, %v3996_v42, %v15571_v54  ;;  %v4472_v1 = vmul.f32 %v15474_v29, %v15540_v59  ;;  %v4480_v20 = vmul.f32 %v15474_v29, %v15544_v21  ;;  %v4481_v52 = vmul.f32 %v15519_v28, %v15545_v5 }
 0x31e   : > { %v11668_v25 = vadd.f32 %v3998_v3, %v3380_v55  ;;  %v4482_v48 = vmul.f32 %v15520_v39, %v15547_v58  ;;  %v4488_v24 = vmul.f32 %v15474_v29, %v11507_v38  ;;  %v4489_v16 = vmul.f32 %v15519_v28, %v11510_v23  ;;  %v15573_v55 = vld [vmem:[#allocation85_spill] sm:$0xff]  ;;  %v15578_v3 = vld [vmem:[#allocation18_spill] sm:$0xff] }
 0x31f   : > { %v4490_v17 = vmul.f32 %v15520_v39, %v11513_v46  ;;  %v4600_v56 = vadd.f32 %v4472_v1, %v15573_v55  ;;  %v4608_v7 = vadd.f32 %v4480_v20, %v4344_v30  ;;  %v4609_v40 = vadd.f32 %v4481_v52, %v4345_v12  ;;  %v15577_v30 = vld [vmem:[#allocation12_spill] sm:$0xff] }
 0x320   : > { %15572 = vst [vmem:[#allocation68_spill] sm:$0xff] %v11668_v25  ;;  %v4736_v21 = vmul.f32 %v15475_v11, %v11478_v49  ;;  %v4610_v5 = vadd.f32 %v4482_v48, %v4346_v14  ;;  %v11687_v51 = vadd.f32 %v4488_v24, %v4352_v50  ;;  %v11689_v58 = vadd.f32 %v4489_v16, %v4353_v41  ;;  %v15582_v55 = vld [vmem:[#allocation52_spill] sm:$0xff] }
 0x321   : > { %v11691_v31 = vadd.f32 %v4490_v17, %v4354_v32  ;;  %v4744_v42 = vmul.f32 %v15475_v11, %v11492_v61  ;;  %v4745_v45 = vmul.f32 %v15309_v9, %v11507_v38  ;;  %v4746_v57 = vmul.f32 %v15206_v27, %v11510_v23  ;;  %v15580_v32 = vld [vmem:[#allocation20_spill] sm:$0xff] }
 0x322   : > { %15574 = vst [vmem:[#allocation77_spill] sm:$0xff] %v11687_v51  ;;  %v4864_v4 = vadd.f32 %v4736_v21, %v4600_v56  ;;  %v5024_v62 = vmul.f32 %v15577_v30, %v11478_v49  ;;  %v5033_v54 = vmul.f32 %v15577_v30, %v11492_v61  ;;  %v5034_v63 = vmul.f32 %v15578_v3, %v11507_v38  ;;  %v1363_v49 = vpop.f32.mrf.mxu0  ;;  %v15581_v61 = vld [vmem:[#allocation122_spill] sm:$0xff]  ;;  %v15583_v21 = vld [vmem:[#allocation33_spill] sm:$0xff] }
 0x323   : > { %15575 = vst [vmem:[#allocation146_spill] sm:$0xff] %v11689_v58  ;;  %v5035_v12 = vmul.f32 %v15579_v36, %v11510_v23  ;;  %v4872_v14 = vadd.f32 %v4744_v42, %v4608_v7  ;;  %v4873_v50 = vadd.f32 %v4745_v45, %v4609_v40  ;;  %v4874_v41 = vadd.f32 %v4746_v57, %v4610_v5  ;;  %v15584_v40 = vld [vmem:[#allocation139_spill] sm:$0xff] }
 0x324   : > { %15576 = vst [vmem:[#allocation112_spill] sm:$0xff] %v11691_v31  ;;  %v5036_v1 = vmul.f32 %v15580_v32, %v11513_v46  ;;  %v7759_v20 = vrot.slane %v5024_v62, 9  ;;  %v7760_v52 = vrot.slane %v5033_v54, 9  ;;  %v5483_v48 = vrot.slane %v5034_v63, 7 }
 0x325   : > { %v5486_v24 = vrot.slane %v5035_v12, 7  ;;  %v5975_v17 = vmul.f32 %v15581_v61, %v11507_v38  ;;  %v5976_v56 = vmul.f32 %v15582_v55, %v11510_v23  ;;  %v5977_v7 = vmul.f32 %v15583_v21, %v11513_v46  ;;  %v11726_v23 = vld [vmem:[%s14360_s2] ss:$0 sm:$0xff] }
 0x326   : > { %v5489_v16 = vrot.slane %v5036_v1, 7  ;;  %v15585_v5 = vrot.slane %v15584_v40, 7  ;;  %v5484_v45 = vsel %vm8176_vm10, %v7760_v52, %v5483_v48  ;;  %v5485_v57 = vrot.slane %v5483_v48, 2  ;;  %15587 = vst [vmem:[#allocation85_spill] sm:$0xff] %v11726_v23  ;;  %v15588_v52 = vld [vmem:[#allocation84_spill] sm:$0xff]  ;;  %v15589_v40 = vld [vmem:[#allocation106_spill] sm:$0xff] }
 0x327   : > { %v5488_v62 = vrot.slane %v5486_v24, 2  ;;  %v5839_v38 = vadd.f32 %v5484_v45, %v4872_v14  ;;  %v1364_v12 = vadd.f32 %v11726_v23, %v1363_v49  ;;  %v11734_v48 = vrot.slane %v15588_v52, 6  ;;  %v15591_v45 = vld [vmem:[#allocation78_spill] sm:$0xff]  ;;  %v15592_v49 = vld [vmem:[#allocation108_spill] sm:$0xff] }
 0x328   : > { %v5459_v42 = vsel %vm8176_vm10, %v7759_v20, %v15585_v5  ;;  %v11721_v54 = vrot.slane %v5489_v16, 2  ;;  %v5487_v1 = vsel %vm8176_vm10, %v5485_v57, %v5486_v24  ;;  %v15590_v5 = vld [vmem:[#allocation3_spill] sm:$0xff]  ;;  %v11743_v15 = vmul.f32 %v15593_v6, %v15592_v49  ;;  %v15595_v57 = vld [vmem:[#allocation13_spill] sm:$0xff] }
 0x329   : > { %v5831_v63 = vadd.f32 %v5459_v42, %v4864_v4  ;;  %v5490_v20 = vsel %vm8176_vm10, %v5488_v62, %v5489_v16  ;;  %v11738_v4 = vmul.f32 %v15590_v5, %v15589_v40  ;;  %v5840_v14 = vadd.f32 %v5487_v1, %v4873_v50  ;;  %v15594_v24 = vld [vmem:[#allocation115_spill] sm:$0xff]  ;;  %v15598_v1 = vld [vmem:[#allocation117_spill] sm:$0xff] }
 0x32a   : > { %15586 = vst [vmem:[#allocation87_spill] sm:$0xff] %v11721_v54  ;;  %v5841_v42 = vadd.f32 %v5490_v20, %v4874_v41  ;;  %v6103_v58 = vadd.f32 %v5975_v17, %v5839_v38  ;;  %v1440_v51 = vmax.f32 %v1364_v12, 0.0  ;;  %v11747_v16 = vmul.f32 %v15595_v57, %v15594_v24  ;;  %v15596_v50 = vld [vmem:[#allocation83_spill] sm:$0xff] }
 0x32b   : > { %v6095_v31 = vadd.f32 %v15591_v45, %v5831_v63  ;;  %v11751_v62 = vmul.f32 %v15590_v5, %v11734_v48  ;;  %v6104_v52 = vadd.f32 %v5976_v56, %v5840_v14  ;;  %v15597_v38 = vld [vmem:[#allocation111_spill] sm:$0xff]  ;;  %v11767_v43 = vmul.f32 %v15595_v57, %v15600_v34  ;;  %v15601_v56 = vld [vmem:[#allocation54_spill] sm:$0xff] }
 0x32c   : > { %v6105_v54 = vadd.f32 %v5977_v7, %v5841_v42  ;;  %v6241_v63 = vadd.f32 %v15596_v50, %v6103_v58  ;;  %v11755_v17 = vmin.f32 %v1440_v51, 6.0  ;;  %v11759_v12 = vmul.f32 %v15593_v6, %v15597_v38  ;;  %v15599_v20 = vld [vmem:[#allocation11_spill] sm:$0xff] }
 0x32d   : > { %v6233_v41 = vadd.f32 %v15596_v50, %v6095_v31  ;;  %v11763_v45 = vmul.f32 %v15599_v20, %v15598_v1  ;;  %v6242_v7 = vadd.f32 %v15601_v56, %v6104_v52  ;;  %v15602_v14 = vld [vmem:[#allocation55_spill] sm:$0xff]  ;;  %v15606_v56 = vld [vmem:[#allocation4_spill] sm:$0xff] }
 0x32e   : > { %v6243_v31 = vadd.f32 %v15602_v14, %v6105_v54  ;;  %v6369_v58 = vmax.f32 %v6241_v63, 0.0  ;;  %v11772_v51 = vrot.slane %v11755_v17, 2  ;;  %v11775_v50 = vrot.slane %v11755_v17, 4  ;;  %v15605_v63 = vld [vmem:[#allocation2_spill] sm:$0xff] }
 0x32f   : > { %v6361_v42 = vmax.f32 %v6233_v41, 0.0  ;;  %v11778_v25 = vrot.slane %v11755_v17, 6  ;;  %v1861_v44 = vmul.f32 %v15590_v5, %v11755_v17  ;;  %v6370_v57 = vmax.f32 %v6242_v7, 0.0 }
 0x330   : > { %v6371_v46 = vmax.f32 %v6243_v31, 0.0  ;;  %v11784_v52 = vmin.f32 %v6369_v58, 6.0  ;;  %v1862_v54 = vmul.f32 %v15593_v6, %v11772_v51  ;;  %v1863_v41 = vmul.f32 %v15599_v20, %v11775_v50  ;;  %v15609_v31 = vld [vmem:[#allocation114_spill] sm:$0xff] }
 0x331   : > { %v11782_v23 = vmin.f32 %v6361_v42, 6.0  ;;  %v2007_v14 = vmul.f32 %v15605_v63, %v15589_v40  ;;  %v2008_v21 = vmul.f32 %v15606_v56, %v15592_v49  ;;  %v11794_v55 = vmin.f32 %v6370_v57, 6.0  ;;  %v15610_v42 = vld [vmem:[#allocation5_spill] sm:$0xff] }
 0x332   : > { %15604 = vst [vmem:[#allocation84_spill] sm:$0xff] %v11784_v52  ;;  %v11796_v7 = vmin.f32 %v6371_v46, 6.0  ;;  %v2009_v58 = vmul.f32 %v15610_v42, %v15609_v31  ;;  %v15611_v52 = vld [vmem:[#allocation7_spill] sm:$0xff]  ;;  %v2016_v6 = vmul.f32 %v15605_v63, %v11734_v48  ;;  %v2017_v20 = vmul.f32 %v15606_v56, %v15597_v38 }
 0x333   : > { %15603 = vst [vmem:[#allocation139_spill] sm:$0xff] %v11782_v23  ;;  %v2010_v23 = vmul.f32 %v15611_v52, %v15594_v24  ;;  %v2018_v40 = vmul.f32 %v15610_v42, %v15598_v1  ;;  %v2019_v57 = vmul.f32 %v15611_v52, %v15600_v34  ;;  %v2025_v46 = vmul.f32 %v15605_v63, %v11755_v17 }
 0x334   : > { %15607 = vst [vmem:[#allocation106_spill] sm:$0xff] %v11794_v55  ;;  %v2027_v55 = vmul.f32 %v15610_v42, %v11775_v50  ;;  %v2028_v5 = vmul.f32 %v15611_v52, %v11778_v25  ;;  %v7724_v61 = vrot.slane %v2007_v14, 9  ;;  %v2393_v53 = vrot.slane %v2008_v21, 7 }
 0x335   : > { %15608 = vst [vmem:[#allocation78_spill] sm:$0xff] %v11796_v7  ;;  %v2026_v7 = vmul.f32 %v15606_v56, %v11772_v51  ;;  %v2396_v33 = vrot.slane %v2009_v58, 7  ;;  %v2399_v32 = vrot.slane %v2010_v23, 7  ;;  %v7725_v36 = vrot.slane %v2016_v6, 9  ;;  %v15612_v23 = vld [vmem:[#allocation129_spill] sm:$0xff] }
 0x336   : > { %v2418_v3 = vrot.slane %v2017_v20, 7  ;;  %v2421_v30 = vrot.slane %v2018_v40, 7  ;;  %v2424_v59 = vrot.slane %v2019_v57, 7  ;;  %v2394_v63 = vsel %vm8176_vm10, %v7724_v61, %v2393_v53 }
 0x337   : > { %v2395_v27 = vrot.slane %v2393_v53, 2  ;;  %v2398_v9 = vrot.slane %v2396_v33, 2  ;;  %v2401_v56 = vrot.slane %v2399_v32, 2  ;;  %v15613_v20 = vrot.slane %v15612_v23, 7 }
 0x338   : > { %v2419_v42 = vsel %vm8176_vm10, %v7725_v36, %v2418_v3  ;;  %v2420_v11 = vrot.slane %v2418_v3, 2  ;;  %v2423_v39 = vrot.slane %v2421_v30, 2  ;;  %v2426_v52 = vrot.slane %v2424_v59, 2  ;;  %v15614_v36 = vld [vmem:[#allocation130_spill] sm:$0xff] }
 0x339   : > { %v2397_v21 = vsel %vm8176_vm10, %v2395_v27, %v2396_v33  ;;  %v2400_v6 = vsel %vm8176_vm10, %v2398_v9, %v2399_v32  ;;  %v2403_v61 = vsel %vm8176_vm10, %v2401_v56, %v15613_v20  ;;  %v7726_v53 = vrot.slane %v2025_v46, 9 }
 0x33a   : > { %v2422_v14 = vsel %vm8176_vm10, %v2420_v11, %v2421_v30  ;;  %v2425_v3 = vsel %vm8176_vm10, %v2423_v39, %v2424_v59  ;;  %v15615_v58 = vrot.slane %v15614_v36, 7  ;;  %v2443_v33 = vrot.slane %v2026_v7, 7  ;;  %v15616_v11 = vld [vmem:[#allocation118_spill] sm:$0xff] }
 0x33b   : > { %v2446_v40 = vrot.slane %v2027_v55, 7  ;;  %v2449_v9 = vrot.slane %v2028_v5, 7  ;;  %v2817_v32 = vadd.f32 %v2394_v63, %v11738_v4  ;;  %v2818_v57 = vadd.f32 %v2397_v21, %v11743_v15 }
 0x33c   : > { %v2428_v27 = vsel %vm8176_vm10, %v2426_v52, %v15615_v58  ;;  %v2444_v56 = vsel %vm8176_vm10, %v7726_v53, %v2443_v33  ;;  %v2445_v46 = vrot.slane %v2443_v33, 2  ;;  %v2819_v30 = vadd.f32 %v2400_v6, %v15616_v11  ;;  %v15617_v6 = vld [vmem:[#allocation116_spill] sm:$0xff] }
 0x33d   : > { %v2820_v39 = vadd.f32 %v2403_v61, %v11747_v16  ;;  %v2448_v59 = vrot.slane %v2446_v40, 2  ;;  %v11844_v23 = vrot.slane %v2449_v9, 2  ;;  %v2825_v52 = vadd.f32 %v2419_v42, %v11751_v62 }
 0x33e   : > { %v2826_v55 = vadd.f32 %v2422_v14, %v11759_v12  ;;  %v2447_v5 = vsel %vm8176_vm10, %v2445_v46, %v2446_v40  ;;  %v2827_v15 = vadd.f32 %v2425_v3, %v11763_v45  ;;  %v11852_v4 = vadd.f32 %v2428_v27, %v11767_v43 }
 0x33f   : > { %v2833_v63 = vadd.f32 %v2444_v56, %v1861_v44  ;;  %v2450_v7 = vsel %vm8176_vm10, %v2448_v59, %v2449_v9  ;;  %v2834_v16 = vadd.f32 %v2447_v5, %v1862_v54  ;;  %v2953_v21 = vmul.f32 %v15457_v19, %v15592_v49  ;;  %v15620_v5 = vld [vmem:[#allocation69_spill] sm:$0xff] }
 0x340   : > { %v2954_v62 = vmul.f32 %v15561_v35, %v15609_v31  ;;  %v2835_v12 = vadd.f32 %v2450_v7, %v1863_v41  ;;  %v2955_v42 = vmul.f32 %v15562_v47, %v15594_v24  ;;  %v2956_v45 = vmul.f32 %v15564_v0, %v15617_v6 }
 0x341   : > { %v2961_v43 = vmul.f32 %v15457_v19, %v15597_v38  ;;  %v2962_v44 = vmul.f32 %v15561_v35, %v15598_v1  ;;  %v2963_v54 = vmul.f32 %v15562_v47, %v15600_v34  ;;  %v2969_v20 = vmul.f32 %v15457_v19, %v11772_v51 }
 0x342   : > { %v2970_v41 = vmul.f32 %v15561_v35, %v11775_v50  ;;  %v2971_v24 = vmul.f32 %v15562_v47, %v11778_v25  ;;  %v3081_v31 = vadd.f32 %v2953_v21, %v2817_v32  ;;  %v3082_v61 = vadd.f32 %v2954_v62, %v2818_v57 }
 0x343   : > { %v3083_v53 = vadd.f32 %v2955_v42, %v2819_v30  ;;  %v3084_v14 = vadd.f32 %v2956_v45, %v2820_v39  ;;  %v3089_v3 = vadd.f32 %v2961_v43, %v2825_v52  ;;  %v3090_v36 = vadd.f32 %v2962_v44, %v2826_v55  ;;  %v15618_v39 = vld [vmem:[#allocation74_spill] sm:$0xff]  ;;  %v15619_v52 = vld [vmem:[#allocation48_spill] sm:$0xff] }
 0x344   : > { %v3091_v58 = vadd.f32 %v2963_v54, %v2827_v15  ;;  %v3097_v27 = vadd.f32 %v2969_v20, %v2833_v63  ;;  %v3098_v33 = vadd.f32 %v2970_v41, %v2834_v16  ;;  %v3099_v40 = vadd.f32 %v2971_v24, %v2835_v12 }
 0x345   : > { %v3217_v9 = vmul.f32 %v15465_v18, %v11734_v48  ;;  %v3218_v56 = vmul.f32 %v15376_v8, %v15597_v38  ;;  %v3219_v46 = vmul.f32 %v15509_v26, %v15598_v1  ;;  %v3220_v32 = vmul.f32 %v15101_v2, %v15600_v34 }
 0x346   : > { %v3225_v57 = vmul.f32 %v15465_v18, %v11755_v17  ;;  %v3226_v11 = vmul.f32 %v15376_v8, %v11772_v51  ;;  %v3227_v30 = vmul.f32 %v15509_v26, %v11775_v50  ;;  %v3233_v59 = vmul.f32 %v15465_v18, %v15618_v39 }
 0x347   : > { %v3234_v55 = vmul.f32 %v15376_v8, %v15619_v52  ;;  %v3235_v15 = vmul.f32 %v15509_v26, %v15620_v5  ;;  %v3345_v63 = vadd.f32 %v3217_v9, %v3081_v31  ;;  %v3346_v7 = vadd.f32 %v3218_v56, %v3082_v61 }
 0x348   : > { %v3347_v16 = vadd.f32 %v3219_v46, %v3083_v53  ;;  %v3348_v21 = vadd.f32 %v3220_v32, %v3084_v14  ;;  %v3353_v62 = vadd.f32 %v3225_v57, %v3089_v3  ;;  %v3354_v12 = vadd.f32 %v3226_v11, %v3090_v36 }
 0x349   : > { %v3355_v42 = vadd.f32 %v3227_v30, %v3091_v58  ;;  %v3361_v6 = vadd.f32 %v3233_v59, %v3097_v27  ;;  %v3362_v45 = vadd.f32 %v3234_v55, %v3098_v33  ;;  %v3363_v43 = vadd.f32 %v3235_v15, %v3099_v40 }
 0x34a   : > { %v3502_v44 = vmul.f32 %v15568_v37, %v11734_v48  ;;  %v3503_v54 = vmul.f32 %v15321_v22, %v15597_v38  ;;  %v3504_v20 = vmul.f32 %v15513_v10, %v15598_v1  ;;  %v3505_v41 = vmul.f32 %v15190_v60, %v15600_v34 }
 0x34b   : > { %v3511_v24 = vmul.f32 %v15568_v37, %v11755_v17  ;;  %v3512_v31 = vmul.f32 %v15321_v22, %v11772_v51  ;;  %v3513_v61 = vmul.f32 %v15513_v10, %v11775_v50  ;;  %v3514_v53 = vmul.f32 %v15190_v60, %v11778_v25 }
 0x34c   : > { %v3520_v14 = vmul.f32 %v15568_v37, %v15618_v39  ;;  %v3521_v3 = vmul.f32 %v15321_v22, %v15619_v52  ;;  %v3522_v36 = vmul.f32 %v15513_v10, %v15620_v5  ;;  %v7740_v58 = vrot.slane %v3502_v44, 9 }
 0x34d   : > { %v3888_v27 = vrot.slane %v3503_v54, 7  ;;  %v3891_v33 = vrot.slane %v3504_v20, 7  ;;  %v3894_v40 = vrot.slane %v3505_v41, 7  ;;  %v7741_v9 = vrot.slane %v3511_v24, 9 }
 0x34e   : > { %v3913_v56 = vrot.slane %v3512_v31, 7  ;;  %v3916_v57 = vrot.slane %v3513_v61, 7  ;;  %v3919_v11 = vrot.slane %v3514_v53, 7  ;;  %v7742_v41 = vrot.slane %v3520_v14, 9  ;;  %v15622_v31 = vld [vmem:[#allocation157_spill] sm:$0xff] }
 0x34f   : > { %v3889_v46 = vsel %vm8176_vm10, %v7740_v58, %v3888_v27  ;;  %v3890_v32 = vrot.slane %v3888_v27, 2  ;;  %v3893_v30 = vrot.slane %v3891_v33, 2  ;;  %v3896_v59 = vrot.slane %v3894_v40, 2 }
 0x350   : > { %v3914_v55 = vsel %vm8176_vm10, %v7741_v9, %v3913_v56  ;;  %v3915_v15 = vrot.slane %v3913_v56, 2  ;;  %v3918_v54 = vrot.slane %v3916_v57, 2  ;;  %v11924_v20 = vrot.slane %v3919_v11, 2 }
 0x351   : > { %v3892_v44 = vsel %vm8176_vm10, %v3890_v32, %v3891_v33  ;;  %v3895_v24 = vsel %vm8176_vm10, %v3893_v30, %v3894_v40  ;;  %v15623_v58 = vrot.slane %v15622_v31, 7  ;;  %v3938_v27 = vrot.slane %v3521_v3, 7 }
 0x352   : > { %15621 = vst [vmem:[#allocation108_spill] sm:$0xff] %v11924_v20  ;;  %v3917_v53 = vsel %vm8176_vm10, %v3915_v15, %v3916_v57  ;;  %v3920_v9 = vsel %vm8176_vm10, %v3918_v54, %v3919_v11  ;;  %v3941_v33 = vrot.slane %v3522_v36, 7  ;;  %v4312_v56 = vadd.f32 %v3889_v46, %v3345_v63 }
 0x353   : > { %v3898_v61 = vsel %vm8176_vm10, %v3896_v59, %v15623_v58  ;;  %v4313_v32 = vadd.f32 %v3892_v44, %v3346_v7  ;;  %v3939_v14 = vsel %vm8176_vm10, %v7742_v41, %v3938_v27  ;;  %v3940_v37 = vrot.slane %v3938_v27, 2  ;;  %v15625_v7 = vld [vmem:[#allocation71_spill] sm:$0xff] }
 0x354   : > { %v4314_v40 = vadd.f32 %v3895_v24, %v3347_v16  ;;  %v11938_v30 = vadd.f32 %v3898_v61, %v3348_v21  ;;  %v3943_v31 = vrot.slane %v3941_v33, 2  ;;  %v4320_v20 = vadd.f32 %v3914_v55, %v3353_v62 }
 0x355   : > { %v4321_v59 = vadd.f32 %v3917_v53, %v3354_v12  ;;  %v4322_v58 = vadd.f32 %v3920_v9, %v3355_v42  ;;  %v3942_v3 = vsel %vm8176_vm10, %v3940_v37, %v3941_v33  ;;  %v4328_v57 = vadd.f32 %v3939_v14, %v3361_v6  ;;  %v15627_v12 = vld [vmem:[#allocation38_spill] sm:$0xff]  ;;  %v15629_v53 = vld [vmem:[#allocation73_spill] sm:$0xff]  ;;  %v15630_v9 = vld [vmem:[#allocation16_spill] sm:$0xff] }
 0x356   : > { %15624 = vst [vmem:[#allocation115_spill] sm:$0xff] %v11938_v30  ;;  %v4440_v36 = vmul.f32 %v15474_v29, %v15592_v49  ;;  %v4448_v63 = vmul.f32 %v15474_v29, %v15597_v38  ;;  %v15626_v46 = vrot.slane %v15625_v7, 7  ;;  %v4329_v21 = vadd.f32 %v3942_v3, %v3362_v45 }
 0x357   : > { %v4449_v62 = vmul.f32 %v15519_v28, %v15598_v1  ;;  %v4450_v42 = vmul.f32 %v15627_v12, %v15600_v34  ;;  %v4456_v6 = vmul.f32 %v15474_v29, %v11772_v51  ;;  %v4457_v49 = vmul.f32 %v15519_v28, %v11775_v50  ;;  %v15628_v1 = vld [vmem:[#allocation121_spill] sm:$0xff] }
 0x358   : > { %v3945_v16 = vsel %vm8176_vm10, %v3943_v31, %v15626_v46  ;;  %v4458_v38 = vmul.f32 %v15627_v12, %v11778_v25  ;;  %v4464_v11 = vmul.f32 %v15474_v29, %v15619_v52  ;;  %v4465_v45 = vmul.f32 %v15519_v28, %v15620_v5  ;;  %v15631_v31 = vld [vmem:[#allocation28_spill] sm:$0xff] }
 0x359   : > { %v4330_v37 = vadd.f32 %v3945_v16, %v3363_v43  ;;  %v4568_v55 = vadd.f32 %v4440_v36, %v15628_v1  ;;  %v4576_v15 = vadd.f32 %v4448_v63, %v4312_v56  ;;  %v4577_v34 = vadd.f32 %v4449_v62, %v4313_v32  ;;  %v15632_v56 = vld [vmem:[#allocation49_spill] sm:$0xff]  ;;  %v15634_v36 = vld [vmem:[#allocation94_spill] sm:$0xff] }
 0x35a   : > { %v4578_v43 = vadd.f32 %v4450_v42, %v4314_v40  ;;  %v4584_v44 = vadd.f32 %v4456_v6, %v4320_v20  ;;  %v4585_v54 = vadd.f32 %v4457_v49, %v4321_v59  ;;  %v4586_v41 = vadd.f32 %v4458_v38, %v4322_v58  ;;  %v15633_v58 = vld [vmem:[#allocation93_spill] sm:$0xff] }
 0x35b   : > { %v4592_v24 = vadd.f32 %v4464_v11, %v4328_v57  ;;  %v4593_v61 = vadd.f32 %v4465_v45, %v4329_v21  ;;  %v4594_v27 = vadd.f32 %v15629_v53, %v4330_v37  ;;  %v4704_v33 = vmul.f32 %v15630_v9, %v11734_v48  ;;  %v15635_v38 = vld [vmem:[#allocation89_spill] sm:$0xff]  ;;  %v15636_v45 = vld [vmem:[#allocation12_spill] sm:$0xff] }
 0x35c   : > { %v4712_v14 = vmul.f32 %v15630_v9, %v11755_v17  ;;  %v4713_v3 = vmul.f32 %v15631_v31, %v11772_v51  ;;  %v4714_v32 = vmul.f32 %v15632_v56, %v11775_v50  ;;  %v4720_v20 = vmul.f32 %v15630_v9, %v15618_v39 }
 0x35d   : > { %v4721_v40 = vmul.f32 %v15631_v31, %v15619_v52  ;;  %v4722_v59 = vmul.f32 %v15632_v56, %v15620_v5  ;;  %v4728_v57 = vmul.f32 %v15630_v9, %v15633_v58  ;;  %v4729_v63 = vmul.f32 %v15631_v31, %v15634_v36  ;;  %v15637_v56 = vld [vmem:[#allocation18_spill] sm:$0xff] }
 0x35e   : > { %v4832_v7 = vadd.f32 %v4704_v33, %v4568_v55  ;;  %v4840_v46 = vadd.f32 %v4712_v14, %v4576_v15  ;;  %v4841_v16 = vadd.f32 %v4713_v3, %v4577_v34  ;;  %v4842_v21 = vadd.f32 %v4714_v32, %v4578_v43  ;;  %v15638_v55 = vld [vmem:[#allocation19_spill] sm:$0xff]  ;;  %v15639_v34 = vld [vmem:[#allocation20_spill] sm:$0xff] }
 0x35f   : > { %v4848_v62 = vadd.f32 %v4720_v20, %v4584_v44  ;;  %v4849_v42 = vadd.f32 %v4721_v40, %v4585_v54  ;;  %v4850_v37 = vadd.f32 %v4722_v59, %v4586_v41  ;;  %v4856_v6 = vadd.f32 %v4728_v57, %v4592_v24  ;;  %v15640_v24 = vld [vmem:[#allocation44_spill] sm:$0xff]  ;;  %v15642_v40 = vld [vmem:[#allocation142_spill] sm:$0xff] }
 0x360   : > { %v4857_v49 = vadd.f32 %v4729_v63, %v4593_v61  ;;  %v4858_v11 = vadd.f32 %v15635_v38, %v4594_v27  ;;  %v4988_v1 = vmul.f32 %v15636_v45, %v11734_v48  ;;  %v4997_v53 = vmul.f32 %v15636_v45, %v11755_v17  ;;  %v15641_v27 = vld [vmem:[#allocation62_spill] sm:$0xff] }
 0x361   : > { %v4998_v31 = vmul.f32 %v15637_v56, %v11772_v51  ;;  %v4999_v15 = vmul.f32 %v15638_v55, %v11775_v50  ;;  %v5000_v43 = vmul.f32 %v15639_v34, %v11778_v25  ;;  %v5006_v44 = vmul.f32 %v15636_v45, %v15618_v39 }
 0x362   : > { %v5007_v54 = vmul.f32 %v15637_v56, %v15619_v52  ;;  %v5008_v48 = vmul.f32 %v15638_v55, %v15620_v5  ;;  %v5015_v17 = vmul.f32 %v15636_v45, %v15633_v58  ;;  %v5016_v41 = vmul.f32 %v15637_v56, %v15634_v36 }
 0x363   : > { %v5017_v61 = vmul.f32 %v15638_v55, %v15640_v24  ;;  %v5018_v33 = vmul.f32 %v15639_v34, %v15641_v27  ;;  %v7755_v14 = vrot.slane %v4988_v1, 9  ;;  %v7756_v39 = vrot.slane %v4997_v53, 9 }
 0x364   : > { %v5383_v3 = vrot.slane %v4998_v31, 7  ;;  %v5386_v32 = vrot.slane %v4999_v15, 7  ;;  %v5389_v20 = vrot.slane %v5000_v43, 7  ;;  %v15643_v59 = vrot.slane %v15642_v40, 7 }
 0x365   : > { %v7757_v58 = vrot.slane %v5006_v44, 9  ;;  %v5408_v63 = vrot.slane %v5007_v54, 7  ;;  %v5411_v38 = vrot.slane %v5008_v48, 7  ;;  %v7758_v15 = vrot.slane %v5015_v17, 9 }
 0x366   : > { %v5359_v57 = vsel %vm8176_vm10, %v7755_v14, %v15643_v59  ;;  %v5384_v45 = vsel %vm8176_vm10, %v7756_v39, %v5383_v3  ;;  %v5385_v55 = vrot.slane %v5383_v3, 2  ;;  %v5388_v56 = vrot.slane %v5386_v32, 2  ;;  %v15645_v39 = vld [vmem:[#allocation70_spill] sm:$0xff] }
 0x367   : > { %v12015_v30 = vrot.slane %v5389_v20, 2  ;;  %v5409_v31 = vsel %vm8176_vm10, %v7757_v58, %v5408_v63  ;;  %v5410_v1 = vrot.slane %v5408_v63, 2  ;;  %v5413_v53 = vrot.slane %v5411_v38, 2 }
 0x368   : > { %v5387_v43 = vsel %vm8176_vm10, %v5385_v55, %v5386_v32  ;;  %v5390_v44 = vsel %vm8176_vm10, %v5388_v56, %v5389_v20  ;;  %v5433_v54 = vrot.slane %v5016_v41, 7  ;;  %v5436_v48 = vrot.slane %v5017_v61, 7 }
 0x369   : > { %15644 = vst [vmem:[#allocation83_spill] sm:$0xff] %v12015_v30  ;;  %v5412_v14 = vsel %vm8176_vm10, %v5410_v1, %v5411_v38  ;;  %v15646_v3 = vrot.slane %v15645_v39, 7  ;;  %v5439_v59 = vrot.slane %v5018_v33, 7  ;;  %v5799_v58 = vadd.f32 %v5359_v57, %v4832_v7 }
 0x36a   : > { %v5434_v17 = vsel %vm8176_vm10, %v7758_v15, %v5433_v54  ;;  %v5435_v63 = vrot.slane %v5433_v54, 2  ;;  %v5438_v55 = vrot.slane %v5436_v48, 2  ;;  %v5807_v32 = vadd.f32 %v5384_v45, %v4840_v46  ;;  %v15648_v15 = vld [vmem:[#allocation122_spill] sm:$0xff]  ;;  %v15649_v46 = vld [vmem:[#allocation52_spill] sm:$0xff] }
 0x36b   : > { %v5415_v40 = vsel %vm8176_vm10, %v5413_v53, %v15646_v3  ;;  %v12031_v30 = vrot.slane %v5439_v59, 2  ;;  %v5808_v56 = vadd.f32 %v5387_v43, %v4841_v16  ;;  %v5809_v41 = vadd.f32 %v5390_v44, %v4842_v21  ;;  %v15650_v16 = vld [vmem:[#allocation33_spill] sm:$0xff] }
 0x36c   : > { %v5815_v61 = vadd.f32 %v5409_v31, %v4848_v62  ;;  %v5437_v20 = vsel %vm8176_vm10, %v5435_v63, %v5436_v48  ;;  %v5440_v38 = vsel %vm8176_vm10, %v5438_v55, %v5439_v59  ;;  %v5816_v1 = vadd.f32 %v5412_v14, %v4849_v42  ;;  %v12046_v62 = vld [vmem:[%s14361_s3 + $0x8] ss:$0 sm:$0xff]  ;;  %v15656_v63 = vld [vmem:[#allocation55_spill] sm:$0xff] }
 0x36d   : > { %15647 = vst [vmem:[#allocation111_spill] sm:$0xff] %v12031_v30  ;;  %v5817_v33 = vadd.f32 %v5415_v40, %v4850_v37  ;;  %v5823_v7 = vadd.f32 %v5434_v17, %v4856_v6  ;;  %v5824_v57 = vadd.f32 %v5437_v20, %v4857_v49  ;;  %v5825_v53 = vadd.f32 %v5440_v38, %v4858_v11  ;;  %v15652_v49 = vld [vmem:[#allocation143_spill] sm:$0xff] }
 0x36e   : > { %v5943_v54 = vmul.f32 %v15648_v15, %v11772_v51  ;;  %v5944_v45 = vmul.f32 %v15649_v46, %v11775_v50  ;;  %v5945_v21 = vmul.f32 %v15650_v16, %v11778_v25  ;;  %15651 = vst [vmem:[#allocation117_spill] sm:$0xff] %v12046_v62  ;;  %v5951_v42 = vmul.f32 %v12046_v62, %v15619_v52  ;;  %v15653_v52 = vld [vmem:[#allocation82_spill] sm:$0xff] }
 0x36f   : > { %v5952_v37 = vmul.f32 %v15649_v46, %v15620_v5  ;;  %v5959_v51 = vmul.f32 %v12046_v62, %v15634_v36  ;;  %v5960_v50 = vmul.f32 %v15649_v46, %v15640_v24  ;;  %v5961_v6 = vmul.f32 %v15650_v16, %v15641_v27  ;;  %v12063_v36 = vld [vmem:[%s14362_s4] ss:$0 sm:$0xff]  ;;  %v15693_v27 = vld [vmem:[#allocation46_spill] sm:$0xff] }
 0x370   : > { %v6063_v11 = vadd.f32 %v15652_v49, %v5799_v58  ;;  %v6071_v31 = vadd.f32 %v5943_v54, %v5807_v32  ;;  %v6072_v43 = vadd.f32 %v5944_v45, %v5808_v56  ;;  %v6073_v44 = vadd.f32 %v5945_v21, %v5809_v41  ;;  %15654 = vst [vmem:[#allocation140_spill] sm:$0xff] %v12063_v36  ;;  %v15655_v58 = vld [vmem:[#allocation54_spill] sm:$0xff]  ;;  %v15691_v46 = vld [vmem:[#allocation53_spill] sm:$0xff] }
 0x371   : > { %v6079_v48 = vadd.f32 %v5951_v42, %v5815_v61  ;;  %v6080_v14 = vadd.f32 %v5952_v37, %v5816_v1  ;;  %v6081_v39 = vadd.f32 %v15653_v52, %v5817_v33  ;;  %v6087_v3 = vadd.f32 %v5959_v51, %v5823_v7  ;;  %v1388_v42 = vpop.f32.mrf.mxu2 }
 0x372   : > { %v6088_v5 = vadd.f32 %v5960_v50, %v5824_v57  ;;  %v6089_v40 = vadd.f32 %v5961_v6, %v5825_v53  ;;  %v6201_v24 = vadd.f32 %v12063_v36, %v6063_v11  ;;  %v6209_v59 = vadd.f32 %v12063_v36, %v6071_v31 }
 0x373   : > { %v6210_v17 = vadd.f32 %v15655_v58, %v6072_v43  ;;  %v6211_v55 = vadd.f32 %v15656_v63, %v6073_v44  ;;  %v6217_v32 = vadd.f32 %v12063_v36, %v6079_v48  ;;  %v6218_v56 = vadd.f32 %v15655_v58, %v6080_v14  ;;  %v1365_v44 = vpop.f32.mrf.mxu0 }
 0x374   : > { %v6219_v41 = vadd.f32 %v15656_v63, %v6081_v39  ;;  %v6225_v61 = vadd.f32 %v12063_v36, %v6087_v3  ;;  %v6226_v20 = vadd.f32 %v15655_v58, %v6088_v5  ;;  %v6227_v38 = vadd.f32 %v15656_v63, %v6089_v40  ;;  %v15666_v39 = vld [vmem:[#allocation85_spill] sm:$0xff]  ;;  %v15689_v36 = vld [vmem:[#allocation126_spill] sm:$0xff] }
 0x375   : > { %v6329_v1 = vmax.f32 %v6201_v24, 0.0  ;;  %v6337_v33 = vmax.f32 %v6209_v59, 0.0  ;;  %v6338_v7 = vmax.f32 %v6210_v17, 0.0  ;;  %v6339_v57 = vmax.f32 %v6211_v55, 0.0  ;;  %v15667_v5 = vld [vmem:[#allocation109_spill] sm:$0xff]  ;;  %v15669_v59 = vld [vmem:[#allocation36_spill] sm:$0xff] }
 0x376   : > { %v6345_v53 = vmax.f32 %v6217_v32, 0.0  ;;  %v6346_v15 = vmax.f32 %v6218_v56, 0.0  ;;  %v6347_v54 = vmax.f32 %v6219_v41, 0.0  ;;  %v6353_v45 = vmax.f32 %v6225_v61, 0.0  ;;  %v15668_v40 = vld [vmem:[#allocation13_spill] sm:$0xff]  ;;  %v15670_v32 = vld [vmem:[#allocation39_spill] sm:$0xff] }
 0x377   : > { %v6354_v21 = vmax.f32 %v6226_v20, 0.0  ;;  %v6355_v37 = vmax.f32 %v6227_v38, 0.0  ;;  %v6457_v51 = vmin.f32 %v6329_v1, 6.0  ;;  %v12075_v50 = vmin.f32 %v6337_v33, 6.0  ;;  %v15671_v61 = vld [vmem:[#allocation50_spill] sm:$0xff]  ;;  %v15672_v33 = vld [vmem:[#allocation65_spill] sm:$0xff] }
 0x378   : > { %v12077_v6 = vmin.f32 %v6338_v7, 6.0  ;;  %v12079_v49 = vmin.f32 %v6339_v57, 6.0  ;;  %v12081_v11 = vmin.f32 %v6345_v53, 6.0  ;;  %v12083_v31 = vmin.f32 %v6346_v15, 6.0  ;;  %v15673_v57 = vld [vmem:[#allocation68_spill] sm:$0xff]  ;;  %v15674_v15 = vld [vmem:[#allocation141_spill] sm:$0xff] }
 0x379   : > { %15657 = vst [vmem:[#allocation114_spill] sm:$0xff] %v12075_v50  ;;  %v12085_v43 = vmin.f32 %v6347_v54, 6.0  ;;  %v12087_v48 = vmin.f32 %v6353_v45, 6.0  ;;  %v12089_v14 = vmin.f32 %v6354_v21, 6.0  ;;  %v12091_v52 = vmin.f32 %v6355_v37, 6.0  ;;  %v15675_v37 = vld [vmem:[#allocation64_spill] sm:$0xff] }
 0x37a   : > { %15658 = vst [vmem:[#allocation129_spill] sm:$0xff] %v12077_v6  ;;  %v1389_v3 = vadd.f32 %v15666_v39, %v1388_v42  ;;  %v1896_v24 = vmul.f32 %v15668_v40, %v15667_v5  ;;  %v2996_v17 = vmul.f32 %v15564_v0, %v15669_v59  ;;  %v3260_v55 = vmul.f32 %v15101_v2, %v15667_v5  ;;  %v15686_v6 = vld [vmem:[#allocation149_spill] sm:$0xff] }
 0x37b   : > { %15659 = vst [vmem:[#allocation130_spill] sm:$0xff] %v12079_v49  ;;  %v4483_v56 = vmul.f32 %v15670_v32, %v15669_v59  ;;  %v4747_v20 = vmul.f32 %v15671_v61, %v15667_v5  ;;  %v1366_v38 = vadd.f32 %v15666_v39, %v1365_v44  ;;  %v12107_v1 = vmul.f32 %v15668_v40, %v11778_v25  ;;  %v15676_v44 = vld [vmem:[#allocation43_spill] sm:$0xff] }
 0x37c   : > { %15660 = vst [vmem:[#allocation118_spill] sm:$0xff] %v12081_v11  ;;  %v1450_v41 = vmax.f32 %v1389_v3, 0.0  ;;  %v3124_v7 = vadd.f32 %v2996_v17, %v15672_v33  ;;  %v2964_v54 = vmul.f32 %v15564_v0, %v15674_v15  ;;  %v12115_v45 = vmul.f32 %v15101_v2, %v11778_v25  ;;  %v15677_v17 = vld [vmem:[#allocation67_spill] sm:$0xff] }
 0x37d   : > { %15661 = vst [vmem:[#allocation116_spill] sm:$0xff] %v12083_v31  ;;  %v4611_v53 = vadd.f32 %v4483_v56, %v15673_v57  ;;  %v1441_v42 = vmax.f32 %v1366_v38, 0.0  ;;  %v12123_v39 = vmul.f32 %v15376_v8, %v15676_v44  ;;  %v12130_v56 = vmul.f32 %v15509_v26, %v15677_v17  ;;  %v15681_v57 = vld [vmem:[#allocation3_spill] sm:$0xff] }
 0x37e   : > { %15662 = vst [vmem:[#allocation74_spill] sm:$0xff] %v12085_v43  ;;  %v1491_v21 = vmin.f32 %v1450_v41, 6.0  ;;  %v3388_v3 = vadd.f32 %v3260_v55, %v3124_v7  ;;  %v12126_v59 = vadd.f32 %v2964_v54, %v11852_v4  ;;  %v15683_v4 = vld [vmem:[#allocation37_spill] sm:$0xff] }
 0x37f   : > { %15663 = vst [vmem:[#allocation48_spill] sm:$0xff] %v12087_v48  ;;  %v4875_v5 = vadd.f32 %v4747_v20, %v4611_v53  ;;  %v15684_v53 = vld [vmem:[#allocation4_spill] sm:$0xff]  ;;  %v12160_v30 = vmin.f32 %v1441_v42, 6.0 }
 0x380   : > { %15664 = vst [vmem:[#allocation69_spill] sm:$0xff] %v12089_v14  ;;  %v12132_v33 = vrot.slane %v1491_v21, 2  ;;  %v12134_v41 = vrot.slane %v1491_v21, 4  ;;  %v12136_v38 = vrot.slane %v1491_v21, 6  ;;  %v15682_v14 = vld [vmem:[#allocation22_spill] sm:$0xff]  ;;  %v3004_v55 = vmul.f32 %v15564_v0, %v1491_v21 }
 0x381   : > { %15665 = vst [vmem:[#allocation157_spill] sm:$0xff] %v12091_v52  ;;  %v1897_v52 = vmul.f32 %v15681_v57, %v1491_v21  ;;  %v2065_v48 = vmul.f32 %v15682_v14, %v1491_v21  ;;  %v3261_v20 = vmul.f32 %v15465_v18, %v1491_v21  ;;  %v3551_v7 = vmul.f32 %v15683_v4, %v1491_v21 }
 0x382   : > { %6730 = vst [vmem:[#allocation1] ss:$4 sm:$0xff] %v6457_v51  ;;  %v12119_v51 = vmul.f32 %v15465_v18, %v15675_v37  ;;  %v12145_v54 = vmul.f32 %v15684_v53, %v12132_v33  ;;  %v3005_v43 = vmul.f32 %v15457_v19, %v12132_v33  ;;  %v4491_v31 = vmul.f32 %v15670_v32, %v1491_v21 }
 0x383   : > { %15678 = vst [vmem:[#allocation71_spill] sm:$0xff] %v12132_v33  ;;  %v4748_v11 = vmul.f32 %v15630_v9, %v1491_v21  ;;  %v2552_v49 = vrot.slane %v2065_v48, 7  ;;  %v12152_v50 = vadd.f32 %v3261_v20, %v15686_v6  ;;  %v5978_v62 = vmul.f32 %v15691_v46, %v1491_v21  ;;  %v15692_v33 = vld [vmem:[#allocation42_spill] sm:$0xff] }
 0x384   : > { %15679 = vst [vmem:[#allocation121_spill] sm:$0xff] %v12134_v41  ;;  %v15688_v41 = vld [vmem:[#allocation51_spill] sm:$0xff]  ;;  %v12178_v42 = vrot.slane %v12160_v30, 4 }
 0x385   : > { %15680 = vst [vmem:[#allocation73_spill] sm:$0xff] %v12136_v38  ;;  %v4022_v38 = vrot.slane %v3551_v7, 7  ;;  %v5037_v63 = vmul.f32 %v15688_v41, %v1491_v21  ;;  %v12157_v16 = vadd.f32 %v4748_v11, %v15689_v36  ;;  %v2553_v34 = vsel %vm8176_vm10, %v15692_v33, %v2552_v49 }
 0x386   : > { %15685 = vst [vmem:[#allocation93_spill] sm:$0xff] %v12145_v54  ;;  %v2554_v48 = vrot.slane %v2552_v49, 2  ;;  %v2868_v7 = vadd.f32 %v2553_v34, %v1896_v24  ;;  %v12171_v36 = vrot.slane %v12160_v30, 2  ;;  %v15695_v11 = vrot.slane %v12145_v54, 7 }
 0x387   : > { %15687 = vst [vmem:[#allocation94_spill] sm:$0xff] %v12152_v50  ;;  %v4023_v6 = vsel %vm8176_vm10, %v15693_v27, %v4022_v38  ;;  %v12168_v20 = vrot.slane %v4022_v38, 2  ;;  %v5492_v50 = vrot.slane %v5037_v63, 7  ;;  %v12181_v49 = vrot.slane %v12160_v30, 6 }
 0x388   : > { %15690 = vst [vmem:[#allocation89_spill] sm:$0xff] %v12157_v16  ;;  %v4355_v58 = vadd.f32 %v4023_v6, %v3388_v3  ;;  %v2556_v21 = vsel %vm8176_vm10, %v2554_v48, %v15695_v11  ;;  %v1865_v27 = vmul.f32 %v15681_v57, %v12160_v30  ;;  %v12185_v24 = vadd.f32 %v3004_v55, %v2868_v7  ;;  %v15698_v3 = vld [vmem:[#allocation87_spill] sm:$0xff]  ;;  %v15700_v6 = vld [vmem:[#allocation10_spill] sm:$0xff] }
 0x389   : > { %15694 = vst [vmem:[#allocation44_spill] sm:$0xff] %v12168_v20  ;;  %v2869_v34 = vadd.f32 %v2556_v21, %v1897_v52  ;;  %v5493_v33 = vsel %vm8176_vm10, %v15698_v3, %v5492_v50  ;;  %v12192_v38 = vrot.slane %v5492_v50, 2  ;;  %v1866_v11 = vmul.f32 %v15700_v6, %v12171_v36  ;;  %v15701_v16 = vld [vmem:[#allocation11_spill] sm:$0xff]  ;;  %v15711_v6 = vld [vmem:[#allocation40_spill] sm:$0xff] }
 0x38a   : > { %15696 = vst [vmem:[#allocation142_spill] sm:$0xff] %v12185_v24  ;;  %v12187_v63 = vadd.f32 %v4491_v31, %v4355_v58  ;;  %v5842_v48 = vadd.f32 %v5493_v33, %v4875_v5  ;;  %v1867_v20 = vmul.f32 %v15701_v16, %v12178_v42  ;;  %v1868_v52 = vmul.f32 %v15668_v40, %v12181_v49  ;;  %v15703_v5 = vld [vmem:[#allocation5_spill] sm:$0xff]  ;;  %v15704_v7 = vld [vmem:[#allocation7_spill] sm:$0xff] }
 0x38b   : > { %15699 = vst [vmem:[#allocation122_spill] sm:$0xff] %v12192_v38  ;;  %v12198_v54 = vadd.f32 %v3005_v43, %v2869_v34  ;;  %v2029_v58 = vmul.f32 %v15682_v14, %v12160_v30  ;;  %v2030_v31 = vmul.f32 %v15684_v53, %v12171_v36  ;;  %v2031_v55 = vmul.f32 %v15703_v5, %v12178_v42 }
 0x38c   : > { %15697 = vst [vmem:[#allocation70_spill] sm:$0xff] %v12187_v63  ;;  %v6106_v50 = vadd.f32 %v5978_v62, %v5842_v48  ;;  %v2032_v21 = vmul.f32 %v15704_v7, %v12181_v49  ;;  %v2972_v43 = vmul.f32 %v15564_v0, %v12160_v30  ;;  %v2973_v33 = vmul.f32 %v15457_v19, %v12171_v36 }
 0x38d   : > { %15702 = vst [vmem:[#allocation143_spill] sm:$0xff] %v12198_v54  ;;  %v2452_v34 = vrot.slane %v2029_v58, 7  ;;  %v2455_v3 = vrot.slane %v2030_v31, 7  ;;  %v2974_v63 = vmul.f32 %v15561_v35, %v12178_v42  ;;  %v15705_v54 = vld [vmem:[#allocation41_spill] sm:$0xff]  ;;  %v2458_v62 = vrot.slane %v2031_v55, 7 }
 0x38e   : > { %v6244_v24 = vadd.f32 %v15705_v54, %v6106_v50  ;;  %v2461_v48 = vrot.slane %v2032_v21, 7  ;;  %v2975_v14 = vmul.f32 %v15562_v47, %v12181_v49  ;;  %v3229_v31 = vmul.f32 %v15465_v18, %v12160_v30  ;;  %v15707_v18 = vld [vmem:[#allocation72_spill] sm:$0xff] }
 0x38f   : > { %v2453_v38 = vsel %vm8176_vm10, %v11844_v23, %v2452_v34  ;;  %v2454_v0 = vrot.slane %v2452_v34, 2  ;;  %v2457_v58 = vrot.slane %v2455_v3, 2  ;;  %v2460_v53 = vrot.slane %v2458_v62, 2 }
 0x390   : > { %v6372_v19 = vmax.f32 %v6244_v24, 0.0  ;;  %v2463_v57 = vrot.slane %v2461_v48, 2  ;;  %v2836_v35 = vadd.f32 %v2453_v38, %v12107_v1  ;;  %v3230_v21 = vmul.f32 %v15376_v8, %v12171_v36 }
 0x391   : > { %v2456_v50 = vsel %vm8176_vm10, %v2454_v0, %v2455_v3  ;;  %v2459_v55 = vsel %vm8176_vm10, %v2457_v58, %v2458_v62  ;;  %v3231_v23 = vmul.f32 %v15509_v26, %v12178_v42  ;;  %v2462_v24 = vsel %vm8176_vm10, %v2460_v53, %v2461_v48 }
 0x392   : > { %v12233_v34 = vmin.f32 %v6372_v19, 6.0  ;;  %v15708_v47 = vrot.slane %v15707_v18, 7  ;;  %v2837_v0 = vadd.f32 %v2456_v50, %v1865_v27  ;;  %v2838_v38 = vadd.f32 %v2459_v55, %v1866_v11  ;;  %v15710_v18 = vld [vmem:[#allocation80_spill] sm:$0xff]  ;;  %v15717_v50 = vld [vmem:[#allocation105_spill] sm:$0xff] }
 0x393   : > { %v2839_v3 = vadd.f32 %v2462_v24, %v1867_v20  ;;  %v3100_v58 = vadd.f32 %v2972_v43, %v2836_v35  ;;  %v3232_v8 = vmul.f32 %v15101_v2, %v12181_v49  ;;  %v3356_v19 = vadd.f32 %v12115_v45, %v12126_v59  ;;  %v15713_v20 = vld [vmem:[#allocation156_spill] sm:$0xff]  ;;  %v15714_v35 = vld [vmem:[#allocation47_spill] sm:$0xff] }
 0x394   : > { %15706 = vst [vmem:[#allocation82_spill] sm:$0xff] %v12233_v34  ;;  %v2465_v1 = vsel %vm8176_vm10, %v2463_v57, %v15708_v47  ;;  %v3101_v5 = vadd.f32 %v2973_v33, %v2837_v0  ;;  %v15709_v34 = vld [vmem:[#allocation138_spill] sm:$0xff]  ;;  %v3102_v53 = vadd.f32 %v2974_v63, %v2838_v38  ;;  %v3358_v47 = vadd.f32 %v3230_v21, %v15711_v6  ;;  %v15712_v57 = vld [vmem:[#allocation155_spill] sm:$0xff] }
 0x395   : > { %v2840_v62 = vadd.f32 %v2465_v1, %v1868_v52  ;;  %v3357_v26 = vadd.f32 %v3229_v31, %v15709_v34  ;;  %v3103_v48 = vadd.f32 %v2975_v14, %v2839_v3  ;;  %v3359_v27 = vadd.f32 %v3231_v23, %v15712_v57  ;;  %v15715_v59 = vld [vmem:[#allocation95_spill] sm:$0xff]  ;;  %v15718_v1 = vld [vmem:[#allocation108_spill] sm:$0xff] }
 0x396   : > { %v3360_v11 = vadd.f32 %v3232_v8, %v15713_v20  ;;  %v3364_v52 = vadd.f32 %v15714_v35, %v3100_v58  ;;  %v3365_v43 = vadd.f32 %v12119_v51, %v3101_v5  ;;  %v3366_v33 = vadd.f32 %v12123_v39, %v3102_v53  ;;  %v15716_v5 = vld [vmem:[#allocation101_spill] sm:$0xff] }
 0x397   : > { %v3104_v7 = vadd.f32 %v15710_v18, %v2840_v62  ;;  %v3367_v45 = vadd.f32 %v12130_v56, %v3103_v48  ;;  %v3515_v14 = vmul.f32 %v15683_v4, %v12160_v30  ;;  %v3516_v63 = vmul.f32 %v15321_v22, %v12171_v36  ;;  %v15719_v18 = vld [vmem:[#allocation58_spill] sm:$0xff] }
 0x398   : > { %v3517_v6 = vmul.f32 %v15513_v10, %v12178_v42  ;;  %v3518_v8 = vmul.f32 %v15190_v60, %v12181_v49  ;;  %v3524_v51 = vmul.f32 %v15683_v4, %v15675_v37  ;;  %v3525_v39 = vmul.f32 %v15321_v22, %v15676_v44  ;;  %v15738_v4 = vld [vmem:[#allocation99_spill] sm:$0xff] }
 0x399   : > { %v3368_v31 = vadd.f32 %v15715_v59, %v3104_v7  ;;  %v3922_v56 = vrot.slane %v3515_v14, 7  ;;  %v4334_v7 = vadd.f32 %v15716_v5, %v3367_v45  ;;  %v3925_v21 = vrot.slane %v3516_v63, 7 }
 0x39a   : > { %v3928_v23 = vrot.slane %v3517_v6, 7  ;;  %v3931_v34 = vrot.slane %v3518_v8, 7  ;;  %v3947_v24 = vrot.slane %v3524_v51, 7  ;;  %v3950_v3 = vrot.slane %v3525_v39, 7  ;;  %v15722_v39 = vld [vmem:[#allocation90_spill] sm:$0xff] }
 0x39b   : > { %v4335_v55 = vadd.f32 %v15717_v50, %v3368_v31  ;;  %v3923_v0 = vsel %vm8176_vm10, %v15718_v1, %v3922_v56  ;;  %v3924_v38 = vrot.slane %v3922_v56, 2  ;;  %v4451_v62 = vmul.f32 %v15670_v32, %v15674_v15  ;;  %v15720_v15 = vld [vmem:[#allocation81_spill] sm:$0xff] }
 0x39c   : > { %v3927_v58 = vrot.slane %v3925_v21, 2  ;;  %v3930_v53 = vrot.slane %v3928_v23, 2  ;;  %v3933_v48 = vrot.slane %v3931_v34, 2  ;;  %v3948_v57 = vsel %vm8176_vm10, %v15719_v18, %v3947_v24 }
 0x39d   : > { %v3926_v20 = vsel %vm8176_vm10, %v3924_v38, %v3925_v21  ;;  %v3949_v35 = vrot.slane %v3947_v24, 2  ;;  %v3952_v45 = vrot.slane %v3950_v3, 2  ;;  %v4323_v59 = vadd.f32 %v3923_v0, %v3356_v19 }
 0x39e   : > { %v3929_v31 = vsel %vm8176_vm10, %v3927_v58, %v3928_v23  ;;  %v3932_v14 = vsel %vm8176_vm10, %v3930_v53, %v3931_v34  ;;  %v15721_v63 = vrot.slane %v15720_v15, 7  ;;  %v4324_v8 = vadd.f32 %v3926_v20, %v3357_v26 }
 0x39f   : > { %v3951_v51 = vsel %vm8176_vm10, %v3949_v35, %v3950_v3  ;;  %v15723_v56 = vrot.slane %v15722_v39, 7  ;;  %v4325_v5 = vadd.f32 %v3929_v31, %v3358_v47  ;;  %v4326_v50 = vadd.f32 %v3932_v14, %v3359_v27  ;;  %v15727_v14 = vld [vmem:[#allocation98_spill] sm:$0xff] }
 0x3a0   : > { %v3935_v6 = vsel %vm8176_vm10, %v3933_v48, %v15721_v63  ;;  %v4331_v23 = vadd.f32 %v3948_v57, %v3364_v52  ;;  %v4332_v24 = vadd.f32 %v3951_v51, %v3365_v43  ;;  %v4459_v1 = vmul.f32 %v15670_v32, %v12160_v30  ;;  %v15724_v52 = vld [vmem:[#allocation115_spill] sm:$0xff]  ;;  %v15725_v48 = vld [vmem:[#allocation76_spill] sm:$0xff] }
 0x3a1   : > { %v3954_v19 = vsel %vm8176_vm10, %v3952_v45, %v15723_v56  ;;  %v4327_v21 = vadd.f32 %v3935_v6, %v3360_v11  ;;  %v4460_v26 = vmul.f32 %v15474_v29, %v12171_v36  ;;  %v4461_v0 = vmul.f32 %v15519_v28, %v12178_v42  ;;  %v15726_v45 = vld [vmem:[#allocation97_spill] sm:$0xff]  ;;  %v15730_v56 = vld [vmem:[#allocation62_spill] sm:$0xff] }
 0x3a2   : > { %v4333_v34 = vadd.f32 %v3954_v19, %v3366_v33  ;;  %v4462_v38 = vmul.f32 %v15627_v12, %v12181_v49  ;;  %v4467_v47 = vmul.f32 %v15670_v32, %v15675_v37  ;;  %v4468_v27 = vmul.f32 %v15474_v29, %v15676_v44  ;;  %v15756_v32 = vld [vmem:[#allocation136_spill] sm:$0xff] }
 0x3a3   : > { %v4469_v11 = vmul.f32 %v15519_v28, %v15677_v17  ;;  %v4579_v43 = vadd.f32 %v4451_v62, %v15724_v52  ;;  %v4587_v33 = vadd.f32 %v4459_v1, %v4323_v59  ;;  %v4588_v3 = vadd.f32 %v4460_v26, %v4324_v8  ;;  %v15728_v62 = vld [vmem:[#allocation28_spill] sm:$0xff]  ;;  %v15729_v8 = vld [vmem:[#allocation49_spill] sm:$0xff] }
 0x3a4   : > { %v4589_v58 = vadd.f32 %v4461_v0, %v4325_v5  ;;  %v4590_v53 = vadd.f32 %v4462_v38, %v4326_v50  ;;  %v4591_v18 = vadd.f32 %v15725_v48, %v4327_v21  ;;  %v4595_v57 = vadd.f32 %v4467_v47, %v4331_v23  ;;  %v15731_v5 = vld [vmem:[#allocation59_spill] sm:$0xff]  ;;  %v15734_v26 = vld [vmem:[#allocation88_spill] sm:$0xff]  ;;  %v15735_v38 = vld [vmem:[#allocation158_spill] sm:$0xff] }
 0x3a5   : > { %v4596_v20 = vadd.f32 %v4468_v27, %v4332_v24  ;;  %v4597_v35 = vadd.f32 %v4469_v11, %v4333_v34  ;;  %v4598_v31 = vadd.f32 %v15726_v45, %v4334_v7  ;;  %v4599_v15 = vadd.f32 %v15727_v14, %v4335_v55  ;;  %v15732_v21 = vld [vmem:[#allocation63_spill] sm:$0xff]  ;;  %v15733_v34 = vld [vmem:[#allocation120_spill] sm:$0xff]  ;;  %v15737_v52 = vld [vmem:[#allocation45_spill] sm:$0xff] }
 0x3a6   : > { %v4715_v63 = vmul.f32 %v15671_v61, %v11778_v25  ;;  %v4716_v6 = vmul.f32 %v15630_v9, %v12160_v30  ;;  %v4717_v59 = vmul.f32 %v15728_v62, %v12171_v36  ;;  %v4718_v51 = vmul.f32 %v15729_v8, %v12178_v42  ;;  %v15736_v27 = vld [vmem:[#allocation159_spill] sm:$0xff] }
 0x3a7   : > { %v4719_v39 = vmul.f32 %v15671_v61, %v12181_v49  ;;  %v4724_v7 = vmul.f32 %v15630_v9, %v15675_v37  ;;  %v4725_v55 = vmul.f32 %v15728_v62, %v15676_v44  ;;  %v4726_v25 = vmul.f32 %v15729_v8, %v15677_v17 }
 0x3a8   : > { %v4731_v19 = vmul.f32 %v15671_v61, %v15730_v56  ;;  %v4732_v50 = vmul.f32 %v15630_v9, %v15731_v5  ;;  %v4733_v23 = vmul.f32 %v15728_v62, %v15732_v21  ;;  %v4843_v24 = vadd.f32 %v4715_v63, %v4579_v43  ;;  %v15739_v62 = vld [vmem:[#allocation102_spill] sm:$0xff]  ;;  %v15740_v63 = vld [vmem:[#allocation127_spill] sm:$0xff] }
 0x3a9   : > { %v4844_v1 = vadd.f32 %v4716_v6, %v15733_v34  ;;  %v4845_v0 = vadd.f32 %v4717_v59, %v15734_v26  ;;  %v4846_v47 = vadd.f32 %v4718_v51, %v15735_v38  ;;  %v4847_v11 = vadd.f32 %v4719_v39, %v15736_v27  ;;  %v15741_v51 = vld [vmem:[#allocation18_spill] sm:$0xff]  ;;  %v15746_v34 = vld [vmem:[#allocation83_spill] sm:$0xff] }
 0x3aa   : > { %v4851_v48 = vadd.f32 %v15737_v52, %v4587_v33  ;;  %v4852_v45 = vadd.f32 %v4724_v7, %v4588_v3  ;;  %v4853_v14 = vadd.f32 %v4725_v55, %v4589_v58  ;;  %v4854_v56 = vadd.f32 %v4726_v25, %v4590_v53  ;;  %v15742_v33 = vld [vmem:[#allocation19_spill] sm:$0xff]  ;;  %v15743_v58 = vld [vmem:[#allocation20_spill] sm:$0xff] }
 0x3ab   : > { %v4855_v8 = vadd.f32 %v15738_v4, %v4591_v18  ;;  %v4859_v9 = vadd.f32 %v4731_v19, %v4595_v57  ;;  %v4860_v61 = vadd.f32 %v4732_v50, %v4596_v20  ;;  %v4861_v29 = vadd.f32 %v4733_v23, %v4597_v35  ;;  %v15744_v20 = vld [vmem:[#allocation107_spill] sm:$0xff]  ;;  %v15745_v50 = vld [vmem:[#allocation110_spill] sm:$0xff] }
 0x3ac   : > { %v4862_v43 = vadd.f32 %v15739_v62, %v4598_v31  ;;  %v4863_v6 = vadd.f32 %v15740_v63, %v4599_v15  ;;  %v5001_v59 = vmul.f32 %v15688_v41, %v12160_v30  ;;  %v5002_v39 = vmul.f32 %v15741_v51, %v12171_v36 }
 0x3ad   : > { %v5003_v3 = vmul.f32 %v15742_v33, %v12178_v42  ;;  %v5004_v53 = vmul.f32 %v15743_v58, %v12181_v49  ;;  %v5010_v4 = vmul.f32 %v15688_v41, %v15675_v37  ;;  %v5011_v18 = vmul.f32 %v15741_v51, %v15676_v44 }
 0x3ae   : > { %v5019_v57 = vmul.f32 %v15688_v41, %v15731_v5  ;;  %v5821_v35 = vadd.f32 %v15744_v20, %v4854_v56  ;;  %v5392_v31 = vrot.slane %v5001_v59, 7  ;;  %v5395_v15 = vrot.slane %v5002_v39, 7  ;;  %v15747_v41 = vld [vmem:[#allocation86_spill] sm:$0xff] }
 0x3af   : > { %v5398_v62 = vrot.slane %v5003_v3, 7  ;;  %v5401_v7 = vrot.slane %v5004_v53, 7  ;;  %v5417_v55 = vrot.slane %v5010_v4, 7  ;;  %v5420_v25 = vrot.slane %v5011_v18, 7  ;;  %v15748_v4 = vld [vmem:[#allocation111_spill] sm:$0xff] }
 0x3b0   : > { %v5442_v19 = vrot.slane %v5019_v57, 7  ;;  %v5822_v23 = vadd.f32 %v15745_v50, %v4855_v8  ;;  %v5393_v26 = vsel %vm8176_vm10, %v15746_v34, %v5392_v31  ;;  %v5394_v38 = vrot.slane %v5392_v31, 2  ;;  %v15749_v57 = vld [vmem:[#allocation61_spill] sm:$0xff] }
 0x3b1   : > { %v5397_v27 = vrot.slane %v5395_v15, 2  ;;  %v5400_v52 = vrot.slane %v5398_v62, 2  ;;  %v5403_v63 = vrot.slane %v5401_v7, 2  ;;  %v5418_v56 = vsel %vm8176_vm10, %v15747_v41, %v5417_v55 }
 0x3b2   : > { %v5419_v59 = vrot.slane %v5417_v55, 2  ;;  %v5422_v39 = vrot.slane %v5420_v25, 2  ;;  %v5396_v3 = vsel %vm8176_vm10, %v5394_v38, %v5395_v15  ;;  %v5443_v18 = vsel %vm8176_vm10, %v15748_v4, %v5442_v19  ;;  %v15751_v55 = vld [vmem:[#allocation91_spill] sm:$0xff] }
 0x3b3   : > { %v5399_v8 = vsel %vm8176_vm10, %v5397_v27, %v5398_v62  ;;  %v5402_v53 = vsel %vm8176_vm10, %v5400_v52, %v5401_v7  ;;  %v15750_v20 = vrot.slane %v15749_v57, 7  ;;  %v15752_v15 = vrot.slane %v15751_v55, 7  ;;  %v15753_v52 = vld [vmem:[#allocation128_spill] sm:$0xff]  ;;  %v15755_v55 = vld [vmem:[#allocation133_spill] sm:$0xff] }
 0x3b4   : > { %v5421_v31 = vsel %vm8176_vm10, %v5419_v59, %v5420_v25  ;;  %v5444_v50 = vrot.slane %v5442_v19, 2  ;;  %v5810_v34 = vadd.f32 %v5393_v26, %v4843_v24  ;;  %v5811_v7 = vadd.f32 %v5396_v3, %v4844_v1  ;;  %v15757_v19 = vld [vmem:[#allocation137_spill] sm:$0xff]  ;;  %v15759_v26 = vld [vmem:[#allocation52_spill] sm:$0xff] }
 0x3b5   : > { %v5405_v41 = vsel %vm8176_vm10, %v5403_v63, %v15750_v20  ;;  %v5424_v62 = vsel %vm8176_vm10, %v5422_v39, %v15752_v15  ;;  %v5812_v38 = vadd.f32 %v5399_v8, %v4845_v0  ;;  %v5813_v27 = vadd.f32 %v5402_v53, %v4846_v47  ;;  %v15758_v0 = vld [vmem:[#allocation117_spill] sm:$0xff]  ;;  %v15762_v8 = vld [vmem:[#allocation103_spill] sm:$0xff]  ;;  %v15763_v53 = vld [vmem:[#allocation104_spill] sm:$0xff] }
 0x3b6   : > { %v15754_v4 = vrot.slane %v15753_v52, 7  ;;  %v5814_v58 = vadd.f32 %v5405_v41, %v4847_v11  ;;  %v5818_v63 = vadd.f32 %v5418_v56, %v4851_v48  ;;  %v5819_v20 = vadd.f32 %v5421_v31, %v4852_v45  ;;  %v15760_v48 = vld [vmem:[#allocation33_spill] sm:$0xff]  ;;  %v15764_v31 = vld [vmem:[#allocation131_spill] sm:$0xff]  ;;  %v15765_v15 = vld [vmem:[#allocation134_spill] sm:$0xff] }
 0x3b7   : > { %v5820_v33 = vadd.f32 %v5424_v62, %v4853_v14  ;;  %v5826_v25 = vadd.f32 %v5443_v18, %v4859_v9  ;;  %v5828_v51 = vadd.f32 %v15755_v55, %v4861_v29  ;;  %v5829_v39 = vadd.f32 %v15756_v32, %v4862_v43  ;;  %v15769_v52 = vld [vmem:[#allocation55_spill] sm:$0xff] }
 0x3b8   : > { %v5446_v57 = vsel %vm8176_vm10, %v5444_v50, %v15754_v4  ;;  %v5830_v24 = vadd.f32 %v15757_v19, %v4863_v6  ;;  %v5946_v1 = vmul.f32 %v15691_v46, %v12160_v30  ;;  %v5947_v47 = vmul.f32 %v15758_v0, %v12171_v36 }
 0x3b9   : > { %v5827_v59 = vadd.f32 %v5446_v57, %v4860_v61  ;;  %v5948_v11 = vmul.f32 %v15759_v26, %v12178_v42  ;;  %v5949_v45 = vmul.f32 %v15760_v48, %v12181_v49  ;;  %v5954_v9 = vmul.f32 %v15691_v46, %v15675_v37  ;;  %v15761_v49 = vld [vmem:[#allocation56_spill] sm:$0xff] }
 0x3ba   : > { %v5955_v29 = vmul.f32 %v15758_v0, %v15676_v44  ;;  %v5956_v32 = vmul.f32 %v15759_v26, %v15677_v17  ;;  %v5962_v30 = vmul.f32 %v15691_v46, %v15731_v5  ;;  %v5963_v61 = vmul.f32 %v15758_v0, %v15732_v21  ;;  %v15766_v21 = vld [vmem:[#allocation135_spill] sm:$0xff] }
 0x3bb   : > { %v6074_v36 = vadd.f32 %v5946_v1, %v5810_v34  ;;  %v6075_v42 = vadd.f32 %v5947_v47, %v5811_v7  ;;  %v6076_v14 = vadd.f32 %v5948_v11, %v5812_v38  ;;  %v6077_v43 = vadd.f32 %v5949_v45, %v5813_v27  ;;  %v15767_v7 = vld [vmem:[#allocation140_spill] sm:$0xff] }
 0x3bc   : > { %v6078_v6 = vadd.f32 %v15761_v49, %v5814_v58  ;;  %v6082_v56 = vadd.f32 %v5954_v9, %v5818_v63  ;;  %v6083_v37 = vadd.f32 %v5955_v29, %v5819_v20  ;;  %v6084_v3 = vadd.f32 %v5956_v32, %v5820_v33  ;;  %v15768_v58 = vld [vmem:[#allocation54_spill] sm:$0xff] }
 0x3bd   : > { %v6085_v44 = vadd.f32 %v15762_v8, %v5821_v35  ;;  %v6086_v18 = vadd.f32 %v15763_v53, %v5822_v23  ;;  %v6090_v17 = vadd.f32 %v5962_v30, %v5826_v25  ;;  %v6091_v41 = vadd.f32 %v5963_v61, %v5827_v59  ;;  %v12428_v61 = vld.sshfl [vmem:[#allocation1 + $0x20] sm:$0xff pattern:$0x73625140] }
 0x3be   : > { %v6092_v5 = vadd.f32 %v15764_v31, %v5828_v51  ;;  %v6093_v62 = vadd.f32 %v15765_v15, %v5829_v39  ;;  %v6094_v50 = vadd.f32 %v15766_v21, %v5830_v24  ;;  %v6212_v34 = vadd.f32 %v15705_v54, %v6074_v36  ;;  %15770 = vst [vmem:[#allocation85_spill] sm:$0xff] %v12428_v61 }
 0x3bf   : > { %v6213_v38 = vadd.f32 %v15767_v7, %v6075_v42  ;;  %v6214_v27 = vadd.f32 %v15768_v58, %v6076_v14  ;;  %v6215_v33 = vadd.f32 %v15769_v52, %v6077_v43  ;;  %v6216_v35 = vadd.f32 %v15705_v54, %v6078_v6 }
 0x3c0   : > { %v6220_v23 = vadd.f32 %v15705_v54, %v6082_v56  ;;  %v6221_v4 = vadd.f32 %v15767_v7, %v6083_v37  ;;  %v6222_v51 = vadd.f32 %v15768_v58, %v6084_v3  ;;  %v6223_v57 = vadd.f32 %v15769_v52, %v6085_v44 }
 0x3c1   : > { %v6224_v63 = vadd.f32 %v15705_v54, %v6086_v18  ;;  %v6228_v20 = vadd.f32 %v15705_v54, %v6090_v17  ;;  %v6229_v25 = vadd.f32 %v15767_v7, %v6091_v41  ;;  %v6230_v59 = vadd.f32 %v15768_v58, %v6092_v5  ;;  %v1390_v18 = vpop.f32.mrf.mxu2 }
 0x3c2   : > { %v6231_v55 = vadd.f32 %v15769_v52, %v6093_v62  ;;  %v6232_v39 = vadd.f32 %v15705_v54, %v6094_v50  ;;  %v6340_v19 = vmax.f32 %v6212_v34, 0.0  ;;  %v6341_v24 = vmax.f32 %v6213_v38, 0.0  ;;  %v15773_v50 = vld [vmem:[#allocation150_spill] sm:$0xff]  ;;  %v15774_v34 = vld [vmem:[#allocation60_spill] sm:$0xff]  ;;  %v12451_v38 = vld [vmem:[%s14360_s2] ss:$0 sm:$0xff] }
 0x3c3   : > { %v6342_v1 = vmax.f32 %v6214_v27, 0.0  ;;  %v6343_v0 = vmax.f32 %v6215_v33, 0.0  ;;  %v6344_v47 = vmax.f32 %v6216_v35, 0.0  ;;  %v6348_v11 = vmax.f32 %v6220_v23, 0.0  ;;  %15775 = vst [vmem:[#allocation65_spill] sm:$0xff] %v12451_v38  ;;  %v15776_v33 = vld [vmem:[#allocation75_spill] sm:$0xff] }
 0x3c4   : > { %v6349_v45 = vmax.f32 %v6221_v4, 0.0  ;;  %v6350_v9 = vmax.f32 %v6222_v51, 0.0  ;;  %v6351_v29 = vmax.f32 %v6223_v57, 0.0  ;;  %v6352_v32 = vmax.f32 %v6224_v63, 0.0  ;;  %v15777_v23 = vld [vmem:[#allocation57_spill] sm:$0xff]  ;;  %v15778_v51 = vld [vmem:[#allocation27_spill] sm:$0xff] }
 0x3c5   : > { %v6356_v30 = vmax.f32 %v6228_v20, 0.0  ;;  %v6357_v36 = vmax.f32 %v6229_v25, 0.0  ;;  %v6358_v42 = vmax.f32 %v6230_v59, 0.0  ;;  %v6359_v14 = vmax.f32 %v6231_v55, 0.0  ;;  %v15779_v63 = vld [vmem:[#allocation79_spill] sm:$0xff]  ;;  %v15780_v25 = vld [vmem:[#allocation144_spill] sm:$0xff] }
 0x3c6   : > { %v6360_v43 = vmax.f32 %v6232_v39, 0.0  ;;  %v12430_v49 = vmin.f32 %v6340_v19, 6.0  ;;  %v6469_v6 = vmin.f32 %v6341_v24, 6.0  ;;  %v6470_v56 = vmin.f32 %v6342_v1, 6.0  ;;  %v15781_v55 = vld [vmem:[#allocation71_spill] sm:$0xff]  ;;  %v15782_v39 = vld [vmem:[#allocation10_spill] sm:$0xff] }
 0x3c7   : > { %v6471_v37 = vmin.f32 %v6343_v0, 6.0  ;;  %v6472_v3 = vmin.f32 %v6344_v47, 6.0  ;;  %v12432_v8 = vmin.f32 %v6348_v11, 6.0  ;;  %v6477_v44 = vmin.f32 %v6349_v45, 6.0  ;;  %v15783_v24 = vld [vmem:[#allocation125_spill] sm:$0xff]  ;;  %v15795_v52 = vld [vmem:[#allocation4_spill] sm:$0xff] }
 0x3c8   : > { %v6478_v53 = vmin.f32 %v6350_v9, 6.0  ;;  %v6479_v17 = vmin.f32 %v6351_v29, 6.0  ;;  %v12434_v41 = vmin.f32 %v6352_v32, 6.0  ;;  %v12436_v31 = vmin.f32 %v6356_v30, 6.0  ;;  %6744 = vst [vmem:[#allocation1 + $0x20] ss:$4 sm:$0xff] %v6469_v6 }
 0x3c9   : > { %15771 = vst [vmem:[#allocation109_spill] sm:$0xff] %v12432_v8  ;;  %v12438_v5 = vmin.f32 %v6357_v36, 6.0  ;;  %v12440_v15 = vmin.f32 %v6358_v42, 6.0  ;;  %v12442_v62 = vmin.f32 %v6359_v14, 6.0  ;;  %v12444_v21 = vmin.f32 %v6360_v43, 6.0  ;;  %v15785_v11 = vld [vmem:[#allocation121_spill] sm:$0xff] }
 0x3ca   : > { %15772 = vst [vmem:[#allocation36_spill] sm:$0xff] %v12436_v31  ;;  %v6876_v7 = vpack.c.bf16 %v15774_v34, %v15773_v50  ;;  %v1391_v27 = vadd.f32 %v12451_v38, %v1390_v18  ;;  %v12455_v35 = vrot.slane %v15776_v33, 6  ;;  %v1883_v4 = vmul.f32 %v15701_v16, %v15777_v23  ;;  %v15786_v9 = vld [vmem:[#allocation73_spill] sm:$0xff]  ;;  %v15787_v32 = vld [vmem:[#allocation7_spill] sm:$0xff]  ;;  %v15788_v36 = vld [vmem:[#allocation124_spill] sm:$0xff] }
 0x3cb   : > { %6745 = vst [vmem:[#allocation1 + $0x21] ss:$4 sm:$0xff] %v6470_v56  ;;  %v1884_v57 = vmul.f32 %v15668_v40, %v15778_v51  ;;  %v1891_v20 = vmul.f32 %v15701_v16, %v15779_v63  ;;  %v1892_v59 = vmul.f32 %v15668_v40, %v15780_v25  ;;  %v1898_v19 = vmul.f32 %v15782_v39, %v15781_v55  ;;  %v15789_v42 = vld [vmem:[#allocation21_spill] sm:$0xff]  ;;  %v15793_v8 = vld [vmem:[#allocation3_spill] sm:$0xff] }
 0x3cc   : > { %6746 = vst [vmem:[#allocation1 + $0x22] ss:$4 sm:$0xff] %v6471_v37  ;;  %7770 = vmatmul.msk.bf16.gmra.mxu1 %vm6893_vm12, %v6876_v7  ;;  %v15784_v1 = vrot.slane %v15783_v24, 7  ;;  %v1451_v47 = vmax.f32 %v1391_v27, 0.0  ;;  %v1899_v45 = vmul.f32 %v15701_v16, %v15785_v11  ;;  %v1900_v29 = vmul.f32 %v15668_v40, %v15786_v9  ;;  %v15790_v43 = vld [vmem:[#allocation5_spill] sm:$0xff]  ;;  %v15794_v16 = vld [vmem:[#allocation2_spill] sm:$0xff] }
 0x3cd   : > { %6747 = vst [vmem:[#allocation1 + $0x23] ss:$4 sm:$0xff] %v6472_v3  ;;  %v2050_v30 = vmul.f32 %v15787_v32, %v15778_v51  ;;  %v2051_v14 = vmul.f32 %v15789_v42, %v15788_v36  ;;  %v2058_v6 = vmul.f32 %v15790_v43, %v15779_v63  ;;  %v2059_v56 = vmul.f32 %v15787_v32, %v15780_v25 }
 0x3ce   : > { %v2510_v0 = vrot.slane %v15784_v1, 2  ;;  %v2060_v37 = vmul.f32 %v15789_v42, %v12455_v35  ;;  %v12484_v3 = vmin.f32 %v1451_v47, 6.0  ;;  %v2067_v18 = vmul.f32 %v15790_v43, %v15785_v11 }
 0x3cf   : > { %v2068_v50 = vmul.f32 %v15787_v32, %v15786_v9  ;;  %v2511_v34 = vrot.slane %v2050_v30, 7  ;;  %v2514_v7 = vrot.slane %v2051_v14, 7  ;;  %v2533_v27 = vrot.slane %v2058_v6, 7  ;;  %v15791_v14 = vld [vmem:[#allocation123_spill] sm:$0xff] }
 0x3d0   : > { %v2536_v33 = vrot.slane %v2059_v56, 7  ;;  %v2539_v23 = vrot.slane %v2060_v37, 7  ;;  %v12491_v24 = vrot.slane %v12484_v3, 2  ;;  %v12494_v1 = vrot.slane %v12484_v3, 4 }
 0x3d1   : > { %v12497_v47 = vrot.slane %v12484_v3, 6  ;;  %v2069_v31 = vmul.f32 %v15789_v42, %v12484_v3  ;;  %v2512_v61 = vsel %vm8176_vm10, %v2510_v0, %v2511_v34  ;;  %v2513_v30 = vrot.slane %v2511_v34, 2 }
 0x3d2   : > { %v2534_v6 = vsel %vm8176_vm10, %v15791_v14, %v2533_v27  ;;  %v2535_v56 = vrot.slane %v2533_v27, 2  ;;  %v1901_v32 = vmul.f32 %v15793_v8, %v12491_v24  ;;  %v1902_v40 = vmul.f32 %v15782_v39, %v12494_v1  ;;  %v15796_v8 = vld [vmem:[#allocation93_spill] sm:$0xff] }
 0x3d3   : > { %v2070_v42 = vmul.f32 %v15794_v16, %v12491_v24  ;;  %v2071_v0 = vmul.f32 %v15795_v52, %v12494_v1  ;;  %v2072_v34 = vmul.f32 %v15790_v43, %v12497_v47  ;;  %v2515_v27 = vsel %vm8176_vm10, %v2513_v30, %v2514_v7 }
 0x3d4   : > { %v12506_v37 = vld.sshfl [vmem:[#allocation1 + $0x20] sm:$0xff pattern:$0x73625140]  ;;  %v2537_v14 = vsel %vm8176_vm10, %v2535_v56, %v2536_v33  ;;  %v15797_v39 = vrot.slane %v15796_v8, 7  ;;  %v2558_v54 = vrot.slane %v2067_v18, 7  ;;  %v2561_v16 = vrot.slane %v2068_v50, 7 }
 0x3d5   : > { %15792 = vst [vmem:[#allocation68_spill] sm:$0xff] %v12506_v37  ;;  %v2538_v37 = vrot.slane %v2536_v33, 2  ;;  %v2564_v38 = vrot.slane %v2069_v31, 7  ;;  %v7731_v52 = vrot.slane %v2070_v42, 9  ;;  %v2568_v43 = vrot.slane %v2071_v0, 7 }
 0x3d6   : > { %6754 = vst [vmem:[#allocation1 + $0x20] ss:$4 sm:$0xff] %v6477_v44  ;;  %v2557_v58 = vrot.slane %v15797_v39, 2  ;;  %v2571_v48 = vrot.slane %v2072_v34, 7  ;;  %v2560_v33 = vrot.slane %v2558_v54, 2  ;;  %v2855_v30 = vadd.f32 %v2512_v61, %v1883_v4 }
 0x3d7   : > { %6755 = vst [vmem:[#allocation1 + $0x21] ss:$4 sm:$0xff] %v6478_v53  ;;  %v2540_v44 = vsel %vm8176_vm10, %v2538_v37, %v2539_v23  ;;  %v2563_v53 = vrot.slane %v2561_v16, 2  ;;  %v2569_v8 = vsel %vm8176_vm10, %v7731_v52, %v2568_v43  ;;  %v2570_v39 = vrot.slane %v2568_v43, 2 }
 0x3d8   : > { %6756 = vst [vmem:[#allocation1 + $0x22] ss:$4 sm:$0xff] %v6479_v17  ;;  %v2559_v7 = vsel %vm8176_vm10, %v2557_v58, %v2558_v54  ;;  %v12531_v31 = vrot.slane %v2571_v48, 2  ;;  %v2856_v17 = vadd.f32 %v2515_v27, %v1884_v57  ;;  %v2562_v42 = vsel %vm8176_vm10, %v2560_v33, %v2561_v16  ;;  %v15799_v57 = vld [vmem:[#allocation15_spill] sm:$0xff] }
 0x3d9   : > { %6757 = vst [vmem:[#allocation1 + $0x23] ss:$4 sm:$0xff] %v12434_v41  ;;  %v2565_v18 = vsel %vm8176_vm10, %v2563_v53, %v2564_v38  ;;  %v15798_v41 = vld [vmem:[#allocation145_spill] sm:$0xff]  ;;  %v2863_v23 = vadd.f32 %v2537_v14, %v1891_v20  ;;  %v2572_v54 = vsel %vm8176_vm10, %v2570_v39, %v2571_v48  ;;  %v2864_v58 = vadd.f32 %v2540_v44, %v1892_v59  ;;  %v15800_v16 = vld [vmem:[#allocation23_spill] sm:$0xff]  ;;  %v15801_v38 = vld [vmem:[#allocation14_spill] sm:$0xff] }
 0x3da   : > { %v2862_v50 = vadd.f32 %v2534_v6, %v15798_v41  ;;  %v2870_v61 = vadd.f32 %v2559_v7, %v1898_v19  ;;  %v2871_v4 = vadd.f32 %v2562_v42, %v1899_v45  ;;  %v2872_v52 = vadd.f32 %v2565_v18, %v1900_v29  ;;  %v15802_v19 = vld [vmem:[#allocation6_spill] sm:$0xff]  ;;  %v15809_v42 = vld [vmem:[#allocation24_spill] sm:$0xff] }
 0x3db   : > { %v2873_v43 = vadd.f32 %v2569_v8, %v1901_v32  ;;  %v2874_v56 = vadd.f32 %v2572_v54, %v1902_v40  ;;  %v2991_v37 = vmul.f32 %v15799_v57, %v15778_v51  ;;  %v2992_v0 = vmul.f32 %v15800_v16, %v15788_v36 }
 0x3dc   : > { %v2998_v34 = vmul.f32 %v15801_v38, %v15779_v63  ;;  %v2999_v20 = vmul.f32 %v15799_v57, %v15780_v25  ;;  %v3000_v48 = vmul.f32 %v15800_v16, %v12455_v35  ;;  %v3006_v59 = vmul.f32 %v15801_v38, %v15785_v11 }
 0x3dd   : > { %v3007_v40 = vmul.f32 %v15799_v57, %v15786_v9  ;;  %v3008_v51 = vmul.f32 %v15800_v16, %v12484_v3  ;;  %v3009_v45 = vmul.f32 %v15802_v19, %v12494_v1  ;;  %v3010_v32 = vmul.f32 %v15801_v38, %v12497_v47 }
 0x3de   : > { %v3119_v36 = vadd.f32 %v2991_v37, %v2855_v30  ;;  %v3120_v6 = vadd.f32 %v2992_v0, %v2856_v17  ;;  %v3126_v27 = vadd.f32 %v2998_v34, %v2862_v50  ;;  %v3127_v14 = vadd.f32 %v2999_v20, %v2863_v23  ;;  %v15808_v30 = vld [vmem:[#allocation25_spill] sm:$0xff]  ;;  %v15810_v50 = vld [vmem:[#allocation8_spill] sm:$0xff] }
 0x3df   : > { %v3128_v44 = vadd.f32 %v3000_v48, %v2864_v58  ;;  %v12563_v7 = vadd.f32 %v3006_v59, %v2870_v61  ;;  %v12565_v33 = vadd.f32 %v3007_v40, %v2871_v4  ;;  %v12568_v53 = vadd.f32 %v3008_v51, %v2872_v52  ;;  %v15812_v0 = vld [vmem:[#allocation96_spill] sm:$0xff] }
 0x3e0   : > { %v12558_v29 = vld.sshfl [vmem:[#allocation1 + $0x20] sm:$0xff pattern:$0x73625140]  ;;  %v12570_v8 = vadd.f32 %v3009_v45, %v2873_v43  ;;  %v12572_v39 = vadd.f32 %v3010_v32, %v2874_v56  ;;  %v3255_v17 = vmul.f32 %v15808_v30, %v15779_v63  ;;  %v3262_v18 = vmul.f32 %v15809_v42, %v15781_v55  ;;  %v15811_v56 = vld [vmem:[#allocation92_spill] sm:$0xff] }
 0x3e1   : > { %15803 = vst [vmem:[#allocation141_spill] sm:$0xff] %v12558_v29  ;;  %v3264_v41 = vmul.f32 %v15101_v2, %v15786_v9  ;;  %v3265_v23 = vmul.f32 %v15810_v50, %v12491_v24  ;;  %v3544_v58 = vmul.f32 %v15513_v10, %v15779_v63  ;;  %v15813_v20 = vld [vmem:[#allocation32_spill] sm:$0xff]  ;;  %v3552_v59 = vmul.f32 %v15321_v22, %v15781_v55  ;;  %v15814_v32 = vld [vmem:[#allocation29_spill] sm:$0xff] }
 0x3e2   : > { %6764 = vst [vmem:[#allocation1 + $0x20] ss:$4 sm:$0xff] %v12438_v5  ;;  %v3256_v5 = vmul.f32 %v15101_v2, %v15780_v25  ;;  %v3383_v54 = vadd.f32 %v3255_v17, %v3119_v36  ;;  %v3390_v4 = vadd.f32 %v3262_v18, %v3126_v27  ;;  %v3546_v48 = vmul.f32 %v15813_v20, %v12455_v35 }
 0x3e3   : > { %15804 = vst [vmem:[#allocation64_spill] sm:$0xff] %v12563_v7  ;;  %v3392_v43 = vadd.f32 %v3264_v41, %v3128_v44  ;;  %v3393_v37 = vadd.f32 %v3265_v23, %v15811_v56  ;;  %v3553_v40 = vmul.f32 %v15513_v10, %v15785_v11  ;;  %v3554_v51 = vmul.f32 %v15190_v60, %v15786_v9  ;;  %v12641_v7 = vld.sshfl [vmem:[#allocation1] sm:$0xff pattern:$0x73625140] }
 0x3e4   : > { %6765 = vst [vmem:[#allocation1 + $0x21] ss:$4 sm:$0xff] %v12440_v15  ;;  %v3263_v15 = vmul.f32 %v15808_v30, %v15785_v11  ;;  %v3384_v61 = vadd.f32 %v3256_v5, %v3120_v6  ;;  %v3555_v45 = vmul.f32 %v15813_v20, %v12484_v3  ;;  %v3556_v36 = vmul.f32 %v15814_v32, %v12491_v24 }
 0x3e5   : > { %15805 = vst [vmem:[#allocation43_spill] sm:$0xff] %v12568_v53  ;;  %v3557_v6 = vmul.f32 %v15321_v22, %v12494_v1  ;;  %v3558_v27 = vmul.f32 %v15513_v10, %v12497_v47  ;;  %v4009_v17 = vrot.slane %v3546_v48, 7  ;;  %v4025_v5 = vrot.slane %v3552_v59, 7  ;;  %v15865_v53 = vld [vmem:[#allocation142_spill] sm:$0xff] }
 0x3e6   : > { %15806 = vst [vmem:[#allocation67_spill] sm:$0xff] %v12570_v8  ;;  %v3391_v52 = vadd.f32 %v3263_v15, %v3127_v14  ;;  %v4003_v14 = vrot.slane %v3544_v58, 7  ;;  %v4028_v18 = vrot.slane %v3553_v40, 7  ;;  %v15815_v15 = vld [vmem:[#allocation113_spill] sm:$0xff]  ;;  %v4034_v56 = vrot.slane %v3555_v45, 7  ;;  %v15817_v8 = vld [vmem:[#allocation44_spill] sm:$0xff] }
 0x3e7   : > { %15807 = vst [vmem:[#allocation149_spill] sm:$0xff] %v12572_v39  ;;  %v4026_v19 = vsel %vm8176_vm10, %v15817_v8, %v4025_v5  ;;  %v4027_v29 = vrot.slane %v4025_v5, 2  ;;  %v7746_v40 = vrot.slane %v3556_v36, 9  ;;  %v4041_v5 = vrot.slane %v3558_v27, 7 }
 0x3e8   : > { %6766 = vst [vmem:[#allocation1 + $0x22] ss:$4 sm:$0xff] %v12442_v62  ;;  %v3266_v62 = vmul.f32 %v15809_v42, %v12494_v1  ;;  %v4004_v41 = vsel %vm8176_vm10, %v15815_v15, %v4003_v14  ;;  %v4005_v23 = vrot.slane %v4003_v14, 2  ;;  %v4030_v58 = vrot.slane %v4028_v18, 2  ;;  %v15819_v14 = vld [vmem:[#allocation153_spill] sm:$0xff]  ;;  %v15844_v42 = vld [vmem:[#allocation12_spill] sm:$0xff] }
 0x3e9   : > { %6767 = vst [vmem:[#allocation1 + $0x23] ss:$4 sm:$0xff] %v12444_v21  ;;  %v3545_v21 = vmul.f32 %v15190_v60, %v15780_v25  ;;  %v4038_v15 = vrot.slane %v3557_v6, 7  ;;  %v4029_v45 = vsel %vm8176_vm10, %v4027_v29, %v4028_v18  ;;  %v15822_v29 = vld [vmem:[#allocation94_spill] sm:$0xff] }
 0x3ea   : > { %v3394_v34 = vadd.f32 %v3266_v62, %v15812_v0  ;;  %v4031_v62 = vrot.slane %v3554_v51, 7  ;;  %v4356_v18 = vadd.f32 %v4026_v19, %v15822_v29  ;;  %v15824_v19 = vld [vmem:[#allocation39_spill] sm:$0xff]  ;;  %6743 = vst [vmem:[#allocation1 + $0x3] ss:$4 sm:$0xff] %v12430_v49 }
 0x3eb   : > { %v4006_v44 = vrot.slane %v3545_v21, 7  ;;  %v15818_v21 = vld [vmem:[#allocation152_spill] sm:$0xff]  ;;  %v4039_v36 = vsel %vm8176_vm10, %v7746_v40, %v4038_v15  ;;  %v4040_v6 = vrot.slane %v4038_v15, 2  ;;  %v4485_v40 = vmul.f32 %v15519_v28, %v15779_v63 }
 0x3ec   : > { %v4033_v59 = vrot.slane %v4031_v62, 2  ;;  %v4032_v8 = vsel %vm8176_vm10, %v4030_v58, %v4031_v62  ;;  %v4357_v62 = vadd.f32 %v4029_v45, %v3390_v4  ;;  %v4495_v63 = vmul.f32 %v15824_v19, %v12484_v3  ;;  %v15827_v45 = vld [vmem:[#allocation130_spill] sm:$0xff] }
 0x3ed   : > { %v4008_v32 = vrot.slane %v4006_v44, 2  ;;  %v4007_v48 = vsel %vm8176_vm10, %v4005_v23, %v4006_v44  ;;  %v15821_v23 = vld [vmem:[#allocation100_spill] sm:$0xff]  ;;  %v4042_v27 = vsel %vm8176_vm10, %v4040_v6, %v4041_v5  ;;  %v4497_v15 = vmul.f32 %v15519_v28, %v12497_v47  ;;  %6742 = vst [vmem:[#allocation1 + $0x2] ss:$4 sm:$0xff] %v15827_v45 }
 0x3ee   : > { %v4035_v44 = vsel %vm8176_vm10, %v4033_v59, %v4034_v56  ;;  %v4360_v56 = vadd.f32 %v4039_v36, %v3393_v37  ;;  %v4361_v59 = vadd.f32 %v4042_v27, %v3394_v34  ;;  %v15826_v37 = vld [vmem:[#allocation129_spill] sm:$0xff] }
 0x3ef   : > { %v4010_v51 = vsel %vm8176_vm10, %v4008_v32, %v4009_v17  ;;  %v4350_v32 = vadd.f32 %v4007_v48, %v3383_v54  ;;  %v4359_v58 = vadd.f32 %v4035_v44, %v3392_v43  ;;  %v15823_v54 = vld [vmem:[#allocation114_spill] sm:$0xff]  ;;  %v15825_v48 = vld [vmem:[#allocation9_spill] sm:$0xff]  ;;  %v4494_v43 = vmul.f32 %v15627_v12, %v15786_v9  ;;  %6741 = vst [vmem:[#allocation1 + $0x1] ss:$4 sm:$0xff] %v15826_v37 }
 0x3f0   : > { %v12615_v0 = vld.sshfl [vmem:[#allocation1 + $0x20] sm:$0xff pattern:$0x73625140]  ;;  %v4351_v17 = vadd.f32 %v4010_v51, %v3384_v61  ;;  %6740 = vst [vmem:[#allocation1] ss:$4 sm:$0xff] %v15823_v54  ;;  %v4487_v61 = vmul.f32 %v15824_v19, %v12455_v35  ;;  %v4492_v4 = vmul.f32 %v15825_v48, %v15781_v55  ;;  %v4496_v34 = vmul.f32 %v15825_v48, %v12494_v1 }
 0x3f1   : > { %15816 = vst [vmem:[#allocation126_spill] sm:$0xff] %v12615_v0  ;;  %v15820_v0 = vld [vmem:[#allocation154_spill] sm:$0xff]  ;;  %v12675_v27 = vadd.f32 %v4497_v15, %v4361_v59  ;;  %v15837_v59 = vld [vmem:[#allocation17_spill] sm:$0xff] }
 0x3f2   : > { %6774 = vst [vmem:[#allocation1 + $0x20] ss:$4 sm:$0xff] %v15818_v21  ;;  %v4349_v21 = vadd.f32 %v4004_v41, %v15821_v23  ;;  %v4486_v41 = vmul.f32 %v15627_v12, %v15780_v25  ;;  %v12664_v44 = vadd.f32 %v4492_v4, %v4356_v18  ;;  %v12671_v23 = vadd.f32 %v4495_v63, %v4359_v58  ;;  %v15835_v18 = vld [vmem:[#allocation49_spill] sm:$0xff]  ;;  %v15841_v15 = vld [vmem:[#allocation146_spill] sm:$0xff] }
 0x3f3   : > { %6775 = vst [vmem:[#allocation1 + $0x21] ss:$4 sm:$0xff] %v15819_v14  ;;  %v12636_v14 = vrot.slane %v4041_v5, 2  ;;  %v4615_v5 = vadd.f32 %v4487_v61, %v4351_v17  ;;  %v12673_v29 = vadd.f32 %v4496_v34, %v4360_v56  ;;  %v15839_v61 = vld [vmem:[#allocation132_spill] sm:$0xff]  ;;  %v15840_v63 = vld [vmem:[#allocation77_spill] sm:$0xff]  ;;  %v5041_v39 = vmul.f32 %v15837_v59, %v12484_v3 }
 0x3f4   : > { %6776 = vst [vmem:[#allocation1 + $0x22] ss:$4 sm:$0xff] %v15820_v0  ;;  %v4358_v0 = vadd.f32 %v4032_v8, %v3391_v52  ;;  %v4493_v52 = vmul.f32 %v15519_v28, %v15785_v11  ;;  %v4613_v51 = vadd.f32 %v4485_v40, %v4349_v21  ;;  %v4614_v8 = vadd.f32 %v4486_v41, %v4350_v32  ;;  %v15833_v21 = vld [vmem:[#allocation50_spill] sm:$0xff]  ;;  %v15834_v32 = vld [vmem:[#allocation28_spill] sm:$0xff] }
 0x3f5   : > { %15830 = vst [vmem:[#allocation87_spill] sm:$0xff] %v12671_v23  ;;  %v4743_v40 = vmul.f32 %v15833_v21, %v15780_v25  ;;  %v4749_v17 = vmul.f32 %v15834_v32, %v15781_v55  ;;  %v4751_v49 = vmul.f32 %v15833_v21, %v15786_v9  ;;  %v4753_v56 = vmul.f32 %v15834_v32, %v12494_v1  ;;  %v15838_v25 = vld [vmem:[#allocation18_spill] sm:$0xff]  ;;  %v15843_v28 = vld [vmem:[#allocation20_spill] sm:$0xff] }
 0x3f6   : > { %v12666_v36 = vadd.f32 %v4493_v52, %v4357_v62  ;;  %v12669_v6 = vadd.f32 %v4494_v43, %v4358_v0  ;;  %15831 = vst [vmem:[#allocation72_spill] sm:$0xff] %v12673_v29  ;;  %v4750_v62 = vmul.f32 %v15835_v18, %v15785_v11  ;;  %v15836_v0 = vld [vmem:[#allocation16_spill] sm:$0xff]  ;;  %v5032_v41 = vmul.f32 %v15837_v59, %v12455_v35  ;;  %v15842_v29 = vld [vmem:[#allocation19_spill] sm:$0xff]  ;;  %v15846_v59 = vld [vmem:[#allocation122_spill] sm:$0xff] }
 0x3f7   : > { %15832 = vst [vmem:[#allocation138_spill] sm:$0xff] %v12675_v27  ;;  %v4752_v58 = vmul.f32 %v15836_v0, %v12491_v24  ;;  %v5038_v54 = vmul.f32 %v15838_v25, %v15781_v55  ;;  %v4871_v4 = vadd.f32 %v4743_v40, %v15839_v61  ;;  %v4877_v52 = vadd.f32 %v4749_v17, %v4613_v51 }
 0x3f8   : > { %15828 = vst [vmem:[#allocation42_spill] sm:$0xff] %v12666_v36  ;;  %v4878_v43 = vadd.f32 %v4750_v62, %v4614_v8  ;;  %v4879_v37 = vadd.f32 %v4751_v49, %v4615_v5  ;;  %v4881_v45 = vadd.f32 %v4753_v56, %v15841_v15  ;;  %v5039_v38 = vmul.f32 %v15842_v29, %v15785_v11 }
 0x3f9   : > { %15829 = vst [vmem:[#allocation46_spill] sm:$0xff] %v12669_v6  ;;  %v4880_v34 = vadd.f32 %v4752_v58, %v15840_v63  ;;  %v5040_v27 = vmul.f32 %v15843_v28, %v15786_v9  ;;  %v5042_v23 = vmul.f32 %v15844_v42, %v12491_v24  ;;  %v5043_v51 = vmul.f32 %v15838_v25, %v12494_v1  ;;  %v15845_v63 = vld [vmem:[#allocation119_spill] sm:$0xff] }
 0x3fa   : > { %v5044_v8 = vmul.f32 %v15842_v29, %v12497_v47  ;;  %v5479_v5 = vrot.slane %v5032_v41, 7  ;;  %v5495_v40 = vrot.slane %v5038_v54, 7  ;;  %v5498_v17 = vrot.slane %v5039_v38, 7 }
 0x3fb   : > { %v5501_v62 = vrot.slane %v5040_v27, 7  ;;  %v5504_v49 = vrot.slane %v5041_v39, 7  ;;  %v7761_v58 = vrot.slane %v5042_v23, 9  ;;  %v5508_v56 = vrot.slane %v5043_v51, 7  ;;  %v15847_v51 = vld [vmem:[#allocation89_spill] sm:$0xff] }
 0x3fc   : > { %v5511_v61 = vrot.slane %v5044_v8, 7  ;;  %v5480_v15 = vsel %vm8176_vm10, %v15845_v63, %v5479_v5  ;;  %v5496_v24 = vsel %vm8176_vm10, %v15846_v59, %v5495_v40  ;;  %v5497_v42 = vrot.slane %v5495_v40, 2 }
 0x3fd   : > { %v5500_v6 = vrot.slane %v5498_v17, 2  ;;  %v5503_v36 = vrot.slane %v5501_v62, 2  ;;  %v5509_v41 = vsel %vm8176_vm10, %v7761_v58, %v5508_v56  ;;  %v5510_v38 = vrot.slane %v5508_v56, 2  ;;  %v1393_v56 = vpop.f32.mrf.mxu2 }
 0x3fe   : > { %v12716_v27 = vrot.slane %v5511_v61, 2  ;;  %v5499_v39 = vsel %vm8176_vm10, %v5497_v42, %v5498_v17  ;;  %v5838_v54 = vadd.f32 %v5480_v15, %v4871_v4  ;;  %v5843_v8 = vadd.f32 %v5496_v24, %v15847_v51  ;;  %v15850_v17 = vld [vmem:[#allocation65_spill] sm:$0xff] }
 0x3ff   : > { %v5502_v23 = vsel %vm8176_vm10, %v5500_v6, %v5501_v62  ;;  %v5505_v59 = vsel %vm8176_vm10, %v5503_v36, %v5504_v49  ;;  %v5512_v5 = vsel %vm8176_vm10, %v5510_v38, %v5511_v61  ;;  %v5844_v40 = vadd.f32 %v5499_v39, %v4877_v52  ;;  %v12732_v6 = vld [vmem:[%s14361_s3 + $0x8] ss:$0 sm:$0xff]  ;;  %v15849_v52 = vld [vmem:[#allocation33_spill] sm:$0xff] }
 0x400   : > { %v5845_v58 = vadd.f32 %v5502_v23, %v4878_v43  ;;  %v5846_v63 = vadd.f32 %v5505_v59, %v4879_v37  ;;  %v5847_v29 = vadd.f32 %v5509_v41, %v4880_v34  ;;  %v5848_v20 = vadd.f32 %v5512_v5, %v4881_v45  ;;  %15848 = vst [vmem:[#allocation80_spill] sm:$0xff] %v12732_v6  ;;  %v15851_v41 = vld [vmem:[#allocation41_spill] sm:$0xff]  ;;  %v15853_v39 = vld [vmem:[#allocation54_spill] sm:$0xff] }
 0x401   : > { %v5974_v42 = vmul.f32 %v15691_v46, %v12455_v35  ;;  %v5979_v36 = vmul.f32 %v12732_v6, %v15781_v55  ;;  %v5980_v4 = vmul.f32 %v15759_v26, %v15785_v11  ;;  %v5981_v43 = vmul.f32 %v15849_v52, %v15786_v9 }
 0x402   : > { %v5982_v37 = vmul.f32 %v15691_v46, %v12484_v3  ;;  %v5983_v35 = vmul.f32 %v12732_v6, %v12494_v1  ;;  %v5984_v34 = vmul.f32 %v15759_v26, %v12497_v47  ;;  %v1394_v62 = vadd.f32 %v15850_v17, %v1393_v56  ;;  %v12751_v3 = vld [vmem:[%s14362_s4] ss:$0 sm:$0xff] }
 0x403   : > { %v6102_v45 = vadd.f32 %v5974_v42, %v5838_v54  ;;  %v6107_v49 = vadd.f32 %v5979_v36, %v5843_v8  ;;  %v6108_v55 = vadd.f32 %v5980_v4, %v5844_v40  ;;  %v6109_v61 = vadd.f32 %v5981_v43, %v5845_v58  ;;  %15852 = vst [vmem:[#allocation40_spill] sm:$0xff] %v12751_v3  ;;  %v15854_v54 = vld [vmem:[#allocation55_spill] sm:$0xff] }
 0x404   : > { %v6110_v15 = vadd.f32 %v5982_v37, %v5846_v63  ;;  %v6111_v11 = vadd.f32 %v5983_v35, %v5847_v29  ;;  %v6112_v24 = vadd.f32 %v5984_v34, %v5848_v20  ;;  %v1452_v38 = vmax.f32 %v1394_v62, 0.0 }
 0x405   : > { %v6240_v9 = vadd.f32 %v15851_v41, %v6102_v45  ;;  %v6245_v1 = vadd.f32 %v12751_v3, %v6107_v49  ;;  %v6246_v23 = vadd.f32 %v15853_v39, %v6108_v55  ;;  %v6247_v51 = vadd.f32 %v15854_v54, %v6109_v61 }
 0x406   : > { %v6248_v8 = vadd.f32 %v15851_v41, %v6110_v15  ;;  %v6249_v59 = vadd.f32 %v12751_v3, %v6111_v11  ;;  %v6250_v20 = vadd.f32 %v15853_v39, %v6112_v24  ;;  %v12759_v5 = vmin.f32 %v1452_v38, 6.0  ;;  %v15857_v15 = vld [vmem:[#allocation11_spill] sm:$0xff]  ;;  %v15858_v24 = vld [vmem:[#allocation13_spill] sm:$0xff]  ;;  %v15864_v39 = vld [vmem:[#allocation66_spill] sm:$0xff] }
 0x407   : > { %v6368_v29 = vmax.f32 %v6240_v9, 0.0  ;;  %v6373_v40 = vmax.f32 %v6245_v1, 0.0  ;;  %v6374_v58 = vmax.f32 %v6246_v23, 0.0  ;;  %v6375_v56 = vmax.f32 %v6247_v51, 0.0  ;;  %v15859_v38 = vld [vmem:[#allocation3_spill] sm:$0xff] }
 0x408   : > { %v6376_v63 = vmax.f32 %v6248_v8, 0.0  ;;  %v6377_v42 = vmax.f32 %v6249_v59, 0.0  ;;  %v6378_v36 = vmax.f32 %v6250_v20, 0.0  ;;  %v12762_v43 = vrot.slane %v12759_v5, 2  ;;  %v15860_v23 = vld [vmem:[#allocation7_spill] sm:$0xff]  ;;  %v15861_v8 = vld [vmem:[#allocation22_spill] sm:$0xff] }
 0x409   : > { %v6496_v4 = vmin.f32 %v6368_v29, 6.0  ;;  %v6501_v37 = vmin.f32 %v6373_v40, 6.0  ;;  %v6502_v35 = vmin.f32 %v6374_v58, 6.0  ;;  %v6503_v34 = vmin.f32 %v6375_v56, 6.0  ;;  %v15862_v20 = vld [vmem:[#allocation4_spill] sm:$0xff] }
 0x40a   : > { %v6504_v45 = vmin.f32 %v6376_v63, 6.0  ;;  %v12764_v62 = vmin.f32 %v6377_v42, 6.0  ;;  %v12766_v49 = vmin.f32 %v6378_v36, 6.0  ;;  %v12769_v55 = vrot.slane %v12759_v5, 4 }
 0x40b   : > { %6777 = vst [vmem:[#allocation1 + $0x23] ss:$4 sm:$0xff] %v6496_v4  ;;  %v12772_v61 = vrot.slane %v12759_v5, 6  ;;  %v1903_v11 = vmul.f32 %v15857_v15, %v12497_v47  ;;  %v1904_v9 = vmul.f32 %v15858_v24, %v12759_v5  ;;  %v1905_v1 = vmul.f32 %v15859_v38, %v12762_v43 }
 0x40c   : > { %15855 = vst [vmem:[#allocation155_spill] sm:$0xff] %v12764_v62  ;;  %v2073_v51 = vmul.f32 %v15860_v23, %v12759_v5  ;;  %v2074_v59 = vmul.f32 %v15861_v8, %v12762_v43  ;;  %v12786_v29 = vmul.f32 %v15862_v20, %v12769_v55  ;;  %v3011_v40 = vmul.f32 %v15799_v57, %v12759_v5  ;;  %v15863_v8 = vld [vmem:[#allocation37_spill] sm:$0xff] }
 0x40d   : > { %15856 = vst [vmem:[#allocation156_spill] sm:$0xff] %v12766_v49  ;;  %v3012_v58 = vmul.f32 %v15800_v16, %v12762_v43  ;;  %v3267_v63 = vmul.f32 %v15808_v30, %v12497_v47  ;;  %v3268_v42 = vmul.f32 %v15101_v2, %v12759_v5  ;;  %v3269_v36 = vmul.f32 %v15810_v50, %v12762_v43 }
 0x40e   : > { %v2574_v56 = vrot.slane %v2073_v51, 7  ;;  %v2577_v4 = vrot.slane %v2074_v59, 7  ;;  %v3559_v62 = vmul.f32 %v15190_v60, %v12759_v5  ;;  %v3560_v20 = vmul.f32 %v15863_v8, %v12762_v43  ;;  %v15866_v59 = vld [vmem:[#allocation143_spill] sm:$0xff] }
 0x40f   : > { %v3395_v26 = vadd.f32 %v3267_v63, %v15864_v39  ;;  %v3396_v2 = vadd.f32 %v3268_v42, %v15865_v53  ;;  %v3397_v57 = vadd.f32 %v3269_v36, %v15866_v59  ;;  %v12811_v49 = vmul.f32 %v15321_v22, %v12769_v55  ;;  %v15872_v59 = vld [vmem:[#allocation70_spill] sm:$0xff] }
 0x410   : > { %v2575_v51 = vsel %vm8176_vm10, %v12531_v31, %v2574_v56  ;;  %v2576_v38 = vrot.slane %v2574_v56, 2  ;;  %v2579_v16 = vrot.slane %v2577_v4, 2  ;;  %v4044_v3 = vrot.slane %v3559_v62, 7 }
 0x411   : > { %v2875_v50 = vadd.f32 %v2575_v51, %v1903_v11  ;;  %v4047_v31 = vrot.slane %v3560_v20, 7  ;;  %v4498_v39 = vmul.f32 %v15627_v12, %v12759_v5  ;;  %v15868_v53 = vrot.slane %v12786_v29, 7 }
 0x412   : > { %v12813_v60 = vld.sshfl [vmem:[#allocation1 + $0x20] sm:$0xff pattern:$0x73625140]  ;;  %v2578_v8 = vsel %vm8176_vm10, %v2576_v38, %v2577_v4  ;;  %v14814_v42 = vrot.slane %v12811_v49, 7  ;;  %v4045_v62 = vsel %vm8176_vm10, %v12636_v14, %v4044_v3  ;;  %v4046_v38 = vrot.slane %v4044_v3, 2 }
 0x413   : > { %15867 = vst [vmem:[#allocation47_spill] sm:$0xff] %v12813_v60  ;;  %v2581_v11 = vsel %vm8176_vm10, %v2579_v16, %v15868_v53  ;;  %v2876_v56 = vadd.f32 %v2578_v8, %v1904_v9  ;;  %v12823_v63 = vadd.f32 %v3011_v40, %v2875_v50  ;;  %v4049_v20 = vrot.slane %v4047_v31, 2  ;;  %v15870_v40 = vld [vmem:[#allocation118_spill] sm:$0xff]  ;;  %v15873_v53 = vld [vmem:[#allocation51_spill] sm:$0xff] }
 0x414   : > { %6785 = vst [vmem:[#allocation1 + $0x21] ss:$4 sm:$0xff] %v6502_v35  ;;  %v12826_v36 = vadd.f32 %v2581_v11, %v1905_v1  ;;  %v4362_v4 = vadd.f32 %v4045_v62, %v3395_v26  ;;  %v4499_v16 = vmul.f32 %v15824_v19, %v12762_v43  ;;  %v4500_v50 = vmul.f32 %v15825_v48, %v12769_v55  ;;  %v15886_v60 = vld [vmem:[#allocation35_spill] sm:$0xff] }
 0x415   : > { %6786 = vst [vmem:[#allocation1 + $0x22] ss:$4 sm:$0xff] %v6503_v34  ;;  %v12831_v35 = vadd.f32 %v3012_v58, %v2876_v56  ;;  %v4048_v34 = vsel %vm8176_vm10, %v4046_v38, %v4047_v31  ;;  %v4051_v14 = vsel %vm8176_vm10, %v4049_v20, %v14814_v42  ;;  %v4754_v3 = vmul.f32 %v15835_v18, %v12497_v47  ;;  %v15871_v58 = vld [vmem:[#allocation112_spill] sm:$0xff]  ;;  %v1395_v56 = vpop.f32.mrf.mxu2  ;;  %v15876_v20 = vld [vmem:[#allocation74_spill] sm:$0xff] }
 0x416   : > { %15869 = vst [vmem:[#allocation95_spill] sm:$0xff] %v12826_v36  ;;  %v4755_v26 = vmul.f32 %v15833_v21, %v12759_v5  ;;  %v4363_v9 = vadd.f32 %v4048_v34, %v3396_v2  ;;  %v4364_v1 = vadd.f32 %v4051_v14, %v3397_v57  ;;  %v12849_v8 = vadd.f32 %v4498_v39, %v4362_v4  ;;  %v15874_v2 = vld [vmem:[#allocation116_spill] sm:$0xff] }
 0x417   : > { %6787 = vst [vmem:[#allocation1 + $0x23] ss:$4 sm:$0xff] %v6504_v45  ;;  %v12847_v45 = vld.sshfl [vmem:[#allocation1] sm:$0xff pattern:$0x73625140]  ;;  %v4882_v51 = vadd.f32 %v4754_v3, %v15871_v58  ;;  %v5045_v47 = vmul.f32 %v15843_v28, %v12759_v5  ;;  %v5046_v11 = vmul.f32 %v15873_v53, %v12762_v43  ;;  %v12868_v38 = vmul.f32 %v15838_v25, %v12769_v55  ;;  %v15892_v36 = vld [vmem:[#allocation32_spill] sm:$0xff] }
 0x418   : > { %6784 = vst [vmem:[#allocation1 + $0x20] ss:$4 sm:$0xff] %v6501_v37  ;;  %v4756_v37 = vmul.f32 %v15836_v0, %v12762_v43  ;;  %v4883_v31 = vadd.f32 %v4755_v26, %v15872_v59  ;;  %v12861_v57 = vadd.f32 %v4499_v16, %v4363_v9  ;;  %v12863_v39 = vadd.f32 %v4500_v50, %v4364_v1  ;;  %v15877_v16 = vld [vmem:[#allocation109_spill] sm:$0xff] }
 0x419   : > { %6750 = vst [vmem:[#allocation1] ss:$4 sm:$0xff] %v15870_v40  ;;  %v5514_v4 = vrot.slane %v5045_v47, 7  ;;  %v5517_v34 = vrot.slane %v5046_v11, 7  ;;  %v5985_v14 = vmul.f32 %v15849_v52, %v12759_v5  ;;  %v5986_v3 = vmul.f32 %v15691_v46, %v12762_v43  ;;  %v15878_v26 = vld [vmem:[#allocation85_spill] sm:$0xff] }
 0x41a   : > { %6751 = vst [vmem:[#allocation1 + $0x1] ss:$4 sm:$0xff] %v15874_v2  ;;  %v4884_v62 = vadd.f32 %v4756_v37, %v12664_v44  ;;  %v14815_v50 = vrot.slane %v12868_v38, 7  ;;  %v5987_v44 = vmul.f32 %v12732_v6, %v12769_v55  ;;  %v6877_v9 = vpack.c.bf16 %v15878_v26, %v12641_v7  ;;  %v15879_v47 = vld [vmem:[#allocation5_spill] sm:$0xff] }
 0x41b   : > { %15875 = vst [vmem:[#allocation101_spill] sm:$0xff] %v12863_v39  ;;  %v1396_v1 = vadd.f32 %v15850_v17, %v1395_v56  ;;  %v5515_v37 = vsel %vm8176_vm10, %v12716_v27, %v5514_v4  ;;  %v5516_v5 = vrot.slane %v5514_v4, 2  ;;  %v5519_v40 = vrot.slane %v5517_v34, 2 }
 0x41c   : > { %6752 = vst [vmem:[#allocation1 + $0x2] ss:$4 sm:$0xff] %v15876_v20  ;;  %v1907_v43 = vmul.f32 %v15857_v15, %v12772_v61  ;;  %v5849_v58 = vadd.f32 %v5515_v37, %v4882_v51  ;;  %7771 = vmatmul.msk.bf16.gmra.mxu1 %vm6893_vm12, %v6877_v9  ;;  %v12890_v11 = vmul.f32 %v15879_v47, %v12772_v61 }
 0x41d   : > { %6753 = vst [vmem:[#allocation1 + $0x3] ss:$4 sm:$0xff] %v15877_v16  ;;  %v1453_v59 = vmax.f32 %v1396_v1, 0.0  ;;  %v3271_v7 = vmul.f32 %v15808_v30, %v12772_v61  ;;  %v5518_v56 = vsel %vm8176_vm10, %v5516_v5, %v5517_v34  ;;  %v5521_v27 = vsel %vm8176_vm10, %v5519_v40, %v14815_v50 }
 0x41e   : > { %v12902_v51 = vmul.f32 %v15513_v10, %v12772_v61  ;;  %v4757_v2 = vmul.f32 %v15834_v32, %v12769_v55  ;;  %v5850_v20 = vadd.f32 %v5518_v56, %v4883_v31  ;;  %v5851_v4 = vadd.f32 %v5521_v27, %v4884_v62 }
 0x41f   : > { %v6113_v16 = vadd.f32 %v5985_v14, %v5849_v58  ;;  %v12906_v26 = vmin.f32 %v1453_v59, 6.0  ;;  %v14819_v9 = vrot.slane %v12890_v11, 7  ;;  %v3399_v34 = vadd.f32 %v3271_v7, %v12565_v33  ;;  %v15883_v7 = vld [vmem:[#allocation21_spill] sm:$0xff] }
 0x420   : > { %v4758_v37 = vmul.f32 %v15835_v18, %v12772_v61  ;;  %v6114_v5 = vadd.f32 %v5986_v3, %v5850_v20  ;;  %v6115_v40 = vadd.f32 %v5987_v44, %v5851_v4  ;;  %v15882_v3 = vld [vmem:[#allocation40_spill] sm:$0xff]  ;;  %v15884_v20 = vld [vmem:[#allocation15_spill] sm:$0xff] }
 0x421   : > { %15880 = vst [vmem:[#allocation105_spill] sm:$0xff] %v12906_v26  ;;  %v6251_v42 = vadd.f32 %v15854_v54, %v6113_v16  ;;  %v1638_v50 = vrot.slane %v12906_v26, 2  ;;  %v12916_v31 = vrot.slane %v12906_v26, 6  ;;  %v1908_v62 = vmul.f32 %v15858_v24, %v12906_v26  ;;  %v15885_v16 = vld [vmem:[#allocation23_spill] sm:$0xff] }
 0x422   : > { %v2077_v33 = vmul.f32 %v15860_v23, %v12906_v26  ;;  %v2585_v14 = vrot.slane %v14819_v9, 2  ;;  %v6252_v58 = vadd.f32 %v15851_v41, %v6114_v5  ;;  %v6253_v44 = vadd.f32 %v15882_v3, %v6115_v40  ;;  %v15888_v40 = vld [vmem:[#allocation43_spill] sm:$0xff] }
 0x423   : > { %15881 = vst [vmem:[#allocation108_spill] sm:$0xff] %v12916_v31  ;;  %v6379_v59 = vmax.f32 %v6251_v42, 0.0  ;;  %v2078_v56 = vmul.f32 %v15883_v7, %v1638_v50  ;;  %v3015_v4 = vmul.f32 %v15884_v20, %v12906_v26  ;;  %v3016_v1 = vmul.f32 %v15885_v16, %v1638_v50 }
 0x424   : > { %v2586_v27 = vrot.slane %v2077_v33, 7  ;;  %v3272_v47 = vmul.f32 %v15886_v60, %v12906_v26  ;;  %v6380_v23 = vmax.f32 %v6252_v58, 0.0  ;;  %v6381_v24 = vmax.f32 %v6253_v44, 0.0  ;;  %v15889_v33 = vld [vmem:[#allocation34_spill] sm:$0xff] }
 0x425   : > { %v12932_v15 = vmin.f32 %v6379_v59, 6.0  ;;  %v2589_v9 = vrot.slane %v2078_v56, 7  ;;  %v3563_v3 = vmul.f32 %v15889_v33, %v12906_v26  ;;  %v3564_v58 = vmul.f32 %v15892_v36, %v1638_v50 }
 0x426   : > { %v2587_v5 = vsel %vm8176_vm10, %v2585_v14, %v2586_v27  ;;  %v2588_v42 = vrot.slane %v2586_v27, 2  ;;  %v3400_v7 = vadd.f32 %v3272_v47, %v15888_v40  ;;  %v12939_v20 = vmin.f32 %v6380_v23, 6.0  ;;  %v1398_v27 = vpop.f32.mrf.mxu2 }
 0x427   : > { %15887 = vst [vmem:[#allocation58_spill] sm:$0xff] %v12932_v15  ;;  %v12941_v16 = vmin.f32 %v6381_v24, 6.0  ;;  %v2879_v48 = vadd.f32 %v2587_v5, %v1907_v43  ;;  %v15893_v59 = vrot.slane %v12902_v51, 7  ;;  %v4056_v14 = vrot.slane %v3563_v3, 7 }
 0x428   : > { %15890 = vst [vmem:[#allocation81_spill] sm:$0xff] %v12939_v20  ;;  %v2590_v44 = vsel %vm8176_vm10, %v2588_v42, %v2589_v9  ;;  %v4502_v47 = vmul.f32 %v15627_v12, %v12906_v26  ;;  %v4059_v23 = vrot.slane %v3564_v58, 7  ;;  %v4503_v24 = vmul.f32 %v15824_v19, %v1638_v50  ;;  %v15894_v42 = vld [vmem:[#allocation42_spill] sm:$0xff]  ;;  %v15898_v58 = vld [vmem:[#allocation87_spill] sm:$0xff] }
 0x429   : > { %15891 = vst [vmem:[#allocation90_spill] sm:$0xff] %v12941_v16  ;;  %v4055_v56 = vrot.slane %v15893_v59, 2  ;;  %v2880_v40 = vadd.f32 %v2590_v44, %v1908_v62  ;;  %v12950_v15 = vadd.f32 %v3015_v4, %v2879_v48  ;;  %v4058_v5 = vrot.slane %v4056_v14, 2  ;;  %v15896_v20 = vld [vmem:[#allocation46_spill] sm:$0xff]  ;;  %v15897_v48 = vld [vmem:[#allocation19_spill] sm:$0xff] }
 0x42a   : > { %v4759_v9 = vmul.f32 %v15833_v21, %v12906_v26  ;;  %v4885_v59 = vadd.f32 %v4757_v2, %v15894_v42  ;;  %v4886_v16 = vadd.f32 %v4758_v37, %v15896_v20  ;;  %v5048_v62 = vmul.f32 %v15897_v48, %v12772_v61 }
 0x42b   : > { %v4057_v43 = vsel %vm8176_vm10, %v4055_v56, %v4056_v14  ;;  %v12958_v3 = vadd.f32 %v3016_v1, %v2880_v40  ;;  %v4060_v4 = vsel %vm8176_vm10, %v4058_v5, %v4059_v23  ;;  %v5049_v56 = vmul.f32 %v15843_v28, %v12906_v26  ;;  %v15899_v14 = vld [vmem:[#allocation17_spill] sm:$0xff] }
 0x42c   : > { %v4366_v36 = vadd.f32 %v4057_v43, %v3399_v34  ;;  %v4887_v44 = vadd.f32 %v4759_v9, %v15898_v58  ;;  %v5050_v6 = vmul.f32 %v15899_v14, %v1638_v50  ;;  %v4367_v39 = vadd.f32 %v4060_v4, %v3400_v7  ;;  %v15902_v43 = vld [vmem:[#allocation52_spill] sm:$0xff]  ;;  %v15911_v14 = vld [vmem:[#allocation149_spill] sm:$0xff] }
 0x42d   : > { %15895 = vst [vmem:[#allocation115_spill] sm:$0xff] %v12958_v3  ;;  %v15901_v34 = vrot.slane %v12868_v38, 7  ;;  %v5523_v37 = vrot.slane %v5048_v62, 7  ;;  %v5526_v20 = vrot.slane %v5049_v56, 7  ;;  %v5988_v42 = vmul.f32 %v15902_v43, %v12772_v61  ;;  %v15905_v4 = vld [vmem:[#allocation24_spill] sm:$0xff] }
 0x42e   : > { %v12969_v2 = vadd.f32 %v4502_v47, %v4366_v36  ;;  %v5529_v40 = vrot.slane %v5050_v6, 7  ;;  %v5989_v23 = vmul.f32 %v15849_v52, %v12906_v26  ;;  %v12977_v5 = vadd.f32 %v4503_v24, %v4367_v39  ;;  %v12982_v47 = vld.sshfl [vmem:[#allocation1] sm:$0xff pattern:$0x73625140]  ;;  %v15906_v56 = vld [vmem:[#allocation48_spill] sm:$0xff]  ;;  %v15912_v26 = vld [vmem:[#allocation138_spill] sm:$0xff] }
 0x42f   : > { %v5522_v1 = vrot.slane %v15901_v34, 2  ;;  %v5525_v7 = vrot.slane %v5523_v37, 2  ;;  %v5990_v36 = vmul.f32 %v15691_v46, %v1638_v50  ;;  %15904 = vst [vmem:[#allocation98_spill] sm:$0xff] %v12982_v47  ;;  %v5528_v38 = vrot.slane %v5526_v20, 2 }
 0x430   : > { %15900 = vst [vmem:[#allocation76_spill] sm:$0xff] %v12969_v2  ;;  %v1399_v6 = vadd.f32 %v15850_v17, %v1398_v27  ;;  %v3274_v58 = vmul.f32 %v15905_v4, %v12916_v31  ;;  %v12992_v24 = vmul.f32 %v15321_v22, %v12916_v31  ;;  %v4761_v50 = vmul.f32 %v15834_v32, %v12916_v31  ;;  %v15909_v27 = vld [vmem:[#allocation69_spill] sm:$0xff]  ;;  %v15914_v2 = vld [vmem:[#allocation54_spill] sm:$0xff] }
 0x431   : > { %15903 = vst [vmem:[#allocation97_spill] sm:$0xff] %v12977_v5  ;;  %v5524_v9 = vsel %vm8176_vm10, %v5522_v1, %v5523_v37  ;;  %v5527_v39 = vsel %vm8176_vm10, %v5525_v7, %v5526_v20  ;;  %v5530_v34 = vsel %vm8176_vm10, %v5528_v38, %v5529_v40  ;;  %v1400_v20 = vpop.f32.mrf.mxu2  ;;  %v15910_v7 = vld [vmem:[#allocation157_spill] sm:$0xff] }
 0x432   : > { %v5852_v62 = vadd.f32 %v5524_v9, %v4885_v59  ;;  %6760 = vst [vmem:[#allocation1] ss:$4 sm:$0xff] %v15906_v56  ;;  %v12998_v59 = vmul.f32 %v15838_v25, %v12916_v31  ;;  %v5853_v1 = vadd.f32 %v5527_v39, %v4886_v16  ;;  %v1454_v9 = vmax.f32 %v1399_v6, 0.0  ;;  %v15913_v31 = vld [vmem:[#allocation36_spill] sm:$0xff] }
 0x433   : > { %15907 = vst [vmem:[#allocation62_spill] sm:$0xff] %v12992_v24  ;;  %v5854_v56 = vadd.f32 %v5530_v34, %v4887_v44  ;;  %v3402_v5 = vadd.f32 %v3274_v58, %v15911_v14  ;;  %v14827_v3 = vrot.slane %v12992_v24, 7  ;;  %v13007_v47 = vadd.f32 %v4761_v50, %v15912_v26  ;;  %v15915_v14 = vld [vmem:[#allocation68_spill] sm:$0xff] }
 0x434   : > { %15908 = vst [vmem:[#allocation59_spill] sm:$0xff] %v12998_v59  ;;  %v6116_v37 = vadd.f32 %v5988_v42, %v5852_v62  ;;  %v13011_v40 = vmin.f32 %v1454_v9, 6.0  ;;  %v6878_v38 = vpack.c.bf16 %v15915_v14, %v12847_v45  ;;  %v13019_v62 = vadd.f32 %v15850_v17, %v1400_v20  ;;  %v15918_v9 = vld [vmem:[#allocation37_spill] sm:$0xff]  ;;  %v15920_v14 = vld [vmem:[#allocation26_spill] sm:$0xff] }
 0x435   : > { %6761 = vst [vmem:[#allocation1 + $0x1] ss:$4 sm:$0xff] %v15909_v27  ;;  %v6117_v27 = vadd.f32 %v5989_v23, %v5853_v1  ;;  %v6118_v42 = vadd.f32 %v5990_v36, %v5854_v56  ;;  %v4065_v44 = vrot.slane %v14827_v3, 2 }
 0x436   : > { %6762 = vst [vmem:[#allocation1 + $0x2] ss:$4 sm:$0xff] %v15910_v7  ;;  %v6254_v25 = vadd.f32 %v15914_v2, %v6116_v37  ;;  %v13023_v23 = vrot.slane %v13011_v40, 2  ;;  %v13026_v6 = vrot.slane %v13011_v40, 4  ;;  %v13030_v58 = vrot.slane %v13011_v40, 6  ;;  %7772 = vmatmul.msk.bf16.gmra.mxu1 %vm6893_vm12, %v6878_v38 }
 0x437   : > { %6763 = vst [vmem:[#allocation1 + $0x3] ss:$4 sm:$0xff] %v15913_v31  ;;  %v6255_v26 = vadd.f32 %v15854_v54, %v6117_v27  ;;  %v6256_v36 = vadd.f32 %v15851_v41, %v6118_v42  ;;  %v3275_v45 = vmul.f32 %v15808_v30, %v13011_v40  ;;  %v3567_v17 = vmul.f32 %v15513_v10, %v13011_v40 }
 0x438   : > { %v6382_v31 = vmax.f32 %v6254_v25, 0.0  ;;  %15916 = vst [vmem:[#allocation63_spill] sm:$0xff] %v13030_v58  ;;  %v3276_v50 = vmul.f32 %v15886_v60, %v13023_v23  ;;  %v3568_v34 = vmul.f32 %v15889_v33, %v13023_v23  ;;  %v13046_v20 = vmul.f32 %v15918_v9, %v13026_v6 }
 0x439   : > { %v6383_v25 = vmax.f32 %v6255_v26, 0.0  ;;  %v6384_v1 = vmax.f32 %v6256_v36, 0.0  ;;  %v3403_v37 = vadd.f32 %v3275_v45, %v12823_v63  ;;  %v4066_v7 = vrot.slane %v3567_v17, 7 }
 0x43a   : > { %v13037_v39 = vmin.f32 %v6382_v31, 6.0  ;;  %v3404_v27 = vadd.f32 %v3276_v50, %v12831_v35  ;;  %v4069_v42 = vrot.slane %v3568_v34, 7  ;;  %v4505_v38 = vmul.f32 %v15920_v14, %v13011_v40 }
 0x43b   : > { %v13048_v56 = vmin.f32 %v6383_v25, 6.0  ;;  %v13053_v26 = vmin.f32 %v6384_v1, 6.0  ;;  %v4067_v31 = vsel %vm8176_vm10, %v4065_v44, %v4066_v7  ;;  %v4068_v36 = vrot.slane %v4066_v7, 2 }
 0x43c   : > { %15917 = vst [vmem:[#allocation120_spill] sm:$0xff] %v13037_v39  ;;  %v14829_v63 = vrot.slane %v13046_v20, 7  ;;  %v4071_v45 = vrot.slane %v4069_v42, 2  ;;  %v4369_v3 = vadd.f32 %v4067_v31, %v3402_v5  ;;  %v4506_v17 = vmul.f32 %v15627_v12, %v13023_v23 }
 0x43d   : > { %15919 = vst [vmem:[#allocation88_spill] sm:$0xff] %v13048_v56  ;;  %v4507_v35 = vmul.f32 %v15824_v19, %v13026_v6  ;;  %v4070_v25 = vsel %vm8176_vm10, %v4068_v36, %v4069_v42  ;;  %v4762_v50 = vmul.f32 %v15835_v18, %v13011_v40  ;;  %v4763_v44 = vmul.f32 %v15833_v21, %v13023_v23 }
 0x43e   : > { %15921 = vst [vmem:[#allocation158_spill] sm:$0xff] %v13053_v26  ;;  %v5053_v34 = vmul.f32 %v15897_v48, %v13011_v40  ;;  %v4073_v5 = vsel %vm8176_vm10, %v4071_v45, %v14829_v63  ;;  %v4370_v1 = vadd.f32 %v4070_v25, %v3403_v37  ;;  %v13074_v7 = vadd.f32 %v4505_v38, %v4369_v3 }
 0x43f   : > { %v5054_v42 = vmul.f32 %v15843_v28, %v13023_v23  ;;  %v4371_v31 = vadd.f32 %v4073_v5, %v3404_v27  ;;  %v4890_v36 = vadd.f32 %v4762_v50, %v12849_v8  ;;  %v4891_v16 = vadd.f32 %v4763_v44, %v12861_v57 }
 0x440   : > { %v13082_v19 = vmul.f32 %v15873_v53, %v13026_v6  ;;  %v13084_v26 = vadd.f32 %v4506_v17, %v4370_v1  ;;  %v15922_v56 = vrot.slane %v12998_v59, 7  ;;  %v5536_v37 = vrot.slane %v5053_v34, 7  ;;  %v15923_v34 = vld [vmem:[#allocation10_spill] sm:$0xff] }
 0x441   : > { %v5539_v3 = vrot.slane %v5054_v42, 7  ;;  %v13088_v38 = vadd.f32 %v4507_v35, %v4371_v31  ;;  %v5992_v8 = vmul.f32 %v15902_v43, %v13011_v40  ;;  %v5993_v57 = vmul.f32 %v15849_v52, %v13023_v23 }
 0x442   : > { %v5535_v45 = vrot.slane %v15922_v56, 2  ;;  %v14832_v25 = vrot.slane %v13082_v19, 7  ;;  %v5538_v17 = vrot.slane %v5536_v37, 2  ;;  %v5994_v56 = vmul.f32 %v15691_v46, %v13026_v6 }
 0x443   : > { %v5541_v50 = vrot.slane %v5539_v3, 2  ;;  %v1455_v35 = vmax.f32 %v13019_v62, 0.0  ;;  %v1906_v5 = vmul.f32 %v15923_v34, %v12769_v55  ;;  %v15924_v1 = vrot.slane %v12786_v29, 7 }
 0x444   : > { %v5537_v27 = vsel %vm8176_vm10, %v5535_v45, %v5536_v37  ;;  %v5540_v31 = vsel %vm8176_vm10, %v5538_v17, %v5539_v3  ;;  %v15925_v37 = vld [vmem:[#allocation14_spill] sm:$0xff]  ;;  %v15927_v29 = vrot.slane %v12890_v11, 7  ;;  %v3278_v17 = vmul.f32 %v15905_v4, %v13030_v58 }
 0x445   : > { %v5856_v44 = vadd.f32 %v5537_v27, %v13007_v47  ;;  %v2582_v42 = vrot.slane %v15924_v1, 2  ;;  %v5543_v45 = vsel %vm8176_vm10, %v5541_v50, %v14832_v25  ;;  %v3014_v63 = vmul.f32 %v15925_v37, %v12772_v61  ;;  %v15928_v50 = vld [vmem:[#allocation64_spill] sm:$0xff] }
 0x446   : > { %v3270_v47 = vmul.f32 %v15905_v4, %v12769_v55  ;;  %v5857_v62 = vadd.f32 %v5540_v31, %v4890_v36  ;;  %v5858_v27 = vadd.f32 %v5543_v45, %v4891_v16  ;;  %v13115_v24 = vmin.f32 %v1455_v35, 6.0 }
 0x447   : > { %v6120_v59 = vadd.f32 %v5992_v8, %v5856_v44  ;;  %v2584_v3 = vsel %vm8176_vm10, %v2582_v42, %v15927_v29  ;;  %v13126_v25 = vmul.f32 %v15321_v22, %v13030_v58  ;;  %v15930_v42 = vrot.slane %v12811_v49, 7 }
 0x448   : > { %15926 = vst [vmem:[#allocation159_spill] sm:$0xff] %v13115_v24  ;;  %v3398_v1 = vadd.f32 %v3270_v47, %v15928_v50  ;;  %v6121_v39 = vadd.f32 %v5993_v57, %v5857_v62  ;;  %v6122_v36 = vadd.f32 %v5994_v56, %v5858_v27  ;;  %v13130_v8 = vrot.slane %v13115_v24, 2  ;;  %v1403_v47 = vpop.f32.mrf.mxu2 }
 0x449   : > { %v6258_v16 = vadd.f32 %v15914_v2, %v6120_v59  ;;  %v2878_v11 = vadd.f32 %v2584_v3, %v1906_v5  ;;  %v3279_v44 = vmul.f32 %v15808_v30, %v13115_v24  ;;  %v3571_v35 = vmul.f32 %v15513_v10, %v13115_v24 }
 0x44a   : > { %15929 = vst [vmem:[#allocation45_spill] sm:$0xff] %v13130_v8  ;;  %v4052_v31 = vrot.slane %v15930_v42, 2  ;;  %v6259_v45 = vadd.f32 %v15854_v54, %v6121_v39  ;;  %v6260_v57 = vadd.f32 %v15851_v41, %v6122_v36  ;;  %v3572_v59 = vmul.f32 %v15889_v33, %v13130_v8 }
 0x44b   : > { %v6386_v56 = vmax.f32 %v6258_v16, 0.0  ;;  %v3142_v62 = vadd.f32 %v3014_v63, %v2878_v11  ;;  %v3407_v5 = vadd.f32 %v3279_v44, %v12950_v15  ;;  %v15931_v27 = vrot.slane %v12902_v51, 7 }
 0x44c   : > { %v14833_v49 = vrot.slane %v13126_v25, 7  ;;  %v6387_v3 = vmax.f32 %v6259_v45, 0.0  ;;  %v6388_v50 = vmax.f32 %v6260_v57, 0.0  ;;  %v4078_v36 = vrot.slane %v3571_v35, 7 }
 0x44d   : > { %v4054_v29 = vsel %vm8176_vm10, %v4052_v31, %v15931_v27  ;;  %v13148_v39 = vmin.f32 %v6386_v56, 6.0  ;;  %v3406_v16 = vadd.f32 %v3278_v17, %v3142_v62  ;;  %v4081_v9 = vrot.slane %v3572_v59, 7 }
 0x44e   : > { %v4077_v42 = vrot.slane %v14833_v49, 2  ;;  %v4365_v63 = vadd.f32 %v4054_v29, %v3398_v1  ;;  %v13152_v11 = vmin.f32 %v6387_v3, 6.0  ;;  %v13154_v15 = vmin.f32 %v6388_v50, 6.0  ;;  %v15936_v29 = vld [vmem:[#allocation18_spill] sm:$0xff] }
 0x44f   : > { %15932 = vst [vmem:[#allocation99_spill] sm:$0xff] %v13148_v39  ;;  %v4080_v51 = vrot.slane %v4078_v36, 2  ;;  %v4501_v44 = vmul.f32 %v15920_v14, %v12772_v61  ;;  %v13160_v45 = vrot.slane %v4081_v9, 2  ;;  %v4509_v17 = vmul.f32 %v15920_v14, %v13115_v24 }
 0x450   : > { %15933 = vst [vmem:[#allocation102_spill] sm:$0xff] %v13152_v11  ;;  %v4079_v31 = vsel %vm8176_vm10, %v4077_v42, %v4078_v36  ;;  %v4510_v35 = vmul.f32 %v15627_v12, %v13130_v8  ;;  %v4764_v59 = vmul.f32 %v15836_v0, %v13026_v6  ;;  %v4765_v62 = vmul.f32 %v15834_v32, %v13030_v58  ;;  %v15937_v36 = vld [vmem:[#allocation101_spill] sm:$0xff]  ;;  %v15949_v12 = vld [vmem:[#allocation95_spill] sm:$0xff] }
 0x451   : > { %15934 = vst [vmem:[#allocation127_spill] sm:$0xff] %v13154_v15  ;;  %v4082_v1 = vsel %vm8176_vm10, %v4080_v51, %v4081_v9  ;;  %v4373_v57 = vadd.f32 %v4079_v31, %v3406_v16  ;;  %v4629_v56 = vadd.f32 %v4501_v44, %v4365_v63  ;;  %v4766_v27 = vmul.f32 %v15835_v18, %v13115_v24  ;;  %v15939_v51 = vld [vmem:[#allocation76_spill] sm:$0xff] }
 0x452   : > { %15935 = vst [vmem:[#allocation107_spill] sm:$0xff] %v13160_v45  ;;  %v4374_v61 = vadd.f32 %v4082_v1, %v3407_v5  ;;  %v5056_v3 = vmul.f32 %v15936_v29, %v13030_v58  ;;  %v4892_v42 = vadd.f32 %v4764_v59, %v15937_v36  ;;  %v5057_v9 = vmul.f32 %v15897_v48, %v13115_v24  ;;  %v1405_v36 = vpop.f32.mrf.mxu2  ;;  %v15946_v45 = vld [vmem:[#allocation6_spill] sm:$0xff] }
 0x453   : > { %v13176_v50 = vadd.f32 %v4509_v17, %v4373_v57  ;;  %v5058_v16 = vmul.f32 %v15843_v28, %v13130_v8  ;;  %v4893_v63 = vadd.f32 %v4765_v62, %v4629_v56  ;;  %v4894_v44 = vadd.f32 %v4766_v27, %v15939_v51  ;;  %v15941_v57 = vld [vmem:[#allocation80_spill] sm:$0xff]  ;;  %v13197_v56 = vld [vmem:[%s14360_s2] ss:$0 sm:$0xff] }
 0x454   : > { %v13183_v5 = vadd.f32 %v4510_v35, %v4374_v61  ;;  %v15940_v31 = vrot.slane %v13082_v19, 7  ;;  %v5545_v49 = vrot.slane %v5056_v3, 7  ;;  %v5548_v15 = vrot.slane %v5057_v9, 7  ;;  %15942 = vst [vmem:[#allocation83_spill] sm:$0xff] %v13197_v56  ;;  %v15943_v61 = vld [vmem:[#allocation98_spill] sm:$0xff]  ;;  %v15944_v62 = vld [vmem:[#allocation141_spill] sm:$0xff] }
 0x455   : > { %v5551_v17 = vrot.slane %v5058_v16, 7  ;;  %v5995_v59 = vmul.f32 %v15941_v57, %v13030_v58  ;;  %v5996_v11 = vmul.f32 %v15902_v43, %v13115_v24  ;;  %v5997_v35 = vmul.f32 %v15849_v52, %v13130_v8 }
 0x456   : > { %15938 = vst [vmem:[#allocation110_spill] sm:$0xff] %v13183_v5  ;;  %v5544_v1 = vrot.slane %v15940_v31, 2  ;;  %v1404_v19 = vadd.f32 %v13197_v56, %v1403_v47  ;;  %v6879_v27 = vpack.c.bf16 %v15944_v62, %v15943_v61  ;;  %v5547_v9 = vrot.slane %v5545_v49, 2 }
 0x457   : > { %v5550_v16 = vrot.slane %v5548_v15, 2  ;;  %v13204_v51 = vrot.slane %v5551_v17, 2  ;;  %v1406_v5 = vadd.f32 %v13197_v56, %v1405_v36  ;;  %v3013_v8 = vmul.f32 %v15946_v45, %v12769_v55 }
 0x458   : > { %v5546_v3 = vsel %vm8176_vm10, %v5544_v1, %v5545_v49  ;;  %v1456_v39 = vmax.f32 %v1404_v19, 0.0  ;;  %7773 = vmatmul.msk.bf16.gmra.mxu1 %vm6893_vm12, %v6879_v27  ;;  %v5549_v47 = vsel %vm8176_vm10, %v5547_v9, %v5548_v15  ;;  %v15947_v49 = vld [vmem:[#allocation8_spill] sm:$0xff]  ;;  %v15948_v62 = vrot.slane %v13046_v20, 7 }
 0x459   : > { %15945 = vst [vmem:[#allocation86_spill] sm:$0xff] %v13204_v51  ;;  %v5859_v31 = vadd.f32 %v5546_v3, %v4892_v42  ;;  %v5552_v61 = vsel %vm8176_vm10, %v5550_v16, %v5551_v17  ;;  %v3277_v1 = vmul.f32 %v15947_v49, %v13026_v6  ;;  %v5860_v19 = vadd.f32 %v5549_v47, %v4893_v63  ;;  %v15951_v17 = vld [vmem:[#allocation9_spill] sm:$0xff]  ;;  %v15952_v20 = vld [vmem:[#allocation40_spill] sm:$0xff] }
 0x45a   : > { %v4074_v42 = vrot.slane %v15948_v62, 2  ;;  %v5861_v3 = vadd.f32 %v5552_v61, %v4894_v44  ;;  %v13218_v51 = vmin.f32 %v1456_v39, 6.0  ;;  %v1457_v36 = vmax.f32 %v1406_v5, 0.0 }
 0x45b   : > { %v6123_v27 = vadd.f32 %v5995_v59, %v5859_v31  ;;  %v3141_v55 = vadd.f32 %v3013_v8, %v15949_v12  ;;  %v15950_v14 = vrot.slane %v13126_v25, 7  ;;  %v4508_v9 = vmul.f32 %v15951_v17, %v13030_v58 }
 0x45c   : > { %v6124_v16 = vadd.f32 %v5996_v11, %v5860_v19  ;;  %v6125_v33 = vadd.f32 %v5997_v35, %v5861_v3  ;;  %v13229_v63 = vrot.slane %v13218_v51, 2  ;;  %v13232_v39 = vrot.slane %v13218_v51, 4 }
 0x45d   : > { %v4076_v15 = vsel %vm8176_vm10, %v4074_v42, %v15950_v14  ;;  %v6261_v62 = vadd.f32 %v15952_v20, %v6123_v27  ;;  %v13235_v12 = vrot.slane %v13218_v51, 6  ;;  %v4769_v25 = vmul.f32 %v15834_v32, %v13218_v51 }
 0x45e   : > { %15953 = vst [vmem:[#allocation111_spill] sm:$0xff] %v13229_v63  ;;  %v13241_v14 = vmul.f32 %v15936_v29, %v13218_v51  ;;  %v6262_v8 = vadd.f32 %v15914_v2, %v6124_v16  ;;  %v6263_v11 = vadd.f32 %v15854_v54, %v6125_v33  ;;  %v4770_v44 = vmul.f32 %v15835_v18, %v13229_v63 }
 0x45f   : > { %15954 = vst [vmem:[#allocation61_spill] sm:$0xff] %v13232_v39  ;;  %v6389_v5 = vmax.f32 %v6261_v62, 0.0  ;;  %v4897_v59 = vadd.f32 %v4769_v25, %v13074_v7  ;;  %v5062_v35 = vmul.f32 %v15897_v48, %v13229_v63  ;;  %v5063_v31 = vmul.f32 %v15843_v28, %v13232_v39 }
 0x460   : > { %15955 = vst [vmem:[#allocation91_spill] sm:$0xff] %v13235_v12  ;;  %v14839_v47 = vrot.slane %v13241_v14, 7  ;;  %v6390_v61 = vmax.f32 %v6262_v8, 0.0  ;;  %v6391_v42 = vmax.f32 %v6263_v11, 0.0  ;;  %v4898_v33 = vadd.f32 %v4770_v44, %v13084_v26 }
 0x461   : > { %v13253_v19 = vmin.f32 %v6389_v5, 6.0  ;;  %v5561_v27 = vrot.slane %v5062_v35, 7  ;;  %v5564_v16 = vrot.slane %v5063_v31, 7  ;;  %v13260_v7 = vmul.f32 %v15941_v57, %v13218_v51 }
 0x462   : > { %v5560_v3 = vrot.slane %v14839_v47, 2  ;;  %v13262_v62 = vmin.f32 %v6390_v61, 6.0  ;;  %v13264_v25 = vmin.f32 %v6391_v42, 6.0  ;;  %v6000_v8 = vmul.f32 %v15902_v43, %v13229_v63 }
 0x463   : > { %15956 = vst [vmem:[#allocation128_spill] sm:$0xff] %v13253_v19  ;;  %v6001_v11 = vmul.f32 %v15849_v52, %v13232_v39  ;;  %v5563_v5 = vrot.slane %v5561_v27, 2  ;;  %v13272_v44 = vmin.f32 %v1457_v36, 6.0  ;;  %v3405_v35 = vadd.f32 %v3277_v1, %v3141_v55 }
 0x464   : > { %15957 = vst [vmem:[#allocation133_spill] sm:$0xff] %v13260_v7  ;;  %v5562_v26 = vsel %vm8176_vm10, %v5560_v3, %v5561_v27  ;;  %v4771_v61 = vmul.f32 %v15833_v21, %v13232_v39  ;;  %v4772_v42 = vmul.f32 %v15836_v0, %v13235_v12  ;;  %v5064_v47 = vmul.f32 %v15873_v53, %v13235_v12 }
 0x465   : > { %15958 = vst [vmem:[#allocation136_spill] sm:$0xff] %v13262_v62  ;;  %v5864_v31 = vadd.f32 %v5562_v26, %v4897_v59  ;;  %v13283_v62 = vrot.slane %v13272_v44, 2  ;;  %v13286_v36 = vrot.slane %v13272_v44, 4  ;;  %v4372_v1 = vadd.f32 %v4076_v15, %v3405_v35 }
 0x466   : > { %15959 = vst [vmem:[#allocation137_spill] sm:$0xff] %v13264_v25  ;;  %v5565_v25 = vsel %vm8176_vm10, %v5563_v5, %v5564_v16  ;;  %v4773_v3 = vmul.f32 %v15834_v32, %v13272_v44  ;;  %v4899_v27 = vadd.f32 %v4771_v61, %v13088_v38  ;;  %v5065_v19 = vmul.f32 %v15936_v29, %v13272_v44 }
 0x467   : > { %15960 = vst [vmem:[#allocation117_spill] sm:$0xff] %v13272_v44  ;;  %v5865_v55 = vadd.f32 %v5565_v25, %v4898_v33  ;;  %v6128_v59 = vadd.f32 %v6000_v8, %v5864_v31  ;;  %v4636_v26 = vadd.f32 %v4508_v9, %v4372_v1  ;;  %v5066_v5 = vmul.f32 %v15897_v48, %v13283_v62  ;;  %v13302_v9 = vld [vmem:[%s14364_s6] ss:$0 sm:$0xff] }
 0x468   : > { %15961 = vst [vmem:[#allocation56_spill] sm:$0xff] %v13283_v62  ;;  %v5566_v53 = vrot.slane %v5564_v16, 2  ;;  %v4901_v15 = vadd.f32 %v4773_v3, %v13176_v50  ;;  %v5567_v33 = vrot.slane %v5064_v47, 7  ;;  %v5570_v8 = vrot.slane %v5065_v19, 7  ;;  %v6955_v47 = vpop.f32.mrf.mxu1 }
 0x469   : > { %15962 = vst [vmem:[#allocation103_spill] sm:$0xff] %v13286_v36  ;;  %v6129_v58 = vadd.f32 %v6001_v11, %v5865_v55  ;;  %v6266_v7 = vadd.f32 %v15914_v2, %v6128_v59  ;;  %v4900_v25 = vadd.f32 %v4772_v42, %v4636_v26  ;;  %v5573_v35 = vrot.slane %v5066_v5, 7  ;;  %v15982_v36 = vld [vmem:[#allocation5_spill] sm:$0xff] }
 0x46a   : > { %v6002_v38 = vmul.f32 %v15691_v46, %v13235_v12  ;;  %15963 = vst [vmem:[#allocation104_spill] sm:$0xff] %v13302_v9  ;;  %v5568_v31 = vsel %vm8176_vm10, %v5566_v53, %v5567_v33  ;;  %v5569_v50 = vrot.slane %v5567_v33, 2  ;;  %v5572_v19 = vrot.slane %v5570_v8, 2  ;;  %v7782_v53 = vld [vmem:[%s7976_s10 + $0xc] sm:$0xf] }
 0x46b   : > { %v6267_v16 = vadd.f32 %v15854_v54, %v6129_v58  ;;  %v6394_v11 = vmax.f32 %v6266_v7, 0.0  ;;  %v13307_v61 = vrot.slane %v5573_v35, 2  ;;  %v5866_v42 = vadd.f32 %v5568_v31, %v4899_v27  ;;  %v13322_v33 = vld [vmem:[%s7976_s10 + $0x10] sm:$0xf] }
 0x46c   : > { %v6003_v1 = vmul.f32 %v15941_v57, %v13272_v44  ;;  %v5571_v58 = vsel %vm8176_vm10, %v5569_v50, %v5570_v8  ;;  %v6004_v7 = vmul.f32 %v15902_v43, %v13283_v62  ;;  %v5574_v3 = vsel %vm8176_vm10, %v5572_v19, %v5573_v35  ;;  %v1408_v57 = vpop.f32.mrf.mxu2 }
 0x46d   : > { %15964 = vst [vmem:[#allocation131_spill] sm:$0xff] %v13307_v61  ;;  %v6395_v55 = vmax.f32 %v6267_v16, 0.0  ;;  %v13311_v59 = vmin.f32 %v6394_v11, 6.0  ;;  %v5867_v26 = vadd.f32 %v5571_v58, %v4900_v25  ;;  %v6130_v5 = vadd.f32 %v6002_v38, %v5866_v42 }
 0x46e   : > { %v6956_v27 = vadd.f32 %v13302_v9, %v6955_v47  ;;  %v5868_v11 = vadd.f32 %v5574_v3, %v4901_v15  ;;  %v7091_v50 = vshrl.u32 %v7782_v53, 16  ;;  %v7100_v35 = vshll.u32 %v13322_v33, 16  ;;  %v15968_v3 = vld [vmem:[#allocation105_spill] sm:$0xff] }
 0x46f   : > { %15965 = vst [vmem:[#allocation134_spill] sm:$0xff] %v13311_v59  ;;  %v13324_v16 = vmin.f32 %v6395_v55, 6.0  ;;  %v6131_v8 = vadd.f32 %v6003_v1, %v5867_v26  ;;  %v6268_v31 = vadd.f32 %v15851_v41, %v6130_v5  ;;  %v7094_v59 = vshll.u32 %v7782_v53, 16  ;;  %v15983_v41 = vld [vmem:[#allocation7_spill] sm:$0xff] }
 0x470   : > { %v6132_v61 = vadd.f32 %v6004_v7, %v5868_v11  ;;  %v1409_v38 = vadd.f32 %v13197_v56, %v1408_v57  ;;  %v7093_v42 = vrot.slane %v7091_v50, 4  ;;  %v13332_v58 = vrot.slane %v7100_v35, 5  ;;  %v15973_v11 = vld [vmem:[#allocation3_spill] sm:$0xff] }
 0x471   : > { %15966 = vst [vmem:[#allocation135_spill] sm:$0xff] %v13324_v16  ;;  %v6269_v47 = vadd.f32 %v15952_v20, %v6131_v8  ;;  %v6396_v19 = vmax.f32 %v6268_v31, 0.0  ;;  %v7096_v55 = vrot.slane %v7094_v59, 5  ;;  %v13335_v53 = vrot.slane %v15968_v3, 4  ;;  %v15974_v31 = vld [vmem:[#allocation108_spill] sm:$0xff] }
 0x472   : > { %v6270_v15 = vadd.f32 %v15914_v2, %v6132_v61  ;;  %15967 = vst [vmem:[#allocation140_spill] sm:$0xff] %v13332_v58  ;;  %v1458_v1 = vmax.f32 %v1409_v38, 0.0  ;;  %v13340_v57 = vrot.slane %v13115_v24, 6  ;;  %v15970_v59 = vmov 0 }
 0x473   : > { %v6397_v7 = vmax.f32 %v6269_v47, 0.0  ;;  %v13337_v26 = vmin.f32 %v6396_v19, 6.0  ;;  %v7097_v5 = vor.u32 %v7096_v55, %v7093_v42  ;;  %v15971_v59 = vsel %vm13344_vm15, 4294967295, %v15970_v59  ;;  %v15976_v47 = vld [vmem:[#allocation11_spill] sm:$0xff]  ;;  %v15977_v42 = vld [vmem:[#allocation13_spill] sm:$0xff] }
 0x474   : > { %v6398_v20 = vmax.f32 %v6270_v15, 0.0  ;;  %15972 = vst [vmem:[#allocation60_spill] sm:$0xff] %v15971_v59  ;;  %v13348_v61 = vmin.f32 %v1458_v1, 6.0  ;;  %v1909_v8 = vmul.f32 %v15973_v11, %v13335_v53  ;;  %v1910_v50 = vmul.f32 %v15923_v34, %v15974_v31 }
 0x475   : > { %15969 = vst [vmem:[#allocation150_spill] sm:$0xff] %v13337_v26  ;;  %v13354_v35 = vmin.f32 %v6397_v7, 6.0  ;;  %v7098_v38 = vrot.slane %v7097_v5, 4  ;;  %v1911_v19 = vmul.f32 %v15976_v47, %v13011_v40  ;;  %v1912_v55 = vmul.f32 %v15977_v42, %v13023_v23  ;;  %v15984_v47 = vld [vmem:[#allocation22_spill] sm:$0xff] }
 0x476   : > { %v13360_v15 = vmin.f32 %v6398_v20, 6.0  ;;  %v13364_v1 = vrot.slane %v13348_v61, 2  ;;  %v13367_v3 = vrot.slane %v13348_v61, 4  ;;  %v13370_v25 = vrot.slane %v13348_v61, 6  ;;  %v15980_v20 = vld [vmem:[#allocation2_spill] sm:$0xff] }
 0x477   : > { %15975 = vst [vmem:[#allocation75_spill] sm:$0xff] %v13354_v35  ;;  %v7103_v7 = vsel %vm13344_vm15, %v7098_v38, %v13332_v58  ;;  %v1917_v5 = vmul.f32 %v15973_v11, %v13340_v57  ;;  %v15981_v35 = vld [vmem:[#allocation4_spill] sm:$0xff]  ;;  %v2081_v62 = vmul.f32 %v15982_v36, %v13011_v40  ;;  %v2082_v42 = vmul.f32 %v15983_v41, %v13023_v23 }
 0x478   : > { %15978 = vst [vmem:[#allocation57_spill] sm:$0xff] %v13360_v15  ;;  %v2079_v15 = vmul.f32 %v15980_v20, %v13335_v53  ;;  %v2080_v26 = vmul.f32 %v15981_v35, %v15974_v31  ;;  %v7506_v16 = vunpack.c.l.bf16 %v7103_v7  ;;  %v13387_v34 = vmul.f32 %v15984_v47, %v13026_v6 }
 0x479   : > { %15979 = vst [vmem:[#allocation27_spill] sm:$0xff] %v13370_v25  ;;  %v2088_v38 = vmul.f32 %v15980_v20, %v13340_v57  ;;  %v2089_v7 = vmul.f32 %v15981_v35, %v13218_v51  ;;  %v2596_v41 = vrot.slane %v2081_v62, 7  ;;  %v2599_v44 = vrot.slane %v2082_v42, 7 }
 0x47a   : > { %v7732_v36 = vrot.slane %v2079_v15, 9  ;;  %v2593_v24 = vrot.slane %v2080_v26, 7  ;;  %v7538_v46 = vadd.f32 %v7506_v16, %v6956_v27  ;;  %v14861_v47 = vrot.slane %v13387_v34, 7 }
 0x47b   : > { %v7733_v56 = vrot.slane %v2088_v38, 9  ;;  %v2618_v54 = vrot.slane %v2089_v7, 7  ;;  %v2598_v2 = vrot.slane %v2596_v41, 2  ;;  %v2601_v20 = vrot.slane %v2599_v44, 2 }
 0x47c   : > { %v2594_v59 = vsel %vm8176_vm10, %v7732_v36, %v2593_v24  ;;  %v2595_v11 = vrot.slane %v2593_v24, 2  ;;  %7570 = vst.msk [vmem:[%s13392_s21] sm:$0xff] %vm1262_vm5, %v7538_v46  ;;  %v3017_v15 = vmul.f32 %v15946_v45, %v15974_v31  ;;  %v3018_v24 = vmul.f32 %v15925_v37, %v13011_v40  ;;  %v13423_v38 = vld.sshfl [vmem:[#allocation1] sm:$0xff pattern:$0x73625140] }
 0x47d   : > { %v2881_v58 = vadd.f32 %v2594_v59, %v1909_v8  ;;  %v2619_v27 = vsel %vm8176_vm10, %v7733_v56, %v2618_v54  ;;  %v13409_v16 = vrot.slane %v2618_v54, 2  ;;  %v2600_v46 = vsel %vm8176_vm10, %v2598_v2, %v2599_v44  ;;  %v15986_v54 = vld [vmem:[#allocation23_spill] sm:$0xff] }
 0x47e   : > { %v2597_v62 = vsel %vm8176_vm10, %v2595_v11, %v2596_v41  ;;  %v2603_v36 = vsel %vm8176_vm10, %v2601_v20, %v14861_v47  ;;  %v2889_v59 = vadd.f32 %v2619_v27, %v1917_v5  ;;  %v2883_v8 = vadd.f32 %v2600_v46, %v1911_v19  ;;  %v15985_v11 = vld [vmem:[#allocation15_spill] sm:$0xff] }
 0x47f   : > { %v2882_v26 = vadd.f32 %v2597_v62, %v1910_v50  ;;  %v2884_v41 = vadd.f32 %v2603_v36, %v1912_v55  ;;  %v3019_v56 = vmul.f32 %v15985_v11, %v13023_v23  ;;  %v3020_v42 = vmul.f32 %v15986_v54, %v13026_v6  ;;  %v15987_v50 = vld [vmem:[#allocation139_spill] sm:$0xff] }
 0x480   : > { %v3025_v2 = vmul.f32 %v15946_v45, %v13218_v51  ;;  %v3145_v40 = vadd.f32 %v3017_v15, %v2881_v58  ;;  %v3273_v7 = vmul.f32 %v15947_v49, %v13335_v53  ;;  %6770 = vst [vmem:[#allocation1] ss:$4 sm:$0xff] %v15987_v50  ;;  %v3281_v23 = vmul.f32 %v15947_v49, %v13340_v57  ;;  %v15988_v20 = vld [vmem:[#allocation147_spill] sm:$0xff] }
 0x481   : > { %v3146_v44 = vadd.f32 %v3018_v24, %v2882_v26  ;;  %v3147_v19 = vadd.f32 %v3019_v56, %v2883_v8  ;;  %v3148_v55 = vadd.f32 %v3020_v42, %v2884_v41  ;;  %v3282_v5 = vmul.f32 %v15905_v4, %v13218_v51  ;;  %6771 = vst [vmem:[#allocation1 + $0x1] ss:$4 sm:$0xff] %v15988_v20  ;;  %v15989_v24 = vld [vmem:[#allocation148_spill] sm:$0xff]  ;;  %v15990_v46 = vld [vmem:[#allocation67_spill] sm:$0xff]  ;;  %v15991_v41 = vld [vmem:[#allocation29_spill] sm:$0xff] }
 0x482   : > { %v3153_v62 = vadd.f32 %v3025_v2, %v2889_v59  ;;  %v3283_v58 = vmul.f32 %v15808_v30, %v13229_v63  ;;  %v3284_v15 = vmul.f32 %v15886_v60, %v13232_v39  ;;  %v3289_v27 = vmul.f32 %v15947_v49, %v13348_v61  ;;  %6772 = vst [vmem:[#allocation1 + $0x2] ss:$4 sm:$0xff] %v15989_v24  ;;  %v15992_v42 = vld [vmem:[#allocation151_spill] sm:$0xff] }
 0x483   : > { %v3401_v36 = vadd.f32 %v3273_v7, %v15990_v46  ;;  %v3409_v26 = vadd.f32 %v3281_v23, %v3145_v40  ;;  %v3410_v8 = vadd.f32 %v3282_v5, %v3146_v44  ;;  %v3565_v56 = vmul.f32 %v15991_v41, %v13335_v53  ;;  %6773 = vst [vmem:[#allocation1 + $0x3] ss:$4 sm:$0xff] %v15992_v42  ;;  %v15993_v40 = vld [vmem:[#allocation34_spill] sm:$0xff]  ;;  %v15994_v7 = vld [vmem:[#allocation37_spill] sm:$0xff] }
 0x484   : > { %v3411_v59 = vadd.f32 %v3283_v58, %v3147_v19  ;;  %v3412_v2 = vadd.f32 %v3284_v15, %v3148_v55  ;;  %v3417_v50 = vadd.f32 %v3289_v27, %v3153_v62  ;;  %v3574_v20 = vmul.f32 %v15991_v41, %v13340_v57  ;;  %v13458_v5 = vld.sshfl [vmem:[#allocation1 + $0x20] sm:$0xff pattern:$0x73625140]  ;;  %v15995_v15 = vld [vmem:[#allocation90_spill] sm:$0xff] }
 0x485   : > { %v3575_v47 = vmul.f32 %v15321_v22, %v13218_v51  ;;  %v3576_v24 = vmul.f32 %v15513_v10, %v13229_v63  ;;  %v3577_v44 = vmul.f32 %v15993_v40, %v13232_v39  ;;  %v13456_v23 = vmul.f32 %v15994_v7, %v13235_v12  ;;  %6794 = vst [vmem:[#allocation1 + $0x20] ss:$4 sm:$0xff] %v15995_v15  ;;  %v15996_v10 = vld [vmem:[#allocation120_spill] sm:$0xff]  ;;  %v15997_v7 = vld [vmem:[#allocation62_spill] sm:$0xff] }
 0x486   : > { %v3583_v19 = vmul.f32 %v15991_v41, %v13348_v61  ;;  %v3584_v55 = vmul.f32 %v15321_v22, %v13364_v1  ;;  %v7747_v62 = vrot.slane %v3565_v56, 9  ;;  %v7748_v58 = vrot.slane %v3574_v20, 9  ;;  %6795 = vst [vmem:[#allocation1 + $0x21] ss:$4 sm:$0xff] %v15996_v10  ;;  %v15999_v20 = vld [vmem:[#allocation88_spill] sm:$0xff]  ;;  %v16000_v40 = vld [vmem:[#allocation158_spill] sm:$0xff] }
 0x487   : > { %v4088_v27 = vrot.slane %v3575_v47, 7  ;;  %v4091_v46 = vrot.slane %v3576_v24, 7  ;;  %v4094_v42 = vrot.slane %v3577_v44, 7  ;;  %v15998_v30 = vrot.slane %v15997_v7, 7  ;;  %6796 = vst [vmem:[#allocation1 + $0x22] ss:$4 sm:$0xff] %v15999_v20 }
 0x488   : > { %v7749_v41 = vrot.slane %v3583_v19, 9  ;;  %v4113_v60 = vrot.slane %v3584_v55, 7  ;;  %v4504_v56 = vmul.f32 %v15951_v17, %v15974_v31  ;;  %6797 = vst [vmem:[#allocation1 + $0x23] ss:$4 sm:$0xff] %v16000_v40 }
 0x489   : > { %v4064_v4 = vsel %vm8176_vm10, %v7747_v62, %v15998_v30  ;;  %v4089_v47 = vsel %vm8176_vm10, %v7748_v58, %v4088_v27  ;;  %v4090_v24 = vrot.slane %v4088_v27, 2  ;;  %v4093_v44 = vrot.slane %v4091_v46, 2 }
 0x48a   : > { %v4096_v15 = vrot.slane %v4094_v42, 2  ;;  %v4114_v10 = vsel %vm8176_vm10, %v7749_v41, %v4113_v60  ;;  %v13479_v7 = vrot.slane %v4113_v60, 2  ;;  %v4368_v30 = vadd.f32 %v4064_v4, %v3401_v36  ;;  %v13481_v55 = vld.sshfl [vmem:[#allocation1] sm:$0xff pattern:$0x73625140]  ;;  %v16005_v41 = vld [vmem:[#allocation84_spill] sm:$0xff] }
 0x48b   : > { %v4376_v19 = vadd.f32 %v4089_v47, %v3409_v26  ;;  %16002 = vst [vmem:[#allocation144_spill] sm:$0xff] %v13481_v55  ;;  %v4092_v62 = vsel %vm8176_vm10, %v4090_v24, %v4091_v46  ;;  %v4095_v58 = vsel %vm8176_vm10, %v4093_v44, %v4094_v42  ;;  %v16003_v27 = vrot.slane %v13456_v23, 7  ;;  %v16006_v47 = vld [vmem:[#allocation106_spill] sm:$0xff] }
 0x48c   : > { %16001 = vst [vmem:[#allocation79_spill] sm:$0xff] %v13479_v7  ;;  %v13491_v20 = vadd.f32 %v4114_v10, %v3417_v50  ;;  %v4377_v60 = vadd.f32 %v4092_v62, %v3410_v8  ;;  %v4378_v4 = vadd.f32 %v4095_v58, %v3411_v59  ;;  %v4512_v26 = vmul.f32 %v15951_v17, %v13218_v51  ;;  %v16007_v46 = vld [vmem:[#allocation26_spill] sm:$0xff]  ;;  %v16013_v7 = vld [vmem:[#allocation12_spill] sm:$0xff] }
 0x48d   : > { %v4098_v40 = vsel %vm8176_vm10, %v4096_v15, %v16003_v27  ;;  %6780 = vst [vmem:[#allocation1] ss:$4 sm:$0xff] %v16005_v41  ;;  %v4513_v42 = vmul.f32 %v16007_v46, %v13229_v63  ;;  %v16008_v24 = vld [vmem:[#allocation38_spill] sm:$0xff]  ;;  %v16009_v15 = vld [vmem:[#allocation39_spill] sm:$0xff]  ;;  %v4632_v10 = vadd.f32 %v4504_v56, %v4368_v30  ;;  %v4760_v59 = vmul.f32 %v15836_v0, %v13335_v53 }
 0x48e   : > { %16004 = vst [vmem:[#allocation71_spill] sm:$0xff] %v13491_v20  ;;  %v4379_v36 = vadd.f32 %v4098_v40, %v3412_v2  ;;  %v4514_v44 = vmul.f32 %v16008_v24, %v13232_v39  ;;  %v4515_v50 = vmul.f32 %v16009_v15, %v13235_v12  ;;  %v16010_v27 = vld [vmem:[#allocation78_spill] sm:$0xff]  ;;  %v4640_v8 = vadd.f32 %v4512_v26, %v4376_v19  ;;  %v16012_v26 = vld [vmem:[#allocation72_spill] sm:$0xff] }
 0x48f   : > { %6781 = vst [vmem:[#allocation1 + $0x1] ss:$4 sm:$0xff] %v16006_v47  ;;  %v4768_v2 = vmul.f32 %v15836_v0, %v13340_v57  ;;  %v4776_v62 = vmul.f32 %v15836_v0, %v13348_v61  ;;  %v16011_v58 = vld [vmem:[#allocation82_spill] sm:$0xff]  ;;  %v4641_v40 = vadd.f32 %v4513_v42, %v4377_v60  ;;  %v4777_v56 = vmul.f32 %v15834_v32, %v13364_v1 }
 0x490   : > { %6782 = vst [vmem:[#allocation1 + $0x2] ss:$4 sm:$0xff] %v16010_v27  ;;  %v4642_v41 = vadd.f32 %v4514_v44, %v4378_v4  ;;  %v4643_v47 = vadd.f32 %v4515_v50, %v4379_v36  ;;  %v4778_v30 = vmul.f32 %v15835_v18, %v13367_v3  ;;  %v4779_v19 = vmul.f32 %v15833_v21, %v13370_v25 }
 0x491   : > { %6783 = vst [vmem:[#allocation1 + $0x3] ss:$4 sm:$0xff] %v16011_v58  ;;  %v4888_v27 = vadd.f32 %v4760_v59, %v16012_v26  ;;  %v4896_v39 = vadd.f32 %v4768_v2, %v4632_v10  ;;  %v4904_v55 = vadd.f32 %v4776_v62, %v4640_v8  ;;  %v4905_v20 = vadd.f32 %v4777_v56, %v4641_v40  ;;  %v16015_v40 = vld [vmem:[#allocation59_spill] sm:$0xff] }
 0x492   : > { %v5051_v58 = vmul.f32 %v16013_v7, %v13335_v53  ;;  %v5060_v60 = vmul.f32 %v16013_v7, %v13340_v57  ;;  %v4906_v4 = vadd.f32 %v4778_v30, %v4642_v41  ;;  %v13522_v36 = vadd.f32 %v4779_v19, %v4643_v47  ;;  %v13535_v57 = vld [vmem:[%s14361_s3 + $0x8] ss:$0 sm:$0xff] }
 0x493   : > { %v5069_v42 = vmul.f32 %v16013_v7, %v13348_v61  ;;  %v5070_v44 = vmul.f32 %v15936_v29, %v13364_v1  ;;  %v5071_v50 = vmul.f32 %v15897_v48, %v13367_v3  ;;  %v5072_v10 = vmul.f32 %v15843_v28, %v13370_v25  ;;  %16014 = vst [vmem:[#allocation125_spill] sm:$0xff] %v13535_v57  ;;  %v6957_v7 = vpop.f32.mrf.mxu1 }
 0x494   : > { %v7762_v8 = vrot.slane %v5051_v58, 9  ;;  %v7763_v53 = vrot.slane %v5060_v60, 9  ;;  %v5991_v61 = vmul.f32 %v13535_v57, %v15974_v31  ;;  %v6007_v62 = vmul.f32 %v13535_v57, %v13364_v1 }
 0x495   : > { %v7764_v59 = vrot.slane %v5069_v42, 9  ;;  %v5583_v2 = vrot.slane %v5070_v44, 7  ;;  %v16016_v41 = vrot.slane %v16015_v40, 7  ;;  %v16017_v56 = vrot.slane %v13241_v14, 7  ;;  %v16018_v40 = vld [vmem:[#allocation155_spill] sm:$0xff] }
 0x496   : > { %v5586_v19 = vrot.slane %v5071_v50, 7  ;;  %v5589_v26 = vrot.slane %v5072_v10, 7  ;;  %v16019_v50 = vld [vmem:[#allocation156_spill] sm:$0xff] }
 0x497   : > { %v5534_v47 = vsel %vm8176_vm10, %v7762_v8, %v16016_v41  ;;  %v5559_v30 = vsel %vm8176_vm10, %v7763_v53, %v16017_v56  ;;  %v5584_v31 = vsel %vm8176_vm10, %v7764_v59, %v5583_v2  ;;  %v5585_v60 = vrot.slane %v5583_v2, 2  ;;  %v7784_v41 = vld [vmem:[%s7976_s10 + $0x14] sm:$0x1] }
 0x498   : > { %v6788_v58 = vld.sshfl [vmem:[#allocation1] sm:$0xff pattern:$0x73625140]  ;;  %v5855_v42 = vadd.f32 %v5534_v47, %v4888_v27  ;;  %v5863_v44 = vadd.f32 %v5559_v30, %v4896_v39  ;;  %v5588_v48 = vrot.slane %v5586_v19, 2  ;;  %v13552_v8 = vrot.slane %v5589_v26, 2  ;;  %v16021_v47 = vld [vmem:[#allocation58_spill] sm:$0xff] }
 0x499   : > { %6790 = vst [vmem:[#allocation1] ss:$4 sm:$0xff] %v16018_v40  ;;  %v5871_v14 = vadd.f32 %v5584_v31, %v4904_v55  ;;  %v6008_v53 = vmul.f32 %v15902_v43, %v13367_v3  ;;  %v5587_v10 = vsel %vm8176_vm10, %v5585_v60, %v5586_v19  ;;  %v6009_v59 = vmul.f32 %v15849_v52, %v13370_v25  ;;  %v16020_v39 = vld [vmem:[#allocation133_spill] sm:$0xff] }
 0x49a   : > { %6791 = vst [vmem:[#allocation1 + $0x1] ss:$4 sm:$0xff] %v16019_v50  ;;  %v6119_v27 = vadd.f32 %v5991_v61, %v5855_v42  ;;  %v6127_v2 = vadd.f32 %v16020_v39, %v5863_v44  ;;  %v5590_v55 = vsel %vm8176_vm10, %v5588_v48, %v5589_v26  ;;  %v5872_v56 = vadd.f32 %v5587_v10, %v4905_v20  ;;  %v16022_v40 = vld [vmem:[#allocation81_spill] sm:$0xff]  ;;  %v16026_v39 = vld [vmem:[#allocation140_spill] sm:$0xff] }
 0x49b   : > { %6792 = vst [vmem:[#allocation1 + $0x2] ss:$4 sm:$0xff] %v16021_v47  ;;  %v6135_v30 = vadd.f32 %v6007_v62, %v5871_v14  ;;  %v6958_v31 = vadd.f32 %v13302_v9, %v6957_v7  ;;  %v5873_v50 = vadd.f32 %v5590_v55, %v4906_v4  ;;  %v13571_v19 = vld [vmem:[%s14362_s4] ss:$0 sm:$0xff]  ;;  %v16024_v42 = vshrl.u32 %v13322_v33, 16  ;;  %v16025_v7 = vld [vmem:[#allocation126_spill] sm:$0xff]  ;;  %v1410_v55 = vpop.f32.mrf.mxu2 }
 0x49c   : > { %6793 = vst [vmem:[#allocation1 + $0x3] ss:$4 sm:$0xff] %v16022_v40  ;;  %v6257_v61 = vadd.f32 %v13571_v19, %v6119_v27  ;;  %v6265_v60 = vadd.f32 %v13571_v19, %v6127_v2  ;;  %v6136_v48 = vadd.f32 %v6008_v53, %v5872_v56  ;;  %v7110_v62 = vshll.u32 %v7784_v41, 16  ;;  %v16027_v40 = vld [vmem:[#allocation54_spill] sm:$0xff]  ;;  %v16028_v53 = vld [vmem:[#allocation55_spill] sm:$0xff] }
 0x49d   : > { %16023 = vst [vmem:[#allocation121_spill] sm:$0xff] %v13571_v19  ;;  %v7106_v44 = vrot.slane %v16024_v42, 4  ;;  %v6273_v20 = vadd.f32 %v13571_v19, %v6135_v30  ;;  %v6880_v26 = vpack.c.bf16 %v16025_v7, %v13423_v38  ;;  %v6137_v4 = vadd.f32 %v6009_v59, %v5873_v50  ;;  %v16032_v42 = vld [vmem:[#allocation3_spill] sm:$0xff] }
 0x49e   : > { %v6385_v14 = vmax.f32 %v6257_v61, 0.0  ;;  %v6393_v10 = vmax.f32 %v6265_v60, 0.0  ;;  %v6274_v27 = vadd.f32 %v16027_v40, %v6136_v48  ;;  %v7112_v2 = vrot.slane %v7110_v62, 5  ;;  %v16031_v61 = vld [vmem:[#allocation83_spill] sm:$0xff] }
 0x49f   : > { %v7107_v47 = vor.u32 %v7106_v44, %v16026_v39  ;;  %v6401_v25 = vmax.f32 %v6273_v20, 0.0  ;;  %7774 = vmatmul.msk.bf16.gmra.mxu1 %vm6893_vm12, %v6880_v26  ;;  %v6882_v33 = vpack.c.bf16 %v13458_v5, %v6788_v58  ;;  %v6275_v56 = vadd.f32 %v16028_v53, %v6137_v4  ;;  %v16034_v58 = vld [vmem:[#allocation63_spill] sm:$0xff] }
 0x4a0   : > { %v13585_v41 = vmin.f32 %v6385_v14, 6.0  ;;  %v13587_v30 = vmin.f32 %v6393_v10, 6.0  ;;  %v6402_v59 = vmax.f32 %v6274_v27, 0.0  ;;  %v1411_v60 = vadd.f32 %v16031_v61, %v1410_v55  ;;  %v16038_v27 = vld [vmem:[#allocation117_spill] sm:$0xff] }
 0x4a1   : > { %v7108_v38 = vrot.slane %v7107_v47, 4  ;;  %v13589_v50 = vmin.f32 %v6401_v25, 6.0  ;;  %7776 = vmatmul.msk.bf16.vlgmr.msrb.gmra.mxu3 %vm6893_vm12, %v6882_v33  ;;  %v1913_v44 = vmul.f32 %v16032_v42, %v13026_v6  ;;  %v6403_v48 = vmax.f32 %v6275_v56, 0.0  ;;  %v6960_v6 = vpop.f32.mrf.mxu1 }
 0x4a2   : > { %16029 = vst [vmem:[#allocation73_spill] sm:$0xff] %v13587_v30  ;;  %v2084_v62 = vmul.f32 %v15981_v35, %v16034_v58  ;;  %v16035_v7 = vrot.slane %v13387_v34, 7  ;;  %v13601_v4 = vmin.f32 %v6402_v59, 6.0  ;;  %v1459_v14 = vmax.f32 %v1411_v60, 0.0 }
 0x4a3   : > { %16030 = vst [vmem:[#allocation124_spill] sm:$0xff] %v13589_v50  ;;  %v7113_v5 = vsel %vm13344_vm15, %v7108_v38, %v7112_v2  ;;  %v3021_v10 = vmul.f32 %v15946_v45, %v16034_v58  ;;  %v13605_v39 = vmin.f32 %v6403_v48, 6.0  ;;  %v3285_v55 = vmul.f32 %v15947_v49, %v13235_v12 }
 0x4a4   : > { %v2604_v26 = vrot.slane %v16035_v7, 2  ;;  %16036 = vst [vmem:[#allocation123_spill] sm:$0xff] %v13601_v4  ;;  %v7507_v25 = vunpack.c.l.bf16 %v7113_v5  ;;  %v2605_v47 = vrot.slane %v2084_v62, 7  ;;  %v3579_v34 = vmul.f32 %v15321_v22, %v16038_v27  ;;  %v7785_v7 = vld [vmem:[%s7976_s10 + $0x18] sm:$0xf] }
 0x4a5   : > { %16037 = vst [vmem:[#allocation93_spill] sm:$0xff] %v13605_v39  ;;  %v13611_v33 = vmin.f32 %v1459_v14, 6.0  ;;  %v16040_v56 = vrot.slane %v13456_v23, 7  ;;  %v4516_v59 = vmul.f32 %v15951_v17, %v16038_v27  ;;  %v13622_v62 = vadd.f32 %v13302_v9, %v6960_v6  ;;  %v1413_v39 = vpop.f32.mrf.mxu2 }
 0x4a6   : > { %v7539_v2 = vadd.f32 %v7507_v25, %v6958_v31  ;;  %v2606_v60 = vsel %vm8176_vm10, %v2604_v26, %v2605_v47  ;;  %v13619_v48 = vrot.slane %v2605_v47, 2  ;;  %v4100_v5 = vrot.slane %v3579_v34, 7  ;;  %v13637_v26 = vld [vmem:[%s7976_s10 + $0x1c] sm:$0xf] }
 0x4a7   : > { %16039 = vst [vmem:[#allocation145_spill] sm:$0xff] %v13611_v33  ;;  %v4099_v38 = vrot.slane %v16040_v56, 2  ;;  %v13628_v31 = vrot.slane %v13611_v33, 2  ;;  %v13631_v23 = vrot.slane %v13611_v33, 4  ;;  %v13634_v25 = vrot.slane %v13611_v33, 6 }
 0x4a8   : > { %7571 = vst.msk [vmem:[%s13392_s21 + $0x8] sm:$0xff] %vm1262_vm5, %v7539_v2  ;;  %v2885_v14 = vadd.f32 %v2606_v60, %v1913_v44  ;;  %v13641_v6 = vrot.slane %v4100_v5, 2  ;;  %v4780_v34 = vmul.f32 %v15836_v0, %v13611_v33  ;;  %v16042_v2 = vld [vmem:[#allocation51_spill] sm:$0xff]  ;;  %v16043_v44 = vld [vmem:[#allocation53_spill] sm:$0xff]  ;;  %v7118_v49 = vshll.u32 %v7785_v7, 16 }
 0x4a9   : > { %16041 = vst [vmem:[#allocation92_spill] sm:$0xff] %v13637_v26  ;;  %v4101_v47 = vsel %vm8176_vm10, %v4099_v38, %v4100_v5  ;;  %v5073_v56 = vmul.f32 %v16042_v2, %v13611_v33  ;;  %v5074_v4 = vmul.f32 %v15936_v29, %v13628_v31  ;;  %v6010_v60 = vmul.f32 %v16043_v44, %v13611_v33 }
 0x4aa   : > { %v3149_v22 = vadd.f32 %v3021_v10, %v2885_v14  ;;  %v6011_v50 = vmul.f32 %v13535_v57, %v13628_v31  ;;  %v7115_v5 = vshrl.u32 %v7785_v7, 16  ;;  %v7124_v45 = vshll.u32 %v13637_v26, 16 }
 0x4ab   : > { %v5592_v38 = vrot.slane %v5073_v56, 7  ;;  %v5595_v42 = vrot.slane %v5074_v4, 7  ;;  %v1414_v10 = vadd.f32 %v16031_v61, %v1413_v39  ;;  %v7120_v30 = vrot.slane %v7118_v49, 5  ;;  %v16045_v61 = vld [vmem:[#allocation159_spill] sm:$0xff]  ;;  %v16046_v49 = vld [vmem:[#allocation10_spill] sm:$0xff] }
 0x4ac   : > { %v3413_v35 = vadd.f32 %v3285_v55, %v3149_v22  ;;  %v7117_v33 = vrot.slane %v7115_v5, 4  ;;  %v13662_v56 = vrot.slane %v7124_v45, 5  ;;  %v13667_v39 = vrot.slane %v16045_v61, 4  ;;  %v16047_v45 = vld [vmem:[#allocation11_spill] sm:$0xff] }
 0x4ad   : > { %v5593_v14 = vsel %vm8176_vm10, %v13552_v8, %v5592_v38  ;;  %v5594_v12 = vrot.slane %v5592_v38, 2  ;;  %v13659_v9 = vrot.slane %v5595_v42, 2  ;;  %v1460_v55 = vmax.f32 %v1414_v10, 0.0  ;;  %v16050_v10 = vld [vmem:[#allocation41_spill] sm:$0xff] }
 0x4ae   : > { %v4380_v40 = vadd.f32 %v4101_v47, %v3413_v35  ;;  %v5874_v7 = vadd.f32 %v5593_v14, %v13522_v36  ;;  %16044 = vst [vmem:[#allocation96_spill] sm:$0xff] %v13662_v56  ;;  %v7121_v4 = vor.u32 %v7120_v30, %v7117_v33  ;;  %v13670_v38 = vrot.slane %v16038_v27, 6  ;;  %v16049_v30 = vld [vmem:[#allocation13_spill] sm:$0xff] }
 0x4af   : > { %v5596_v22 = vsel %vm8176_vm10, %v5594_v12, %v5595_v42  ;;  %v1914_v35 = vmul.f32 %v16046_v49, %v16034_v58  ;;  %v13674_v36 = vmin.f32 %v1460_v55, 6.0  ;;  %v1915_v5 = vmul.f32 %v16047_v45, %v16045_v61  ;;  %v16048_v12 = vld [vmem:[#allocation45_spill] sm:$0xff] }
 0x4b0   : > { %v4644_v2 = vadd.f32 %v4516_v59, %v4380_v40  ;;  %v6138_v8 = vadd.f32 %v6010_v60, %v5874_v7  ;;  %v7122_v47 = vrot.slane %v7121_v4, 4  ;;  %v1916_v42 = vmul.f32 %v16049_v30, %v16048_v12  ;;  %v16051_v59 = vld [vmem:[#allocation5_spill] sm:$0xff] }
 0x4b1   : > { %v1918_v40 = vmul.f32 %v16046_v49, %v13218_v51  ;;  %v2085_v60 = vmul.f32 %v16051_v59, %v16045_v61  ;;  %v13690_v4 = vrot.slane %v13674_v36, 4  ;;  %v13693_v55 = vrot.slane %v13674_v36, 6  ;;  %v16052_v51 = vld [vmem:[#allocation7_spill] sm:$0xff]  ;;  %v16053_v30 = vld [vmem:[#allocation21_spill] sm:$0xff] }
 0x4b2   : > { %v4908_v33 = vadd.f32 %v4780_v34, %v4644_v2  ;;  %v6276_v14 = vadd.f32 %v16050_v10, %v6138_v8  ;;  %v7127_v58 = vsel %vm13344_vm15, %v7122_v47, %v13662_v56  ;;  %v2086_v49 = vmul.f32 %v16052_v51, %v16048_v12 }
 0x4b3   : > { %v7508_v8 = vunpack.c.l.bf16 %v7127_v58  ;;  %v2087_v45 = vmul.f32 %v16053_v30, %v13667_v39  ;;  %v13701_v47 = vmul.f32 %v16051_v59, %v13229_v63  ;;  %v2608_v7 = vrot.slane %v2085_v60, 7 }
 0x4b4   : > { %v5875_v34 = vadd.f32 %v5596_v22, %v4908_v33  ;;  %v6404_v2 = vmax.f32 %v6276_v14, 0.0  ;;  %v3022_v20 = vmul.f32 %v15925_v37, %v16045_v61  ;;  %v2611_v33 = vrot.slane %v2086_v49, 7 }
 0x4b5   : > { %16054 = vst [vmem:[#allocation113_spill] sm:$0xff] %v13701_v47  ;;  %v7540_v22 = vadd.f32 %v7508_v8, %v13622_v62  ;;  %v2609_v14 = vsel %vm8176_vm10, %v13619_v48, %v2608_v7  ;;  %v2610_v58 = vrot.slane %v2608_v7, 2  ;;  %v2614_v30 = vrot.slane %v2087_v45, 7 }
 0x4b6   : > { %v6139_v56 = vadd.f32 %v6011_v50, %v5875_v34  ;;  %v13705_v26 = vmin.f32 %v6404_v2, 6.0  ;;  %v14886_v51 = vrot.slane %v13701_v47, 7  ;;  %v2613_v60 = vrot.slane %v2611_v33, 2  ;;  %v16059_v47 = vld [vmem:[#allocation56_spill] sm:$0xff] }
 0x4b7   : > { %7572 = vst.msk [vmem:[%s13392_s21 + $0x10] sm:$0xff] %vm1262_vm5, %v7540_v22  ;;  %v2886_v61 = vadd.f32 %v2609_v14, %v1914_v35  ;;  %v3023_v50 = vmul.f32 %v15985_v11, %v16048_v12  ;;  %v2612_v62 = vsel %vm8176_vm10, %v2610_v58, %v2611_v33  ;;  %v3024_v49 = vmul.f32 %v15986_v54, %v13667_v39  ;;  %v16056_v22 = vld [vmem:[#allocation35_spill] sm:$0xff]  ;;  %v16057_v14 = vld [vmem:[#allocation24_spill] sm:$0xff] }
 0x4b8   : > { %16055 = vst [vmem:[#allocation44_spill] sm:$0xff] %v13705_v26  ;;  %v6277_v59 = vadd.f32 %v13571_v19, %v6139_v56  ;;  %v2622_v48 = vsel %vm8176_vm10, %v13409_v16, %v14886_v51  ;;  %v3026_v56 = vmul.f32 %v15925_v37, %v13229_v63  ;;  %v2615_v35 = vsel %vm8176_vm10, %v2613_v60, %v2614_v30  ;;  %v16060_v37 = vld [vmem:[#allocation25_spill] sm:$0xff]  ;;  %v16061_v54 = vld [vmem:[#allocation103_spill] sm:$0xff] }
 0x4b9   : > { %v2887_v7 = vadd.f32 %v2612_v62, %v1915_v5  ;;  %v2890_v34 = vadd.f32 %v2622_v48, %v1918_v40  ;;  %v2888_v2 = vadd.f32 %v2615_v35, %v1916_v42  ;;  %v3150_v8 = vadd.f32 %v3022_v20, %v2886_v61  ;;  %v16062_v30 = vld [vmem:[#allocation115_spill] sm:$0xff]  ;;  %v16063_v61 = vld [vmem:[#allocation32_spill] sm:$0xff] }
 0x4ba   : > { %v6405_v45 = vmax.f32 %v6277_v59, 0.0  ;;  %v3280_v33 = vmul.f32 %v16056_v22, %v16048_v12  ;;  %v3286_v16 = vmul.f32 %v16057_v14, %v16038_v27  ;;  %v3287_v59 = vmul.f32 %v16060_v37, %v16059_v47 }
 0x4bb   : > { %v3151_v51 = vadd.f32 %v3023_v50, %v2887_v7  ;;  %v3154_v26 = vadd.f32 %v3026_v56, %v2890_v34  ;;  %v3152_v63 = vadd.f32 %v3024_v49, %v2888_v2  ;;  %v3288_v5 = vmul.f32 %v16056_v22, %v16061_v54  ;;  %v16064_v50 = vld [vmem:[#allocation31_spill] sm:$0xff]  ;;  %v16065_v49 = vld [vmem:[#allocation34_spill] sm:$0xff] }
 0x4bc   : > { %v13734_v58 = vmin.f32 %v6405_v45, 6.0  ;;  %v3290_v20 = vmul.f32 %v16057_v14, %v13364_v1  ;;  %v3408_v42 = vadd.f32 %v3280_v33, %v16062_v30  ;;  %v3414_v40 = vadd.f32 %v3286_v16, %v3150_v8  ;;  %v16068_v14 = vld [vmem:[#allocation79_spill] sm:$0xff] }
 0x4bd   : > { %v3415_v60 = vadd.f32 %v3287_v59, %v3151_v51  ;;  %v3573_v62 = vmul.f32 %v16063_v61, %v13667_v39  ;;  %v3580_v48 = vmul.f32 %v16064_v50, %v16059_v47  ;;  %v3416_v56 = vadd.f32 %v3288_v5, %v3152_v63  ;;  %v16067_v59 = vld [vmem:[#allocation107_spill] sm:$0xff] }
 0x4be   : > { %16058 = vst [vmem:[#allocation152_spill] sm:$0xff] %v13734_v58  ;;  %v3418_v45 = vadd.f32 %v3290_v20, %v3154_v26  ;;  %v3581_v35 = vmul.f32 %v16065_v49, %v16061_v54  ;;  %v3582_v7 = vmul.f32 %v16063_v61, %v13670_v38  ;;  %v13753_v34 = vmul.f32 %v16064_v50, %v13367_v3 }
 0x4bf   : > { %v4084_v2 = vrot.slane %v3573_v62, 7  ;;  %v4103_v51 = vrot.slane %v3580_v48, 7  ;;  %v4511_v8 = vmul.f32 %v16009_v15, %v13667_v39  ;;  %v4517_v63 = vmul.f32 %v16007_v46, %v16059_v47 }
 0x4c0   : > { %16066 = vst [vmem:[#allocation153_spill] sm:$0xff] %v13753_v34  ;;  %v4106_v33 = vrot.slane %v3581_v35, 7  ;;  %v4109_v16 = vrot.slane %v3582_v7, 7  ;;  %v4518_v26 = vmul.f32 %v16008_v24, %v16061_v54  ;;  %v14895_v62 = vrot.slane %v13753_v34, 7 }
 0x4c1   : > { %v4085_v5 = vsel %vm8176_vm10, %v16067_v59, %v4084_v2  ;;  %v4104_v20 = vsel %vm8176_vm10, %v13641_v6, %v4103_v51  ;;  %v4105_v30 = vrot.slane %v4103_v51, 2  ;;  %v4519_v58 = vmul.f32 %v16009_v15, %v13670_v38 }
 0x4c2   : > { %v4108_v48 = vrot.slane %v4106_v33, 2  ;;  %v4375_v35 = vadd.f32 %v4085_v5, %v3408_v42  ;;  %v4381_v7 = vadd.f32 %v4104_v20, %v3414_v40  ;;  %v4117_v2 = vsel %vm8176_vm10, %v16068_v14, %v14895_v62 }
 0x4c3   : > { %v4107_v24 = vsel %vm8176_vm10, %v4105_v30, %v4106_v33  ;;  %v4520_v6 = vmul.f32 %v15951_v17, %v13364_v1  ;;  %v4521_v51 = vmul.f32 %v16007_v46, %v13367_v3  ;;  %v4385_v59 = vadd.f32 %v4117_v2, %v3418_v45  ;;  %v16069_v30 = vld [vmem:[#allocation71_spill] sm:$0xff]  ;;  %v13790_v17 = vpop.f32.mrf.mxu3 }
 0x4c4   : > { %v4110_v42 = vsel %vm8176_vm10, %v4108_v48, %v4109_v16  ;;  %v4382_v40 = vadd.f32 %v4107_v24, %v3415_v60  ;;  %v4639_v5 = vadd.f32 %v4511_v8, %v4375_v35  ;;  %v4645_v33 = vadd.f32 %v4517_v63, %v4381_v7  ;;  %v16071_v63 = vld [vmem:[#allocation97_spill] sm:$0xff]  ;;  %v16072_v48 = vld [vmem:[#allocation110_spill] sm:$0xff] }
 0x4c5   : > { %v4383_v20 = vadd.f32 %v4110_v42, %v3416_v56  ;;  %v4648_v34 = vadd.f32 %v4520_v6, %v16069_v30  ;;  %v4767_v27 = vmul.f32 %v15833_v21, %v16048_v12  ;;  %v4649_v62 = vadd.f32 %v4521_v51, %v4385_v59 }
 0x4c6   : > { %v4646_v14 = vadd.f32 %v4518_v26, %v4382_v40  ;;  %v4774_v1 = vmul.f32 %v15835_v18, %v16059_v47  ;;  %v4775_v46 = vmul.f32 %v15833_v21, %v16061_v54  ;;  %v4781_v60 = vmul.f32 %v15834_v32, %v13628_v31  ;;  %v16074_v40 = vld [vmem:[#allocation17_spill] sm:$0xff] }
 0x4c7   : > { %v4647_v24 = vadd.f32 %v4519_v58, %v4383_v20  ;;  %v4782_v56 = vmul.f32 %v15835_v18, %v13631_v23  ;;  %v4783_v12 = vmul.f32 %v15833_v21, %v13634_v25  ;;  %v16070_v45 = vrot.slane %v13674_v36, 2 }
 0x4c8   : > { %v4785_v16 = vmul.f32 %v15834_v32, %v13690_v4  ;;  %v4895_v26 = vadd.f32 %v4767_v27, %v16071_v63  ;;  %v4902_v58 = vadd.f32 %v4774_v1, %v16072_v48  ;;  %v4903_v35 = vadd.f32 %v4775_v46, %v4639_v5  ;;  %v16075_v27 = vld [vmem:[#allocation19_spill] sm:$0xff]  ;;  %v16077_v5 = vld [vmem:[#allocation12_spill] sm:$0xff] }
 0x4c9   : > { %v4784_v8 = vmul.f32 %v15836_v0, %v16070_v45  ;;  %v4909_v7 = vadd.f32 %v4781_v60, %v4645_v33  ;;  %v4910_v2 = vadd.f32 %v4782_v56, %v4646_v14  ;;  %v4911_v6 = vadd.f32 %v4783_v12, %v4647_v24 }
 0x4ca   : > { %v13805_v42 = vadd.f32 %v4785_v16, %v4649_v62  ;;  %v5059_v59 = vmul.f32 %v16074_v40, %v13667_v39  ;;  %v5067_v20 = vmul.f32 %v15843_v28, %v16061_v54  ;;  %v5068_v30 = vmul.f32 %v16074_v40, %v13670_v38  ;;  %v16078_v16 = vld [vmem:[#allocation86_spill] sm:$0xff] }
 0x4cb   : > { %v4912_v51 = vadd.f32 %v4784_v8, %v4648_v34  ;;  %v5075_v45 = vmul.f32 %v16075_v27, %v13631_v23  ;;  %v5076_v46 = vmul.f32 %v15843_v28, %v13634_v25  ;;  %v5077_v34 = vmul.f32 %v16074_v40, %v13674_v36 }
 0x4cc   : > { %16073 = vst [vmem:[#allocation154_spill] sm:$0xff] %v13805_v42  ;;  %v16076_v62 = vrot.slane %v13674_v36, 2  ;;  %v5079_v14 = vmul.f32 %v15936_v29, %v13690_v4  ;;  %v13826_v1 = vmul.f32 %v16075_v27, %v13693_v55  ;;  %v5554_v24 = vrot.slane %v5059_v59, 7 }
 0x4cd   : > { %v5576_v60 = vrot.slane %v5067_v20, 7  ;;  %v5579_v56 = vrot.slane %v5068_v30, 7  ;;  %v5598_v12 = vrot.slane %v5075_v45, 7  ;;  %v5601_v8 = vrot.slane %v5076_v46, 7 }
 0x4ce   : > { %v5078_v33 = vmul.f32 %v16077_v5, %v16076_v62  ;;  %v5555_v63 = vsel %vm8176_vm10, %v16078_v16, %v5554_v24  ;;  %v5604_v48 = vrot.slane %v5077_v34, 7  ;;  %v5608_v32 = vrot.slane %v5079_v14, 7  ;;  %v1420_v62 = vpop.f32.mrf.mxu3  ;;  %v16079_v5 = vld [vmem:[#allocation131_spill] sm:$0xff] }
 0x4cf   : > { %v5577_v29 = vsel %vm8176_vm10, %v16079_v5, %v5576_v60  ;;  %v5578_v0 = vrot.slane %v5576_v60, 2  ;;  %v5599_v59 = vsel %vm8176_vm10, %v13659_v9, %v5598_v12  ;;  %v5600_v20 = vrot.slane %v5598_v12, 2 }
 0x4d0   : > { %v7765_v42 = vrot.slane %v5078_v33, 9  ;;  %v5603_v30 = vrot.slane %v5601_v8, 2  ;;  %v13839_v46 = vrot.slane %v5608_v32, 2  ;;  %v5862_v34 = vadd.f32 %v5555_v63, %v4895_v26 }
 0x4d1   : > { %v5580_v33 = vsel %vm8176_vm10, %v5578_v0, %v5579_v56  ;;  %v5602_v14 = vsel %vm8176_vm10, %v5600_v20, %v5601_v8  ;;  %v5869_v24 = vadd.f32 %v5577_v29, %v4902_v58  ;;  %v5876_v60 = vadd.f32 %v5599_v59, %v4909_v7  ;;  %v16082_v20 = vld [vmem:[#allocation99_spill] sm:$0xff] }
 0x4d2   : > { %v5609_v45 = vsel %vm8176_vm10, %v7765_v42, %v5608_v32  ;;  %16080 = vst [vmem:[#allocation100_spill] sm:$0xff] %v13839_v46  ;;  %v5605_v16 = vsel %vm8176_vm10, %v5603_v30, %v5604_v48  ;;  %v5870_v9 = vadd.f32 %v5580_v33, %v4903_v35  ;;  %v5877_v12 = vadd.f32 %v5602_v14, %v4910_v2  ;;  %v6962_v2 = vpop.f32.mrf.mxu1  ;;  %v16083_v33 = vld [vmem:[#allocation104_spill] sm:$0xff]  ;;  %v16101_v46 = vld [vmem:[#allocation73_spill] sm:$0xff] }
 0x4d3   : > { %v5879_v62 = vadd.f32 %v5609_v45, %v4912_v51  ;;  %v5878_v5 = vadd.f32 %v5605_v16, %v4911_v6  ;;  %v5998_v32 = vmul.f32 %v16043_v44, %v13667_v39  ;;  %v6005_v26 = vmul.f32 %v15849_v52, %v16061_v54  ;;  %v13861_v39 = vld.sshfl [vmem:[#allocation1] sm:$0xff pattern:$0x73625140] }
 0x4d4   : > { %v6006_v0 = vmul.f32 %v16043_v44, %v13670_v38  ;;  %v6012_v29 = vmul.f32 %v15902_v43, %v13631_v23  ;;  %v6013_v58 = vmul.f32 %v15849_v52, %v13634_v25  ;;  %v6014_v35 = vmul.f32 %v16043_v44, %v13674_v36  ;;  %6800 = vst [vmem:[#allocation1] ss:$4 sm:$0xff] %v13585_v41 }
 0x4d5   : > { %v6015_v7 = vmul.f32 %v13535_v57, %v13690_v4  ;;  %v13865_v6 = vmul.f32 %v15902_v43, %v13693_v55  ;;  %v6126_v51 = vadd.f32 %v5998_v32, %v5862_v34  ;;  %v6133_v42 = vadd.f32 %v6005_v26, %v5869_v24  ;;  %6801 = vst [vmem:[#allocation1 + $0x1] ss:$4 sm:$0xff] %v16082_v20  ;;  %v16084_v34 = vld [vmem:[#allocation102_spill] sm:$0xff]  ;;  %v16091_v20 = vld [vmem:[#allocation96_spill] sm:$0xff] }
 0x4d6   : > { %v6134_v56 = vadd.f32 %v6006_v0, %v5870_v9  ;;  %v6140_v8 = vadd.f32 %v6012_v29, %v5876_v60  ;;  %v6141_v63 = vadd.f32 %v6013_v58, %v5877_v12  ;;  %v6142_v48 = vadd.f32 %v6014_v35, %v5878_v5  ;;  %6802 = vst [vmem:[#allocation1 + $0x2] ss:$4 sm:$0xff] %v16084_v34  ;;  %v16085_v24 = vld [vmem:[#allocation54_spill] sm:$0xff]  ;;  %v7787_v12 = vld [vmem:[%s7976_s10 + $0x20] sm:$0x1]  ;;  %v16086_v5 = vld [vmem:[#allocation127_spill] sm:$0xff] }
 0x4d7   : > { %16081 = vst [vmem:[#allocation94_spill] sm:$0xff] %v13865_v6  ;;  %v6143_v59 = vadd.f32 %v6015_v7, %v5879_v62  ;;  %v6264_v4 = vadd.f32 %v16050_v10, %v6126_v51  ;;  %v6271_v30 = vadd.f32 %v16028_v53, %v6133_v42  ;;  %v6963_v14 = vadd.f32 %v16083_v33, %v6962_v2  ;;  %v13879_v62 = vld.sshfl [vmem:[#allocation1 + $0x20] sm:$0xff pattern:$0x73625140]  ;;  %v16087_v29 = vld [vmem:[#allocation92_spill] sm:$0xff] }
 0x4d8   : > { %v6272_v45 = vadd.f32 %v16050_v10, %v6134_v56  ;;  %v6278_v16 = vadd.f32 %v16085_v24, %v6140_v8  ;;  %v6279_v41 = vadd.f32 %v16028_v53, %v6141_v63  ;;  %v6280_v60 = vadd.f32 %v16050_v10, %v6142_v48  ;;  %6803 = vst [vmem:[#allocation1 + $0x3] ss:$4 sm:$0xff] %v16086_v5  ;;  %v16089_v7 = vld [vmem:[#allocation128_spill] sm:$0xff] }
 0x4d9   : > { %v6281_v9 = vadd.f32 %v13571_v19, %v6143_v59  ;;  %v6392_v32 = vmax.f32 %v6264_v4, 0.0  ;;  %v6399_v26 = vmax.f32 %v6271_v30, 0.0  ;;  %v16088_v58 = vshrl.u32 %v16087_v29, 16  ;;  %6804 = vst [vmem:[#allocation1 + $0x20] ss:$4 sm:$0xff] %v16089_v7  ;;  %v16090_v8 = vld [vmem:[#allocation136_spill] sm:$0xff] }
 0x4da   : > { %v6400_v0 = vmax.f32 %v6272_v45, 0.0  ;;  %v6406_v2 = vmax.f32 %v6278_v16, 0.0  ;;  %v6407_v51 = vmax.f32 %v6279_v41, 0.0  ;;  %v6408_v42 = vmax.f32 %v6280_v60, 0.0  ;;  %6805 = vst [vmem:[#allocation1 + $0x21] ss:$4 sm:$0xff] %v16090_v8 }
 0x4db   : > { %v7130_v35 = vrot.slane %v16088_v58, 4  ;;  %v6409_v56 = vmax.f32 %v6281_v9, 0.0  ;;  %v6520_v63 = vmin.f32 %v6392_v32, 6.0  ;;  %v13886_v48 = vmin.f32 %v6399_v26, 6.0  ;;  %v16092_v30 = vld [vmem:[#allocation137_spill] sm:$0xff]  ;;  %v16094_v32 = vld [vmem:[#allocation11_spill] sm:$0xff] }
 0x4dc   : > { %v13888_v59 = vmin.f32 %v6400_v0, 6.0  ;;  %6806 = vst [vmem:[#allocation1 + $0x22] ss:$4 sm:$0xff] %v16092_v30  ;;  %v13892_v45 = vmin.f32 %v6406_v2, 6.0  ;;  %v13894_v33 = vmin.f32 %v6407_v51, 6.0  ;;  %v13896_v34 = vmin.f32 %v6408_v42, 6.0 }
 0x4dd   : > { %v7131_v4 = vor.u32 %v7130_v35, %v16091_v20  ;;  %v13898_v16 = vmin.f32 %v6409_v56, 6.0  ;;  %v7134_v60 = vshll.u32 %v7787_v12, 16  ;;  %v7883_v9 = vld [vmem:[%s14360_s2] ss:$0 sm:$0xff]  ;;  %v1923_v26 = vmul.f32 %v16094_v32, %v16059_v47  ;;  %6807 = vst [vmem:[#allocation1 + $0x23] ss:$4 sm:$0xff] %v6520_v63 }
 0x4de   : > { %v1419_v5 = vadd.f32 %v7883_v9, %v13790_v17  ;;  %v16095_v0 = vld [vmem:[#allocation13_spill] sm:$0xff]  ;;  %v16097_v7 = vld [vmem:[#allocation7_spill] sm:$0xff]  ;;  %v3031_v17 = vmul.f32 %v15985_v11, %v16061_v54 }
 0x4df   : > { %16093 = vst [vmem:[#allocation114_spill] sm:$0xff] %v13898_v16  ;;  %v7132_v41 = vrot.slane %v7131_v4, 4  ;;  %v1924_v29 = vmul.f32 %v16095_v0, %v16061_v54  ;;  %v16096_v58 = vld [vmem:[#allocation5_spill] sm:$0xff]  ;;  %v2095_v12 = vmul.f32 %v16097_v7, %v16061_v54  ;;  %v7136_v42 = vrot.slane %v7134_v60, 5  ;;  %v16099_v8 = vld [vmem:[#allocation23_spill] sm:$0xff] }
 0x4e0   : > { %v13910_v35 = vmul.f32 %v16096_v58, %v16059_v47  ;;  %v16098_v2 = vld [vmem:[#allocation21_spill] sm:$0xff]  ;;  %v1462_v56 = vmax.f32 %v1419_v5, 0.0  ;;  %v3032_v63 = vmul.f32 %v16099_v8, %v13670_v38  ;;  %v3295_v58 = vmul.f32 %v16060_v37, %v13631_v23 }
 0x4e1   : > { %v2096_v51 = vmul.f32 %v16098_v2, %v13670_v38  ;;  %v2636_v4 = vrot.slane %v2095_v12, 7  ;;  %v7137_v53 = vsel %vm13344_vm15, %v7132_v41, %v7136_v42  ;;  %v3296_v60 = vmul.f32 %v16056_v22, %v13634_v25  ;;  %v13944_v6 = vld.sshfl [vmem:[#allocation1] sm:$0xff pattern:$0x73625140] }
 0x4e2   : > { %v14903_v20 = vrot.slane %v13910_v35, 7  ;;  %v1503_v24 = vmin.f32 %v1462_v56, 6.0  ;;  %v13929_v54 = vmul.f32 %v16064_v50, %v13631_v23  ;;  %v7509_v5 = vunpack.c.l.bf16 %v7137_v53  ;;  %6810 = vst [vmem:[#allocation1] ss:$4 sm:$0xff] %v16101_v46 }
 0x4e3   : > { %v2639_v30 = vrot.slane %v2096_v51, 7  ;;  %v2638_v12 = vrot.slane %v2636_v4, 2  ;;  %v3590_v2 = vmul.f32 %v16065_v49, %v13634_v25  ;;  %v3591_v41 = vmul.f32 %v16063_v61, %v13674_v36 }
 0x4e4   : > { %v2635_v38 = vrot.slane %v14903_v20, 2  ;;  %v1665_v51 = vrot.slane %v1503_v24, 2  ;;  %v4128_v42 = vrot.slane %v13929_v54, 7  ;;  %v4527_v56 = vmul.f32 %v16009_v15, %v13674_v36 }
 0x4e5   : > { %v7541_v50 = vadd.f32 %v7509_v5, %v6963_v14  ;;  %v2640_v20 = vsel %vm8176_vm10, %v2638_v12, %v2639_v30  ;;  %v4131_v19 = vrot.slane %v3590_v2, 7  ;;  %v4134_v57 = vrot.slane %v3591_v41, 7 }
 0x4e6   : > { %v2637_v53 = vsel %vm8176_vm10, %v2635_v38, %v2636_v4  ;;  %v2896_v43 = vadd.f32 %v2640_v20, %v1924_v29  ;;  %v4130_v61 = vrot.slane %v4128_v42, 2  ;;  %v4791_v14 = vmul.f32 %v15833_v21, %v1503_v24  ;;  %v1415_v20 = vpop.f32.mrf.mxu2 }
 0x4e7   : > { %v2895_v16 = vadd.f32 %v2637_v53, %v1923_v26  ;;  %7573 = vst.msk [vmem:[%s13392_s21 + $0x18] sm:$0xff] %vm1262_vm5, %v7541_v50  ;;  %v4133_v36 = vrot.slane %v4131_v19, 2  ;;  %v13953_v4 = vmul.f32 %v15843_v28, %v1503_v24  ;;  %v5086_v30 = vmul.f32 %v16074_v40, %v1665_v51  ;;  %v16102_v50 = vld [vmem:[#allocation134_spill] sm:$0xff]  ;;  %v16105_v53 = vld [vmem:[#allocation135_spill] sm:$0xff] }
 0x4e8   : > { %v3160_v38 = vadd.f32 %v3032_v63, %v2896_v43  ;;  %v4132_v26 = vsel %vm8176_vm10, %v4130_v61, %v4131_v19  ;;  %v13959_v29 = vmul.f32 %v15849_v52, %v1503_v24  ;;  %v6022_v41 = vmul.f32 %v16043_v44, %v1665_v51  ;;  %6811 = vst [vmem:[#allocation1 + $0x1] ss:$4 sm:$0xff] %v16102_v50  ;;  %v16103_v43 = vld [vmem:[#allocation144_spill] sm:$0xff]  ;;  %v13970_v24 = vld.sshfl [vmem:[#allocation1 + $0x20] sm:$0xff pattern:$0x73625140] }
 0x4e9   : > { %v3159_v5 = vadd.f32 %v3031_v17, %v2895_v16  ;;  %v4135_v46 = vsel %vm8176_vm10, %v4133_v36, %v4134_v57  ;;  %v5626_v12 = vrot.slane %v13953_v4, 7  ;;  %v5629_v2 = vrot.slane %v5086_v30, 7  ;;  %v16104_v17 = vld [vmem:[#allocation47_spill] sm:$0xff]  ;;  %6812 = vst [vmem:[#allocation1 + $0x2] ss:$4 sm:$0xff] %v16105_v53  ;;  %v16107_v30 = vld [vmem:[#allocation61_spill] sm:$0xff] }
 0x4ea   : > { %v3424_v16 = vadd.f32 %v3296_v60, %v3160_v38  ;;  %v6881_v63 = vpack.c.bf16 %v16104_v17, %v16103_v43  ;;  %v6883_v19 = vpack.c.bf16 %v13879_v62, %v13861_v39  ;;  %v1416_v61 = vadd.f32 %v7883_v9, %v1415_v20  ;;  %v16106_v36 = vld [vmem:[#allocation111_spill] sm:$0xff]  ;;  %v16108_v60 = vld [vmem:[#allocation150_spill] sm:$0xff]  ;;  %v16111_v43 = vld [vmem:[#allocation113_spill] sm:$0xff]  ;;  %6816 = vst [vmem:[#allocation1 + $0x22] ss:$4 sm:$0xff] %v13886_v48 }
 0x4eb   : > { %v3423_v40 = vadd.f32 %v3295_v58, %v3159_v5  ;;  %v5628_v57 = vrot.slane %v5626_v12, 2  ;;  %v1919_v51 = vmul.f32 %v16094_v32, %v16106_v36  ;;  %v1920_v58 = vmul.f32 %v16095_v0, %v16107_v30  ;;  %6813 = vst [vmem:[#allocation1 + $0x3] ss:$4 sm:$0xff] %v16108_v60  ;;  %v16109_v39 = vld [vmem:[#allocation91_spill] sm:$0xff]  ;;  %v16113_v0 = vld [vmem:[#allocation117_spill] sm:$0xff]  ;;  %v16114_v53 = vld [vmem:[#allocation10_spill] sm:$0xff] }
 0x4ec   : > { %v4391_v38 = vadd.f32 %v4135_v46, %v3424_v16  ;;  %7775 = vmatmul.msk.bf16.gmra.mxu1 %vm6893_vm12, %v6881_v63  ;;  %7777 = vmatmul.msk.bf16.gmra.mxu3 %vm6893_vm12, %v6883_v19  ;;  %v16110_v62 = vld [vmem:[#allocation3_spill] sm:$0xff]  ;;  %v16112_v9 = vrot.slane %v16111_v43, 7  ;;  %v1461_v17 = vmax.f32 %v1416_v61, 0.0  ;;  %v1922_v36 = vmul.f32 %v16114_v53, %v16113_v0  ;;  %v16116_v16 = vld [vmem:[#allocation22_spill] sm:$0xff]  ;;  %v16117_v19 = vld [vmem:[#allocation4_spill] sm:$0xff] }
 0x4ed   : > { %v13980_v5 = vadd.f32 %v4132_v26, %v3423_v40  ;;  %v1921_v50 = vmul.f32 %v16110_v62, %v16109_v39  ;;  %v5630_v32 = vsel %vm8176_vm10, %v5628_v57, %v5629_v2  ;;  %v2091_v26 = vmul.f32 %v16097_v7, %v16107_v30  ;;  %v16115_v46 = vld [vmem:[#allocation75_spill] sm:$0xff]  ;;  %v16118_v2 = vld [vmem:[#allocation57_spill] sm:$0xff]  ;;  %v16119_v43 = vld [vmem:[#allocation6_spill] sm:$0xff]  ;;  %6817 = vst [vmem:[#allocation1 + $0x23] ss:$4 sm:$0xff] %v13888_v59 }
 0x4ee   : > { %v2623_v20 = vrot.slane %v16112_v9, 2  ;;  %6814 = vst [vmem:[#allocation1 + $0x20] ss:$4 sm:$0xff] %v16115_v46  ;;  %v4655_v40 = vadd.f32 %v4527_v56, %v4391_v38  ;;  %v2092_v63 = vmul.f32 %v16116_v16, %v16109_v39  ;;  %v2093_v60 = vmul.f32 %v16117_v19, %v16113_v0  ;;  %v14008_v38 = vpop.f32.mrf.mxu1  ;;  %v16121_v59 = vld [vmem:[#allocation27_spill] sm:$0xff]  ;;  %v16122_v19 = vld [vmem:[#allocation145_spill] sm:$0xff] }
 0x4ef   : > { %v3027_v62 = vmul.f32 %v15985_v11, %v16107_v30  ;;  %6815 = vst [vmem:[#allocation1 + $0x21] ss:$4 sm:$0xff] %v16118_v2  ;;  %v14002_v57 = vmin.f32 %v1461_v17, 6.0  ;;  %v2624_v61 = vrot.slane %v2091_v26, 7  ;;  %v3028_v7 = vmul.f32 %v16099_v8, %v16109_v39  ;;  %v16120_v11 = vld [vmem:[#allocation14_spill] sm:$0xff] }
 0x4f0   : > { %v3029_v56 = vmul.f32 %v16119_v43, %v16113_v0  ;;  %v4919_v9 = vadd.f32 %v4791_v14, %v4655_v40  ;;  %v2627_v53 = vrot.slane %v2092_v63, 7  ;;  %v2630_v46 = vrot.slane %v2093_v60, 7  ;;  %v16123_v60 = vld [vmem:[#allocation8_spill] sm:$0xff] }
 0x4f1   : > { %v3030_v30 = vmul.f32 %v16120_v11, %v16059_v47  ;;  %v14015_v17 = vrot.slane %v14002_v57, 2  ;;  %v14018_v8 = vrot.slane %v14002_v57, 4  ;;  %v14021_v39 = vrot.slane %v14002_v57, 6 }
 0x4f2   : > { %v2625_v48 = vsel %vm8176_vm10, %v2623_v20, %v2624_v61  ;;  %v5886_v14 = vadd.f32 %v5630_v32, %v4919_v9  ;;  %v2626_v0 = vrot.slane %v2624_v61, 2  ;;  %v2629_v26 = vrot.slane %v2627_v53, 2 }
 0x4f3   : > { %v2632_v40 = vrot.slane %v2630_v46, 2  ;;  %v2891_v16 = vadd.f32 %v2625_v48, %v1919_v51  ;;  %v3291_v47 = vmul.f32 %v16060_v37, %v13367_v3  ;;  %v3292_v63 = vmul.f32 %v16056_v22, %v16121_v59  ;;  %v14039_v22 = vld.sshfl [vmem:[#allocation1] sm:$0xff pattern:$0x73625140] }
 0x4f4   : > { %v3293_v2 = vmul.f32 %v16123_v60, %v16122_v19  ;;  %v6150_v43 = vadd.f32 %v6022_v41, %v5886_v14  ;;  %v2628_v11 = vsel %vm8176_vm10, %v2626_v0, %v2627_v53  ;;  %v2631_v20 = vsel %vm8176_vm10, %v2629_v26, %v2630_v46  ;;  %v16125_v41 = vld [vmem:[#allocation24_spill] sm:$0xff]  ;;  %v16126_v46 = vld [vmem:[#allocation37_spill] sm:$0xff] }
 0x4f5   : > { %v16124_v32 = vrot.slane %v13910_v35, 7  ;;  %v2892_v61 = vadd.f32 %v2628_v11, %v1920_v58  ;;  %v2893_v37 = vadd.f32 %v2631_v20, %v1921_v50  ;;  %v3155_v9 = vadd.f32 %v3027_v62, %v2891_v16  ;;  %v16127_v0 = vld [vmem:[#allocation124_spill] sm:$0xff]  ;;  %v16128_v62 = vld [vmem:[#allocation123_spill] sm:$0xff]  ;;  %v16129_v16 = vld [vmem:[#allocation30_spill] sm:$0xff] }
 0x4f6   : > { %v6288_v48 = vadd.f32 %v16050_v10, %v6150_v43  ;;  %v3294_v14 = vmul.f32 %v16125_v41, %v13628_v31  ;;  %v3586_v53 = vmul.f32 %v16065_v49, %v16121_v59  ;;  %v3587_v35 = vmul.f32 %v16126_v46, %v16122_v19  ;;  %6820 = vst [vmem:[#allocation1] ss:$4 sm:$0xff] %v16127_v0  ;;  %v16130_v43 = vld [vmem:[#allocation153_spill] sm:$0xff] }
 0x4f7   : > { %v2634_v51 = vsel %vm8176_vm10, %v2632_v40, %v16124_v32  ;;  %v3156_v26 = vadd.f32 %v3028_v7, %v2892_v61  ;;  %v3157_v58 = vadd.f32 %v3029_v56, %v2893_v37  ;;  %6821 = vst [vmem:[#allocation1 + $0x1] ss:$4 sm:$0xff] %v16128_v62  ;;  %v3588_v60 = vmul.f32 %v16129_v16, %v13628_v31  ;;  %v16132_v49 = vld [vmem:[#allocation93_spill] sm:$0xff]  ;;  %v14055_v7 = vpop.f32.mrf.mxu1  ;;  %v16137_v62 = vld [vmem:[#allocation26_spill] sm:$0xff] }
 0x4f8   : > { %v2894_v3 = vadd.f32 %v2634_v51, %v1922_v36  ;;  %v3419_v36 = vadd.f32 %v3291_v47, %v3155_v9  ;;  %v6416_v40 = vmax.f32 %v6288_v48, 0.0  ;;  %v16131_v11 = vrot.slane %v16130_v43, 7  ;;  %6822 = vst [vmem:[#allocation1 + $0x2] ss:$4 sm:$0xff] %v16132_v49 }
 0x4f9   : > { %v4119_v32 = vrot.slane %v3586_v53, 7  ;;  %v3420_v51 = vadd.f32 %v3292_v63, %v3156_v26  ;;  %v3421_v41 = vadd.f32 %v3293_v2, %v3157_v58  ;;  %v4122_v0 = vrot.slane %v3587_v35, 7  ;;  %v14057_v56 = vld.sshfl [vmem:[#allocation1 + $0x20] sm:$0xff pattern:$0x73625140]  ;;  %v16134_v63 = vld [vmem:[#allocation38_spill] sm:$0xff] }
 0x4fa   : > { %v3158_v50 = vadd.f32 %v3030_v30, %v2894_v3  ;;  %v4118_v20 = vrot.slane %v16131_v11, 2  ;;  %v14059_v30 = vmin.f32 %v6416_v40, 6.0  ;;  %v4125_v37 = vrot.slane %v3588_v60, 7  ;;  %v16133_v3 = vld [vmem:[#allocation44_spill] sm:$0xff]  ;;  %v16136_v58 = vld [vmem:[#allocation9_spill] sm:$0xff] }
 0x4fb   : > { %v4121_v61 = vrot.slane %v4119_v32, 2  ;;  %6823 = vst [vmem:[#allocation1 + $0x3] ss:$4 sm:$0xff] %v16133_v3  ;;  %v4124_v9 = vrot.slane %v4122_v0, 2  ;;  %v4522_v2 = vmul.f32 %v16134_v63, %v16121_v59  ;;  %v16135_v53 = vld [vmem:[#allocation152_spill] sm:$0xff]  ;;  %v4525_v40 = vmul.f32 %v16137_v62, %v13631_v23 }
 0x4fc   : > { %v3422_v46 = vadd.f32 %v3294_v14, %v3158_v50  ;;  %v4120_v47 = vsel %vm8176_vm10, %v4118_v20, %v4119_v32  ;;  %v4523_v14 = vmul.f32 %v16009_v15, %v16122_v19  ;;  %6824 = vst [vmem:[#allocation1 + $0x20] ss:$4 sm:$0xff] %v16135_v53  ;;  %v4127_v26 = vrot.slane %v4125_v37, 2  ;;  %v16139_v20 = vld [vmem:[#allocation28_spill] sm:$0xff] }
 0x4fd   : > { %v4386_v48 = vadd.f32 %v4120_v47, %v3419_v36  ;;  %v4123_v35 = vsel %vm8176_vm10, %v4121_v61, %v4122_v0  ;;  %v4524_v50 = vmul.f32 %v16136_v58, %v13628_v31  ;;  %6825 = vst [vmem:[#allocation1 + $0x21] ss:$4 sm:$0xff] %v13892_v45  ;;  %v4126_v59 = vsel %vm8176_vm10, %v4124_v9, %v4125_v37  ;;  %v16141_v47 = vld [vmem:[#allocation18_spill] sm:$0xff]  ;;  %v16142_v53 = vld [vmem:[#allocation100_spill] sm:$0xff] }
 0x4fe   : > { %v4387_v36 = vadd.f32 %v4123_v35, %v3420_v51  ;;  %v4526_v15 = vmul.f32 %v16134_v63, %v13634_v25  ;;  %6826 = vst [vmem:[#allocation1 + $0x22] ss:$4 sm:$0xff] %v13894_v33  ;;  %v4129_v31 = vsel %vm8176_vm10, %v4127_v26, %v4128_v42  ;;  %v4388_v16 = vadd.f32 %v4126_v59, %v3421_v41  ;;  %v16138_v33 = vld [vmem:[#allocation16_spill] sm:$0xff] }
 0x4ff   : > { %v4650_v19 = vadd.f32 %v4522_v2, %v4386_v48  ;;  %v4786_v23 = vmul.f32 %v15835_v18, %v13693_v55  ;;  %v4787_v45 = vmul.f32 %v15833_v21, %v14002_v57  ;;  %6827 = vst [vmem:[#allocation1 + $0x23] ss:$4 sm:$0xff] %v13896_v34  ;;  %v4389_v60 = vadd.f32 %v4129_v31, %v3422_v46  ;;  %v16140_v34 = vld [vmem:[#allocation51_spill] sm:$0xff] }
 0x500   : > { %v4651_v43 = vadd.f32 %v4523_v14, %v4387_v36  ;;  %v4654_v25 = vadd.f32 %v4526_v15, %v13980_v5  ;;  %v4788_v11 = vmul.f32 %v16138_v33, %v14015_v17  ;;  %v4652_v54 = vadd.f32 %v4524_v50, %v4388_v16  ;;  %v14101_v5 = vpop.f32.mrf.mxu1  ;;  %v16144_v36 = vld [vmem:[#allocation125_spill] sm:$0xff] }
 0x501   : > { %v4789_v42 = vmul.f32 %v16139_v20, %v14018_v8  ;;  %v4790_v32 = vmul.f32 %v15835_v18, %v14021_v39  ;;  %v4914_v55 = vadd.f32 %v4786_v23, %v4650_v19  ;;  %v4653_v49 = vadd.f32 %v4525_v40, %v4389_v60  ;;  %v16143_v40 = vld [vmem:[#allocation154_spill] sm:$0xff]  ;;  %v16145_v19 = vld [vmem:[#allocation52_spill] sm:$0xff]  ;;  %v7788_v16 = vld [vmem:[%s7976_s10 + $0x24] sm:$0xf] }
 0x502   : > { %v4915_v51 = vadd.f32 %v4787_v45, %v4651_v43  ;;  %v5081_v21 = vmul.f32 %v15843_v28, %v14002_v57  ;;  %v5082_v41 = vmul.f32 %v16140_v34, %v14015_v17  ;;  %v4916_v46 = vadd.f32 %v4788_v11, %v4652_v54  ;;  %v14115_v50 = vld.sshfl [vmem:[#allocation1] sm:$0xff pattern:$0x73625140]  ;;  %v16146_v23 = vld [vmem:[#allocation114_spill] sm:$0xff]  ;;  %v16149_v34 = vld [vmem:[#allocation55_spill] sm:$0xff] }
 0x503   : > { %v4918_v0 = vadd.f32 %v4790_v32, %v4654_v25  ;;  %v5083_v61 = vmul.f32 %v16141_v47, %v14018_v8  ;;  %v5084_v37 = vmul.f32 %v16075_v27, %v14021_v39  ;;  %v4917_v18 = vadd.f32 %v4789_v42, %v4653_v49  ;;  %6830 = vst [vmem:[#allocation1] ss:$4 sm:$0xff] %v16146_v23  ;;  %v16150_v47 = vld [vmem:[#allocation121_spill] sm:$0xff] }
 0x504   : > { %v5611_v3 = vrot.slane %v13826_v1, 7  ;;  %v5614_v9 = vrot.slane %v5081_v21, 7  ;;  %v5617_v48 = vrot.slane %v5082_v41, 7  ;;  %v6017_v2 = vmul.f32 %v15849_v52, %v14002_v57 }
 0x505   : > { %v5620_v63 = vrot.slane %v5083_v61, 7  ;;  %v5623_v28 = vrot.slane %v5084_v37, 7  ;;  %v6018_v14 = vmul.f32 %v16043_v44, %v14015_v17  ;;  %v6019_v52 = vmul.f32 %v16144_v36, %v14018_v8 }
 0x506   : > { %v5612_v35 = vsel %vm8176_vm10, %v16142_v53, %v5611_v3  ;;  %v5613_v26 = vrot.slane %v5611_v3, 2  ;;  %v5616_v27 = vrot.slane %v5614_v9, 2  ;;  %v5619_v58 = vrot.slane %v5617_v48, 2  ;;  %v14120_v57 = vld.sshfl [vmem:[#allocation1 + $0x20] sm:$0xff pattern:$0x73625140] }
 0x507   : > { %v5622_v1 = vrot.slane %v5620_v63, 2  ;;  %v5625_v62 = vrot.slane %v5623_v28, 2  ;;  %v5880_v59 = vadd.f32 %v5612_v35, %v16143_v40  ;;  %v6020_v31 = vmul.f32 %v16145_v19, %v14021_v39  ;;  %6837 = vst [vmem:[#allocation1 + $0x23] ss:$4 sm:$0xff] %v14059_v30  ;;  %v16147_v39 = vld [vmem:[#allocation94_spill] sm:$0xff] }
 0x508   : > { %v5615_v44 = vsel %vm8176_vm10, %v5613_v26, %v5614_v9  ;;  %v5618_v17 = vsel %vm8176_vm10, %v5616_v27, %v5617_v48  ;;  %v5621_v15 = vsel %vm8176_vm10, %v5619_v58, %v5620_v63  ;;  %v14140_v20 = vpop.f32.mrf.mxu1  ;;  %v7139_v49 = vshrl.u32 %v7788_v16, 16  ;;  %v7791_v35 = vld [vmem:[%s7976_s10 + $0x30] sm:$0xf] }
 0x509   : > { %v5624_v8 = vsel %vm8176_vm10, %v5622_v1, %v5623_v28  ;;  %v5627_v45 = vsel %vm8176_vm10, %v5625_v62, %v5626_v12  ;;  %v5881_v60 = vadd.f32 %v5615_v44, %v4914_v55  ;;  %v5882_v43 = vadd.f32 %v5618_v17, %v4915_v51  ;;  %v16148_v12 = vld [vmem:[#allocation54_spill] sm:$0xff]  ;;  %v7792_v62 = vld [vmem:[%s7976_s10 + $0x34] sm:$0xf] }
 0x50a   : > { %v5883_v25 = vadd.f32 %v5621_v15, %v4916_v46  ;;  %v5884_v33 = vadd.f32 %v5624_v8, %v4917_v18  ;;  %v5885_v11 = vadd.f32 %v5627_v45, %v4918_v0  ;;  %v6144_v54 = vadd.f32 %v16147_v39, %v5880_v59  ;;  %v7789_v51 = vld [vmem:[%s7976_s10 + $0x28] sm:$0xf]  ;;  %v7790_v28 = vld [vmem:[%s7976_s10 + $0x2c] sm:$0x1] }
 0x50b   : > { %v6145_v42 = vadd.f32 %v6017_v2, %v5881_v60  ;;  %v6146_v32 = vadd.f32 %v6018_v14, %v5882_v43  ;;  %v7141_v46 = vrot.slane %v7139_v49, 4  ;;  %v7142_v0 = vshll.u32 %v7788_v16, 16  ;;  %v14159_v16 = vld [vmem:[%s14364_s6] ss:$0 sm:$0xff] }
 0x50c   : > { %v6147_v21 = vadd.f32 %v6019_v52, %v5883_v25  ;;  %v6148_v4 = vadd.f32 %v6020_v31, %v5884_v33  ;;  %v6149_v13 = vadd.f32 %v13959_v29, %v5885_v11  ;;  %v6282_v55 = vadd.f32 %v16148_v12, %v6144_v54  ;;  %v7793_v31 = vld [vmem:[%s7976_s10 + $0x38] sm:$0x1] }
 0x50d   : > { %v6283_v30 = vadd.f32 %v16149_v34, %v6145_v42  ;;  %v6284_v41 = vadd.f32 %v16050_v10, %v6146_v32  ;;  %v7144_v48 = vrot.slane %v7142_v0, 5  ;;  %v7148_v63 = vshll.u32 %v7789_v51, 16 }
 0x50e   : > { %v6285_v61 = vadd.f32 %v16150_v47, %v6147_v21  ;;  %v6286_v37 = vadd.f32 %v16148_v12, %v6148_v4  ;;  %v6287_v18 = vadd.f32 %v16149_v34, %v6149_v13  ;;  %v6410_v3 = vmax.f32 %v6282_v55, 0.0  ;;  %v7795_v4 = vld [vmem:[%s7976_s10 + $0x40] sm:$0xf] }
 0x50f   : > { %v6411_v9 = vmax.f32 %v6283_v30, 0.0  ;;  %v6412_v29 = vmax.f32 %v6284_v41, 0.0  ;;  %v7145_v58 = vor.u32 %v7144_v48, %v7141_v46  ;;  %v7150_v1 = vrot.slane %v7148_v63, 5 }
 0x510   : > { %v6413_v2 = vmax.f32 %v6285_v61, 0.0  ;;  %v6414_v14 = vmax.f32 %v6286_v37, 0.0  ;;  %v6415_v53 = vmax.f32 %v6287_v18, 0.0  ;;  %v6538_v10 = vmin.f32 %v6410_v3, 6.0  ;;  %v6975_v52 = vpop.f32.mrf.mxu1 }
 0x511   : > { %v6539_v26 = vmin.f32 %v6411_v9, 6.0  ;;  %v6540_v27 = vmin.f32 %v6412_v29, 6.0  ;;  %v7152_v36 = vshrl.u32 %v7789_v51, 16  ;;  %v7146_v17 = vrot.slane %v7145_v58, 4 }
 0x512   : > { %v6541_v40 = vmin.f32 %v6413_v2, 6.0  ;;  %v6542_v59 = vmin.f32 %v6414_v14, 6.0  ;;  %6831 = vst [vmem:[#allocation1 + $0x1] ss:$4 sm:$0xff] %v6538_v10  ;;  %v6543_v44 = vmin.f32 %v6415_v53, 6.0  ;;  %v6884_v15 = vpack.c.bf16 %v13970_v24, %v13944_v6 }
 0x513   : > { %v7158_v19 = vshll.u32 %v7790_v28, 16  ;;  %6832 = vst [vmem:[#allocation1 + $0x2] ss:$4 sm:$0xff] %v6539_v26  ;;  %v6966_v23 = vadd.f32 %v14159_v16, %v14008_v38  ;;  %v7154_v8 = vrot.slane %v7152_v36, 4  ;;  %v7163_v45 = vshrl.u32 %v7791_v35, 16 }
 0x514   : > { %v7166_v60 = vshll.u32 %v7791_v35, 16  ;;  %6833 = vst [vmem:[#allocation1 + $0x3] ss:$4 sm:$0xff] %v6540_v27  ;;  %v7151_v6 = vsel %vm13344_vm15, %v7146_v17, %v7150_v1  ;;  %7778 = vmatmul.msk.bf16.gmra.mxu3 %vm6893_vm12, %v6884_v15  ;;  %v7172_v25 = vshll.u32 %v7792_v62, 16  ;;  %v7176_v33 = vshrl.u32 %v7792_v62, 16 }
 0x515   : > { %v7160_v24 = vrot.slane %v7158_v19, 5  ;;  %6834 = vst [vmem:[#allocation1 + $0x20] ss:$4 sm:$0xff] %v6541_v40  ;;  %v7510_v11 = vunpack.c.l.bf16 %v7151_v6  ;;  %v7155_v39 = vor.u32 %v7154_v8, %v7150_v1  ;;  %v7165_v54 = vrot.slane %v7163_v45, 4  ;;  %v7794_v38 = vld [vmem:[%s7976_s10 + $0x3c] sm:$0xf] }
 0x516   : > { %v7168_v42 = vrot.slane %v7166_v60, 5  ;;  %6835 = vst [vmem:[#allocation1 + $0x21] ss:$4 sm:$0xff] %v6542_v59  ;;  %v6968_v32 = vadd.f32 %v14159_v16, %v14055_v7  ;;  %v7174_v49 = vrot.slane %v7172_v25, 5  ;;  %v7178_v21 = vrot.slane %v7176_v33, 4 }
 0x517   : > { %6836 = vst [vmem:[#allocation1 + $0x22] ss:$4 sm:$0xff] %v6543_v44  ;;  %v7542_v13 = vadd.f32 %v7510_v11, %v6966_v23  ;;  %v7156_v12 = vrot.slane %v7155_v39, 4  ;;  %v7182_v51 = vshll.u32 %v7793_v31, 16  ;;  %v6971_v34 = vadd.f32 %v14159_v16, %v14101_v5  ;;  %v7796_v5 = vld [vmem:[%s7976_s10 + $0x44] sm:$0x1] }
 0x518   : > { %v7169_v55 = vor.u32 %v7168_v42, %v7165_v54  ;;  %v7179_v30 = vor.u32 %v7178_v21, %v7174_v49  ;;  %v7187_v41 = vshrl.u32 %v7794_v38, 16  ;;  %v7190_v46 = vshll.u32 %v7794_v38, 16  ;;  %v6977_v37 = vpop.f32.mrf.mxu1  ;;  %v7797_v14 = vld [vmem:[%s7976_s10 + $0x48] sm:$0xf]  ;;  %v7798_v27 = vld [vmem:[%s7976_s10 + $0x4c] sm:$0xf] }
 0x519   : > { %7574 = vst.msk [vmem:[%s13392_s21 + $0x20] sm:$0xff] %vm1262_vm5, %v7542_v13  ;;  %v7161_v7 = vsel %vm13344_vm15, %v7156_v12, %v7160_v24  ;;  %v7184_v47 = vrot.slane %v7182_v51, 5  ;;  %v7196_v61 = vshll.u32 %v7795_v4, 16  ;;  %v6973_v63 = vadd.f32 %v14159_v16, %v14140_v20  ;;  %v7801_v13 = vld [vmem:[%s7976_s10 + $0x58] sm:$0xf] }
 0x51a   : > { %v7170_v0 = vrot.slane %v7169_v55, 4  ;;  %v7511_v18 = vunpack.c.l.bf16 %v7161_v7  ;;  %v7180_v3 = vrot.slane %v7179_v30, 4  ;;  %v7189_v9 = vrot.slane %v7187_v41, 4 }
 0x51b   : > { %v7192_v29 = vrot.slane %v7190_v46, 5  ;;  %v7198_v28 = vrot.slane %v7196_v61, 5  ;;  %v7200_v2 = vshrl.u32 %v7795_v4, 16  ;;  %v6976_v1 = vadd.f32 %v14159_v16, %v6975_v52  ;;  %v7800_v4 = vld [vmem:[%s7976_s10 + $0x54] sm:$0xf] }
 0x51c   : > { %v7175_v48 = vsel %vm13344_vm15, %v7170_v0, %v7174_v49  ;;  %v7543_v53 = vadd.f32 %v7511_v18, %v6968_v32  ;;  %v7185_v35 = vsel %vm13344_vm15, %v7180_v3, %v7184_v47  ;;  %v7206_v40 = vshll.u32 %v7796_v5, 16  ;;  %v7799_v49 = vld [vmem:[%s7976_s10 + $0x50] sm:$0x1]  ;;  %v7802_v5 = vld [vmem:[%s7976_s10 + $0x5c] sm:$0x1] }
 0x51d   : > { %v7512_v10 = vunpack.c.l.bf16 %v7175_v48  ;;  %v7193_v26 = vor.u32 %v7192_v29, %v7189_v9  ;;  %v7513_v58 = vunpack.c.l.bf16 %v7185_v35  ;;  %v7202_v62 = vrot.slane %v7200_v2, 4  ;;  %v7803_v48 = vld [vmem:[%s7976_s10 + $0x60] sm:$0xf] }
 0x51e   : > { %7575 = vst.msk [vmem:[%s13392_s21 + $0x28] sm:$0xff] %vm1262_vm5, %v7543_v53  ;;  %v7211_v36 = vshrl.u32 %v7797_v14, 16  ;;  %v7214_v44 = vshll.u32 %v7797_v14, 16  ;;  %v7208_v19 = vrot.slane %v7206_v40, 5  ;;  %v7220_v31 = vshll.u32 %v7798_v27, 16 }
 0x51f   : > { %v7544_v20 = vadd.f32 %v7512_v10, %v6971_v34  ;;  %v7194_v59 = vrot.slane %v7193_v26, 4  ;;  %v7545_v17 = vadd.f32 %v7513_v58, %v6973_v63  ;;  %v7203_v15 = vor.u32 %v7202_v62, %v7198_v28 }
 0x520   : > { %v7213_v8 = vrot.slane %v7211_v36, 4  ;;  %v7216_v52 = vrot.slane %v7214_v44, 5  ;;  %v7224_v45 = vshrl.u32 %v7798_v27, 16  ;;  %v6980_v24 = vpop.f32.mrf.mxu1  ;;  %v6885_v25 = vpack.c.bf16 %v14057_v56, %v14039_v22 }
 0x521   : > { %7576 = vst.msk [vmem:[%s13392_s21 + $0x30] sm:$0xff] %vm1262_vm5, %v7544_v20  ;;  %v7199_v23 = vsel %vm13344_vm15, %v7194_v59, %v7198_v28  ;;  %v7204_v6 = vrot.slane %v7203_v15, 4  ;;  %v6978_v33 = vadd.f32 %v14159_v16, %v6977_v37  ;;  %v7222_v39 = vrot.slane %v7220_v31, 5 }
 0x522   : > { %7577 = vst.msk [vmem:[%s13392_s21 + $0x38] sm:$0xff] %vm1262_vm5, %v7545_v17  ;;  %v7514_v60 = vunpack.c.l.bf16 %v7199_v23  ;;  %v7217_v11 = vor.u32 %v7216_v52, %v7213_v8  ;;  %v7226_v21 = vrot.slane %v7224_v45, 4  ;;  %v6981_v22 = vadd.f32 %v14159_v16, %v6980_v24  ;;  %v7813_v24 = vld [vmem:[%s7976_s10 + $0x88] sm:$0xf] }
 0x523   : > { %v7209_v42 = vsel %vm13344_vm15, %v7204_v6, %v7208_v19  ;;  %v7230_v56 = vshll.u32 %v7799_v49, 16  ;;  %v7235_v12 = vshrl.u32 %v7800_v4, 16  ;;  %v7238_v55 = vshll.u32 %v7800_v4, 16  ;;  %v7804_v19 = vld [vmem:[%s7976_s10 + $0x64] sm:$0xf] }
 0x524   : > { %v7546_v54 = vadd.f32 %v7514_v60, %v6976_v1  ;;  %7779 = vmatmul.msk.bf16.gmra.mxu3 %vm6893_vm12, %v6885_v25  ;;  %v7515_v38 = vunpack.c.l.bf16 %v7209_v42  ;;  %v7218_v32 = vrot.slane %v7217_v11, 4  ;;  %v7227_v30 = vor.u32 %v7226_v21, %v7222_v39  ;;  %v7005_v60 = vpop.f32.mrf.mxu3  ;;  %v7812_v6 = vld [vmem:[%s7976_s10 + $0x84] sm:$0xf]  ;;  %v7806_v4 = vld [vmem:[%s7976_s10 + $0x6c] sm:$0xf] }
 0x525   : > { %v7244_v41 = vshll.u32 %v7801_v13, 16  ;;  %v7232_v7 = vrot.slane %v7230_v56, 5  ;;  %v7237_v0 = vrot.slane %v7235_v12, 4  ;;  %v7240_v47 = vrot.slane %v7238_v55, 5 }
 0x526   : > { %7578 = vst.msk [vmem:[%s13392_s21 + $0x40] sm:$0xff] %vm1262_vm5, %v7546_v54  ;;  %v7547_v51 = vadd.f32 %v7515_v38, %v6978_v33  ;;  %v7223_v34 = vsel %vm13344_vm15, %v7218_v32, %v7222_v39  ;;  %v7228_v61 = vrot.slane %v7227_v30, 4  ;;  %v7248_v37 = vshrl.u32 %v7801_v13, 16  ;;  %v7805_v38 = vld [vmem:[%s7976_s10 + $0x68] sm:$0x1] }
 0x527   : > { %v7516_v46 = vunpack.c.l.bf16 %v7223_v34  ;;  %v7241_v9 = vor.u32 %v7240_v47, %v7237_v0  ;;  %v7246_v29 = vrot.slane %v7244_v41, 5  ;;  %v7254_v10 = vshll.u32 %v7802_v5, 16  ;;  %v7814_v0 = vld [vmem:[%s7976_s10 + $0x8c] sm:$0x1] }
 0x528   : > { %7579 = vst.msk [vmem:[%s13392_s21 + $0x48] sm:$0xff] %vm1262_vm5, %v7547_v51  ;;  %v6982_v3 = vpop.f32.mrf.mxu1  ;;  %v7233_v28 = vsel %vm13344_vm15, %v7228_v61, %v7232_v7  ;;  %v7250_v2 = vrot.slane %v7248_v37, 4  ;;  %v7259_v35 = vshrl.u32 %v7803_v48, 16  ;;  %v7262_v1 = vshll.u32 %v7803_v48, 16 }
 0x529   : > { %v7548_v18 = vadd.f32 %v7516_v46, %v6981_v22  ;;  %v6983_v63 = vadd.f32 %v14159_v16, %v6982_v3  ;;  %v7517_v14 = vunpack.c.l.bf16 %v7233_v28  ;;  %v7242_v53 = vrot.slane %v7241_v9, 4  ;;  %v6839_v61 = vld.sshfl [vmem:[#allocation1 + $0x20] sm:$0xff pattern:$0x73625140] }
 0x52a   : > { %v7251_v58 = vor.u32 %v7250_v2, %v7246_v29  ;;  %v7256_v59 = vrot.slane %v7254_v10, 5  ;;  %v7261_v36 = vrot.slane %v7259_v35, 4  ;;  %v7264_v44 = vrot.slane %v7262_v1, 5  ;;  %v6838_v3 = vld.sshfl [vmem:[#allocation1] sm:$0xff pattern:$0x73625140] }
 0x52b   : > { %7580 = vst.msk [vmem:[%s13392_s21 + $0x50] sm:$0xff] %vm1262_vm5, %v7548_v18  ;;  %v7549_v26 = vadd.f32 %v7517_v14, %v6983_v63  ;;  %v7247_v27 = vsel %vm13344_vm15, %v7242_v53, %v7246_v29  ;;  %v6886_v17 = vpack.c.bf16 %v14120_v57, %v14115_v50  ;;  %v7272_v23 = vshrl.u32 %v7804_v19, 16  ;;  %v7807_v14 = vld [vmem:[%s7976_s10 + $0x70] sm:$0xf] }
 0x52c   : > { %v7518_v62 = vunpack.c.l.bf16 %v7247_v27  ;;  %v7252_v20 = vrot.slane %v7251_v58, 4  ;;  %v7265_v52 = vor.u32 %v7264_v44, %v7261_v36  ;;  %v7268_v45 = vshll.u32 %v7804_v19, 16  ;;  %v7007_v48 = vpop.f32.mrf.mxu3 }
 0x52d   : > { %7581 = vst.msk [vmem:[%s13392_s21 + $0x58] sm:$0xff] %vm1262_vm5, %v7549_v26  ;;  %v7331_v50 = vshrl.u32 %v7812_v6, 16  ;;  %v7334_v57 = vshll.u32 %v7812_v6, 16  ;;  %v7274_v33 = vrot.slane %v7272_v23, 4  ;;  %v7340_v11 = vshll.u32 %v7813_v24, 16 }
 0x52e   : > { %v7257_v8 = vsel %vm13344_vm15, %v7252_v20, %v7256_v59  ;;  %v7266_v54 = vrot.slane %v7265_v52, 4  ;;  %v7270_v42 = vrot.slane %v7268_v45, 5  ;;  %v7344_v22 = vshrl.u32 %v7813_v24, 16  ;;  %v7808_v6 = vld [vmem:[%s7976_s10 + $0x74] sm:$0x1] }
 0x52f   : > { %v7519_v25 = vunpack.c.l.bf16 %v7257_v8  ;;  %v7333_v32 = vrot.slane %v7331_v50, 4  ;;  %v7336_v49 = vrot.slane %v7334_v57, 5  ;;  %v7342_v13 = vrot.slane %v7340_v11, 5 }
 0x530   : > { %v6985_v40 = vpop.f32.mrf.mxu1  ;;  %v7275_v55 = vor.u32 %v7274_v33, %v7270_v42  ;;  %v7278_v51 = vshll.u32 %v7805_v38, 16  ;;  %v7271_v34 = vsel %vm13344_vm15, %v7266_v54, %v7270_v42  ;;  %v7283_v30 = vshrl.u32 %v7806_v4, 16  ;;  %v7809_v38 = vld [vmem:[%s7976_s10 + $0x78] sm:$0xf] }
 0x531   : > { %v6986_v15 = vadd.f32 %v14159_v16, %v6985_v40  ;;  %v7337_v56 = vor.u32 %v7336_v49, %v7333_v32  ;;  %v7286_v41 = vshll.u32 %v7806_v4, 16  ;;  %v7006_v7 = vadd.f32 %v14159_v16, %v7005_v60 }
 0x532   : > { %v7346_v47 = vrot.slane %v7344_v22, 4  ;;  %v7350_v18 = vshll.u32 %v7814_v0, 16  ;;  %v7520_v9 = vunpack.c.l.bf16 %v7271_v34  ;;  %v7280_v29 = vrot.slane %v7278_v51, 5  ;;  %v7810_v34 = vld [vmem:[%s7976_s10 + $0x7c] sm:$0xf] }
 0x533   : > { %v7550_v31 = vadd.f32 %v7518_v62, %v6986_v15  ;;  %v7338_v46 = vrot.slane %v7337_v56, 4  ;;  %v7276_v2 = vrot.slane %v7275_v55, 4  ;;  %v7285_v53 = vrot.slane %v7283_v30, 4  ;;  %v7815_v56 = vld [vmem:[%s7976_s10 + $0x90] sm:$0xf] }
 0x534   : > { %7780 = vmatmul.msk.bf16.gmra.mxu3 %vm6893_vm12, %v6886_v17  ;;  %v7347_v63 = vor.u32 %v7346_v47, %v7342_v13  ;;  %v7288_v10 = vrot.slane %v7286_v41, 5  ;;  %v7352_v35 = vrot.slane %v7350_v18, 5  ;;  %v6887_v26 = vpack.c.bf16 %v6839_v61, %v6838_v3  ;;  %v7816_v18 = vld [vmem:[%s7976_s10 + $0x94] sm:$0xf] }
 0x535   : > { %7582 = vst.msk [vmem:[%s13392_s21 + $0x60] sm:$0xff] %vm1262_vm5, %v7550_v31  ;;  %v7343_v37 = vsel %vm13344_vm15, %v7338_v46, %v7342_v13  ;;  %v7008_v62 = vadd.f32 %v14159_v16, %v7007_v48  ;;  %v7292_v20 = vshll.u32 %v7807_v14, 16  ;;  %v7281_v36 = vsel %vm13344_vm15, %v7276_v2, %v7280_v29 }
 0x536   : > { %v7526_v5 = vunpack.c.l.bf16 %v7343_v37  ;;  %v7348_v1 = vrot.slane %v7347_v63, 4  ;;  %v7289_v44 = vor.u32 %v7288_v10, %v7285_v53  ;;  %v7296_v17 = vshrl.u32 %v7807_v14, 16 }
 0x537   : > { %v7521_v31 = vunpack.c.l.bf16 %v7281_v36  ;;  %v7294_v52 = vrot.slane %v7292_v20, 5  ;;  %v7310_v4 = vshll.u32 %v7809_v38, 16  ;;  %v7355_v30 = vshrl.u32 %v7815_v56, 16 }
 0x538   : > { %v6987_v39 = vpop.f32.mrf.mxu1  ;;  %v7558_v58 = vadd.f32 %v7526_v5, %v7006_v7  ;;  %v7353_v59 = vsel %vm13344_vm15, %v7348_v1, %v7352_v35  ;;  %v7290_v8 = vrot.slane %v7289_v44, 4  ;;  %v7298_v45 = vrot.slane %v7296_v17, 4  ;;  %v7811_v5 = vld [vmem:[%s7976_s10 + $0x80] sm:$0x1] }
 0x539   : > { %v6988_v21 = vadd.f32 %v14159_v16, %v6987_v39  ;;  %v7527_v15 = vunpack.c.l.bf16 %v7353_v59  ;;  %v7312_v55 = vrot.slane %v7310_v4, 5  ;;  %v7358_v41 = vshll.u32 %v7815_v56, 16 }
 0x53a   : > { %7590 = vst.msk [vmem:[%s13392_s21 + $0xa0] sm:$0xff] %vm1262_vm5, %v7558_v58  ;;  %v7295_v50 = vsel %vm13344_vm15, %v7290_v8, %v7294_v52  ;;  %v7299_v57 = vor.u32 %v7298_v45, %v7294_v52  ;;  %v7316_v0 = vshll.u32 %v7810_v34, 16  ;;  %v7320_v47 = vshrl.u32 %v7810_v34, 16  ;;  %v7817_v58 = vld [vmem:[%s7976_s10 + $0x98] sm:$0x1] }
 0x53b   : > { %v7551_v12 = vadd.f32 %v7519_v25, %v6988_v21  ;;  %v7559_v19 = vadd.f32 %v7527_v15, %v7008_v62  ;;  %v7302_v25 = vshll.u32 %v7808_v6, 16  ;;  %v7522_v33 = vunpack.c.l.bf16 %v7295_v50  ;;  %v7821_v34 = vld [vmem:[%s7976_s10 + $0xa8] sm:$0xf] }
 0x53c   : > { %v7300_v39 = vrot.slane %v7299_v57, 4  ;;  %v7307_v21 = vshrl.u32 %v7809_v38, 16  ;;  %v7357_v61 = vrot.slane %v7355_v30, 4  ;;  %v7360_v37 = vrot.slane %v7358_v41, 5 }
 0x53d   : > { %7583 = vst.msk [vmem:[%s13392_s21 + $0x68] sm:$0xff] %vm1262_vm5, %v7551_v12  ;;  %v7304_v54 = vrot.slane %v7302_v25, 5  ;;  %v7322_v29 = vrot.slane %v7320_v47, 4  ;;  %v7364_v63 = vshll.u32 %v7816_v18, 16  ;;  %v7326_v53 = vshll.u32 %v7811_v5, 16 }
 0x53e   : > { %7591 = vst.msk [vmem:[%s13392_s21 + $0xa8] sm:$0xff] %vm1262_vm5, %v7559_v19  ;;  %v7309_v12 = vrot.slane %v7307_v21, 4  ;;  %v7361_v48 = vor.u32 %v7360_v37, %v7357_v61  ;;  %v7374_v44 = vshll.u32 %v7817_v58, 16  ;;  %v7819_v21 = vld [vmem:[%s7976_s10 + $0xa0] sm:$0xf] }
 0x53f   : > { %v7305_v49 = vsel %vm13344_vm15, %v7300_v39, %v7304_v54  ;;  %v7366_v35 = vrot.slane %v7364_v63, 5  ;;  %v7818_v54 = vld [vmem:[%s7976_s10 + $0x9c] sm:$0xf]  ;;  %v7392_v56 = vshrl.u32 %v7819_v21, 16  ;;  %v7822_v5 = vld [vmem:[%s7976_s10 + $0xac] sm:$0xf] }
 0x540   : > { %v6990_v28 = vpop.f32.mrf.mxu1  ;;  %v7523_v22 = vunpack.c.l.bf16 %v7305_v49  ;;  %v7313_v7 = vor.u32 %v7312_v55, %v7309_v12  ;;  %v7362_v10 = vrot.slane %v7361_v48, 4  ;;  %v7376_v8 = vrot.slane %v7374_v44, 5  ;;  %v7824_v58 = vld [vmem:[%s7976_s10 + $0xb4] sm:$0xf] }
 0x541   : > { %v6991_v27 = vadd.f32 %v14159_v16, %v6990_v28  ;;  %v7368_v28 = vshrl.u32 %v7816_v18, 16  ;;  %v7382_v38 = vshll.u32 %v7818_v54, 16  ;;  %v7394_v55 = vrot.slane %v7392_v56, 4 }
 0x542   : > { %v7314_v3 = vrot.slane %v7313_v7, 4  ;;  %v7367_v59 = vsel %vm13344_vm15, %v7362_v10, %v7366_v35  ;;  %v7403_v7 = vshrl.u32 %v7821_v34, 16 }
 0x543   : > { %v7552_v40 = vadd.f32 %v7520_v9, %v6991_v27  ;;  %v7318_v9 = vrot.slane %v7316_v0, 5  ;;  %v7528_v19 = vunpack.c.l.bf16 %v7367_v59  ;;  %v7384_v49 = vrot.slane %v7382_v38, 5 }
 0x544   : > { %7781 = vmatmul.msk.bf16.gmra.mxu3 %vm6893_vm12, %v6887_v26  ;;  %v7370_v26 = vrot.slane %v7368_v28, 4  ;;  %v7406_v0 = vshll.u32 %v7821_v34, 16  ;;  %v7430_v59 = vshll.u32 %v7824_v58, 16 }
 0x545   : > { %7584 = vst.msk [vmem:[%s13392_s21 + $0x70] sm:$0xff] %vm1262_vm5, %v7552_v40  ;;  %v7319_v2 = vsel %vm13344_vm15, %v7314_v3, %v7318_v9  ;;  %v7323_v14 = vor.u32 %v7322_v29, %v7318_v9  ;;  %v7328_v40 = vrot.slane %v7326_v53, 5  ;;  %v7405_v3 = vrot.slane %v7403_v7, 4 }
 0x546   : > { %v7524_v27 = vunpack.c.l.bf16 %v7319_v2  ;;  %v7371_v36 = vor.u32 %v7370_v26, %v7366_v35  ;;  %v7408_v9 = vrot.slane %v7406_v0, 5  ;;  %v7412_v2 = vshll.u32 %v7822_v5, 16  ;;  %v7828_v0 = vld [vmem:[%s7976_s10 + $0xc4] sm:$0xf] }
 0x547   : > { %v7324_v62 = vrot.slane %v7323_v14, 4  ;;  %v7416_v14 = vshrl.u32 %v7822_v5, 16 }
 0x548   : > { %v6992_v23 = vpop.f32.mrf.mxu1  ;;  %v7409_v28 = vor.u32 %v7408_v9, %v7405_v3  ;;  %v7414_v26 = vrot.slane %v7412_v2, 5  ;;  %v7464_v3 = vshrl.u32 %v7828_v0, 16  ;;  %v7829_v2 = vld [vmem:[%s7976_s10 + $0xc8] sm:$0x1] }
 0x549   : > { %v6993_v60 = vadd.f32 %v14159_v16, %v6992_v23  ;;  %v7329_v15 = vsel %vm13344_vm15, %v7324_v62, %v7328_v40  ;;  %v7372_v23 = vrot.slane %v7371_v36, 4  ;;  %v7823_v62 = vld [vmem:[%s7976_s10 + $0xb0] sm:$0x1] }
 0x54a   : > { %v7525_v45 = vunpack.c.l.bf16 %v7329_v15  ;;  %v7410_v35 = vrot.slane %v7409_v28, 4 }
 0x54b   : > { %v7553_v24 = vadd.f32 %v7521_v31, %v6993_v60  ;;  %v7377_v50 = vsel %vm13344_vm15, %v7372_v23, %v7376_v8 }
 0x54c   : > { %v7529_v25 = vunpack.c.l.bf16 %v7377_v50  ;;  %v7415_v36 = vsel %vm13344_vm15, %v7410_v35, %v7414_v26  ;;  %v7470_v35 = vshll.u32 %v7829_v2, 16 }
 0x54d   : > { %7585 = vst.msk [vmem:[%s13392_s21 + $0x78] sm:$0xff] %vm1262_vm5, %v7553_v24  ;;  %v7532_v15 = vunpack.c.l.bf16 %v7415_v36 }
 0x550   : > { %v6995_v11 = vpop.f32.mrf.mxu1 }
 0x551   : > { %v6996_v42 = vadd.f32 %v14159_v16, %v6995_v11 }
 0x553   : > { %v7554_v32 = vadd.f32 %v7522_v33, %v6996_v42  ;;  %v7379_v42 = vshrl.u32 %v7818_v54, 16 }
 0x555   : > { %7586 = vst.msk [vmem:[%s13392_s21 + $0x80] sm:$0xff] %vm1262_vm5, %v7554_v32  ;;  %v7381_v32 = vrot.slane %v7379_v42, 4 }
 0x557   : > { %v7385_v4 = vor.u32 %v7384_v49, %v7381_v32  ;;  %v7826_v32 = vld [vmem:[%s7976_s10 + $0xbc] sm:$0x1]  ;;  %v7827_v49 = vld [vmem:[%s7976_s10 + $0xc0] sm:$0xf] }
 0x558   : > { %v6997_v13 = vpop.f32.mrf.mxu1  ;;  %v7446_v56 = vshll.u32 %v7826_v32, 16 }
 0x559   : > { %v6998_v51 = vadd.f32 %v14159_v16, %v6997_v13  ;;  %v7386_v13 = vrot.slane %v7385_v4, 4 }
 0x55b   : > { %v7555_v46 = vadd.f32 %v7523_v22, %v6998_v51  ;;  %v7388_v22 = vshll.u32 %v7819_v21, 16  ;;  %v7820_v51 = vld [vmem:[%s7976_s10 + $0xa4] sm:$0x1] }
 0x55d   : > { %7587 = vst.msk [vmem:[%s13392_s21 + $0x88] sm:$0xff] %vm1262_vm5, %v7555_v46  ;;  %v7390_v12 = vrot.slane %v7388_v22, 5  ;;  %v7398_v46 = vshll.u32 %v7820_v51, 16 }
 0x55f   : > { %v7391_v30 = vsel %vm13344_vm15, %v7386_v13, %v7390_v12  ;;  %v7395_v41 = vor.u32 %v7394_v55, %v7390_v12  ;;  %v7400_v18 = vrot.slane %v7398_v46, 5  ;;  %v7451_v13 = vshrl.u32 %v7827_v49, 16 }
 0x560   : > { %v7530_v47 = vunpack.c.l.bf16 %v7391_v30  ;;  %v7454_v12 = vshll.u32 %v7827_v49, 16  ;;  %v7448_v30 = vrot.slane %v7446_v56, 5 }
 0x561   : > { %v7396_v37 = vrot.slane %v7395_v41, 4  ;;  %v7453_v41 = vrot.slane %v7451_v13, 4 }
 0x562   : > { %v7456_v46 = vrot.slane %v7454_v12, 5 }
 0x563   : > { %v7401_v63 = vsel %vm13344_vm15, %v7396_v37, %v7400_v18  ;;  %v7460_v18 = vshll.u32 %v7828_v0, 16 }
 0x564   : > { %v7531_v53 = vunpack.c.l.bf16 %v7401_v63  ;;  %v7457_v37 = vor.u32 %v7456_v46, %v7453_v41  ;;  %v7466_v63 = vrot.slane %v7464_v3, 4 }
 0x566   : > { %v7458_v5 = vrot.slane %v7457_v37, 4 }
 0x569   : > { %v7000_v1 = vpop.f32.mrf.mxu1 }
 0x56a   : > { %v7001_v20 = vadd.f32 %v14159_v16, %v7000_v1 }
 0x56c   : > { %v7556_v17 = vadd.f32 %v7524_v27, %v7001_v20  ;;  %v7418_v27 = vrot.slane %v7416_v14, 4  ;;  %v7427_v20 = vshrl.u32 %v7824_v58, 16 }
 0x56e   : > { %7588 = vst.msk [vmem:[%s13392_s21 + $0x90] sm:$0xff] %vm1262_vm5, %v7556_v17  ;;  %v7419_v44 = vor.u32 %v7418_v27, %v7414_v26  ;;  %v7422_v17 = vshll.u32 %v7823_v62, 16 }
 0x56f   : > { %v7010_v31 = vpop.f32.mrf.mxu3 }
 0x570   : > { %v7011_v52 = vadd.f32 %v14159_v16, %v7010_v31  ;;  %v7432_v31 = vrot.slane %v7430_v59, 5  ;;  %v7420_v8 = vrot.slane %v7419_v44, 4 }
 0x571   : > { %v7002_v60 = vpop.f32.mrf.mxu1 }
 0x572   : > { %v7560_v6 = vadd.f32 %v7528_v19, %v7011_v52  ;;  %v7003_v24 = vadd.f32 %v14159_v16, %v7002_v60  ;;  %v7429_v19 = vrot.slane %v7427_v20, 4  ;;  %v7424_v52 = vrot.slane %v7422_v17, 5 }
 0x574   : > { %7592 = vst.msk [vmem:[%s13392_s21 + $0xb0] sm:$0xff] %vm1262_vm5, %v7560_v6  ;;  %v7557_v57 = vadd.f32 %v7525_v45, %v7003_v24  ;;  %v7825_v45 = vld [vmem:[%s7976_s10 + $0xb8] sm:$0xf]  ;;  %v7433_v24 = vor.u32 %v7432_v31, %v7429_v19 }
 0x575   : > { %v7436_v50 = vshll.u32 %v7825_v45, 16 }
 0x576   : > { %7589 = vst.msk [vmem:[%s13392_s21 + $0x98] sm:$0xff] %vm1262_vm5, %v7557_v57  ;;  %v7425_v57 = vsel %vm13344_vm15, %v7420_v8, %v7424_v52 }
 0x577   : > { %v7012_v33 = vpop.f32.mrf.mxu3 }
 0x578   : > { %v7013_v11 = vadd.f32 %v14159_v16, %v7012_v33  ;;  %v7533_v33 = vunpack.c.l.bf16 %v7425_v57 }
 0x57a   : > { %v7561_v39 = vadd.f32 %v7529_v25, %v7013_v11  ;;  %v7440_v25 = vshrl.u32 %v7825_v45, 16  ;;  %v7434_v11 = vrot.slane %v7433_v24, 4 }
 0x57c   : > { %7593 = vst.msk [vmem:[%s13392_s21 + $0xb8] sm:$0xff] %vm1262_vm5, %v7561_v39  ;;  %v7438_v39 = vrot.slane %v7436_v50, 5  ;;  %v7442_v42 = vrot.slane %v7440_v25, 4 }
 0x57e   : > { %v7439_v4 = vsel %vm13344_vm15, %v7434_v11, %v7438_v39  ;;  %v7443_v22 = vor.u32 %v7442_v42, %v7438_v39 }
 0x57f   : > { %v7534_v55 = vunpack.c.l.bf16 %v7439_v4 }
 0x580   : > { %v7444_v34 = vrot.slane %v7443_v22, 4 }
 0x597   : > { %v7015_v61 = vpop.f32.mrf.mxu3 }
 0x598   : > { %v7016_v29 = vadd.f32 %v14159_v16, %v7015_v61  ;;  %v7449_v61 = vsel %vm13344_vm15, %v7444_v34, %v7448_v30 }
 0x599   : > { %v7535_v9 = vunpack.c.l.bf16 %v7449_v61 }
 0x59a   : > { %v7562_v48 = vadd.f32 %v7530_v47, %v7016_v29 }
 0x59c   : > { %7594 = vst.msk [vmem:[%s13392_s21 + $0xc0] sm:$0xff] %vm1262_vm5, %v7562_v48  ;;  %v7462_v48 = vrot.slane %v7460_v18, 5 }
 0x59f   : > { %v7017_v10 = vpop.f32.mrf.mxu3 }
 0x5a0   : > { %v7018_v1 = vadd.f32 %v14159_v16, %v7017_v10  ;;  %v7467_v10 = vor.u32 %v7466_v63, %v7462_v48 }
 0x5a2   : > { %v7563_v40 = vadd.f32 %v7531_v53, %v7018_v1  ;;  %v7463_v53 = vsel %vm13344_vm15, %v7458_v5, %v7462_v48  ;;  %v7468_v58 = vrot.slane %v7467_v10, 4  ;;  %v7472_v1 = vrot.slane %v7470_v35, 5 }
 0x5a3   : > { %v7536_v26 = vunpack.c.l.bf16 %v7463_v53 }
 0x5a4   : > { %7595 = vst.msk [vmem:[%s13392_s21 + $0xc8] sm:$0xff] %vm1262_vm5, %v7563_v40  ;;  %v7473_v20 = vsel %vm13344_vm15, %v7468_v58, %v7472_v1 }
 0x5a5   : > { %v7537_v59 = vunpack.c.l.bf16 %v7473_v20 }
 0x5a7   : > { %v7020_v23 = vpop.f32.mrf.mxu3 }
 0x5a8   : > { %v7021_v60 = vadd.f32 %v14159_v16, %v7020_v23 }
 0x5aa   : > { %v7564_v6 = vadd.f32 %v7532_v15, %v7021_v60 }
 0x5ac   : > { %7596 = vst.msk [vmem:[%s13392_s21 + $0xd0] sm:$0xff] %vm1262_vm5, %v7564_v6 }
 0x5af   : > { %v7022_v54 = vpop.f32.mrf.mxu3 }
 0x5b0   : > { %v7023_v38 = vadd.f32 %v14159_v16, %v7022_v54 }
 0x5b2   : > { %v7565_v21 = vadd.f32 %v7533_v33, %v7023_v38 }
 0x5b4   : > { %7597 = vst.msk [vmem:[%s13392_s21 + $0xd8] sm:$0xff] %vm1262_vm5, %v7565_v21 }
 0x5b7   : > { %v7025_v51 = vpop.f32.mrf.mxu3 }
 0x5b8   : > { %v7026_v7 = vadd.f32 %v14159_v16, %v7025_v51 }
 0x5ba   : > { %v7566_v47 = vadd.f32 %v7534_v55, %v7026_v7 }
 0x5bc   : > { %7598 = vst.msk [vmem:[%s13392_s21 + $0xe0] sm:$0xff] %vm1262_vm5, %v7566_v47 }
 0x5bf   : > { %v7027_v29 = vpop.f32.mrf.mxu3 }
 0x5c0   : > { %v7028_v28 = vadd.f32 %v14159_v16, %v7027_v29 }
 0x5c2   : > { %v7567_v14 = vadd.f32 %v7535_v9, %v7028_v28 }
 0x5c4   : > { %7599 = vst.msk [vmem:[%s13392_s21 + $0xe8] sm:$0xff] %vm1262_vm5, %v7567_v14 }
 0x5c7   : > { %v7030_v27 = vpop.f32.mrf.mxu3 }
 0x5c8   : > { %v7031_v62 = vadd.f32 %v14159_v16, %v7030_v27 }
 0x5ca   : > { %v7568_v40 = vadd.f32 %v7536_v26, %v7031_v62 }
 0x5cc   : > { %7600 = vst.msk [vmem:[%s13392_s21 + $0xf0] sm:$0xff] %vm1262_vm5, %v7568_v40 }
 0x5cf   : > { %v7032_v36 = vpop.f32.mrf.mxu3 }
 0x5d0   : > { %v7033_v44 = vadd.f32 %v14159_v16, %v7032_v36 }
 0x5d2   : > { %v7569_v17 = vadd.f32 %v7537_v59, %v7033_v44 }
 0x5d4   : > { %7601 = vst.msk [vmem:[%s13392_s21 + $0xf8] sm:$0xff] %vm1262_vm5, %v7569_v17 }
 0x5d5 PF: > { %s17_s26 = sadd.s32 1, %s7907_s26   ;;  %s16152_s24 = smov %s7903_s25 }
 0x5d6   : > { %p14_p5 = scmp.ge.s32.totalorder %s17_s26, 4   ;;  %s16153_s25 = smov %s16155_s27 }
 0x5d8   :  { %16 = sbr.rel (!%p14_p5) target bundleno = 2 (0x2), region = 94 }

</bundles_post_ra>
